<compile_context>
chip_gen: v7x
topology: tpu7x:2x2x1
jax: 0.10.0
libtpu: 0.0.40
codegen_flags: <defaults>
</compile_context>

<pallas_src>
import functools
import math

import jax
import jax.numpy as jnp
from jax import lax
from jax.experimental import pallas as pl
from jax.experimental.pallas import tpu as pltpu

FEATURE_DIM = 1536     # efficientnet_b3 classifier[1].in_features
STEM_C = 40            # efficientnet_b3 stem width (real channels, multiple of 8)
BN_EPS = 1e-5


# ----------------------------------------------------------------------------
# Fused kernel: conv stem (transposed) + SiLU + GAP accumulate, and on the last
# row-chunk of each image: projection + feature_processor + merged heads.
# ----------------------------------------------------------------------------
def bone_age_fused_kernel(
        x_ref, wc_ref, bc_ref,
        wpt_ref, bpt_ref,
        w1t_ref, b1t_ref, s1t_ref, t1t_ref,
        w2t_ref, b2t_ref, s2t_ref, t2t_ref,
        wh1t_ref, bh1t_ref, wh2t_ref, bh2t_ref,
        out_ref, acc_ref, *, nl, ow, inv_spatial):
    f32, bf16 = jnp.float32, jnp.bfloat16
    r = pl.program_id(1)

    @pl.when(r == 0)
    def _init():
        acc_ref[...] = jnp.zeros_like(acc_ref)   # per-image pooled-sum accumulator

    # ---- conv stem: channels on sublanes, spatial on lanes (lane-dense) ----
    x = x_ref[...]                                                 # [27, th*NL] bf16
    y = jnp.dot(wc_ref[...], x, preferred_element_type=f32)       # [40, th*NL] f32
    y = y + bc_ref[...]                                            # bias column [40,1]
    y = y * (0.5 * jnp.tanh(0.5 * y) + 0.5)                        # SiLU over 40 real rows only
    col = lax.broadcasted_iota(jnp.int32, y.shape, 1)
    y = jnp.where((col % nl) < ow, y, 0.0)                         # drop per-row lane padding
    acc_ref[...] += jnp.sum(y, axis=1, keepdims=True)              # GAP partial sums (XLU)

    # ---- finalize: GAP + projection + feature_processor + heads (column-oriented) ----
    @pl.when(r == pl.num_programs(1) - 1)
    def _finalize():
        pooled = acc_ref[...] * inv_spatial                        # [40, 1] f32

        feats = jnp.dot(wpt_ref[...], pooled.astype(bf16),
                        preferred_element_type=f32) + bpt_ref[...]             # [1536,1]

        # feature_processor: Dropout(id) -> Linear -> ReLU -> BN (folded), x2
        h1 = jnp.dot(w1t_ref[...], feats.astype(bf16),
                     preferred_element_type=f32) + b1t_ref[...]
        h1 = jnp.maximum(h1, 0.0) * s1t_ref[...] + t1t_ref[...]                # [512,1]

        h2 = jnp.dot(w2t_ref[...], h1.astype(bf16),
                     preferred_element_type=f32) + b2t_ref[...]
        h2 = jnp.maximum(h2, 0.0) * s2t_ref[...] + t2t_ref[...]                # [256,1]

        # merged first layers of the three heads: one [256,256] mat-vec
        h3 = jnp.maximum(
            jnp.dot(wh1t_ref[...], h2.astype(bf16),
                    preferred_element_type=f32) + bh1t_ref[...], 0.0)          # [256,1]

        # merged block-diagonal second layers: one [8,256] mat-vec, rows 0..2 used
        raw = jnp.dot(wh2t_ref[...], h3.astype(bf16),
                      preferred_element_type=f32) + bh2t_ref[...]              # [8,1]

        rowi = lax.broadcasted_iota(jnp.int32, raw.shape, 0)
        sig = 0.5 * jnp.tanh(0.5 * raw) + 0.5                                  # sigmoid (stable)
        sp = jnp.maximum(raw, 0.0) + jnp.log1p(jnp.exp(-jnp.abs(raw)))         # softplus (no overflow)
        out_ref[...] = jnp.where(rowi == 1, sig, jnp.where(rowi == 2, sp, raw))


# ----------------------------------------------------------------------------
# Parameter init (synthetic backbone stem + folded BN + merged heads).
# Weights for the head chain are stored transposed ([out, in]) because the head
# runs column-oriented on [features, 1] activations inside the kernel.
# ----------------------------------------------------------------------------
def _linear_t(key, fan_in, fan_out):
    kw, kb = jax.random.split(key)
    w = jax.random.normal(kw, (fan_out, fan_in), jnp.float32) / math.sqrt(fan_in)
    b = 0.01 * jax.random.normal(kb, (fan_out, 1), jnp.float32)
    return w, b


def _bn_fold(key, n):
    kg, kb, km, kv = jax.random.split(key, 4)
    gamma = 1.0 + 0.1 * jax.random.normal(kg, (n, 1), jnp.float32)
    beta = 0.1 * jax.random.normal(kb, (n, 1), jnp.float32)
    rmean = 0.1 * jax.random.normal(km, (n, 1), jnp.float32)
    rvar = 1.0 + 0.1 * jnp.abs(jax.random.normal(kv, (n, 1), jnp.float32))
    scale = gamma / jnp.sqrt(rvar + BN_EPS)
    shift = beta - rmean * scale
    return scale, shift


def init_params(key):
    bf16 = jnp.bfloat16
    ks = jax.random.split(key, 12)
    p = {}

    # --- synthetic backbone: exact 3x3/s2/pad1 conv stem (40ch) + GAP + proj ---
    kcw, kcb = jax.random.split(ks[0])
    wconv = jax.random.normal(kcw, (3, 3, 3, STEM_C), jnp.float32) / math.sqrt(27.0)
    # kernel contracts channel index (kh*3 + kw)*3 + c -> [40, 27]
    p['Wc'] = jnp.transpose(wconv, (3, 0, 1, 2)).reshape(STEM_C, 27).astype(bf16)
    p['bc'] = 0.01 * jax.random.normal(kcb, (STEM_C, 1), jnp.float32)

    wpt, p['bpT'] = _linear_t(ks[1], STEM_C, FEATURE_DIM)          # [1536, 40] (no 128 pad)
    p['WpT'] = wpt.astype(bf16)

    # --- feature_processor ---
    w1t, p['b1T'] = _linear_t(ks[2], FEATURE_DIM, 512)
    p['W1T'] = w1t.astype(bf16)
    p['s1T'], p['t1T'] = _bn_fold(ks[3], 512)
    w2t, p['b2T'] = _linear_t(ks[4], 512, 256)
    p['W2T'] = w2t.astype(bf16)
    p['s2T'], p['t2T'] = _bn_fold(ks[5], 256)

    # --- heads: first layers concatenated, second layers block-diagonal ---
    wa1t, ba1 = _linear_t(ks[6], 256, 128)
    wa2t, ba2 = _linear_t(ks[7], 128, 1)
    wg1t, bg1 = _linear_t(ks[8], 256, 64)
    wg2t, bg2 = _linear_t(ks[9], 64, 1)
    wu1t, bu1 = _linear_t(ks[10], 256, 64)
    wu2t, bu2 = _linear_t(ks[11], 64, 1)

    p['WH1T'] = jnp.concatenate([wa1t, wg1t, wu1t], axis=0).astype(bf16)   # [256, 256]
    p['bH1T'] = jnp.concatenate([ba1, bg1, bu1], axis=0)                   # [256, 1]

    wh2 = jnp.zeros((8, 256), jnp.float32)
    wh2 = wh2.at[0, 0:128].set(wa2t[0])
    wh2 = wh2.at[1, 128:192].set(wg2t[0])
    wh2 = wh2.at[2, 192:256].set(wu2t[0])
    p['WH2T'] = wh2.astype(bf16)
    bh2 = jnp.zeros((8, 1), jnp.float32)
    bh2 = bh2.at[0, 0].set(ba2[0, 0]).at[1, 0].set(bg2[0, 0]).at[2, 0].set(bu2[0, 0])
    p['bH2T'] = bh2
    return p


def _pick_row_chunk(oh, nl, budget_lanes=16384):
    """Largest divisor th of OH with th*NL <= budget (keeps per-step f32 temporaries
    ~40*budget*4*<live buffers> well under the 32 MiB scoped-VMEM limit on all gens,
    including v7x's 64 MiB physical)."""
    best = 1
    for th in range(1, oh + 1):
        if oh % th == 0 and th * nl <= budget_lanes:
            best = th
    return best


# ----------------------------------------------------------------------------
# Forward wrapper.
# ----------------------------------------------------------------------------
@jax.jit
def bone_age_forward(x, params):
    """x: [B, 3, H, W] float32 (NCHW, like PyTorch). Returns dict of [B] arrays."""
    B, C, H, W = x.shape
    assert C == 3 and H % 2 == 0 and W % 2 == 0
    OH, OW = H // 2, W // 2
    NL = ((OW + 127) // 128) * 128          # lane-dense per-row width

    # Host-side im2col for the 3x3/s2/pad1 stem: one fused pad/slice/concat/cast pass,
    # single bf16 array, row/col shifts baked in (no in-kernel roll, no xa/xb copies,
    # no batch padding).
    xp = jnp.pad(x, ((0, 0), (0, 0), (1, 1), (1, 1)))
    patches = [xp[:, :, kh:kh + 2 * OH:2, kw:kw + 2 * OW:2]
               for kh in range(3) for kw in range(3)]
    x27 = jnp.concatenate(patches, axis=1)                          # [B, 27, OH, OW]
    x27 = jnp.pad(x27, ((0, 0), (0, 0), (0, 0), (0, NL - OW)))
    x27 = x27.astype(jnp.bfloat16).reshape(B, 27, OH * NL)          # [B, 27, OH*NL]

    th = _pick_row_chunk(OH, NL)
    n_chunks = OH // th

    kernel = functools.partial(bone_age_fused_kernel, nl=NL, ow=OW,
                               inv_spatial=1.0 / float(OH * OW))
    const2 = lambda b, r: (0, 0)

    out = pl.pallas_call(
        kernel,
        out_shape=jax.ShapeDtypeStruct((B, 8, 1), jnp.float32),
        grid=(B, n_chunks),
        in_specs=[
            pl.BlockSpec((None, 27, th * NL), lambda b, r: (b, 0, r)),
            pl.BlockSpec((STEM_C, 27), const2),
            pl.BlockSpec((STEM_C, 1), const2),
            pl.BlockSpec((FEATURE_DIM, STEM_C), const2),
            pl.BlockSpec((FEATURE_DIM, 1), const2),
            pl.BlockSpec((512, FEATURE_DIM), const2),
            pl.BlockSpec((512, 1), const2),
            pl.BlockSpec((512, 1), const2),
            pl.BlockSpec((512, 1), const2),
            pl.BlockSpec((256, 512), const2),
            pl.BlockSpec((256, 1), const2),
            pl.BlockSpec((256, 1), const2),
            pl.BlockSpec((256, 1), const2),
            pl.BlockSpec((256, 256), const2),
            pl.BlockSpec((256, 1), const2),
            pl.BlockSpec((8, 256), const2),
            pl.BlockSpec((8, 1), const2),
        ],
        out_specs=pl.BlockSpec((None, 8, 1), lambda b, r: (b, 0, 0)),
        scratch_shapes=[pltpu.VMEM((STEM_C, 1), jnp.float32)],
        compiler_params=pltpu.CompilerParams(
            dimension_semantics=("parallel", "arbitrary"),
            vmem_limit_bytes=32 * 1024 * 1024),
    )(x27, params['Wc'], params['bc'],
      params['WpT'], params['bpT'],
      params['W1T'], params['b1T'], params['s1T'], params['t1T'],
      params['W2T'], params['b2T'], params['s2T'], params['t2T'],
      params['WH1T'], params['bH1T'], params['WH2T'], params['bH2T'])

    # .squeeze() on a [B, 1] tensor with B > 1 -> shape [B]
    return {'age': out[:, 0, 0],
            'gender': out[:, 1, 0],
            'uncertainty': out[:, 2, 0]}


if __name__ == "__main__":
    key = jax.random.PRNGKey(0)
    kx, kp = jax.random.split(key)

    B, C, H, W = 2, 3, 16, 16
    x = jax.random.normal(kx, (B, C, H, W), jnp.float32)
    params = init_params(kp)

    out = bone_age_forward(x, params)
    out = jax.block_until_ready(out)

    assert out['age'].shape == (B,)
    assert out['gender'].shape == (B,)
    assert out['uncertainty'].shape == (B,)
    assert bool(jnp.all(jnp.isfinite(out['age'])))
    assert bool(jnp.all((out['gender'] >= 0.0) & (out['gender'] <= 1.0)))
    assert bool(jnp.all(out['uncertainty'] >= 0.0))

    print("KERNEL_OK")
</pallas_src>

<mosaic_0001>
module attributes {stable_mosaic.version = 11 : i64} {
  func.func @bone_age_fused_kernel(%arg0: i32, %arg1: i32, %arg2: memref<1x27x1024xbf16, #tpu.memory_space<vmem>>, %arg3: memref<40x27xbf16, #tpu.memory_space<vmem>>, %arg4: memref<40x1xf32, #tpu.memory_space<vmem>>, %arg5: memref<1536x40xbf16, #tpu.memory_space<vmem>>, %arg6: memref<1536x1xf32, #tpu.memory_space<vmem>>, %arg7: memref<512x1536xbf16, #tpu.memory_space<vmem>>, %arg8: memref<512x1xf32, #tpu.memory_space<vmem>>, %arg9: memref<512x1xf32, #tpu.memory_space<vmem>>, %arg10: memref<512x1xf32, #tpu.memory_space<vmem>>, %arg11: memref<256x512xbf16, #tpu.memory_space<vmem>>, %arg12: memref<256x1xf32, #tpu.memory_space<vmem>>, %arg13: memref<256x1xf32, #tpu.memory_space<vmem>>, %arg14: memref<256x1xf32, #tpu.memory_space<vmem>>, %arg15: memref<256x256xbf16, #tpu.memory_space<vmem>>, %arg16: memref<256x1xf32, #tpu.memory_space<vmem>>, %arg17: memref<8x256xbf16, #tpu.memory_space<vmem>>, %arg18: memref<8x1xf32, #tpu.memory_space<vmem>>, %arg19: memref<1x8x1xf32, #tpu.memory_space<vmem>>, %arg20: memref<40x1xf32, #tpu.memory_space<vmem>>) attributes {dimension_semantics = [#tpu.dimension_semantics<parallel>, #tpu.dimension_semantics<arbitrary>], iteration_bounds = array<i64: 2, 1>, scalar_prefetch = 0 : i64, scratch_operands = 1 : i64, tpu.core_type = #tpu.core_type<tc>, window_params = [{transform_indices = @transform_0, window_bounds = array<i64: 1, 27, 1024>}, {pipeline_mode = #tpu.pipeline_mode<synchronous>, transform_indices = @transform_1, window_bounds = array<i64: 40, 27>}, {pipeline_mode = #tpu.pipeline_mode<synchronous>, transform_indices = @transform_2, window_bounds = array<i64: 40, 1>}, {pipeline_mode = #tpu.pipeline_mode<synchronous>, transform_indices = @transform_3, window_bounds = array<i64: 1536, 40>}, {pipeline_mode = #tpu.pipeline_mode<synchronous>, transform_indices = @transform_4, window_bounds = array<i64: 1536, 1>}, {pipeline_mode = #tpu.pipeline_mode<synchronous>, transform_indices = @transform_5, window_bounds = array<i64: 512, 1536>}, {pipeline_mode = #tpu.pipeline_mode<synchronous>, transform_indices = @transform_6, window_bounds = array<i64: 512, 1>}, {pipeline_mode = #tpu.pipeline_mode<synchronous>, transform_indices = @transform_7, window_bounds = array<i64: 512, 1>}, {pipeline_mode = #tpu.pipeline_mode<synchronous>, transform_indices = @transform_8, window_bounds = array<i64: 512, 1>}, {pipeline_mode = #tpu.pipeline_mode<synchronous>, transform_indices = @transform_9, window_bounds = array<i64: 256, 512>}, {pipeline_mode = #tpu.pipeline_mode<synchronous>, transform_indices = @transform_10, window_bounds = array<i64: 256, 1>}, {pipeline_mode = #tpu.pipeline_mode<synchronous>, transform_indices = @transform_11, window_bounds = array<i64: 256, 1>}, {pipeline_mode = #tpu.pipeline_mode<synchronous>, transform_indices = @transform_12, window_bounds = array<i64: 256, 1>}, {pipeline_mode = #tpu.pipeline_mode<synchronous>, transform_indices = @transform_13, window_bounds = array<i64: 256, 256>}, {pipeline_mode = #tpu.pipeline_mode<synchronous>, transform_indices = @transform_14, window_bounds = array<i64: 256, 1>}, {pipeline_mode = #tpu.pipeline_mode<synchronous>, transform_indices = @transform_15, window_bounds = array<i64: 8, 256>}, {pipeline_mode = #tpu.pipeline_mode<synchronous>, transform_indices = @transform_16, window_bounds = array<i64: 8, 1>}, {transform_indices = @transform_17, window_bounds = array<i64: 1, 8, 1>}]} {
    %c0_i32 = arith.constant 0 : i32
    %0 = arith.cmpi eq, %arg1, %c0_i32 : i32
    %1 = arith.extui %0 : i1 to i32
    %c0_i32_0 = arith.constant 0 : i32
    %2 = arith.cmpi ne, %1, %c0_i32_0 : i32
    scf.if %2 {
      %cst_22 = arith.constant 0.000000e+00 : f32
      %47 = vector.broadcast %cst_22 : f32 to vector<40x1xf32>
      %c0_23 = arith.constant 0 : index
      %c0_24 = arith.constant 0 : index
      %48 = vector.load %arg20[%c0_23, %c0_24] : memref<40x1xf32, #tpu.memory_space<vmem>>, vector<40x1xf32>
      tpu.vector_store %arg20[%c0_23, %c0_24], %47 {strides = array<i32>} : memref<40x1xf32, #tpu.memory_space<vmem>>, vector<40x1xf32>,
    } else {
    }
    %c0 = arith.constant 0 : index
    %c0_1 = arith.constant 0 : index
    %c0_2 = arith.constant 0 : index
    %3 = vector.load %arg2[%c0, %c0_1, %c0_2] : memref<1x27x1024xbf16, #tpu.memory_space<vmem>>, vector<1x27x1024xbf16>
    %4 = vector.shape_cast %3 : vector<1x27x1024xbf16> to vector<27x1024xbf16>
    %c0_3 = arith.constant 0 : index
    %c0_4 = arith.constant 0 : index
    %5 = vector.load %arg3[%c0_3, %c0_4] : memref<40x27xbf16, #tpu.memory_space<vmem>>, vector<40x27xbf16>
    %cst = arith.constant dense<0.000000e+00> : vector<40x1024xf32>
    %6 = tpu.matmul %5, %4, %cst {dimension_numbers = #tpu.dot_dimension_numbers<[1], [0], [0], [1], [0, 0, 1, 1], [], []>} : vector<40x27xbf16>, vector<27x1024xbf16>, vector<40x1024xf32> -> vector<40x1024xf32>
    %c0_5 = arith.constant 0 : index
    %c0_6 = arith.constant 0 : index
    %7 = vector.load %arg4[%c0_5, %c0_6] : memref<40x1xf32, #tpu.memory_space<vmem>>, vector<40x1xf32>
    %8 = vector.broadcast %7 : vector<40x1xf32> to vector<40x1024xf32>
    %9 = arith.addf %6, %8 : vector<40x1024xf32>
    %cst_7 = arith.constant 5.000000e-01 : f32
    %10 = vector.broadcast %cst_7 : f32 to vector<40x1024xf32>
    %11 = arith.mulf %10, %9 : vector<40x1024xf32>
    %12 = math.tanh %11 : vector<40x1024xf32>
    %cst_8 = arith.constant 5.000000e-01 : f32
    %13 = vector.broadcast %cst_8 : f32 to vector<40x1024xf32>
    %14 = arith.mulf %13, %12 : vector<40x1024xf32>
    %cst_9 = arith.constant 5.000000e-01 : f32
    %15 = vector.broadcast %cst_9 : f32 to vector<40x1024xf32>
    %16 = arith.addf %14, %15 : vector<40x1024xf32>
    %17 = arith.mulf %9, %16 : vector<40x1024xf32>
    %18 = tpu.iota {dimensions = array<i32: 1>} : vector<40x1024xi32>
    %c128_i32 = arith.constant 128 : i32
    %c0_i32_10 = arith.constant 0 : i32
    %19 = arith.cmpi eq, %c128_i32, %c0_i32_10 : i32
    %c1_i32 = arith.constant 1 : i32
    %20 = arith.select %19, %c1_i32, %c128_i32 : i32
    %21 = vector.broadcast %20 : i32 to vector<40x1024xi32>
    %22 = arith.remsi %18, %21 : vector<40x1024xi32>
    %c0_i32_11 = arith.constant 0 : i32
    %23 = vector.broadcast %c0_i32_11 : i32 to vector<40x1024xi32>
    %24 = arith.cmpi ne, %22, %23 : vector<40x1024xi32>
    %c0_i32_12 = arith.constant 0 : i32
    %25 = vector.broadcast %c0_i32_12 : i32 to vector<40x1024xi32>
    %26 = arith.cmpi slt, %22, %25 : vector<40x1024xi32>
    %c0_i32_13 = arith.constant 0 : i32
    %27 = arith.cmpi slt, %20, %c0_i32_13 : i32
    %28 = vector.broadcast %27 : i1 to vector<40x1024xi1>
    %29 = vector.broadcast %28 : vector<40x1024xi1> to vector<40x1024xi1>
    %30 = arith.xori %26, %29 : vector<40x1024xi1>
    %31 = arith.andi %30, %24 : vector<40x1024xi1>
    %32 = vector.broadcast %20 : i32 to vector<40x1024xi32>
    %33 = arith.addi %22, %32 : vector<40x1024xi32>
    %34 = arith.select %31, %33, %22 : vector<40x1024xi1>, vector<40x1024xi32>
    %c8_i32 = arith.constant 8 : i32
    %35 = vector.broadcast %c8_i32 : i32 to vector<40x1024xi32>
    %36 = arith.cmpi slt, %34, %35 : vector<40x1024xi32>
    %cst_14 = arith.constant 0.000000e+00 : f32
    %37 = vector.broadcast %cst_14 : f32 to vector<40x1024xf32>
    %38 = arith.select %36, %17, %37 : vector<40x1024xi1>, vector<40x1024xf32>
    %c0_15 = arith.constant 0 : index
    %c0_16 = arith.constant 0 : index
    %39 = vector.load %arg20[%c0_15, %c0_16] : memref<40x1xf32, #tpu.memory_space<vmem>>, vector<40x1xf32>
    %cst_17 = arith.constant dense<0.000000e+00> : vector<40xf32>
    %40 = vector.multi_reduction <add>, %38, %cst_17 [1] : vector<40x1024xf32> to vector<40xf32>
    %41 = vector.shape_cast %40 : vector<40xf32> to vector<40x1xf32>
    %42 = arith.addf %39, %41 : vector<40x1xf32>
    %c0_18 = arith.constant 0 : index
    %c0_19 = arith.constant 0 : index
    %43 = vector.load %arg20[%c0_18, %c0_19] : memref<40x1xf32, #tpu.memory_space<vmem>>, vector<40x1xf32>
    tpu.vector_store %arg20[%c0_18, %c0_19], %42 {strides = array<i32>} : memref<40x1xf32, #tpu.memory_space<vmem>>, vector<40x1xf32>,
    %c0_i32_20 = arith.constant 0 : i32
    %44 = arith.cmpi eq, %arg1, %c0_i32_20 : i32
    %45 = arith.extui %44 : i1 to i32
    %c0_i32_21 = arith.constant 0 : i32
    %46 = arith.cmpi ne, %45, %c0_i32_21 : i32
    scf.if %46 {
      %c0_22 = arith.constant 0 : index
      %c0_23 = arith.constant 0 : index
      %47 = vector.load %arg20[%c0_22, %c0_23] : memref<40x1xf32, #tpu.memory_space<vmem>>, vector<40x1xf32>
      %cst_24 = arith.constant 1.562500e-02 : f32
      %48 = vector.broadcast %cst_24 : f32 to vector<40x1xf32>
      %49 = arith.mulf %47, %48 : vector<40x1xf32>
      %c0_25 = arith.constant 0 : index
      %c0_26 = arith.constant 0 : index
      %50 = vector.load %arg5[%c0_25, %c0_26] : memref<1536x40xbf16, #tpu.memory_space<vmem>>, vector<1536x40xbf16>
      %51 = arith.truncf %49 : vector<40x1xf32> to vector<40x1xbf16>
      %cst_27 = arith.constant dense<0.000000e+00> : vector<1536x1xf32>
      %52 = tpu.matmul %50, %51, %cst_27 {dimension_numbers = #tpu.dot_dimension_numbers<[1], [0], [0], [1], [0, 0, 1, 1], [], []>} : vector<1536x40xbf16>, vector<40x1xbf16>, vector<1536x1xf32> -> vector<1536x1xf32>
      %c0_28 = arith.constant 0 : index
      %c0_29 = arith.constant 0 : index
      %53 = vector.load %arg6[%c0_28, %c0_29] : memref<1536x1xf32, #tpu.memory_space<vmem>>, vector<1536x1xf32>
      %54 = arith.addf %52, %53 : vector<1536x1xf32>
      %c0_30 = arith.constant 0 : index
      %c0_31 = arith.constant 0 : index
      %55 = vector.load %arg7[%c0_30, %c0_31] : memref<512x1536xbf16, #tpu.memory_space<vmem>>, vector<512x1536xbf16>
      %56 = arith.truncf %54 : vector<1536x1xf32> to vector<1536x1xbf16>
      %cst_32 = arith.constant dense<0.000000e+00> : vector<512x1xf32>
      %57 = tpu.matmul %55, %56, %cst_32 {dimension_numbers = #tpu.dot_dimension_numbers<[1], [0], [0], [1], [0, 0, 1, 1], [], []>} : vector<512x1536xbf16>, vector<1536x1xbf16>, vector<512x1xf32> -> vector<512x1xf32>
      %c0_33 = arith.constant 0 : index
      %c0_34 = arith.constant 0 : index
      %58 = vector.load %arg8[%c0_33, %c0_34] : memref<512x1xf32, #tpu.memory_space<vmem>>, vector<512x1xf32>
      %59 = arith.addf %57, %58 : vector<512x1xf32>
      %cst_35 = arith.constant 0.000000e+00 : f32
      %60 = vector.broadcast %cst_35 : f32 to vector<512x1xf32>
      %61 = arith.maximumf %59, %60 : vector<512x1xf32>
      %c0_36 = arith.constant 0 : index
      %c0_37 = arith.constant 0 : index
      %62 = vector.load %arg9[%c0_36, %c0_37] : memref<512x1xf32, #tpu.memory_space<vmem>>, vector<512x1xf32>
      %63 = arith.mulf %61, %62 : vector<512x1xf32>
      %c0_38 = arith.constant 0 : index
      %c0_39 = arith.constant 0 : index
      %64 = vector.load %arg10[%c0_38, %c0_39] : memref<512x1xf32, #tpu.memory_space<vmem>>, vector<512x1xf32>
      %65 = arith.addf %63, %64 : vector<512x1xf32>
      %c0_40 = arith.constant 0 : index
      %c0_41 = arith.constant 0 : index
      %66 = vector.load %arg11[%c0_40, %c0_41] : memref<256x512xbf16, #tpu.memory_space<vmem>>, vector<256x512xbf16>
      %67 = arith.truncf %65 : vector<512x1xf32> to vector<512x1xbf16>
      %cst_42 = arith.constant dense<0.000000e+00> : vector<256x1xf32>
      %68 = tpu.matmul %66, %67, %cst_42 {dimension_numbers = #tpu.dot_dimension_numbers<[1], [0], [0], [1], [0, 0, 1, 1], [], []>} : vector<256x512xbf16>, vector<512x1xbf16>, vector<256x1xf32> -> vector<256x1xf32>
      %c0_43 = arith.constant 0 : index
      %c0_44 = arith.constant 0 : index
      %69 = vector.load %arg12[%c0_43, %c0_44] : memref<256x1xf32, #tpu.memory_space<vmem>>, vector<256x1xf32>
      %70 = arith.addf %68, %69 : vector<256x1xf32>
      %cst_45 = arith.constant 0.000000e+00 : f32
      %71 = vector.broadcast %cst_45 : f32 to vector<256x1xf32>
      %72 = arith.maximumf %70, %71 : vector<256x1xf32>
      %c0_46 = arith.constant 0 : index
      %c0_47 = arith.constant 0 : index
      %73 = vector.load %arg13[%c0_46, %c0_47] : memref<256x1xf32, #tpu.memory_space<vmem>>, vector<256x1xf32>
      %74 = arith.mulf %72, %73 : vector<256x1xf32>
      %c0_48 = arith.constant 0 : index
      %c0_49 = arith.constant 0 : index
      %75 = vector.load %arg14[%c0_48, %c0_49] : memref<256x1xf32, #tpu.memory_space<vmem>>, vector<256x1xf32>
      %76 = arith.addf %74, %75 : vector<256x1xf32>
      %c0_50 = arith.constant 0 : index
      %c0_51 = arith.constant 0 : index
      %77 = vector.load %arg15[%c0_50, %c0_51] : memref<256x256xbf16, #tpu.memory_space<vmem>>, vector<256x256xbf16>
      %78 = arith.truncf %76 : vector<256x1xf32> to vector<256x1xbf16>
      %cst_52 = arith.constant dense<0.000000e+00> : vector<256x1xf32>
      %79 = tpu.matmul %77, %78, %cst_52 {dimension_numbers = #tpu.dot_dimension_numbers<[1], [0], [0], [1], [0, 0, 1, 1], [], []>} : vector<256x256xbf16>, vector<256x1xbf16>, vector<256x1xf32> -> vector<256x1xf32>
      %c0_53 = arith.constant 0 : index
      %c0_54 = arith.constant 0 : index
      %80 = vector.load %arg16[%c0_53, %c0_54] : memref<256x1xf32, #tpu.memory_space<vmem>>, vector<256x1xf32>
      %81 = arith.addf %79, %80 : vector<256x1xf32>
      %cst_55 = arith.constant 0.000000e+00 : f32
      %82 = vector.broadcast %cst_55 : f32 to vector<256x1xf32>
      %83 = arith.maximumf %81, %82 : vector<256x1xf32>
      %c0_56 = arith.constant 0 : index
      %c0_57 = arith.constant 0 : index
      %84 = vector.load %arg17[%c0_56, %c0_57] : memref<8x256xbf16, #tpu.memory_space<vmem>>, vector<8x256xbf16>
      %85 = arith.truncf %83 : vector<256x1xf32> to vector<256x1xbf16>
      %cst_58 = arith.constant dense<0.000000e+00> : vector<8x1xf32>
      %86 = tpu.matmul %84, %85, %cst_58 {dimension_numbers = #tpu.dot_dimension_numbers<[1], [0], [0], [1], [0, 0, 1, 1], [], []>} : vector<8x256xbf16>, vector<256x1xbf16>, vector<8x1xf32> -> vector<8x1xf32>
      %c0_59 = arith.constant 0 : index
      %c0_60 = arith.constant 0 : index
      %87 = vector.load %arg18[%c0_59, %c0_60] : memref<8x1xf32, #tpu.memory_space<vmem>>, vector<8x1xf32>
      %88 = arith.addf %86, %87 : vector<8x1xf32>
      %89 = tpu.iota {dimensions = array<i32: 0>} : vector<8x1xi32>
      %cst_61 = arith.constant 5.000000e-01 : f32
      %90 = vector.broadcast %cst_61 : f32 to vector<8x1xf32>
      %91 = arith.mulf %90, %88 : vector<8x1xf32>
      %92 = math.tanh %91 : vector<8x1xf32>
      %cst_62 = arith.constant 5.000000e-01 : f32
      %93 = vector.broadcast %cst_62 : f32 to vector<8x1xf32>
      %94 = arith.mulf %93, %92 : vector<8x1xf32>
      %cst_63 = arith.constant 5.000000e-01 : f32
      %95 = vector.broadcast %cst_63 : f32 to vector<8x1xf32>
      %96 = arith.addf %94, %95 : vector<8x1xf32>
      %cst_64 = arith.constant 0.000000e+00 : f32
      %97 = vector.broadcast %cst_64 : f32 to vector<8x1xf32>
      %98 = arith.maximumf %88, %97 : vector<8x1xf32>
      %99 = math.absf %88 : vector<8x1xf32>
      %cst_65 = arith.constant 0.000000e+00 : f32
      %100 = vector.broadcast %cst_65 : f32 to vector<8x1xf32>
      %101 = arith.subf %100, %99 : vector<8x1xf32>
      %102 = math.exp %101 : vector<8x1xf32>
      %103 = math.log1p %102 : vector<8x1xf32>
      %104 = arith.addf %98, %103 : vector<8x1xf32>
      %c1_i32_66 = arith.constant 1 : i32
      %105 = vector.broadcast %c1_i32_66 : i32 to vector<8x1xi32>
      %106 = arith.cmpi eq, %89, %105 : vector<8x1xi32>
      %c2_i32 = arith.constant 2 : i32
      %107 = vector.broadcast %c2_i32 : i32 to vector<8x1xi32>
      %108 = arith.cmpi eq, %89, %107 : vector<8x1xi32>
      %109 = arith.select %108, %104, %88 : vector<8x1xi1>, vector<8x1xf32>
      %110 = arith.select %106, %96, %109 : vector<8x1xi1>, vector<8x1xf32>
      %c0_67 = arith.constant 0 : index
      %c0_68 = arith.constant 0 : index
      %c0_69 = arith.constant 0 : index
      %111 = vector.load %arg19[%c0_67, %c0_68, %c0_69] : memref<1x8x1xf32, #tpu.memory_space<vmem>>, vector<1x8x1xf32>
      %112 = vector.shape_cast %111 : vector<1x8x1xf32> to vector<8x1xf32>
      %113 = vector.shape_cast %110 : vector<8x1xf32> to vector<1x8x1xf32>
      tpu.vector_store %arg19[%c0_67, %c0_68, %c0_69], %113 {strides = array<i32>} : memref<1x8x1xf32, #tpu.memory_space<vmem>>, vector<1x8x1xf32>,
    } else {
    }
    return
  }
  func.func @transform_0(%arg0: i32, %arg1: i32) -> (i32, i32, i32) {
    %c0_i32 = arith.constant 0 : i32
    %c0_i32_0 = arith.constant 0 : i32
    return %arg0, %c0_i32, %arg1 : i32, i32, i32
  }
  func.func @transform_1(%arg0: i32, %arg1: i32) -> (i32, i32) {
    %c0_i32 = arith.constant 0 : i32
    %c0_i32_0 = arith.constant 0 : i32
    %c0_i32_1 = arith.constant 0 : i32
    return %c0_i32, %c0_i32_0 : i32, i32
  }
  func.func @transform_2(%arg0: i32, %arg1: i32) -> (i32, i32) {
    %c0_i32 = arith.constant 0 : i32
    %c0_i32_0 = arith.constant 0 : i32
    %c0_i32_1 = arith.constant 0 : i32
    return %c0_i32, %c0_i32_0 : i32, i32
  }
  func.func @transform_3(%arg0: i32, %arg1: i32) -> (i32, i32) {
    %c0_i32 = arith.constant 0 : i32
    %c0_i32_0 = arith.constant 0 : i32
    %c0_i32_1 = arith.constant 0 : i32
    return %c0_i32, %c0_i32_0 : i32, i32
  }
  func.func @transform_4(%arg0: i32, %arg1: i32) -> (i32, i32) {
    %c0_i32 = arith.constant 0 : i32
    %c0_i32_0 = arith.constant 0 : i32
    %c0_i32_1 = arith.constant 0 : i32
    return %c0_i32, %c0_i32_0 : i32, i32
  }
  func.func @transform_5(%arg0: i32, %arg1: i32) -> (i32, i32) {
    %c0_i32 = arith.constant 0 : i32
    %c0_i32_0 = arith.constant 0 : i32
    %c0_i32_1 = arith.constant 0 : i32
    return %c0_i32, %c0_i32_0 : i32, i32
  }
  func.func @transform_6(%arg0: i32, %arg1: i32) -> (i32, i32) {
    %c0_i32 = arith.constant 0 : i32
    %c0_i32_0 = arith.constant 0 : i32
    %c0_i32_1 = arith.constant 0 : i32
    return %c0_i32, %c0_i32_0 : i32, i32
  }
  func.func @transform_7(%arg0: i32, %arg1: i32) -> (i32, i32) {
    %c0_i32 = arith.constant 0 : i32
    %c0_i32_0 = arith.constant 0 : i32
    %c0_i32_1 = arith.constant 0 : i32
    return %c0_i32, %c0_i32_0 : i32, i32
  }
  func.func @transform_8(%arg0: i32, %arg1: i32) -> (i32, i32) {
    %c0_i32 = arith.constant 0 : i32
    %c0_i32_0 = arith.constant 0 : i32
    %c0_i32_1 = arith.constant 0 : i32
    return %c0_i32, %c0_i32_0 : i32, i32
  }
  func.func @transform_9(%arg0: i32, %arg1: i32) -> (i32, i32) {
    %c0_i32 = arith.constant 0 : i32
    %c0_i32_0 = arith.constant 0 : i32
    %c0_i32_1 = arith.constant 0 : i32
    return %c0_i32, %c0_i32_0 : i32, i32
  }
  func.func @transform_10(%arg0: i32, %arg1: i32) -> (i32, i32) {
    %c0_i32 = arith.constant 0 : i32
    %c0_i32_0 = arith.constant 0 : i32
    %c0_i32_1 = arith.constant 0 : i32
    return %c0_i32, %c0_i32_0 : i32, i32
  }
  func.func @transform_11(%arg0: i32, %arg1: i32) -> (i32, i32) {
    %c0_i32 = arith.constant 0 : i32
    %c0_i32_0 = arith.constant 0 : i32
    %c0_i32_1 = arith.constant 0 : i32
    return %c0_i32, %c0_i32_0 : i32, i32
  }
  func.func @transform_12(%arg0: i32, %arg1: i32) -> (i32, i32) {
    %c0_i32 = arith.constant 0 : i32
    %c0_i32_0 = arith.constant 0 : i32
    %c0_i32_1 = arith.constant 0 : i32
    return %c0_i32, %c0_i32_0 : i32, i32
  }
  func.func @transform_13(%arg0: i32, %arg1: i32) -> (i32, i32) {
    %c0_i32 = arith.constant 0 : i32
    %c0_i32_0 = arith.constant 0 : i32
    %c0_i32_1 = arith.constant 0 : i32
    return %c0_i32, %c0_i32_0 : i32, i32
  }
  func.func @transform_14(%arg0: i32, %arg1: i32) -> (i32, i32) {
    %c0_i32 = arith.constant 0 : i32
    %c0_i32_0 = arith.constant 0 : i32
    %c0_i32_1 = arith.constant 0 : i32
    return %c0_i32, %c0_i32_0 : i32, i32
  }
  func.func @transform_15(%arg0: i32, %arg1: i32) -> (i32, i32) {
    %c0_i32 = arith.constant 0 : i32
    %c0_i32_0 = arith.constant 0 : i32
    %c0_i32_1 = arith.constant 0 : i32
    return %c0_i32, %c0_i32_0 : i32, i32
  }
  func.func @transform_16(%arg0: i32, %arg1: i32) -> (i32, i32) {
    %c0_i32 = arith.constant 0 : i32
    %c0_i32_0 = arith.constant 0 : i32
    %c0_i32_1 = arith.constant 0 : i32
    return %c0_i32, %c0_i32_0 : i32, i32
  }
  func.func @transform_17(%arg0: i32, %arg1: i32) -> (i32, i32, i32) {
    %c0_i32 = arith.constant 0 : i32
    %c0_i32_0 = arith.constant 0 : i32
    %c0_i32_1 = arith.constant 0 : i32
    return %arg0, %c0_i32, %c0_i32_0 : i32, i32, i32
  }
}

</mosaic_0001>

<bundles_post_ra>
// kernel: bone_age_forward.1
= control target key start
LH: loop header
LB: loop body
LE: loop exit
PB: predicated region body
PF: predicated region fallthrough
CT: control target
= control target key end

     0   :  { %s12528_s24 = smov 0   ;;  %s12530_s25 = smov 0   ;;  %s17326_s0 = inlined_call_operand.vmem [shape: bf16[2,27,1024], index: 0, kind: input, shape index: {}]   ;;  %s17327_s1 = inlined_call_operand.vmem [shape: bf16[40,27], index: 1, kind: input, shape index: {}]   ;;  %s17328_s2 = inlined_call_operand.vmem [shape: f32[40,1], index: 2, kind: input, shape index: {}]   ;;  %s17329_s3 = inlined_call_operand.vmem [shape: bf16[1536,40], index: 3, kind: input, shape index: {}]   ;;  %s17330_s4 = inlined_call_operand.vmem [shape: f32[1536,1], index: 4, kind: input, shape index: {}]   ;;  %s17331_s5 = inlined_call_operand.vmem [shape: bf16[512,1536], index: 5, kind: input, shape index: {}]   ;;  %s17332_s6 = inlined_call_operand.vmem [shape: f32[512,1], index: 6, kind: input, shape index: {}]   ;;  %s17333_s7 = inlined_call_operand.vmem [shape: f32[512,1], index: 7, kind: input, shape index: {}]   ;;  %s17334_s8 = inlined_call_operand.vmem [shape: f32[512,1], index: 8, kind: input, shape index: {}]   ;;  %s17335_s9 = inlined_call_operand.vmem [shape: bf16[256,512], index: 9, kind: input, shape index: {}]   ;;  %s17336_s10 = inlined_call_operand.vmem [shape: f32[256,1], index: 10, kind: input, shape index: {}]   ;;  %s17337_s11 = inlined_call_operand.vmem [shape: f32[256,1], index: 11, kind: input, shape index: {}]   ;;  %s17338_s12 = inlined_call_operand.vmem [shape: f32[256,1], index: 12, kind: input, shape index: {}]   ;;  %s17339_s13 = inlined_call_operand.vmem [shape: bf16[256,256], index: 13, kind: input, shape index: {}]   ;;  %s17340_s14 = inlined_call_operand.vmem [shape: f32[256,1], index: 14, kind: input, shape index: {}]   ;;  %s17341_s15 = inlined_call_operand.vmem [shape: bf16[8,256], index: 15, kind: input, shape index: {}]   ;;  %s17342_s16 = inlined_call_operand.vmem [shape: f32[8,1], index: 16, kind: input, shape index: {}]   ;;  %s17343_s17 = inlined_call_operand.vmem [shape: f32[2,8,1], index: 17, kind: output, shape index: {}]  }
   0x1   :  { %17346 = sst [smem:[#allocation22_spill]] %s17326_s0  ;;  %s12532_s26 = smov 0  }
   0x2   :  { %17347 = sst [smem:[#allocation23_spill]] %s17327_s1 }
   0x3 LB: > { %s39_s27 = sadd.s32 1, %s12429_s25  ;;  %p9435_p0 = scmp.ge.s32.totalorder %s12433_s26, 1  ;;  %s12433_s26 = sphi %s12532_s26, %s27_s26   ;;  %s12429_s25 = sphi %s12530_s25, %s17412_s25   ;;  %s12425_s24 = sphi %s12528_s24, %s17411_s24  }
   0x4   : > { %p41_p1 = scmp.ge.s32.totalorder %s39_s27, 2  ;;  %p506_p2 = scmp.lt.s32.totalorder %s12433_s26, 3 }
   0x6   : > { %s17414_s27 = smov (%p41_p1, %s39_s27), 0  ;;  %p507_p3 = pnand %p9435_p0, %p506_p2 }
   0x8   : > { %510 = sbr.rel (%p507_p3) target bundleno = 3154 (0xc52), region = 88 }
   0xf   : > { %p562_p4 = scmp.lt.s32.totalorder %s12425_s24, 1  ;;  %vm732_vm0 = vcmask 1044480   ;;  %v12435_v0 = vmov 0   ;;  %vm733_vm1 = vcmask 1045504   ;;  %v12436_v1 = vmov 65535   ;;  %v607_v3 = vld [vmem:[%s17328_s2] sm:$0xff] }
  0x10   : > { %792 = vmatprep.mubr.bf16.mxu0 %v12435_v0  ;;  %853 = vmatprep.mubr.bf16.mxu1 %v12435_v0  ;;  %v734_v2 = vsel %vm732_vm0, 4294967295, %v12436_v1  ;;  %v609_v4 = vld [vmem:[%s17328_s2 + $0x10] sm:$0xff]  ;;  %s17348_s20 = sld [smem:[#allocation22_spill]]  ;;  %v608_v5 = vld [vmem:[%s17328_s2 + $0x8] sm:$0xff]  ;;  %v610_v22 = vld [vmem:[%s17328_s2 + $0x18] sm:$0xff]  ;;  %vm722_vm2 = vcmask 220160   ;;  %v17345_v53 = vlaneseq }
  0x11   : > { %s17416_s24 = smov (!%p562_p4, %s12425_s24), 1  ;;  %11502 = vset.pattern.permute.xlu0 %v12435_v0  ;;  %11503 = vset.pattern.permute.xlu1 %v12435_v0  ;;  %v735_v14 = vsel %vm733_vm1, %v734_v2, 0  ;;  %v611_v28 = vld [vmem:[%s17328_s2 + $0x20] sm:$0xff]  ;;  %s17349_s1 = sld [smem:[#allocation23_spill]]  ;;  %vm580_vm3 = vcmask 7168   ;;  %v12437_v52 = vmov 0.0  }
  0x12   : > { %s10146_s28 = sshll.u32 %s17416_s24, 7  ;;  %614 = vperm.xlu0 %11502, %v607_v3   ;;  %624 = vperm.xlu1 %11503, %v609_v4   ;;  %581 = vst.msk [vmem:[#allocation2] sm:$0xff] %vm580_vm3, %v12437_v52  ;;  %582 = vst.msk [vmem:[#allocation2 + $0x8] sm:$0xff] %vm580_vm3, %v12437_v52  ;;  %v12630_v55 = vand.u32 127, %v17345_v53  ;;  %vm2298_vm12 = vcmask 326656   ;;  %vm2587_vm13 = vcmask 1043456  }
  0x13   : > { %583 = vst.msk [vmem:[#allocation2 + $0x10] sm:$0xff] %vm580_vm3, %v12437_v52  ;;  %584 = vst.msk [vmem:[#allocation2 + $0x18] sm:$0xff] %vm580_vm3, %v12437_v52 }
  0x14   : > { %585 = vst.msk [vmem:[#allocation2 + $0x20] sm:$0xff] %vm580_vm3, %v12437_v52  ;;  %v1207_v61 = vadd.s32 256, %v12630_v55  ;;  %v1206_v2 = vadd.s32 128, %v12630_v55  ;;  %vm1309_vm4 = vcmp.lt.s32.totalorder %v12630_v55, 8 }
  0x16   : > { %s12562_s21 = scalar_lea.vmem %s17348_s20, %s10146_s28  ;;  %619 = vperm.xlu0 %11502, %v608_v5   ;;  %629 = vperm.xlu1 %11503, %v610_v22   ;;  %s9438_s28 = sshll.u32 %s17416_s24, 3 }
  0x17   : > { %v586_v6 = vld [vmem:[%s12562_s21] sm:$0xff]  ;;  %v587_v8 = vld [vmem:[%s12562_s21 + $0x8] sm:$0xff]  ;;  %v588_v21 = vld [vmem:[%s12562_s21 + $0x10] sm:$0xff]  ;;  %s574_s30 = scalar_lea.vmem %s17343_s17, %s9438_s28 }
  0x18   : > { %v590_v7 = vld [vmem:[%s12562_s21 + $0x20] sm:$0xff]  ;;  %v591_v10 = vld [vmem:[%s12562_s21 + $0x28] sm:$0xff]  ;;  %v592_v25 = vld [vmem:[%s12562_s21 + $0x30] sm:$0xff] }
  0x19   : > { %v9443_v9 = vcombine.high %v586_v6, %v590_v7  ;;  %v9442_v11 = vcombine.low %v586_v6, %v590_v7  ;;  %v594_v12 = vld [vmem:[%s12562_s21 + $0x40] sm:$0xff]  ;;  %v9445_v15 = vcombine.high %v587_v8, %v591_v10  ;;  %v9444_v16 = vcombine.low %v587_v8, %v591_v10  ;;  %v595_v18 = vld [vmem:[%s12562_s21 + $0x48] sm:$0xff]  ;;  %v589_v26 = vld [vmem:[%s12562_s21 + $0x18] sm:$0xff] }
  0x1a   : > { %v598_v13 = vld [vmem:[%s12562_s21 + $0x60] sm:$0x33]  ;;  %v599_v19 = vld [vmem:[%s12562_s21 + $0x68] sm:$0x33]  ;;  %v593_v27 = vld [vmem:[%s12562_s21 + $0x38] sm:$0xff]  ;;  %v9447_v37 = vcombine.high %v588_v21, %v592_v25  ;;  %634 = vperm.xlu0 %11502, %v611_v28   ;;  %v9446_v42 = vcombine.low %v588_v21, %v592_v25  ;;  %v1224_v25 = vand.u32 127, %v1206_v2 }
  0x1b   : > { %v9451_v17 = vcombine.high %v594_v12, %v598_v13  ;;  %v9450_v20 = vcombine.low %v594_v12, %v598_v13  ;;  %760 = vmatprep.subr.bf16.mxu0 %v9443_v9  ;;  %v9453_v23 = vcombine.high %v595_v18, %v599_v19  ;;  %v9452_v24 = vcombine.low %v595_v18, %v599_v19  ;;  %v596_v31 = vld [vmem:[%s12562_s21 + $0x50] sm:$0xff]  ;;  %v597_v33 = vld [vmem:[%s12562_s21 + $0x58] sm:$0xff]  ;;  %v11504_v36 = vld [vmem:[%s17349_s1] sm:$0xff]  }
  0x1c   : > { %821 = vmatprep.subr.bf16.mxu1 %v9445_v15  ;;  %761 = vmatpush1.bf16.msra.mxu0 %v9442_v11  ;;  %v600_v32 = vld [vmem:[%s12562_s21 + $0x70] sm:$0x33]  ;;  %v601_v38 = vld [vmem:[%s12562_s21 + $0x78] sm:$0x33]  ;;  %v9449_v39 = vcombine.high %v589_v26, %v593_v27  ;;  %v9448_v44 = vcombine.low %v589_v26, %v593_v27  ;;  %v11505_v48 = vld [vmem:[%s17349_s1 + $0x8] sm:$0xff]   ;;  %v1208_v18 = vadd.s32 384, %v12630_v55 }
  0x1d   : > { %v740_v29 = vand.u32 %v9451_v17, %v735_v14  ;;  %v737_v30 = vand.u32 %v9450_v20, %v735_v14  ;;  %822 = vmatpush1.bf16.msra.mxu1 %v9444_v16  ;;  %v746_v34 = vand.u32 %v9453_v23, %v735_v14  ;;  %v743_v35 = vand.u32 %v9452_v24, %v735_v14  ;;  %v11506_v51 = vld [vmem:[%s17349_s1 + $0x10] ss:$0 sps:$4 sm:$0xff]  }
  0x1e   : > { %v9455_v40 = vcombine.high %v596_v31, %v600_v32  ;;  %v9457_v41 = vcombine.high %v597_v33, %v601_v38  ;;  %v9454_v43 = vcombine.low %v596_v31, %v600_v32  ;;  %v9456_v46 = vcombine.low %v597_v33, %v601_v38 }
  0x1f   : > { %762 = vmatprep.subr.bf16.mxu0 %v740_v29  ;;  %823 = vmatprep.subr.bf16.mxu1 %v746_v34  ;;  %v1231_v24 = vand.u32 127, %v1207_v61  ;;  %v1238_v29 = vand.u32 127, %v1208_v18  ;;  %vm12713_vm6 = vcmp.lt.s32.totalorder %v1224_v25, 8 }
  0x20   : > { %763 = vmatpush1.bf16.msra.mxu0 %v737_v30  ;;  %v752_v45 = vand.u32 %v9455_v40, %v735_v14  ;;  %v758_v47 = vand.u32 %v9457_v41, %v735_v14  ;;  %v749_v49 = vand.u32 %v9454_v43, %v735_v14  ;;  %v755_v50 = vand.u32 %v9456_v46, %v735_v14  ;;  %v11507_v46 = vld [vmem:[%s17329_s3] sm:$0xff]  }
  0x21   : > { %824 = vmatpush1.bf16.msra.mxu1 %v743_v35  ;;  %882 = vmatprep.subr.bf16.mxu0 %v9447_v37  ;;  %vm12700_vm5 = vcmp.lt.s32.totalorder %v1231_v24, 8  ;;  %vm12721_vm7 = vcmp.lt.s32.totalorder %v1238_v29, 8 }
  0x22   : > { %943 = vmatprep.subr.bf16.mxu1 %v9449_v39 }
  0x23   : > { %9458 = vmatmul.mubr.msk.bf16.vlgmr.msra.gmra.mrb[0].mxu0 %vm722_vm2, %v11504_v36 }
  0x24   : > { %9461 = vmatmul.mubr.msk.bf16.vlgmr.msra.gmra.mrb[0].mxu1 %vm722_vm2, %v11504_v36  ;;  %802 = vmatprep.mubr.bf16.mxu0 %v12435_v0 }
  0x25   : > { %863 = vmatprep.mubr.bf16.mxu1 %v12435_v0  ;;  %883 = vmatpush1.bf16.msra.mxu0 %v9446_v42 }
  0x26   : > { %944 = vmatpush1.bf16.msra.mxu1 %v9448_v44  ;;  %884 = vmatprep.subr.bf16.mxu0 %v752_v45 }
  0x27   : > { %945 = vmatprep.subr.bf16.mxu1 %v758_v47 }
  0x29   : > { %885 = vmatpush1.bf16.msra.mxu0 %v749_v49 }
  0x2a   : > { %946 = vmatpush1.bf16.msra.mxu1 %v755_v50  ;;  %v12711_v50 = vadd.s32 512, %v12630_v55 }
  0x2b   : > { %9459 = vmatmul.mubr.msk.bf16.gmra.mrb[4].mxu0 %vm722_vm2, %v11505_v48  ;;  %10802 = vmatprep.subr.bf16.mxu1 %v12435_v0 }
  0x2c   : > { %9462 = vmatmul.mubr.msk.bf16.gmra.mrb[4].mxu1 %vm722_vm2, %v11505_v48  ;;  %812 = vmatprep.mubr.bf16.mxu0 %v12435_v0 }
  0x2d   : > { %873 = vmatprep.mubr.bf16.mxu1 %v12435_v0 }
  0x33   : > { %9460 = vmatmul.mubr.msk.bf16.gmra.mrb[8].mxu0 %vm722_vm2, %v11506_v51 }
  0x34   : > { %9463 = vmatmul.mubr.msk.bf16.gmra.mrb[8].mxu1 %vm722_vm2, %v11506_v51  ;;  %914 = vmatprep.mubr.bf16.mxu0 %v12435_v0 }
  0x35   : > { %975 = vmatprep.mubr.bf16.mxu1 %v12435_v0 }
  0x3b   : > { %9464 = vmatmul.mubr.msk.bf16.vlgmr.msra.gmra.mrb[12].mxu0 %vm722_vm2, %v11504_v36 }
  0x3c   : > { %9467 = vmatmul.mubr.msk.bf16.vlgmr.msra.gmra.mrb[12].mxu1 %vm722_vm2, %v11504_v36  ;;  %924 = vmatprep.mubr.bf16.mxu0 %v12435_v0 }
  0x3d   : > { %985 = vmatprep.mubr.bf16.mxu1 %v12435_v0 }
  0x43   : > { %9465 = vmatmul.mubr.msk.bf16.gmra.mrb[16].mxu0 %vm722_vm2, %v11505_v48 }
  0x44   : > { %9468 = vmatmul.mubr.msk.bf16.gmra.mrb[16].mxu1 %vm722_vm2, %v11505_v48  ;;  %934 = vmatprep.mubr.bf16.mxu0 %v12435_v0 }
  0x45   : > { %995 = vmatprep.mubr.bf16.mxu1 %v12435_v0 }
  0x4b   : > { %9466 = vmatmul.mubr.msk.bf16.gmra.mrb[20].mxu0 %vm722_vm2, %v11506_v51 }
  0x4c   : > { %9469 = vmatmul.mubr.msk.bf16.gmra.mrb[20].mxu1 %vm722_vm2, %v11506_v51  ;;  %10610 = vmatprep.mubr.msk.bf16.mxu0 %vm2298_vm12, %v11507_v46  ;;  %v11540_v46 = vld [vmem:[%s17329_s3 + $0x108] sm:$0xff]  }
  0x91   : > { %v12627_v54 = vpop.permute.xlu0 %614  ;;  %v12632_v56 = vpop.permute.xlu1 %624 }
  0x95   : > { %v12634_v58 = vpop.permute.xlu0 %619  ;;  %v12671_v23 = vpop.permute.xlu1 %629 }
  0x99   : > { %v12708_v49 = vpop.permute.xlu0 %634 }
  0xf6   : > { %v794_v57 = vpop.f32.mrb[0].mxu0 }
  0xf7   : > { %v12637_v59 = vadd.f32 %v794_v57, %v12627_v54  ;;  %v855_v60 = vpop.f32.mrb[0].mxu1  ;;  %v796_v62 = vpop.f32.mrb[1].mxu0 }
  0xf8   : > { %v12641_v63 = vadd.f32 %v855_v60, %v12627_v54  ;;  %v12644_v1 = vadd.f32 %v796_v62, %v12627_v54  ;;  %v857_v3 = vpop.f32.mrb[1].mxu1  ;;  %v798_v4 = vpop.f32.mrb[2].mxu0  ;;  %v12719_v60 = vadd.s32 768, %v12630_v55 }
  0xf9   : > { %v1004_v5 = vmul.f32 0.5, %v12637_v59  ;;  %v12649_v6 = vadd.f32 %v857_v3, %v12627_v54  ;;  %v12652_v7 = vadd.f32 %v798_v4, %v12634_v58  ;;  %v859_v8 = vpop.f32.mrb[2].mxu1  ;;  %v800_v9 = vpop.f32.mrb[3].mxu0 }
  0xfa   : > { %v1006_v10 = vmul.f32 0.5, %v12641_v63  ;;  %v1005_v11 = vmul.f32 0.5, %v12644_v1  ;;  %v12657_v12 = vadd.f32 %v859_v8, %v12634_v58  ;;  %v12660_v13 = vadd.f32 %v800_v9, %v12634_v58  ;;  %v861_v14 = vpop.f32.mrb[3].mxu1 }
  0xfb   : > { %12325 = vtanh.f32 %v1004_v5  ;;  %v1007_v15 = vmul.f32 0.5, %v12649_v6  ;;  %v1012_v16 = vmul.f32 0.5, %v12652_v7  ;;  %v12665_v17 = vadd.f32 %v861_v14, %v12634_v58 }
  0xfc   : > { %12327 = vtanh.f32 %v1006_v10  ;;  %v1014_v19 = vmul.f32 0.5, %v12657_v12  ;;  %v1013_v20 = vmul.f32 0.5, %v12660_v13  ;;  %v12727_v5 = vadd.s32 640, %v12630_v55 }
  0xfd   : > { %12329 = vtanh.f32 %v1005_v11  ;;  %v1015_v21 = vmul.f32 0.5, %v12665_v17 }
  0xfe   : > { %12331 = vtanh.f32 %v1007_v15  ;;  %v804_v22 = vpop.f32.mrb[4].mxu0  ;;  %v12735_v15 = vadd.s32 896, %v12630_v55 }
  0xff   : > { %12333 = vtanh.f32 %v1012_v16  ;;  %v12674_v26 = vadd.f32 %v804_v22, %v12632_v56  ;;  %v865_v27 = vpop.f32.mrb[4].mxu1  ;;  %v806_v28 = vpop.f32.mrb[5].mxu0  ;;  %v1245_v22 = vand.u32 127, %v12711_v50 }
 0x100   : > { %12335 = vtanh.f32 %v1014_v19  ;;  %v12677_v30 = vadd.f32 %v865_v27, %v12632_v56  ;;  %v12680_v31 = vadd.f32 %v806_v28, %v12632_v56  ;;  %v867_v32 = vpop.f32.mrb[5].mxu1  ;;  %v808_v33 = vpop.f32.mrb[6].mxu0 }
 0x101   : > { %12337 = vtanh.f32 %v1013_v20  ;;  %v1020_v34 = vmul.f32 0.5, %v12674_v26  ;;  %v12685_v35 = vadd.f32 %v867_v32, %v12632_v56  ;;  %v12688_v36 = vadd.f32 %v808_v33, %v12671_v23  ;;  %v869_v37 = vpop.f32.mrb[6].mxu1  ;;  %v810_v38 = vpop.f32.mrb[7].mxu0 }
 0x102   : > { %12339 = vtanh.f32 %v1015_v21  ;;  %v1022_v39 = vmul.f32 0.5, %v12677_v30  ;;  %v1021_v40 = vmul.f32 0.5, %v12680_v31  ;;  %v12693_v41 = vadd.f32 %v869_v37, %v12671_v23  ;;  %v871_v42 = vpop.f32.mrb[7].mxu1 }
 0x103   : > { %12341 = vtanh.f32 %v1020_v34  ;;  %v1023_v43 = vmul.f32 0.5, %v12685_v35  ;;  %v1028_v44 = vmul.f32 0.5, %v12688_v36  ;;  %v12698_v45 = vadd.f32 %v810_v38, %v12671_v23 }
 0x104   : > { %12343 = vtanh.f32 %v1022_v39  ;;  %v1030_v47 = vmul.f32 0.5, %v12693_v41  ;;  %v12706_v48 = vadd.f32 %v871_v42, %v12671_v23  ;;  %vm12945_vm8 = vcmp.lt.s32.totalorder %v1245_v22, 8 }
 0x105   : > { %v12326_v51 = vpop.eup %12325  ;;  %12345 = vtanh.f32 %v1021_v40  ;;  %v1029_v57 = vmul.f32 0.5, %v12698_v45 }
 0x106   : > { %v12328_v61 = vpop.eup %12327  ;;  %v1084_v62 = vmul.f32 0.5, %v12326_v51  ;;  %12347 = vtanh.f32 %v1023_v43  ;;  %v1031_v3 = vmul.f32 0.5, %v12706_v48  ;;  %v814_v4 = vpop.f32.mrb[8].mxu0 }
 0x107   : > { %v12330_v8 = vpop.eup %12329  ;;  %v1086_v9 = vmul.f32 0.5, %v12328_v61  ;;  %12349 = vtanh.f32 %v1028_v44  ;;  %v12730_v10 = vadd.f32 %v814_v4, %v12708_v49  ;;  %v875_v11 = vpop.f32.mrb[8].mxu1 }
 0x108   : > { %v12732_v14 = vpop.f32.mrb[9].mxu0  ;;  %v12332_v16 = vpop.eup %12331  ;;  %v1124_v18 = vadd.f32 0.5, %v1084_v62  ;;  %v1085_v19 = vmul.f32 0.5, %v12330_v8  ;;  %12351 = vtanh.f32 %v1030_v47 }
 0x109   : > { %v12737_v20 = vpop.f32.mrb[9].mxu1  ;;  %v818_v21 = vpop.f32.mrb[10].mxu0  ;;  %v1126_v25 = vadd.f32 0.5, %v1086_v9  ;;  %v1087_v27 = vmul.f32 0.5, %v12332_v16  ;;  %12353 = vtanh.f32 %v1029_v57  ;;  %v1036_v28 = vmul.f32 0.5, %v12730_v10 }
 0x10a   : > { %v12334_v24 = vpop.eup %12333  ;;  %v819_v29 = vpop.f32.mrb[11].mxu0  ;;  %v1164_v34 = vmul.f32 %v1124_v18, %v12637_v59  ;;  %v1125_v37 = vadd.f32 0.5, %v1085_v19  ;;  %12355 = vtanh.f32 %v1031_v3  ;;  %v12748_v9 = vadd.f32 %v875_v11, %v12708_v49 }
 0x10b   : > { %v879_v32 = vpop.f32.mrb[10].mxu1  ;;  %v12336_v33 = vpop.eup %12335  ;;  %v1092_v38 = vmul.f32 0.5, %v12334_v24  ;;  %v1166_v42 = vmul.f32 %v1126_v25, %v12641_v63  ;;  %v1127_v43 = vadd.f32 0.5, %v1087_v27  ;;  %12357 = vtanh.f32 %v1036_v28 }
 0x10c   : > { %v880_v39 = vpop.f32.mrb[11].mxu1  ;;  %v12338_v40 = vpop.eup %12337  ;;  %v1094_v44 = vmul.f32 0.5, %v12336_v33  ;;  %v1317_v51 = vsel %vm1309_vm4, %v1164_v34, 0.0  ;;  %v1165_v57 = vmul.f32 %v1125_v37, %v12644_v1 }
 0x10d   : > { %v12340_v47 = vpop.eup %12339  ;;  %v1132_v61 = vadd.f32 0.5, %v1092_v38  ;;  %v1093_v62 = vmul.f32 0.5, %v12338_v40  ;;  %v1167_v59 = vmul.f32 %v1127_v43, %v12649_v6  ;;  %v1319_v25 = vsel %vm12700_vm5, %v1166_v42, 0.0 }
 0x10e   : > { %v12342_v4 = vpop.eup %12341  ;;  %v1134_v8 = vadd.f32 0.5, %v1094_v44  ;;  %v1095_v3 = vmul.f32 0.5, %v12340_v47  ;;  %v1318_v16 = vsel %vm12713_vm6, %v1165_v57, 0.0  ;;  %v12753_v24 = vpop.f32.mrb[12].mxu0 }
 0x10f   : > { %v12344_v63 = vpop.eup %12343  ;;  %v1172_v18 = vmul.f32 %v1132_v61, %v12652_v7  ;;  %v1133_v19 = vadd.f32 0.5, %v1093_v62  ;;  %v1100_v21 = vmul.f32 0.5, %v12342_v4  ;;  %v1362_v6 = vadd.f32 %v1318_v16, %v1317_v51  ;;  %v12758_v11 = vpop.f32.mrb[12].mxu1 }
 0x110   : > { %v12346_v1 = vpop.eup %12345  ;;  %v1174_v27 = vmul.f32 %v1134_v8, %v12657_v12  ;;  %v1135_v28 = vadd.f32 0.5, %v1095_v3  ;;  %v12760_v29 = vpop.f32.mrb[13].mxu0  ;;  %v1102_v37 = vmul.f32 0.5, %v12344_v63  ;;  %v1320_v12 = vsel %vm12721_vm7, %v1167_v59, 0.0 }
 0x111   : > { %v12348_v32 = vpop.eup %12347  ;;  %v1325_v7 = vsel %vm1309_vm4, %v1172_v18, 0.0  ;;  %v1173_v33 = vmul.f32 %v1133_v19, %v12660_v13  ;;  %v1140_v34 = vadd.f32 0.5, %v1100_v21  ;;  %v12765_v38 = vpop.f32.mrb[13].mxu1  ;;  %v1363_v42 = vadd.f32 %v1362_v6, %v1319_v25 }
 0x112   : > { %v12767_v39 = vpop.f32.mrb[14].mxu0  ;;  %v12350_v40 = vpop.eup %12349  ;;  %v1175_v43 = vmul.f32 %v1135_v28, %v12665_v17  ;;  %v1101_v44 = vmul.f32 0.5, %v12346_v1  ;;  %v1142_v62 = vadd.f32 0.5, %v1102_v37  ;;  %v1103_v4 = vmul.f32 0.5, %v12348_v32 }
 0x113   : > { %v12772_v47 = vpop.f32.mrb[14].mxu1  ;;  %v12774_v51 = vpop.f32.mrb[15].mxu0  ;;  %v1326_v13 = vsel %vm12713_vm6, %v1173_v33, 0.0  ;;  %v1180_v61 = vmul.f32 %v1140_v34, %v12674_v26  ;;  %v12781_v59 = vadd.f32 %v1363_v42, %v1320_v12  ;;  %v1327_v17 = vsel %vm12700_vm5, %v1174_v27, 0.0 }
 0x114   : > { %v12352_v57 = vpop.eup %12351  ;;  %v12779_v8 = vpop.f32.mrb[15].mxu1  ;;  %v1371_v63 = vadd.f32 %v1326_v13, %v1325_v7  ;;  %v1141_v16 = vadd.f32 0.5, %v1101_v44  ;;  %v1182_v21 = vmul.f32 %v1142_v62, %v12677_v30  ;;  %v1143_v1 = vadd.f32 0.5, %v1103_v4 }
 0x115   : > { %v12354_v3 = vpop.eup %12353  ;;  %v1333_v19 = vsel %vm1309_vm4, %v1180_v61, 0.0  ;;  %v1108_v26 = vmul.f32 0.5, %v12350_v40  ;;  %v1110_v32 = vmul.f32 0.5, %v12352_v57  ;;  %v1328_v34 = vsel %vm12721_vm7, %v1175_v43, 0.0 }
 0x116   : > { %v12356_v18 = vpop.eup %12355  ;;  %v1372_v6 = vadd.f32 %v1371_v63, %v1327_v17  ;;  %v1181_v28 = vmul.f32 %v1141_v16, %v12680_v31  ;;  %v1109_v33 = vmul.f32 0.5, %v12354_v3  ;;  %v1183_v27 = vmul.f32 %v1143_v1, %v12685_v35  ;;  %v926_v12 = vpop.f32.mrb[16].mxu0 }
 0x117   : > { %v12358_v25 = vpop.eup %12357  ;;  %v1148_v7 = vadd.f32 0.5, %v1108_v26  ;;  %v1111_v37 = vmul.f32 0.5, %v12356_v18  ;;  %v1150_v40 = vadd.f32 0.5, %v1110_v32  ;;  %v987_v13 = vpop.f32.mrb[16].mxu1  ;;  %v1335_v31 = vsel %vm12700_vm5, %v1182_v21, 0.0 }
 0x118   : > { %v12792_v42 = vadd.f32 %v1372_v6, %v1328_v34  ;;  %v1334_v30 = vsel %vm12713_vm6, %v1181_v28, 0.0  ;;  %v1149_v44 = vadd.f32 0.5, %v1109_v33  ;;  %v12796_v61 = vpop.f32.mrb[17].mxu0  ;;  %v12801_v62 = vpop.f32.mrb[17].mxu1  ;;  %v1116_v63 = vmul.f32 0.5, %v12358_v25 }
 0x119   : > { %v1380_v57 = vadd.f32 %v1334_v30, %v1333_v19  ;;  %v1188_v43 = vmul.f32 %v1148_v7, %v12688_v36  ;;  %v1151_v35 = vadd.f32 0.5, %v1111_v37  ;;  %v12803_v4 = vpop.f32.mrb[18].mxu0  ;;  %v1190_v3 = vmul.f32 %v1150_v40, %v12693_v41  ;;  %v12808_v18 = vpop.f32.mrb[18].mxu1 }
 0x11a   : > { %v1189_v17 = vmul.f32 %v1149_v44, %v12698_v45  ;;  %v1038_v16 = vmul.f32 0.5, %v12748_v9  ;;  %v12810_v1 = vpop.f32.mrb[19].mxu0  ;;  %v12816_v19 = vadd.f32 %v12732_v14, %v12708_v49  ;;  %v12818_v26 = vpop.f32.mrb[19].mxu1  ;;  %v1259_v41 = vand.u32 127, %v12719_v60 }
 0x11b   : > { %v1381_v21 = vadd.f32 %v1380_v57, %v1335_v31  ;;  %v1341_v36 = vsel %vm1309_vm4, %v1188_v43, 0.0  ;;  %v1336_v45 = vsel %vm12721_vm7, %v1183_v27, 0.0  ;;  %v1191_v6 = vmul.f32 %v1151_v35, %v12706_v48 }
 0x11c   : > { %v1342_v25 = vsel %vm12713_vm6, %v1189_v17, 0.0  ;;  %12359 = vtanh.f32 %v1038_v16  ;;  %v1343_v32 = vsel %vm12700_vm5, %v1190_v3, 0.0  ;;  %v1037_v33 = vmul.f32 0.5, %v12816_v19 }
 0x11d   : > { %v12826_v28 = vadd.f32 %v1381_v21, %v1336_v45  ;;  %v1389_v14 = vadd.f32 %v1342_v25, %v1341_v36  ;;  %v1156_v34 = vadd.f32 0.5, %v1116_v63  ;;  %v12833_v7 = vadd.f32 %v12737_v20, %v12708_v49 }
 0x11e   : > { %v12837_v27 = vadd.f32 %v12753_v24, %v12627_v54  ;;  %v12841_v48 = vadd.f32 %v12758_v11, %v12627_v54  ;;  %12361 = vtanh.f32 %v1037_v33  ;;  %v12845_v30 = vadd.f32 %v12760_v29, %v12627_v54  ;;  %v936_v20 = vpop.f32.mrb[20].mxu0 }
 0x11f   : > { %v1390_v37 = vadd.f32 %v1389_v14, %v1343_v32  ;;  %v12849_v40 = vadd.f32 %v12765_v38, %v12627_v54  ;;  %v1344_v44 = vsel %vm12721_vm7, %v1191_v6, 0.0  ;;  %v1039_v24 = vmul.f32 0.5, %v12833_v7  ;;  %v997_v57 = vpop.f32.mrb[20].mxu1  ;;  %v938_v43 = vpop.f32.mrb[21].mxu0 }
 0x120   : > { %v1008_v31 = vmul.f32 0.5, %v12837_v27  ;;  %v1010_v11 = vmul.f32 0.5, %v12841_v48  ;;  %v1009_v29 = vmul.f32 0.5, %v12845_v30  ;;  %v12862_v54 = vadd.f32 %v12767_v39, %v12634_v58  ;;  %v12864_v38 = vpop.f32.mrb[21].mxu1  ;;  %v940_v17 = vpop.f32.mrb[22].mxu0 }
 0x121   : > { %v12856_v35 = vadd.f32 %v1390_v37, %v1344_v44  ;;  %v1011_v3 = vmul.f32 0.5, %v12849_v40  ;;  %12363 = vtanh.f32 %v1039_v24  ;;  %v12868_v63 = vadd.f32 %v12772_v47, %v12634_v58  ;;  %v941_v36 = vpop.f32.mrb[23].mxu0  ;;  %v1001_v45 = vpop.f32.mrb[22].mxu1 }
 0x122   : > { %v12872_v16 = vadd.f32 %v12774_v51, %v12634_v58  ;;  %v12876_v21 = vadd.f32 %v12779_v8, %v12634_v58  ;;  %12365 = vtanh.f32 %v1008_v31  ;;  %v1016_v39 = vmul.f32 0.5, %v12862_v54  ;;  %v1002_v6 = vpop.f32.mrb[23].mxu1 }
 0x123   : > { %v12880_v25 = vadd.f32 %v926_v12, %v12632_v56  ;;  %v1252_v47 = vand.u32 127, %v12727_v5  ;;  %v1196_v32 = vmul.f32 %v1156_v34, %v12730_v10  ;;  %12367 = vtanh.f32 %v1010_v11 }
 0x124   : > { %v1018_v51 = vmul.f32 0.5, %v12868_v63  ;;  %v12886_v14 = vadd.f32 %v987_v13, %v12632_v56  ;;  %12369 = vtanh.f32 %v1009_v29  ;;  %v1017_v58 = vmul.f32 0.5, %v12872_v16 }
 0x125   : > { %v12891_v8 = vadd.f32 %v12796_v61, %v12632_v56  ;;  %v1266_v12 = vand.u32 127, %v12735_v15  ;;  %12371 = vtanh.f32 %v1011_v3  ;;  %v1019_v37 = vmul.f32 0.5, %v12876_v21 }
 0x126   : > { %v12360_v33 = vpop.eup %12359  ;;  %v1024_v10 = vmul.f32 0.5, %v12880_v25  ;;  %v12898_v34 = vadd.f32 %v12801_v62, %v12632_v56  ;;  %12373 = vtanh.f32 %v1016_v39  ;;  %v12902_v44 = vadd.f32 %v12803_v4, %v12671_v23 }
 0x127   : > { %v1118_v13 = vmul.f32 0.5, %v12360_v33  ;;  %v12906_v61 = vadd.f32 %v12808_v18, %v12671_v23  ;;  %v1349_v24 = vsel %vm1309_vm4, %v1196_v32, 0.0  ;;  %12375 = vtanh.f32 %v1018_v51 }
 0x128   : > { %v1026_v31 = vmul.f32 0.5, %v12886_v14  ;;  %v12913_v56 = vadd.f32 %v12810_v1, %v12671_v23  ;;  %v12362_v62 = vpop.eup %12361  ;;  %12377 = vtanh.f32 %v1017_v58  ;;  %v1025_v4 = vmul.f32 0.5, %v12891_v8 }
 0x129   : > { %v1158_v11 = vadd.f32 0.5, %v1118_v13  ;;  %v12918_v29 = vadd.f32 %v12818_v26, %v12671_v23  ;;  %v1117_v18 = vmul.f32 0.5, %v12362_v62  ;;  %12379 = vtanh.f32 %v1019_v37 }
 0x12a   : > { %v1027_v55 = vmul.f32 0.5, %v12898_v34  ;;  %v12922_v3 = vadd.f32 %v936_v20, %v12708_v49  ;;  %12381 = vtanh.f32 %v1024_v10  ;;  %v1032_v1 = vmul.f32 0.5, %v12902_v44 }
 0x12b   : > { %v1034_v17 = vmul.f32 0.5, %v12906_v61  ;;  %v12927_v36 = vadd.f32 %v997_v57, %v12708_v49  ;;  %v12364_v45 = vpop.eup %12363  ;;  %v1198_v39 = vmul.f32 %v1158_v11, %v12748_v9  ;;  %v1157_v23 = vadd.f32 0.5, %v1117_v18 }
 0x12c   : > { %12383 = vtanh.f32 %v1026_v31  ;;  %v1033_v26 = vmul.f32 0.5, %v12913_v56  ;;  %v12366_v6 = vpop.eup %12365  ;;  %v1119_v32 = vmul.f32 0.5, %v12364_v45  ;;  %v1035_v20 = vmul.f32 0.5, %v12918_v29 }
 0x12d   : > { %12385 = vtanh.f32 %v1025_v4  ;;  %v12933_v51 = vadd.f32 %v938_v43, %v12708_v49  ;;  %v12368_v58 = vpop.eup %12367  ;;  %v1197_v33 = vmul.f32 %v1157_v23, %v12816_v19  ;;  %v1088_v57 = vmul.f32 0.5, %v12366_v6 }
 0x12e   : > { %12387 = vtanh.f32 %v1027_v55  ;;  %v1040_v37 = vmul.f32 0.5, %v12922_v3  ;;  %v12370_v9 = vpop.eup %12369  ;;  %v1159_v10 = vadd.f32 0.5, %v1119_v32  ;;  %v1090_v13 = vmul.f32 0.5, %v12368_v58 }
 0x12f   : > { %12389 = vtanh.f32 %v1032_v1  ;;  %v1042_v31 = vmul.f32 0.5, %v12927_v36  ;;  %v12372_v62 = vpop.eup %12371  ;;  %v1350_v11 = vsel %vm12713_vm6, %v1197_v33, 0.0  ;;  %v1128_v4 = vadd.f32 0.5, %v1088_v57 }
 0x130   : > { %v1089_v43 = vmul.f32 0.5, %v12370_v9  ;;  %12391 = vtanh.f32 %v1034_v17  ;;  %v12374_v18 = vpop.eup %12373  ;;  %v1351_v19 = vsel %vm12700_vm5, %v1198_v39, 0.0  ;;  %v1199_v55 = vmul.f32 %v1159_v10, %v12833_v7 }
 0x131   : > { %v1398_v45 = vadd.f32 %v1350_v11, %v1349_v24  ;;  %v1091_v23 = vmul.f32 0.5, %v12372_v62  ;;  %v12376_v6 = vpop.eup %12375  ;;  %v1130_v52 = vadd.f32 0.5, %v1090_v13  ;;  %v1096_v58 = vmul.f32 0.5, %v12374_v18 }
 0x132   : > { %v1129_v32 = vadd.f32 0.5, %v1089_v43  ;;  %12393 = vtanh.f32 %v1033_v26  ;;  %vm12951_vm9 = vcmp.lt.s32.totalorder %v1252_v47, 8  ;;  %v12378_v7 = vpop.eup %12377  ;;  %v1168_v17 = vmul.f32 %v1128_v4, %v12837_v27 }
 0x133   : > { %v1399_v24 = vadd.f32 %v1398_v45, %v1351_v19  ;;  %v1041_v50 = vmul.f32 0.5, %v12933_v51  ;;  %v12959_v22 = vadd.f32 %v12864_v38, %v12708_v49  ;;  %v12380_v39 = vpop.eup %12379  ;;  %v1352_v26 = vsel %vm12721_vm7, %v1199_v55, 0.0 }
 0x134   : > { %v1131_v33 = vadd.f32 0.5, %v1091_v23  ;;  %v1098_v5 = vmul.f32 0.5, %v12376_v6  ;;  %v1097_v47 = vmul.f32 0.5, %v12378_v7  ;;  %vm12965_vm10 = vcmp.lt.s32.totalorder %v1259_v41, 8  ;;  %v12382_v27 = vpop.eup %12381 }
 0x135   : > { %v12969_v9 = vadd.f32 %v1399_v24, %v1352_v26  ;;  %v1136_v10 = vadd.f32 0.5, %v1096_v58  ;;  %v1099_v13 = vmul.f32 0.5, %v12380_v39  ;;  %12395 = vtanh.f32 %v1035_v20 }
 0x136   : > { %vm12973_vm11 = vcmp.lt.s32.totalorder %v1266_v12, 8  ;;  %v12384_v2 = vpop.eup %12383  ;;  %v1170_v38 = vmul.f32 %v1130_v52, %v12841_v48  ;;  %v1169_v60 = vmul.f32 %v1129_v32, %v12845_v30  ;;  %v1138_v41 = vadd.f32 0.5, %v1098_v5 }
 0x137   : > { %v1104_v62 = vmul.f32 0.5, %v12382_v27  ;;  %v12386_v11 = vpop.eup %12385  ;;  %v1137_v4 = vadd.f32 0.5, %v1097_v47  ;;  %v1106_v43 = vmul.f32 0.5, %v12384_v2  ;;  %12397 = vtanh.f32 %v1040_v37 }
 0x138   : > { %v1043_v18 = vmul.f32 0.5, %v12959_v22  ;;  %v12388_v20 = vpop.eup %12387  ;;  %v1171_v15 = vmul.f32 %v1131_v33, %v12849_v40  ;;  %v1139_v12 = vadd.f32 0.5, %v1099_v13  ;;  %v1105_v55 = vmul.f32 0.5, %v12386_v11 }
 0x139   : > { %v1144_v19 = vadd.f32 0.5, %v1104_v62  ;;  %v12390_v45 = vpop.eup %12389  ;;  %v1176_v23 = vmul.f32 %v1136_v10, %v12862_v54  ;;  %v1146_v48 = vadd.f32 0.5, %v1106_v43  ;;  %v1107_v6 = vmul.f32 0.5, %v12388_v20 }
 0x13a   : > { %12399 = vtanh.f32 %v1042_v31  ;;  %v12392_v30 = vpop.eup %12391  ;;  %v1178_v52 = vmul.f32 %v1138_v41, %v12868_v63  ;;  %v1145_v32 = vadd.f32 0.5, %v1105_v55  ;;  %v1112_v58 = vmul.f32 0.5, %v12390_v45 }
 0x13b   : > { %12401 = vtanh.f32 %v1041_v50  ;;  %v1177_v37 = vmul.f32 %v1137_v4, %v12872_v16  ;;  %v1147_v7 = vadd.f32 0.5, %v1107_v6  ;;  %v1114_v24 = vmul.f32 0.5, %v12392_v30 }
 0x13c   : > { %12403 = vtanh.f32 %v1043_v18  ;;  %v12394_v40 = vpop.eup %12393  ;;  %v1179_v39 = vmul.f32 %v1139_v12, %v12876_v21  ;;  %v1184_v26 = vmul.f32 %v1144_v19, %v12880_v25  ;;  %v1152_v54 = vadd.f32 0.5, %v1112_v58 }
 0x13d   : > { %v1321_v31 = vsel %vm12945_vm8, %v1168_v17, 0.0  ;;  %v1186_v33 = vmul.f32 %v1146_v48, %v12886_v14  ;;  %v1154_v63 = vadd.f32 0.5, %v1114_v24  ;;  %v1113_v5 = vmul.f32 0.5, %v12394_v40 }
 0x13e   : > { %v1322_v50 = vsel %vm12951_vm9, %v1169_v60, 0.0  ;;  %v1185_v16 = vmul.f32 %v1145_v32, %v12891_v8  ;;  %v1187_v47 = vmul.f32 %v1147_v7, %v12898_v34  ;;  %v1365_v27 = vadd.f32 %v12781_v59, %v1321_v31 }
 0x13f   : > { %v1329_v21 = vsel %vm12945_vm8, %v1176_v23, 0.0  ;;  %v12396_v25 = vpop.eup %12395  ;;  %v1192_v10 = vmul.f32 %v1152_v54, %v12902_v44  ;;  %v1153_v17 = vadd.f32 0.5, %v1113_v5  ;;  %v1323_v14 = vsel %vm12965_vm10, %v1170_v38, 0.0 }
 0x140   : > { %v1330_v13 = vsel %vm12951_vm9, %v1177_v37, 0.0  ;;  %v1115_v2 = vmul.f32 0.5, %v12396_v25  ;;  %v1324_v8 = vsel %vm12973_vm11, %v1171_v15, 0.0  ;;  %v1366_v34 = vadd.f32 %v1365_v27, %v1322_v50 }
 0x141   : > { %v1374_v59 = vadd.f32 %v12792_v42, %v1329_v21  ;;  %v12398_v60 = vpop.eup %12397  ;;  %v1194_v41 = vmul.f32 %v1154_v63, %v12906_v61  ;;  %v1193_v62 = vmul.f32 %v1153_v17, %v12913_v56  ;;  %v1331_v44 = vsel %vm12965_vm10, %v1178_v52, 0.0 }
 0x142   : > { %v1337_v38 = vsel %vm12945_vm8, %v1184_v26, 0.0  ;;  %v1120_v11 = vmul.f32 0.5, %v12398_v60  ;;  %v1367_v4 = vadd.f32 %v1366_v34, %v1323_v14  ;;  %v1338_v18 = vsel %vm12951_vm9, %v1185_v16, 0.0  ;;  %v1360_v34 = vld [vmem:[#allocation2 + $0x18] sm:$0xff] }
 0x143   : > { %v1375_v43 = vadd.f32 %v1374_v59, %v1330_v13  ;;  %v1155_v15 = vadd.f32 0.5, %v1115_v2  ;;  %v1332_v42 = vsel %vm12973_vm11, %v1179_v39, 0.0  ;;  %v1339_v61 = vsel %vm12965_vm10, %v1186_v33, 0.0  ;;  %v1358_v13 = vld [vmem:[#allocation2 + $0x8] sm:$0xff] }
 0x144   : > { %v12400_v20 = vpop.eup %12399  ;;  %v1383_v56 = vadd.f32 %v12826_v28, %v1337_v38  ;;  %v1160_v19 = vadd.f32 0.5, %v1120_v11  ;;  %v1368_v45 = vadd.f32 %v1367_v4, %v1324_v8  ;;  %v1345_v23 = vsel %vm12945_vm8, %v1192_v10, 0.0  ;;  %v1359_v8 = vld [vmem:[#allocation2 + $0x10] sm:$0xff] }
 0x145   : > { %v12402_v12 = vpop.eup %12401  ;;  %v1122_v55 = vmul.f32 0.5, %v12400_v20  ;;  %v1376_v30 = vadd.f32 %v1375_v43, %v1331_v44  ;;  %v1340_v52 = vsel %vm12973_vm11, %v1187_v47, 0.0  ;;  %v1346_v28 = vsel %vm12951_vm9, %v1193_v62, 0.0  ;;  %v1361_v62 = vld [vmem:[#allocation2 + $0x20] sm:$0xff] }
 0x146   : > { %v12404_v48 = vpop.eup %12403  ;;  %v1121_v6 = vmul.f32 0.5, %v12402_v12  ;;  %v1384_v32 = vadd.f32 %v1383_v56, %v1338_v18  ;;  %v1200_v58 = vmul.f32 %v1160_v19, %v12922_v3  ;;  %1369 = vadd.xlane.f32.xlu1 %v1368_v45  ;;  %v1392_v26 = vadd.f32 %v12856_v35, %v1345_v23 }
 0x147   : > { %v1162_v37 = vadd.f32 0.5, %v1122_v55  ;;  %v1123_v7 = vmul.f32 0.5, %v12404_v48  ;;  %v1377_v40 = vadd.f32 %v1376_v30, %v1332_v42  ;;  %v1195_v54 = vmul.f32 %v1155_v15, %v12918_v29  ;;  %v11508_v48 = vld [vmem:[%s17329_s3 + $0x8] sm:$0xff]   ;;  %v11510_v30 = vld [vmem:[%s17329_s3 + $0x18] sm:$0xff]  }
 0x148   : > { %v1161_v24 = vadd.f32 0.5, %v1121_v6  ;;  %v1385_v39 = vadd.f32 %v1384_v32, %v1339_v61  ;;  %v1353_v63 = vsel %vm12945_vm8, %v1200_v58, 0.0  ;;  %v1393_v50 = vadd.f32 %v1392_v26, %v1346_v28  ;;  %v11509_v6 = vld [vmem:[%s17329_s3 + $0x10] sm:$0xff]   ;;  %v11512_v32 = vld [vmem:[%s17329_s3 + $0x28] sm:$0xff]  }
 0x149   : > { %v1202_v31 = vmul.f32 %v1162_v37, %v12927_v36  ;;  %v1163_v33 = vadd.f32 0.5, %v1123_v7  ;;  %1378 = vadd.xlane.f32.xlu0 %v1377_v40  ;;  %v1401_v16 = vadd.f32 %v12969_v9, %v1353_v63  ;;  %v1347_v47 = vsel %vm12965_vm10, %v1194_v41, 0.0  ;;  %v11513_v58 = vld [vmem:[%s17329_s3 + $0x30] sm:$0xff]   ;;  %v11514_v37 = vld [vmem:[%s17329_s3 + $0x38] sm:$0xff]   ;;  %v11515_v7 = vld [vmem:[%s17329_s3 + $0x40] sm:$0xff]  }
 0x14a   : > { %v1201_v3 = vmul.f32 %v1161_v24, %v12933_v51  ;;  %v1386_v5 = vadd.f32 %v1385_v39, %v1340_v52  ;;  %v1394_v27 = vadd.f32 %v1393_v50, %v1347_v47  ;;  %v1348_v36 = vsel %vm12973_vm11, %v1195_v54, 0.0  ;;  %v11511_v52 = vld [vmem:[%s17329_s3 + $0x20] sm:$0xff]   ;;  %v11516_v28 = vld [vmem:[%s17329_s3 + $0x48] sm:$0xff]   ;;  %v11517_v24 = vld [vmem:[%s17329_s3 + $0x50] sm:$0xff]  }
 0x14b   : > { %v1203_v35 = vmul.f32 %v1163_v33, %v12959_v22  ;;  %v1355_v21 = vsel %vm12965_vm10, %v1202_v31, 0.0  ;;  %v1357_v22 = vld [vmem:[#allocation2] sm:$0xff]  ;;  %v11518_v40 = vld [vmem:[%s17329_s3 + $0x58] sm:$0xff]   ;;  %v11520_v26 = vld [vmem:[%s17329_s3 + $0x68] sm:$0xff]  }
 0x14c   : > { %v1354_v29 = vsel %vm12951_vm9, %v1201_v3, 0.0  ;;  %v1395_v51 = vadd.f32 %v1394_v27, %v1348_v36  ;;  %v11519_v39 = vld [vmem:[%s17329_s3 + $0x60] sm:$0xff]   ;;  %v11521_v54 = vld [vmem:[%s17329_s3 + $0x70] sm:$0xff]   ;;  %v11522_v31 = vld [vmem:[%s17329_s3 + $0x78] sm:$0xff]  }
 0x14d   : > { %v1402_v1 = vadd.f32 %v1401_v16, %v1354_v29  ;;  %1387 = vadd.xlane.f32.xlu0 %v1386_v5  ;;  %v1356_v9 = vsel %vm12973_vm11, %v1203_v35, 0.0  ;;  %v11523_v33 = vld [vmem:[%s17329_s3 + $0x80] sm:$0xff]   ;;  %v11524_v63 = vld [vmem:[%s17329_s3 + $0x88] sm:$0xff]   ;;  %v11525_v3 = vld [vmem:[%s17329_s3 + $0x90] sm:$0xff]  }
 0x14e   : > { %1396 = vadd.xlane.f32.xlu1 %v1395_v51  ;;  %v11526_v5 = vld [vmem:[%s17329_s3 + $0x98] sm:$0xff]   ;;  %v11527_v50 = vld [vmem:[%s17329_s3 + $0xa0] sm:$0xff]   ;;  %v11528_v16 = vld [vmem:[%s17329_s3 + $0xa8] sm:$0xff]  }
 0x14f   : > { %v1403_v25 = vadd.f32 %v1402_v1, %v1355_v21  ;;  %v11529_v47 = vld [vmem:[%s17329_s3 + $0xb0] sm:$0xff]   ;;  %v11530_v35 = vld [vmem:[%s17329_s3 + $0xb8] sm:$0xff]   ;;  %v11531_v27 = vld [vmem:[%s17329_s3 + $0xc0] sm:$0xff]  }
 0x150   : > { %v11532_v29 = vld [vmem:[%s17329_s3 + $0xc8] sm:$0xff]   ;;  %v11533_v36 = vld [vmem:[%s17329_s3 + $0xd0] sm:$0xff]   ;;  %v11534_v1 = vld [vmem:[%s17329_s3 + $0xd8] sm:$0xff]  }
 0x151   : > { %v1404_v10 = vadd.f32 %v1403_v25, %v1356_v9  ;;  %v11535_v51 = vld [vmem:[%s17329_s3 + $0xe0] sm:$0xff]   ;;  %v11536_v21 = vld [vmem:[%s17329_s3 + $0xe8] sm:$0xff]   ;;  %v11537_v25 = vld [vmem:[%s17329_s3 + $0xf0] sm:$0xff]  }
 0x152   : > { %v11538_v9 = vld [vmem:[%s17329_s3 + $0xf8] sm:$0xff]  }
 0x153   : > { %1405 = vadd.xlane.f32.xlu0 %v1404_v10  ;;  %v11539_v10 = vld [vmem:[%s17329_s3 + $0x100] sm:$0xff]  }
 0x1d3   : > { %v1370_v17 = vpop.xlane.xlu1 %1369 }
 0x1d4   : > { %v1407_v14 = vadd.f32 %v1370_v17, %v1357_v22  ;;  %v11541_v22 = vld [vmem:[%s17329_s3 + $0x110] sm:$0xff]   ;;  %v11542_v17 = vld [vmem:[%s17329_s3 + $0x118] sm:$0xff]  }
 0x1d6   : > { %1413 = vst.msk [vmem:[#allocation2] sm:$0xff] %vm580_vm3, %v1407_v14  ;;  %v1379_v57 = vpop.xlane.xlu0 %1378  ;;  %v11543_v14 = vld [vmem:[%s17329_s3 + $0x120] sm:$0xff]  }
 0x1d7   : > { %v1408_v2 = vadd.f32 %v1379_v57, %v1358_v13  ;;  %v11544_v13 = vld [vmem:[%s17329_s3 + $0x128] sm:$0xff]   ;;  %v11545_v57 = vld [vmem:[%s17329_s3 + $0x130] sm:$0xff]  }
 0x1d9   : > { %1414 = vst.msk [vmem:[#allocation2 + $0x8] sm:$0xff] %vm580_vm3, %v1408_v2  ;;  %v11546_v2 = vld [vmem:[%s17329_s3 + $0x138] sm:$0xff]  }
 0x1da   : > { %v1388_v49 = vpop.xlane.xlu0 %1387 }
 0x1db   : > { %v1409_v59 = vadd.f32 %v1388_v49, %v1359_v8  ;;  %v1397_v60 = vpop.xlane.xlu1 %1396  ;;  %v11547_v8 = vld [vmem:[%s17329_s3 + $0x140] sm:$0xff]   ;;  %v11548_v49 = vld [vmem:[%s17329_s3 + $0x148] sm:$0xff]  }
 0x1dc   : > { %v1410_v41 = vadd.f32 %v1397_v60, %v1360_v34  ;;  %v11549_v34 = vld [vmem:[%s17329_s3 + $0x150] sm:$0xff]   ;;  %v11551_v60 = vld [vmem:[%s17329_s3 + $0x160] sm:$0xff]  }
 0x1dd   : > { %1415 = vst.msk [vmem:[#allocation2 + $0x10] sm:$0xff] %vm580_vm3, %v1409_v59  ;;  %v1421_v44 = vld [vmem:[#allocation2] sm:$0xff]  ;;  %v11550_v59 = vld [vmem:[%s17329_s3 + $0x158] sm:$0xff]  }
 0x1de   : > { %1416 = vst.msk [vmem:[#allocation2 + $0x18] sm:$0xff] %vm580_vm3, %v1410_v41  ;;  %v1426_v43 = vmul.f32 0.015625, %v1421_v44  ;;  %v11552_v41 = vld [vmem:[%s17329_s3 + $0x168] sm:$0xff]   ;;  %v11554_v44 = vld [vmem:[%s17329_s3 + $0x178] sm:$0xff]  }
 0x1e0   : > { %v1406_v38 = vpop.xlane.xlu0 %1405  ;;  %v1422_v4 = vld [vmem:[#allocation2 + $0x8] sm:$0xff] }
 0x1e1   : > { %v1411_v11 = vadd.f32 %v1406_v38, %v1361_v62  ;;  %v1427_v18 = vmul.f32 0.015625, %v1422_v4  ;;  %v11553_v62 = vld [vmem:[%s17329_s3 + $0x170] sm:$0xff]   ;;  %v11555_v38 = vld [vmem:[%s17329_s3 + $0x180] sm:$0xff]  }
 0x1e2   : > { %v11557_v4 = vld [vmem:[%s17329_s3 + $0x190] sm:$0xff]  }
 0x1e3   : > { %1417 = vst.msk [vmem:[#allocation2 + $0x20] sm:$0xff] %vm580_vm3, %v1411_v11  ;;  %v1623_v20 = vpack.c.bf16 %v1427_v18, %v1426_v43  ;;  %v11556_v11 = vld [vmem:[%s17329_s3 + $0x188] sm:$0xff]   ;;  %v11558_v43 = vld [vmem:[%s17329_s3 + $0x198] sm:$0xff]   ;;  %v11559_v18 = vld [vmem:[%s17329_s3 + $0x1a0] sm:$0xff]  }
 0x1e4   : > { %v1423_v15 = vld [vmem:[#allocation2 + $0x10] sm:$0xff] }
 0x1e5   : > { %10604 = vmatprep.subr.bf16.mxu0 %v1623_v20  ;;  %v1424_v42 = vld [vmem:[#allocation2 + $0x18] sm:$0xff]  ;;  %v1428_v61 = vmul.f32 0.015625, %v1423_v15  ;;  %v11561_v15 = vld [vmem:[%s17329_s3 + $0x1b0] sm:$0xff]  }
 0x1e6   : > { %10605 = vmatpush3.bf16.msra.mxu0 %v1623_v20  ;;  %v1429_v56 = vmul.f32 0.015625, %v1424_v42  ;;  %v11560_v20 = vld [vmem:[%s17329_s3 + $0x1a8] sm:$0xff]   ;;  %v1628_v42 = vld [vmem:[%s17330_s4 + $0x10] sm:$0xff] }
 0x1e8   : > { %v1624_v12 = vpack.c.bf16 %v1429_v56, %v1428_v61  ;;  %v1629_v56 = vld [vmem:[%s17330_s4 + $0x18] sm:$0xff] }
 0x1ea   : > { %v1425_v19 = vld [vmem:[#allocation2 + $0x20] sm:$0xff]  ;;  %10606 = vmatprep.subr.bf16.mxu0 %v1624_v12 }
 0x1eb   : > { %v1430_v55 = vmul.f32 0.015625, %v1425_v19  ;;  %10607 = vmatpush3.bf16.msra.mxu0 %v1624_v12  ;;  %v1626_v19 = vld [vmem:[%s17330_s4] sm:$0xff] }
 0x1ed   : > { %v1625_v45 = vpack.c.bf16 %v1430_v55, %v1430_v55  ;;  %v1627_v55 = vld [vmem:[%s17330_s4 + $0x8] sm:$0xff] }
 0x1ef   : > { %11474 = vmatprep.subr.msk.bf16.mxu0 %vm2587_vm13, %v1625_v45  ;;  %v2589_v23 = vsel %vm2587_vm13, %v1625_v45, 0  ;;  %v11562_v45 = vld [vmem:[%s17329_s3 + $0x1b8] sm:$0xff]  }
 0x1f0   : > { %10609 = vmatpush3.bf16.msra.mxu0 %v2589_v23 }
 0x1f1   : > { %5856 = vmatprep.subr.bf16.mxu0 %v12435_v0 }
 0x1f3   : > { %10611 = vmatmul.mubr.msk.bf16.vlgmr.msra.gmra.mrb[24].mxu0 %vm2298_vm12, %v11508_v48  ;;  %v11563_v48 = vld [vmem:[%s17329_s3 + $0x1c0] sm:$0xff]  }
 0x1f4   : > { %10614 = vmatprep.mubr.msk.bf16.mxu0 %vm2298_vm12, %v11509_v6 }
 0x1fb   : > { %10615 = vmatmul.mubr.msk.bf16.gmra.mrb[28].mxu0 %vm2298_vm12, %v11510_v30 }
 0x1fc   : > { %10618 = vmatprep.mubr.msk.bf16.mxu0 %vm2298_vm12, %v11511_v52 }
 0x203   : > { %10619 = vmatmul.mubr.msk.bf16.gmra.mrb[32].mxu0 %vm2298_vm12, %v11512_v32 }
 0x204   : > { %10622 = vmatprep.mubr.msk.bf16.mxu0 %vm2298_vm12, %v11513_v58 }
 0x20b   : > { %10623 = vmatmul.mubr.msk.bf16.gmra.mrb[36].mxu0 %vm2298_vm12, %v11514_v37 }
 0x20c   : > { %10626 = vmatprep.mubr.msk.bf16.mxu0 %vm2298_vm12, %v11515_v7  ;;  %v11597_v7 = vld [vmem:[%s17331_s5 + $0x6cc] ss:$48 sps:$4 sm:$0xff]  }
 0x20d   : > { %6321 = vmatprep.mubr.bf16.mxu1 %v11597_v7 }
 0x213   : > { %10627 = vmatmul.mubr.msk.bf16.gmra.mrb[40].mxu0 %vm2298_vm12, %v11516_v28 }
 0x214   : > { %10630 = vmatprep.mubr.msk.bf16.mxu0 %vm2298_vm12, %v11517_v24  ;;  %v1632_v24 = vld [vmem:[%s17330_s4 + $0x30] sm:$0xff] }
 0x21b   : > { %10631 = vmatmul.mubr.msk.bf16.gmra.mrb[44].mxu0 %vm2298_vm12, %v11518_v40 }
 0x21c   : > { %10634 = vmatprep.mubr.msk.bf16.mxu0 %vm2298_vm12, %v11519_v39  ;;  %v1633_v39 = vld [vmem:[%s17330_s4 + $0x38] sm:$0xff] }
 0x223   : > { %10635 = vmatmul.mubr.msk.bf16.gmra.mrb[48].mxu0 %vm2298_vm12, %v11520_v26 }
 0x224   : > { %10638 = vmatprep.mubr.msk.bf16.mxu0 %vm2298_vm12, %v11521_v54  ;;  %v1630_v54 = vld [vmem:[%s17330_s4 + $0x20] sm:$0xff] }
 0x22b   : > { %10639 = vmatmul.mubr.msk.bf16.gmra.mrb[52].mxu0 %vm2298_vm12, %v11522_v31  ;;  %v1631_v31 = vld [vmem:[%s17330_s4 + $0x28] sm:$0xff] }
 0x22c   : > { %10642 = vmatprep.mubr.msk.bf16.mxu0 %vm2298_vm12, %v11523_v33  ;;  %v11564_v33 = vld [vmem:[%s17329_s3 + $0x1c8] sm:$0xff]  }
 0x233   : > { %10643 = vmatmul.mubr.msk.bf16.gmra.mrb[56].mxu0 %vm2298_vm12, %v11524_v63 }
 0x234   : > { %10646 = vmatprep.mubr.msk.bf16.mxu0 %vm2298_vm12, %v11525_v3  ;;  %v11565_v3 = vld [vmem:[%s17329_s3 + $0x1d0] sm:$0xff]  }
 0x23b   : > { %10647 = vmatmul.mubr.msk.bf16.gmra.mrb[60].mxu0 %vm2298_vm12, %v11526_v5 }
 0x23c   : > { %10650 = vmatprep.mubr.msk.bf16.mxu0 %vm2298_vm12, %v11527_v50 }
 0x243   : > { %10651 = vmatmul.mubr.msk.bf16.gmra.mrb[64].mxu0 %vm2298_vm12, %v11528_v16 }
 0x244   : > { %10654 = vmatprep.mubr.msk.bf16.mxu0 %vm2298_vm12, %v11529_v47 }
 0x24b   : > { %10655 = vmatmul.mubr.msk.bf16.gmra.mrb[68].mxu0 %vm2298_vm12, %v11530_v35 }
 0x24c   : > { %10658 = vmatprep.mubr.msk.bf16.mxu0 %vm2298_vm12, %v11531_v27 }
 0x253   : > { %10659 = vmatmul.mubr.msk.bf16.gmra.mrb[72].mxu0 %vm2298_vm12, %v11532_v29 }
 0x254   : > { %10662 = vmatprep.mubr.msk.bf16.mxu0 %vm2298_vm12, %v11533_v36  ;;  %v1636_v36 = vld [vmem:[%s17330_s4 + $0x50] sm:$0xff] }
 0x25b   : > { %10663 = vmatmul.mubr.msk.bf16.gmra.mrb[76].mxu0 %vm2298_vm12, %v11534_v1 }
 0x25c   : > { %10666 = vmatprep.mubr.msk.bf16.mxu0 %vm2298_vm12, %v11535_v51  ;;  %v1637_v51 = vld [vmem:[%s17330_s4 + $0x58] sm:$0xff] }
 0x263   : > { %10667 = vmatmul.mubr.msk.bf16.gmra.mrb[80].mxu0 %vm2298_vm12, %v11536_v21 }
 0x264   : > { %10670 = vmatprep.mubr.msk.bf16.mxu0 %vm2298_vm12, %v11537_v25  ;;  %v1634_v25 = vld [vmem:[%s17330_s4 + $0x40] sm:$0xff] }
 0x26b   : > { %10671 = vmatmul.mubr.msk.bf16.gmra.mrb[84].mxu0 %vm2298_vm12, %v11538_v9  ;;  %v1635_v9 = vld [vmem:[%s17330_s4 + $0x48] sm:$0xff] }
 0x26c   : > { %10674 = vmatprep.mubr.msk.bf16.mxu0 %vm2298_vm12, %v11539_v10  ;;  %v11566_v10 = vld [vmem:[%s17329_s3 + $0x1d8] sm:$0xff]  }
 0x273   : > { %10675 = vmatmul.mubr.msk.bf16.gmra.mrb[88].mxu0 %vm2298_vm12, %v11540_v46 }
 0x274   : > { %10678 = vmatprep.mubr.msk.bf16.mxu0 %vm2298_vm12, %v11541_v22  ;;  %v11567_v22 = vld [vmem:[%s17329_s3 + $0x1e0] sm:$0xff]  }
 0x27b   : > { %10679 = vmatmul.mubr.msk.bf16.gmra.mrb[92].mxu0 %vm2298_vm12, %v11542_v17 }
 0x27c   : > { %10682 = vmatprep.mubr.msk.bf16.mxu0 %vm2298_vm12, %v11543_v14 }
 0x283   : > { %10683 = vmatmul.mubr.msk.bf16.gmra.mrb[96].mxu0 %vm2298_vm12, %v11544_v13 }
 0x284   : > { %10686 = vmatprep.mubr.msk.bf16.mxu0 %vm2298_vm12, %v11545_v57 }
 0x28b   : > { %10687 = vmatmul.mubr.msk.bf16.gmra.mrb[100].mxu0 %vm2298_vm12, %v11546_v2 }
 0x28c   : > { %10690 = vmatprep.mubr.msk.bf16.mxu0 %vm2298_vm12, %v11547_v8 }
 0x293   : > { %10691 = vmatmul.mubr.msk.bf16.gmra.mrb[104].mxu0 %vm2298_vm12, %v11548_v49 }
 0x294   : > { %10694 = vmatprep.mubr.msk.bf16.mxu0 %vm2298_vm12, %v11549_v34  ;;  %v1640_v34 = vld [vmem:[%s17330_s4 + $0x70] sm:$0xff] }
 0x29b   : > { %10695 = vmatmul.mubr.msk.bf16.gmra.mrb[108].mxu0 %vm2298_vm12, %v11550_v59 }
 0x29c   : > { %10698 = vmatprep.mubr.msk.bf16.mxu0 %vm2298_vm12, %v11551_v60  ;;  %v1641_v60 = vld [vmem:[%s17330_s4 + $0x78] sm:$0xff] }
 0x2a3   : > { %10699 = vmatmul.mubr.msk.bf16.gmra.mrb[112].mxu0 %vm2298_vm12, %v11552_v41 }
 0x2a4   : > { %10702 = vmatprep.mubr.msk.bf16.mxu0 %vm2298_vm12, %v11553_v62  ;;  %v1638_v62 = vld [vmem:[%s17330_s4 + $0x60] sm:$0xff] }
 0x2ab   : > { %10703 = vmatmul.mubr.msk.bf16.gmra.mrb[116].mxu0 %vm2298_vm12, %v11554_v44  ;;  %v1639_v44 = vld [vmem:[%s17330_s4 + $0x68] sm:$0xff] }
 0x2ac   : > { %10706 = vmatprep.mubr.msk.bf16.mxu0 %vm2298_vm12, %v11555_v38  ;;  %v11568_v38 = vld [vmem:[%s17329_s3 + $0x1e8] sm:$0xff]  }
 0x2b3   : > { %10707 = vmatmul.mubr.msk.bf16.gmra.mrb[120].mxu0 %vm2298_vm12, %v11556_v11 }
 0x2b4   : > { %10710 = vmatprep.mubr.msk.bf16.mxu0 %vm2298_vm12, %v11557_v4  ;;  %v11569_v4 = vld [vmem:[%s17329_s3 + $0x1f0] sm:$0xff]  }
 0x2bb   : > { %10711 = vmatmul.mubr.msk.bf16.gmra.mrb[124].mxu0 %vm2298_vm12, %v11558_v43 }
 0x2bc   : > { %10714 = vmatprep.mubr.msk.bf16.mxu0 %vm2298_vm12, %v11559_v18 }
 0x2c3   : > { %10715 = vmatmul.mubr.msk.bf16.gmra.mrb[128].mxu0 %vm2298_vm12, %v11560_v20 }
 0x2c4   : > { %10718 = vmatprep.mubr.msk.bf16.mxu0 %vm2298_vm12, %v11561_v15 }
 0x2c6   : > { %v10612_v61 = vpop.f32.mrb[24].mxu0 }
 0x2c7   : > { %v2625_v12 = vpop.f32.mrb[25].mxu0  ;;  %v2634_v6 = vadd.f32 %v10612_v61, %v1628_v42 }
 0x2c8   : > { %v10613_v23 = vpop.f32.mrb[26].mxu0  ;;  %v2626_v32 = vadd.f32 %v2625_v12, %v1626_v19  ;;  %v1644_v12 = vld [vmem:[%s17330_s4 + $0x90] sm:$0xff] }
 0x2c9   : > { %v2637_v30 = vadd.f32 %v10613_v23, %v1629_v56  ;;  %v2628_v52 = vpop.f32.mrb[27].mxu0  ;;  %v1642_v23 = vld [vmem:[%s17330_s4 + $0x80] sm:$0xff] }
 0x2ca   : > { %v2629_v58 = vadd.f32 %v2628_v52, %v1627_v55  ;;  %v1645_v55 = vld [vmem:[%s17330_s4 + $0x98] sm:$0xff]  ;;  %v11571_v52 = vld [vmem:[%s17329_s3 + $0x200] sm:$0xff]  }
 0x2cb   : > { %10719 = vmatmul.mubr.msk.bf16.gmra.mrb[132].mxu0 %vm2298_vm12, %v11562_v45  ;;  %v3777_v37 = vpack.c.bf16 %v2637_v30, %v2634_v6  ;;  %v11570_v6 = vld [vmem:[%s17329_s3 + $0x1f8] sm:$0xff]  }
 0x2cc   : > { %v3776_v28 = vpack.c.bf16 %v2629_v58, %v2626_v32  ;;  %10722 = vmatprep.mubr.msk.bf16.mxu0 %vm2298_vm12, %v11563_v48  ;;  %v1643_v48 = vld [vmem:[%s17330_s4 + $0x88] sm:$0xff] }
 0x2ce   : > { %v10616_v40 = vpop.f32.mrb[28].mxu0  ;;  %5857 = vmatpush1.bf16.msra.mxu0 %v3776_v28 }
 0x2cf   : > { %v2641_v26 = vpop.f32.mrb[29].mxu0  ;;  %5858 = vmatprep.subr.bf16.mxu0 %v12435_v0  ;;  %v2650_v5 = vadd.f32 %v10616_v40, %v1632_v24 }
 0x2d0   : > { %v10617_v63 = vpop.f32.mrb[30].mxu0  ;;  %v2642_v47 = vadd.f32 %v2641_v26, %v1630_v54  ;;  %v1649_v54 = vld [vmem:[%s17330_s4 + $0xb8] sm:$0xff] }
 0x2d1   : > { %v2653_v50 = vadd.f32 %v10617_v63, %v1633_v39  ;;  %v2644_v16 = vpop.f32.mrb[31].mxu0  ;;  %v1648_v39 = vld [vmem:[%s17330_s4 + $0xb0] sm:$0xff]  ;;  %v1647_v63 = vld [vmem:[%s17330_s4 + $0xa8] sm:$0xff] }
 0x2d2   : > { %v2645_v35 = vadd.f32 %v2644_v16, %v1631_v31  ;;  %5859 = vmatpush1.bf16.msra.mxu0 %v3777_v37 }
 0x2d3   : > { %10723 = vmatmul.mubr.msk.bf16.gmra.mrb[136].mxu0 %vm2298_vm12, %v11564_v33  ;;  %5860 = vmatprep.subr.bf16.mxu0 %v12435_v0  ;;  %v3779_v27 = vpack.c.bf16 %v2653_v50, %v2650_v5  ;;  %v1646_v33 = vld [vmem:[%s17330_s4 + $0xa0] sm:$0xff]  ;;  %v11573_v50 = vld [vmem:[%s17329_s3 + $0x210] sm:$0xff]  }
 0x2d4   : > { %v3778_v29 = vpack.c.bf16 %v2645_v35, %v2642_v47  ;;  %10726 = vmatprep.mubr.msk.bf16.mxu0 %vm2298_vm12, %v11565_v3  ;;  %v11572_v3 = vld [vmem:[%s17329_s3 + $0x208] sm:$0xff]  }
 0x2d6   : > { %v10620_v1 = vpop.f32.mrb[32].mxu0  ;;  %5861 = vmatpush1.bf16.msra.mxu0 %v3778_v29 }
 0x2d7   : > { %v2657_v21 = vpop.f32.mrb[33].mxu0  ;;  %5862 = vmatprep.subr.bf16.mxu0 %v12435_v0  ;;  %v2666_v17 = vadd.f32 %v10620_v1, %v1636_v36 }
 0x2d8   : > { %v10621_v46 = vpop.f32.mrb[34].mxu0  ;;  %v2658_v57 = vadd.f32 %v2657_v21, %v1634_v25  ;;  %v1653_v25 = vld [vmem:[%s17330_s4 + $0xd8] sm:$0xff] }
 0x2d9   : > { %v2669_v14 = vadd.f32 %v10621_v46, %v1637_v51  ;;  %v2660_v13 = vpop.f32.mrb[35].mxu0  ;;  %v1652_v51 = vld [vmem:[%s17330_s4 + $0xd0] sm:$0xff]  ;;  %v1651_v46 = vld [vmem:[%s17330_s4 + $0xc8] sm:$0xff] }
 0x2da   : > { %v2661_v2 = vadd.f32 %v2660_v13, %v1635_v9  ;;  %5863 = vmatpush1.bf16.msra.mxu0 %v3779_v27 }
 0x2db   : > { %v3781_v8 = vpack.c.bf16 %v2669_v14, %v2666_v17  ;;  %10727 = vmatmul.mubr.msk.bf16.gmra.mrb[140].mxu0 %vm2298_vm12, %v11566_v10  ;;  %5864 = vmatprep.subr.bf16.mxu0 %v12435_v0  ;;  %v1650_v10 = vld [vmem:[%s17330_s4 + $0xc0] sm:$0xff] }
 0x2dc   : > { %v3780_v49 = vpack.c.bf16 %v2661_v2, %v2658_v57  ;;  %10730 = vmatprep.mubr.msk.bf16.mxu0 %vm2298_vm12, %v11567_v22  ;;  %v11574_v22 = vld [vmem:[%s17329_s3 + $0x218] sm:$0xff]   ;;  %v11575_v14 = vld [vmem:[%s17329_s3 + $0x220] sm:$0xff]  }
 0x2de   : > { %v10624_v59 = vpop.f32.mrb[36].mxu0  ;;  %5865 = vmatpush1.bf16.msra.mxu0 %v3780_v49 }
 0x2df   : > { %v2673_v41 = vpop.f32.mrb[37].mxu0  ;;  %5866 = vmatprep.subr.bf16.mxu0 %v12435_v0  ;;  %v2682_v43 = vadd.f32 %v10624_v59, %v1640_v34 }
 0x2e0   : > { %v10625_v11 = vpop.f32.mrb[38].mxu0  ;;  %v2674_v15 = vadd.f32 %v2673_v41, %v1638_v62  ;;  %v1657_v62 = vld [vmem:[%s17330_s4 + $0xf8] sm:$0xff] }
 0x2e1   : > { %v2685_v18 = vadd.f32 %v10625_v11, %v1641_v60  ;;  %v2676_v20 = vpop.f32.mrb[39].mxu0  ;;  %v1656_v60 = vld [vmem:[%s17330_s4 + $0xf0] sm:$0xff]  ;;  %v1655_v11 = vld [vmem:[%s17330_s4 + $0xe8] sm:$0xff] }
 0x2e2   : > { %v2677_v42 = vadd.f32 %v2676_v20, %v1639_v44  ;;  %5867 = vmatpush1.bf16.msra.mxu0 %v3781_v8 }
 0x2e3   : > { %v3783_v61 = vpack.c.bf16 %v2685_v18, %v2682_v43  ;;  %10731 = vmatmul.mubr.msk.bf16.gmra.mrb[144].mxu0 %vm2298_vm12, %v11568_v38  ;;  %5868 = vmatprep.subr.bf16.mxu0 %v12435_v0  ;;  %v1654_v38 = vld [vmem:[%s17330_s4 + $0xe0] sm:$0xff]  ;;  %v11577_v18 = vld [vmem:[%s17329_s3 + $0x230] sm:$0xff]  }
 0x2e4   : > { %v3782_v56 = vpack.c.bf16 %v2677_v42, %v2674_v15  ;;  %10734 = vmatprep.mubr.msk.bf16.mxu0 %vm2298_vm12, %v11569_v4  ;;  %v11576_v4 = vld [vmem:[%s17329_s3 + $0x228] sm:$0xff]  }
 0x2e6   : > { %v10628_v19 = vpop.f32.mrb[40].mxu0  ;;  %5869 = vmatpush1.bf16.msra.mxu0 %v3782_v56 }
 0x2e7   : > { %v2689_v45 = vpop.f32.mrb[41].mxu0  ;;  %5870 = vmatprep.subr.bf16.mxu0 %v12435_v0  ;;  %v2698_v32 = vadd.f32 %v10628_v19, %v1644_v12 }
 0x2e8   : > { %v10629_v30 = vpop.f32.mrb[42].mxu0  ;;  %v2690_v7 = vadd.f32 %v2689_v45, %v1642_v23  ;;  %v1661_v23 = vld [vmem:[%s17330_s4 + $0x118] sm:$0xff] }
 0x2e9   : > { %v2701_v58 = vadd.f32 %v10629_v30, %v1645_v55  ;;  %v2692_v37 = vpop.f32.mrb[43].mxu0  ;;  %v1660_v55 = vld [vmem:[%s17330_s4 + $0x110] sm:$0xff]  ;;  %v1659_v30 = vld [vmem:[%s17330_s4 + $0x108] sm:$0xff] }
 0x2ea   : > { %v2693_v28 = vadd.f32 %v2692_v37, %v1643_v48  ;;  %5871 = vmatpush1.bf16.msra.mxu0 %v3783_v61 }
 0x2eb   : > { %v3785_v24 = vpack.c.bf16 %v2701_v58, %v2698_v32  ;;  %10735 = vmatmul.mubr.msk.bf16.gmra.mrb[148].mxu0 %vm2298_vm12, %v11570_v6  ;;  %5872 = vmatprep.subr.bf16.mxu0 %v12435_v0  ;;  %v1658_v6 = vld [vmem:[%s17330_s4 + $0x100] sm:$0xff] }
 0x2ec   : > { %v3784_v40 = vpack.c.bf16 %v2693_v28, %v2690_v7  ;;  %10738 = vmatprep.mubr.msk.bf16.mxu0 %vm2298_vm12, %v11571_v52  ;;  %v11578_v52 = vld [vmem:[%s17329_s3 + $0x238] sm:$0xff]   ;;  %v11579_v58 = vld [vmem:[%s17329_s3 + $0x240] sm:$0xff]  }
 0x2ee   : > { %v10632_v26 = vpop.f32.mrb[44].mxu0  ;;  %5873 = vmatpush1.bf16.msra.mxu0 %v3784_v40 }
 0x2ef   : > { %v2705_v31 = vpop.f32.mrb[45].mxu0  ;;  %5874 = vmatprep.subr.bf16.mxu0 %v12435_v0  ;;  %v2714_v16 = vadd.f32 %v10632_v26, %v1648_v39 }
 0x2f0   : > { %v10633_v5 = vpop.f32.mrb[46].mxu0  ;;  %v2706_v27 = vadd.f32 %v2705_v31, %v1646_v33  ;;  %v1665_v33 = vld [vmem:[%s17330_s4 + $0x138] sm:$0xff] }
 0x2f1   : > { %v2717_v47 = vadd.f32 %v10633_v5, %v1649_v54  ;;  %v2708_v35 = vpop.f32.mrb[47].mxu0  ;;  %v1664_v54 = vld [vmem:[%s17330_s4 + $0x130] sm:$0xff]  ;;  %v1663_v5 = vld [vmem:[%s17330_s4 + $0x128] sm:$0xff] }
 0x2f2   : > { %v2709_v29 = vadd.f32 %v2708_v35, %v1647_v63  ;;  %5875 = vmatpush1.bf16.msra.mxu0 %v3785_v24 }
 0x2f3   : > { %v3787_v36 = vpack.c.bf16 %v2717_v47, %v2714_v16  ;;  %10739 = vmatmul.mubr.msk.bf16.gmra.mrb[152].mxu0 %vm2298_vm12, %v11572_v3  ;;  %5876 = vmatprep.subr.bf16.mxu0 %v12435_v0  ;;  %v1662_v3 = vld [vmem:[%s17330_s4 + $0x120] sm:$0xff]  ;;  %v11581_v47 = vld [vmem:[%s17329_s3 + $0x250] sm:$0xff]  }
 0x2f4   : > { %v3786_v1 = vpack.c.bf16 %v2709_v29, %v2706_v27  ;;  %10742 = vmatprep.mubr.msk.bf16.mxu0 %vm2298_vm12, %v11573_v50  ;;  %v11580_v50 = vld [vmem:[%s17329_s3 + $0x248] sm:$0xff]  }
 0x2f6   : > { %v10636_v21 = vpop.f32.mrb[48].mxu0  ;;  %5877 = vmatpush1.bf16.msra.mxu0 %v3786_v1 }
 0x2f7   : > { %v2721_v9 = vpop.f32.mrb[49].mxu0  ;;  %5878 = vmatprep.subr.bf16.mxu0 %v12435_v0  ;;  %v2730_v13 = vadd.f32 %v10636_v21, %v1652_v51 }
 0x2f8   : > { %v10637_v17 = vpop.f32.mrb[50].mxu0  ;;  %v2722_v8 = vadd.f32 %v2721_v9, %v1650_v10  ;;  %v1669_v10 = vld [vmem:[%s17330_s4 + $0x158] sm:$0xff] }
 0x2f9   : > { %v2733_v57 = vadd.f32 %v10637_v17, %v1653_v25  ;;  %v2724_v2 = vpop.f32.mrb[51].mxu0  ;;  %v1668_v25 = vld [vmem:[%s17330_s4 + $0x150] sm:$0xff]  ;;  %v1667_v17 = vld [vmem:[%s17330_s4 + $0x148] sm:$0xff] }
 0x2fa   : > { %v2725_v49 = vadd.f32 %v2724_v2, %v1651_v46  ;;  %5879 = vmatpush1.bf16.msra.mxu0 %v3787_v36 }
 0x2fb   : > { %v3789_v34 = vpack.c.bf16 %v2733_v57, %v2730_v13  ;;  %10743 = vmatmul.mubr.msk.bf16.gmra.mrb[156].mxu0 %vm2298_vm12, %v11574_v22  ;;  %5880 = vmatprep.subr.bf16.mxu0 %v12435_v0  ;;  %v1666_v22 = vld [vmem:[%s17330_s4 + $0x140] sm:$0xff] }
 0x2fc   : > { %v3788_v59 = vpack.c.bf16 %v2725_v49, %v2722_v8  ;;  %10746 = vmatprep.mubr.msk.bf16.mxu0 %vm2298_vm12, %v11575_v14  ;;  %v11582_v14 = vld [vmem:[%s17329_s3 + $0x258] sm:$0xff]   ;;  %v11583_v57 = vld [vmem:[%s17329_s3 + $0x260] sm:$0xff]  }
 0x2fe   : > { %v10640_v41 = vpop.f32.mrb[52].mxu0  ;;  %5881 = vmatpush1.bf16.msra.mxu0 %v3788_v59 }
 0x2ff   : > { %v2737_v44 = vpop.f32.mrb[53].mxu0  ;;  %5882 = vmatprep.subr.bf16.mxu0 %v12435_v0  ;;  %v2746_v20 = vadd.f32 %v10640_v41, %v1656_v60 }
 0x300   : > { %v10641_v43 = vpop.f32.mrb[54].mxu0  ;;  %v2738_v61 = vadd.f32 %v2737_v44, %v1654_v38  ;;  %v1673_v38 = vld [vmem:[%s17330_s4 + $0x178] sm:$0xff] }
 0x301   : > { %v2749_v15 = vadd.f32 %v10641_v43, %v1657_v62  ;;  %v2740_v42 = vpop.f32.mrb[55].mxu0  ;;  %v1672_v62 = vld [vmem:[%s17330_s4 + $0x170] sm:$0xff]  ;;  %v1671_v43 = vld [vmem:[%s17330_s4 + $0x168] sm:$0xff] }
 0x302   : > { %v2741_v56 = vadd.f32 %v2740_v42, %v1655_v11  ;;  %5883 = vmatpush1.bf16.msra.mxu0 %v3789_v34 }
 0x303   : > { %v3791_v12 = vpack.c.bf16 %v2749_v15, %v2746_v20  ;;  %10747 = vmatmul.mubr.msk.bf16.gmra.mrb[160].mxu0 %vm2298_vm12, %v11576_v4  ;;  %5884 = vmatprep.subr.bf16.mxu0 %v12435_v0  ;;  %v1670_v4 = vld [vmem:[%s17330_s4 + $0x160] sm:$0xff]  ;;  %v11585_v15 = vld [vmem:[%s17329_s3 + $0x270] sm:$0xff]  }
 0x304   : > { %v3790_v19 = vpack.c.bf16 %v2741_v56, %v2738_v61  ;;  %10750 = vmatprep.mubr.msk.bf16.mxu0 %vm2298_vm12, %v11577_v18  ;;  %v11584_v18 = vld [vmem:[%s17329_s3 + $0x268] sm:$0xff]  }
 0x306   : > { %v10644_v45 = vpop.f32.mrb[56].mxu0  ;;  %5885 = vmatpush1.bf16.msra.mxu0 %v3790_v19 }
 0x307   : > { %v2753_v48 = vpop.f32.mrb[57].mxu0  ;;  %5886 = vmatprep.subr.bf16.mxu0 %v12435_v0  ;;  %v2762_v37 = vadd.f32 %v10644_v45, %v1660_v55 }
 0x308   : > { %v10645_v32 = vpop.f32.mrb[58].mxu0  ;;  %v2754_v24 = vadd.f32 %v2753_v48, %v1658_v6  ;;  %v1677_v6 = vld [vmem:[%s17330_s4 + $0x198] sm:$0xff] }
 0x309   : > { %v2765_v7 = vadd.f32 %v10645_v32, %v1661_v23  ;;  %v2756_v28 = vpop.f32.mrb[59].mxu0  ;;  %v1676_v23 = vld [vmem:[%s17330_s4 + $0x190] sm:$0xff]  ;;  %v1675_v32 = vld [vmem:[%s17330_s4 + $0x188] sm:$0xff] }
 0x30a   : > { %v2757_v40 = vadd.f32 %v2756_v28, %v1659_v30  ;;  %5887 = vmatpush1.bf16.msra.mxu0 %v3791_v12 }
 0x30b   : > { %v13464_v39 = vpack.c.bf16 %v2765_v7, %v2762_v37  ;;  %10751 = vmatmul.mubr.msk.bf16.gmra.mrb[164].mxu0 %vm2298_vm12, %v11578_v52  ;;  %6145 = vmatprep.subr.bf16.mxu0 %v12435_v0  ;;  %v1674_v52 = vld [vmem:[%s17330_s4 + $0x180] sm:$0xff] }
 0x30c   : > { %v13468_v26 = vpack.c.bf16 %v2757_v40, %v2754_v24  ;;  %10754 = vmatprep.mubr.msk.bf16.mxu0 %vm2298_vm12, %v11579_v58  ;;  %v11586_v58 = vld [vmem:[%s17329_s3 + $0x278] sm:$0xff]   ;;  %v11587_v7 = vld [vmem:[%s17329_s3 + $0x280] sm:$0xff]  }
 0x30e   : > { %v10648_v31 = vpop.f32.mrb[60].mxu0  ;;  %10818 = vmatpush1.bf16.msra.mxu1 %v13468_v26 }
 0x30f   : > { %v2769_v63 = vpop.f32.mrb[61].mxu0  ;;  %10803 = vmatprep.subr.bf16.mxu1 %v12435_v0  ;;  %v2778_v35 = vadd.f32 %v10648_v31, %v1664_v54 }
 0x310   : > { %v10649_v16 = vpop.f32.mrb[62].mxu0  ;;  %v2770_v36 = vadd.f32 %v2769_v63, %v1662_v3  ;;  %v1680_v3 = vld [vmem:[%s17330_s4 + $0x1b0] sm:$0xff] }
 0x311   : > { %v2781_v27 = vadd.f32 %v10649_v16, %v1665_v33  ;;  %v2772_v29 = vpop.f32.mrb[63].mxu0 }
 0x312   : > { %v2773_v1 = vadd.f32 %v2772_v29, %v1663_v5  ;;  %10819 = vmatpush1.bf16.msra.mxu1 %v13464_v39 }
 0x313   : > { %v13492_v51 = vpack.c.bf16 %v2781_v27, %v2778_v35  ;;  %10755 = vmatmul.mubr.msk.bf16.gmra.mrb[168].mxu0 %vm2298_vm12, %v11580_v50  ;;  %10804 = vmatprep.subr.bf16.mxu1 %v12435_v0  ;;  %v1681_v50 = vld [vmem:[%s17330_s4 + $0x1b8] sm:$0xff]  ;;  %v1679_v35 = vld [vmem:[%s17330_s4 + $0x1a8] sm:$0xff] }
 0x314   : > { %v13496_v21 = vpack.c.bf16 %v2773_v1, %v2770_v36  ;;  %10758 = vmatprep.mubr.msk.bf16.mxu0 %vm2298_vm12, %v11581_v47  ;;  %v1678_v47 = vld [vmem:[%s17330_s4 + $0x1a0] sm:$0xff]  ;;  %v11588_v27 = vld [vmem:[%s17329_s3 + $0x288] sm:$0xff]   ;;  %v11589_v36 = vld [vmem:[%s17329_s3 + $0x290] sm:$0xff]  }
 0x316   : > { %v10652_v9 = vpop.f32.mrb[64].mxu0  ;;  %10820 = vmatpush1.bf16.msra.mxu1 %v13496_v21 }
 0x317   : > { %v2785_v46 = vpop.f32.mrb[65].mxu0  ;;  %10805 = vmatprep.subr.bf16.mxu1 %v12435_v0  ;;  %v2794_v2 = vadd.f32 %v10652_v9, %v1668_v25 }
 0x318   : > { %v10653_v13 = vpop.f32.mrb[66].mxu0  ;;  %v2786_v34 = vadd.f32 %v2785_v46, %v1666_v22 }
 0x319   : > { %v2797_v8 = vadd.f32 %v10653_v13, %v1669_v10  ;;  %v2788_v49 = vpop.f32.mrb[67].mxu0 }
 0x31a   : > { %v2789_v59 = vadd.f32 %v2788_v49, %v1667_v17  ;;  %10821 = vmatpush1.bf16.msra.mxu1 %v13492_v51  ;;  %v1683_v49 = vld [vmem:[%s17330_s4 + $0x1c8] sm:$0xff] }
 0x31b   : > { %v13520_v60 = vpack.c.bf16 %v2797_v8, %v2794_v2  ;;  %10759 = vmatmul.mubr.msk.bf16.gmra.mrb[172].mxu0 %vm2298_vm12, %v11582_v14  ;;  %10806 = vmatprep.subr.bf16.mxu1 %v12435_v0  ;;  %v1684_v14 = vld [vmem:[%s17330_s4 + $0x1d0] sm:$0xff]  ;;  %v1682_v8 = vld [vmem:[%s17330_s4 + $0x1c0] sm:$0xff] }
 0x31c   : > { %v13524_v41 = vpack.c.bf16 %v2789_v59, %v2786_v34  ;;  %10762 = vmatprep.mubr.msk.bf16.mxu0 %vm2298_vm12, %v11583_v57  ;;  %v1685_v57 = vld [vmem:[%s17330_s4 + $0x1d8] sm:$0xff] }
 0x31d   : > { %v11590_v34 = vld [vmem:[%s17329_s3 + $0x298] sm:$0xff]  }
 0x31e   : > { %v10656_v44 = vpop.f32.mrb[68].mxu0  ;;  %10822 = vmatpush1.bf16.msra.mxu1 %v13524_v41 }
 0x31f   : > { %v2801_v11 = vpop.f32.mrb[69].mxu0  ;;  %10807 = vmatprep.subr.bf16.mxu1 %v12435_v0  ;;  %v2810_v42 = vadd.f32 %v10656_v44, %v1672_v62  ;;  %v11591_v62 = vld [vmem:[%s17329_s3 + $0x2a0] sm:$0xff]  }
 0x320   : > { %v10657_v20 = vpop.f32.mrb[70].mxu0  ;;  %v2802_v12 = vadd.f32 %v2801_v11, %v1670_v4 }
 0x321   : > { %v2813_v61 = vadd.f32 %v10657_v20, %v1673_v38  ;;  %v2804_v56 = vpop.f32.mrb[71].mxu0 }
 0x322   : > { %v2805_v19 = vadd.f32 %v2804_v56, %v1671_v43  ;;  %10823 = vmatpush1.bf16.msra.mxu1 %v13520_v60 }
 0x323   : > { %v13548_v55 = vpack.c.bf16 %v2813_v61, %v2810_v42  ;;  %10763 = vmatmul.mubr.msk.bf16.gmra.mrb[176].mxu0 %vm2298_vm12, %v11584_v18  ;;  %10808 = vmatprep.subr.bf16.mxu1 %v12435_v0  ;;  %v1689_v61 = vld [vmem:[%s17330_s4 + $0x1f8] sm:$0xff] }
 0x324   : > { %v13552_v45 = vpack.c.bf16 %v2805_v19, %v2802_v12  ;;  %10766 = vmatprep.mubr.msk.bf16.mxu0 %vm2298_vm12, %v11585_v15  ;;  %v1688_v15 = vld [vmem:[%s17330_s4 + $0x1f0] sm:$0xff]  ;;  %v1686_v12 = vld [vmem:[%s17330_s4 + $0x1e0] sm:$0xff]  ;;  %v1687_v19 = vld [vmem:[%s17330_s4 + $0x1e8] sm:$0xff] }
 0x326   : > { %v10660_v48 = vpop.f32.mrb[72].mxu0  ;;  %10824 = vmatpush1.bf16.msra.mxu1 %v13552_v45 }
 0x327   : > { %v2817_v30 = vpop.f32.mrb[73].mxu0  ;;  %10809 = vmatprep.subr.bf16.mxu1 %v12435_v0  ;;  %v2826_v28 = vadd.f32 %v10660_v48, %v1676_v23  ;;  %v11592_v23 = vld [vmem:[%s17329_s3 + $0x2a8] sm:$0xff]  }
 0x328   : > { %v10661_v37 = vpop.f32.mrb[74].mxu0  ;;  %v2818_v54 = vadd.f32 %v2817_v30, %v1674_v52 }
 0x329   : > { %v2829_v24 = vadd.f32 %v10661_v37, %v1677_v6  ;;  %v2820_v40 = vpop.f32.mrb[75].mxu0  ;;  %v11593_v6 = vld [vmem:[%s17329_s3 + $0x2b0] sm:$0xff]  }
 0x32a   : > { %v2821_v31 = vadd.f32 %v2820_v40, %v1675_v32  ;;  %10825 = vmatpush1.bf16.msra.mxu1 %v13548_v55  ;;  %v1690_v40 = vld [vmem:[%s17330_s4 + $0x200] sm:$0xff] }
 0x32b   : > { %v13576_v33 = vpack.c.bf16 %v2829_v24, %v2826_v28  ;;  %10767 = vmatmul.mubr.msk.bf16.gmra.mrb[180].mxu0 %vm2298_vm12, %v11586_v58  ;;  %10810 = vmatprep.subr.bf16.mxu1 %v12435_v0  ;;  %v1692_v24 = vld [vmem:[%s17330_s4 + $0x210] sm:$0xff] }
 0x32c   : > { %v13580_v63 = vpack.c.bf16 %v2821_v31, %v2818_v54  ;;  %10770 = vmatprep.mubr.msk.bf16.mxu0 %vm2298_vm12, %v11587_v7  ;;  %v1693_v31 = vld [vmem:[%s17330_s4 + $0x218] sm:$0xff] }
 0x32e   : > { %v10664_v5 = vpop.f32.mrb[76].mxu0  ;;  %10826 = vmatpush1.bf16.msra.mxu1 %v13580_v63 }
 0x32f   : > { %v2833_v16 = vpop.f32.mrb[77].mxu0  ;;  %10811 = vmatprep.subr.bf16.mxu1 %v12435_v0  ;;  %v2842_v1 = vadd.f32 %v10664_v5, %v1680_v3  ;;  %v11594_v3 = vld [vmem:[%s17329_s3 + $0x2b8] sm:$0xff]  }
 0x330   : > { %v10665_v29 = vpop.f32.mrb[78].mxu0  ;;  %v2834_v10 = vadd.f32 %v2833_v16, %v1678_v47  ;;  %v1691_v16 = vld [vmem:[%s17330_s4 + $0x208] sm:$0xff]  ;;  %v11598_v47 = vld [vmem:[%s17329_s3 + $0x2c0] sm:$0xff]  }
 0x331   : > { %v2845_v25 = vadd.f32 %v10665_v29, %v1681_v50  ;;  %v2836_v9 = vpop.f32.mrb[79].mxu0  ;;  %v11595_v29 = vld [vmem:[%s17331_s5 + $0x6c8] ss:$48 sps:$4 sm:$0xff]  }
 0x332   : > { %v2837_v46 = vadd.f32 %v2836_v9, %v1679_v35  ;;  %10827 = vmatpush1.bf16.msra.mxu1 %v13576_v33 }
 0x333   : > { %v13604_v22 = vpack.c.bf16 %v2845_v25, %v2842_v1  ;;  %10771 = vmatmul.mubr.msk.bf16.gmra.mrb[184].mxu0 %vm2298_vm12, %v11588_v27  ;;  %10812 = vmatprep.subr.bf16.mxu1 %v12435_v0  ;;  %v11600_v25 = vld [vmem:[%s17331_s5 + $0x72c] ss:$48 sps:$4 sm:$0xff]  }
 0x334   : > { %v13608_v17 = vpack.c.bf16 %v2837_v46, %v2834_v10  ;;  %10774 = vmatprep.mubr.msk.bf16.mxu0 %vm2298_vm12, %v11589_v36 }
 0x336   : > { %v10668_v13 = vpop.f32.mrb[80].mxu0  ;;  %10828 = vmatpush1.bf16.msra.mxu1 %v13608_v17 }
 0x337   : > { %v2849_v2 = vpop.f32.mrb[81].mxu0  ;;  %10813 = vmatprep.subr.bf16.mxu1 %v12435_v0  ;;  %v2858_v44 = vadd.f32 %v10668_v13, %v1684_v14  ;;  %v1696_v14 = vld [vmem:[%s17330_s4 + $0x230] sm:$0xff]  ;;  %v1694_v13 = vld [vmem:[%s17330_s4 + $0x220] sm:$0xff] }
 0x338   : > { %v10669_v59 = vpop.f32.mrb[82].mxu0  ;;  %v2850_v4 = vadd.f32 %v2849_v2, %v1682_v8  ;;  %v1697_v2 = vld [vmem:[%s17330_s4 + $0x238] sm:$0xff]  ;;  %v11599_v8 = vld [vmem:[%s17329_s3 + $0x2c8] sm:$0xff]  }
 0x339   : > { %v2861_v38 = vadd.f32 %v10669_v59, %v1685_v57  ;;  %v2852_v11 = vpop.f32.mrb[83].mxu0  ;;  %v1695_v59 = vld [vmem:[%s17330_s4 + $0x228] sm:$0xff] }
 0x33a   : > { %v2853_v43 = vadd.f32 %v2852_v11, %v1683_v49  ;;  %10829 = vmatpush1.bf16.msra.mxu1 %v13604_v22  ;;  %v11602_v11 = vld [vmem:[%s17331_s5 + $0x728] ss:$48 sps:$4 sm:$0xff]  }
 0x33b   : > { %v13632_v18 = vpack.c.bf16 %v2861_v38, %v2858_v44  ;;  %10775 = vmatmul.mubr.msk.bf16.gmra.mrb[188].mxu0 %vm2298_vm12, %v11590_v34  ;;  %10814 = vmatprep.subr.bf16.mxu1 %v12435_v0 }
 0x33c   : > { %v13636_v20 = vpack.c.bf16 %v2853_v43, %v2850_v4  ;;  %10778 = vmatprep.mubr.msk.bf16.mxu0 %vm2298_vm12, %v11591_v62  ;;  %v11603_v62 = vld [vmem:[%s17329_s3 + $0x2d0] sm:$0xff]  }
 0x33e   : > { %v10672_v42 = vpop.f32.mrb[84].mxu0  ;;  %10830 = vmatpush1.bf16.msra.mxu1 %v13636_v20 }
 0x33f   : > { %v2865_v56 = vpop.f32.mrb[85].mxu0  ;;  %10815 = vmatprep.subr.bf16.mxu1 %v12435_v0  ;;  %v2874_v30 = vadd.f32 %v10672_v42, %v1688_v15  ;;  %v11605_v15 = vld [vmem:[%s17331_s5 + $0x78c] ss:$48 sps:$4 sm:$0xff]  }
 0x340   : > { %v10673_v48 = vpop.f32.mrb[86].mxu0  ;;  %v2866_v58 = vadd.f32 %v2865_v56, %v1686_v12  ;;  %v1700_v12 = vld [vmem:[%s17330_s4 + $0x250] sm:$0xff] }
 0x341   : > { %v2877_v52 = vadd.f32 %v10673_v48, %v1689_v61  ;;  %v2868_v32 = vpop.f32.mrb[87].mxu0  ;;  %v1701_v48 = vld [vmem:[%s17330_s4 + $0x258] sm:$0xff] }
 0x342   : > { %v2869_v37 = vadd.f32 %v2868_v32, %v1687_v19  ;;  %10831 = vmatpush1.bf16.msra.mxu1 %v13632_v18  ;;  %v1698_v19 = vld [vmem:[%s17330_s4 + $0x240] sm:$0xff]  ;;  %v1699_v32 = vld [vmem:[%s17330_s4 + $0x248] sm:$0xff] }
 0x343   : > { %v13660_v7 = vpack.c.bf16 %v2877_v52, %v2874_v30  ;;  %10779 = vmatmul.mubr.msk.bf16.gmra.mrb[192].mxu0 %vm2298_vm12, %v11592_v23  ;;  %10816 = vmatprep.subr.bf16.mxu1 %v12435_v0 }
 0x344   : > { %v13664_v28 = vpack.c.bf16 %v2869_v37, %v2866_v58  ;;  %10782 = vmatprep.mubr.msk.bf16.mxu0 %vm2298_vm12, %v11593_v6  ;;  %v11604_v6 = vld [vmem:[%s17329_s3 + $0x2d8] sm:$0xff]   ;;  %v11608_v58 = vld [vmem:[%s17329_s3 + $0x2e0] sm:$0xff]  }
 0x346   : > { %10832 = vmatpush1.bf16.msra.mxu1 %v13664_v28  ;;  %v10676_v54 = vpop.f32.mrb[88].mxu0 }
 0x347   : > { %10817 = vmatprep.subr.bf16.mxu1 %v12435_v0  ;;  %v2890_v5 = vadd.f32 %v10676_v54, %v1692_v24  ;;  %v2881_v50 = vpop.f32.mrb[89].mxu0 }
 0x348   : > { %v2882_v35 = vadd.f32 %v2881_v50, %v1690_v40  ;;  %v10677_v27 = vpop.f32.mrb[90].mxu0  ;;  %v11607_v40 = vld [vmem:[%s17331_s5 + $0x788] ss:$48 sps:$4 sm:$0xff]  }
 0x349   : > { %v2893_v36 = vadd.f32 %v10677_v27, %v1693_v31  ;;  %v2884_v1 = vpop.f32.mrb[91].mxu0 }
 0x34a   : > { %10833 = vmatpush1.bf16.msra.mxu1 %v13660_v7  ;;  %v2885_v9 = vadd.f32 %v2884_v1, %v1691_v16 }
 0x34b   : > { %10783 = vmatmul.mubr.msk.bf16.gmra.mrb[196].mxu0 %vm2298_vm12, %v11594_v3  ;;  %v3809_v10 = vpack.c.bf16 %v2893_v36, %v2890_v5  ;;  %6434 = vmatprep.subr.bf16.mxu1 %v12435_v0  ;;  %v11610_v3 = vld [vmem:[%s17331_s5 + $0x7ec] ss:$48 sps:$4 sm:$0xff]  }
 0x34c   : > { %10786 = vmatprep.mubr.msk.bf16.mxu0 %vm2298_vm12, %v11598_v47  ;;  %v3808_v46 = vpack.c.bf16 %v2885_v9, %v2882_v35  ;;  %v1704_v47 = vld [vmem:[%s17330_s4 + $0x270] sm:$0xff]  ;;  %v1702_v35 = vld [vmem:[%s17330_s4 + $0x260] sm:$0xff]  ;;  %v11609_v36 = vld [vmem:[%s17329_s3 + $0x2e8] sm:$0xff]  }
 0x34d   : > { %6322 = vmatmul.mubr.bf16.vlgmr.msra.gmra.mrb[24].mxu1 %v11595_v29  ;;  %v1705_v29 = vld [vmem:[%s17330_s4 + $0x278] sm:$0xff]  ;;  %v1703_v9 = vld [vmem:[%s17330_s4 + $0x268] sm:$0xff] }
 0x34e   : > { %6329 = vmatprep.mubr.bf16.mxu1 %v11600_v25  ;;  %v10680_v57 = vpop.f32.mrb[92].mxu0  ;;  %6435 = vmatpush1.bf16.msra.mxu1 %v3808_v46 }
 0x34f   : > { %v2906_v49 = vadd.f32 %v10680_v57, %v1696_v14  ;;  %v2897_v34 = vpop.f32.mrb[93].mxu0  ;;  %6436 = vmatprep.subr.bf16.mxu1 %v12435_v0 }
 0x350   : > { %v2898_v44 = vadd.f32 %v2897_v34, %v1694_v13  ;;  %v10681_v38 = vpop.f32.mrb[94].mxu0  ;;  %v11612_v13 = vld [vmem:[%s17331_s5 + $0x7e8] ss:$48 sps:$4 sm:$0xff]  }
 0x351   : > { %v2909_v4 = vadd.f32 %v10681_v38, %v1697_v2  ;;  %v2900_v43 = vpop.f32.mrb[95].mxu0 }
 0x352   : > { %v2901_v42 = vadd.f32 %v2900_v43, %v1695_v59  ;;  %6437 = vmatpush1.bf16.msra.mxu1 %v3809_v10  ;;  %v11613_v10 = vld [vmem:[%s17329_s3 + $0x2f0] sm:$0xff]  }
 0x353   : > { %10787 = vmatmul.mubr.msk.bf16.gmra.mrb[200].mxu0 %vm2298_vm12, %v11599_v8  ;;  %v3811_v61 = vpack.c.bf16 %v2909_v4, %v2906_v49  ;;  %6438 = vmatprep.subr.bf16.mxu1 %v12435_v0  ;;  %v11615_v8 = vld [vmem:[%s17331_s5 + $0x84c] ss:$48 sps:$4 sm:$0xff]  }
 0x354   : > { %10790 = vmatprep.mubr.msk.bf16.mxu0 %vm2298_vm12, %v11603_v62  ;;  %v3810_v56 = vpack.c.bf16 %v2901_v42, %v2898_v44  ;;  %v1708_v62 = vld [vmem:[%s17330_s4 + $0x290] sm:$0xff]  ;;  %v1706_v44 = vld [vmem:[%s17330_s4 + $0x280] sm:$0xff]  ;;  %v11614_v4 = vld [vmem:[%s17329_s3 + $0x2f8] sm:$0xff]  }
 0x355   : > { %6330 = vmatmul.mubr.bf16.gmra.mrb[28].mxu1 %v11602_v11  ;;  %v1709_v11 = vld [vmem:[%s17330_s4 + $0x298] sm:$0xff]  ;;  %v1707_v42 = vld [vmem:[%s17330_s4 + $0x288] sm:$0xff] }
 0x356   : > { %6337 = vmatprep.mubr.bf16.mxu1 %v11605_v15  ;;  %v10684_v23 = vpop.f32.mrb[96].mxu0  ;;  %6439 = vmatpush1.bf16.msra.mxu1 %v3810_v56 }
 0x357   : > { %v2922_v30 = vadd.f32 %v10684_v23, %v1700_v12  ;;  %v2913_v52 = vpop.f32.mrb[97].mxu0  ;;  %6440 = vmatprep.subr.bf16.mxu1 %v12435_v0 }
 0x358   : > { %v2914_v37 = vadd.f32 %v2913_v52, %v1698_v19  ;;  %v10685_v24 = vpop.f32.mrb[98].mxu0  ;;  %v11617_v19 = vld [vmem:[%s17331_s5 + $0x848] ss:$48 sps:$4 sm:$0xff]  }
 0x359   : > { %v2925_v54 = vadd.f32 %v10685_v24, %v1701_v48  ;;  %v2916_v31 = vpop.f32.mrb[99].mxu0 }
 0x35a   : > { %v2917_v5 = vadd.f32 %v2916_v31, %v1699_v32  ;;  %6441 = vmatpush1.bf16.msra.mxu1 %v3811_v61  ;;  %v11620_v61 = vld [vmem:[%s17331_s5 + $0x4] ss:$48 sps:$4 sm:$0xff]  }
 0x35b   : > { %10791 = vmatmul.mubr.msk.bf16.gmra.mrb[204].mxu0 %vm2298_vm12, %v11604_v6  ;;  %v3813_v50 = vpack.c.bf16 %v2925_v54, %v2922_v30  ;;  %6442 = vmatprep.subr.bf16.mxu1 %v12435_v0  ;;  %v11621_v6 = vld [vmem:[%s17331_s5 + $0x8ac] ss:$48 sps:$4 sm:$0xff]   ;;  %v11618_v54 = vld [vmem:[%s17331_s5] ss:$48 sps:$4 sm:$0xff]  }
 0x35c   : > { %10794 = vmatprep.mubr.msk.bf16.mxu0 %vm2298_vm12, %v11608_v58  ;;  %v3812_v16 = vpack.c.bf16 %v2917_v5, %v2914_v37  ;;  %v1712_v58 = vld [vmem:[%s17330_s4 + $0x2b0] sm:$0xff]  ;;  %v1710_v37 = vld [vmem:[%s17330_s4 + $0x2a0] sm:$0xff]  ;;  %v1711_v5 = vld [vmem:[%s17330_s4 + $0x2a8] sm:$0xff] }
 0x35d   : > { %6338 = vmatmul.mubr.bf16.gmra.mrb[32].mxu1 %v11607_v40  ;;  %v1713_v40 = vld [vmem:[%s17330_s4 + $0x2b8] sm:$0xff] }
 0x35e   : > { %6345 = vmatprep.mubr.bf16.mxu1 %v11610_v3  ;;  %v10688_v27 = vpop.f32.mrb[100].mxu0  ;;  %6443 = vmatpush1.bf16.msra.mxu1 %v3812_v16 }
 0x35f   : > { %v2938_v1 = vadd.f32 %v10688_v27, %v1704_v47  ;;  %v2929_v25 = vpop.f32.mrb[101].mxu0  ;;  %6444 = vmatprep.subr.bf16.mxu1 %v12435_v0  ;;  %v11623_v47 = vld [vmem:[%s17331_s5 + $0x8a8] ss:$48 sps:$4 sm:$0xff]  }
 0x360   : > { %v2930_v46 = vadd.f32 %v2929_v25, %v1702_v35  ;;  %v10689_v14 = vpop.f32.mrb[102].mxu0 }
 0x361   : > { %v2941_v57 = vadd.f32 %v10689_v14, %v1705_v29  ;;  %v2932_v2 = vpop.f32.mrb[103].mxu0  ;;  %v11624_v29 = vld [vmem:[%s17331_s5 + $0x90c] ss:$48 sps:$4 sm:$0xff]  }
 0x362   : > { %v2933_v49 = vadd.f32 %v2932_v2, %v1703_v9  ;;  %6445 = vmatpush1.bf16.msra.mxu1 %v3813_v50  ;;  %v1716_v9 = vld [vmem:[%s17330_s4 + $0x2d0] sm:$0xff]  ;;  %v1717_v14 = vld [vmem:[%s17330_s4 + $0x2d8] sm:$0xff] }
 0x363   : > { %10795 = vmatmul.mubr.msk.bf16.gmra.mrb[208].mxu0 %vm2298_vm12, %v11609_v36  ;;  %v3815_v34 = vpack.c.bf16 %v2941_v57, %v2938_v1  ;;  %6446 = vmatprep.subr.bf16.mxu1 %v12435_v0  ;;  %v1715_v57 = vld [vmem:[%s17330_s4 + $0x2c8] sm:$0xff] }
 0x364   : > { %10798 = vmatprep.mubr.msk.bf16.mxu0 %vm2298_vm12, %v11613_v10  ;;  %v3814_v59 = vpack.c.bf16 %v2933_v49, %v2930_v46  ;;  %v1714_v10 = vld [vmem:[%s17330_s4 + $0x2c0] sm:$0xff]  ;;  %v11626_v49 = vld [vmem:[%s17331_s5 + $0x908] ss:$48 sps:$4 sm:$0xff]  }
 0x365   : > { %6346 = vmatmul.mubr.bf16.gmra.mrb[36].mxu1 %v11612_v13 }
 0x366   : > { %6353 = vmatprep.mubr.bf16.mxu1 %v11615_v8  ;;  %v10692_v38 = vpop.f32.mrb[104].mxu0  ;;  %6447 = vmatpush1.bf16.msra.mxu1 %v3814_v59 }
 0x367   : > { %v2954_v43 = vadd.f32 %v10692_v38, %v1708_v62  ;;  %v2945_v15 = vpop.f32.mrb[105].mxu0  ;;  %6448 = vmatprep.subr.bf16.mxu1 %v12435_v0  ;;  %v11627_v62 = vld [vmem:[%s17331_s5 + $0x96c] ss:$48 sps:$4 sm:$0xff]  }
 0x368   : > { %v2946_v56 = vadd.f32 %v2945_v15, %v1706_v44  ;;  %v10693_v12 = vpop.f32.mrb[106].mxu0  ;;  %v1721_v15 = vld [vmem:[%s17330_s4 + $0x2f8] sm:$0xff] }
 0x369   : > { %v2957_v23 = vadd.f32 %v10693_v12, %v1709_v11  ;;  %v2948_v48 = vpop.f32.mrb[107].mxu0  ;;  %v1720_v11 = vld [vmem:[%s17330_s4 + $0x2f0] sm:$0xff] }
 0x36a   : > { %v2949_v30 = vadd.f32 %v2948_v48, %v1707_v42  ;;  %6449 = vmatpush1.bf16.msra.mxu1 %v3815_v34 }
 0x36b   : > { %10799 = vmatmul.mubr.msk.bf16.gmra.mrb[212].mxu0 %vm2298_vm12, %v11614_v4  ;;  %v3817_v52 = vpack.c.bf16 %v2957_v23, %v2954_v43  ;;  %6450 = vmatprep.subr.bf16.mxu1 %v12435_v0  ;;  %v1718_v4 = vld [vmem:[%s17330_s4 + $0x2e0] sm:$0xff] }
 0x36c   : > { %5888 = vmatprep.mubr.bf16.mxu0 %v11620_v61  ;;  %v3816_v32 = vpack.c.bf16 %v2949_v30, %v2946_v56  ;;  %v1719_v61 = vld [vmem:[%s17330_s4 + $0x2e8] sm:$0xff] }
 0x36d   : > { %6354 = vmatmul.mubr.bf16.gmra.mrb[40].mxu1 %v11617_v19  ;;  %v11629_v19 = vld [vmem:[%s17331_s5 + $0x968] ss:$48 sps:$4 sm:$0xff]  }
 0x36e   : > { %6361 = vmatprep.mubr.bf16.mxu1 %v11621_v6  ;;  %v10696_v24 = vpop.f32.mrb[108].mxu0  ;;  %6451 = vmatpush1.bf16.msra.mxu1 %v3816_v32  ;;  %v11630_v6 = vld [vmem:[%s17331_s5 + $0x9cc] ss:$48 sps:$4 sm:$0xff]   ;;  %v1724_v32 = vld [vmem:[%s17330_s4 + $0x310] sm:$0xff] }
 0x36f   : > { %v2970_v31 = vadd.f32 %v10696_v24, %v1712_v58  ;;  %v2961_v3 = vpop.f32.mrb[109].mxu0  ;;  %6452 = vmatprep.subr.bf16.mxu1 %v12435_v0  ;;  %v1722_v58 = vld [vmem:[%s17330_s4 + $0x300] sm:$0xff]  ;;  %v1725_v24 = vld [vmem:[%s17330_s4 + $0x318] sm:$0xff] }
 0x370   : > { %v2962_v50 = vadd.f32 %v2961_v3, %v1710_v37  ;;  %v10697_v16 = vpop.f32.mrb[110].mxu0 }
 0x371   : > { %v2973_v35 = vadd.f32 %v10697_v16, %v1713_v40  ;;  %v2964_v27 = vpop.f32.mrb[111].mxu0 }
 0x372   : > { %v2965_v36 = vadd.f32 %v2964_v27, %v1711_v5  ;;  %6453 = vmatpush1.bf16.msra.mxu1 %v3817_v52  ;;  %v11632_v5 = vld [vmem:[%s17331_s5 + $0x9c8] ss:$48 sps:$4 sm:$0xff]  }
 0x373   : > { %5889 = vmatmul.mubr.bf16.vlgmr.msra.gmra.mrb[216].mxu0 %v11618_v54  ;;  %v3819_v1 = vpack.c.bf16 %v2973_v35, %v2970_v31  ;;  %6454 = vmatprep.subr.bf16.mxu1 %v12435_v0  ;;  %v1723_v54 = vld [vmem:[%s17330_s4 + $0x308] sm:$0xff] }
 0x374   : > { %6146 = vmatpush1.bf16.msra.mxu0 %v13468_v26  ;;  %v3818_v25 = vpack.c.bf16 %v2965_v36, %v2962_v50  ;;  %v11636_v36 = vld [vmem:[%s17331_s5 + $0xa8c] ss:$48 sps:$4 sm:$0xff]  }
 0x375   : > { %6362 = vmatmul.mubr.bf16.gmra.mrb[44].mxu1 %v11623_v47  ;;  %6147 = vmatprep.subr.bf16.mxu0 %v12435_v0  ;;  %v11633_v47 = vld [vmem:[%s17331_s5 + $0xa2c] ss:$48 sps:$4 sm:$0xff]  }
 0x376   : > { %6369 = vmatprep.mubr.bf16.mxu1 %v11624_v29  ;;  %v10700_v46 = vpop.f32.mrb[112].mxu0  ;;  %6455 = vmatpush1.bf16.msra.mxu1 %v3818_v25  ;;  %v11635_v29 = vld [vmem:[%s17331_s5 + $0xa28] ss:$48 sps:$4 sm:$0xff]  }
 0x377   : > { %v2986_v26 = vadd.f32 %v10700_v46, %v1716_v9  ;;  %v2977_v13 = vpop.f32.mrb[113].mxu0  ;;  %6456 = vmatprep.subr.bf16.mxu1 %v12435_v0  ;;  %v1729_v9 = vld [vmem:[%s17330_s4 + $0x338] sm:$0xff] }
 0x378   : > { %6148 = vmatpush1.bf16.msra.mxu0 %v13464_v39  ;;  %v2978_v2 = vadd.f32 %v2977_v13, %v1714_v10  ;;  %v10701_v8 = vpop.f32.mrb[114].mxu0  ;;  %v11641_v46 = vld [vmem:[%s17331_s5 + $0xae8] ss:$48 sps:$4 sm:$0xff]  }
 0x379   : > { %6149 = vmatprep.subr.bf16.mxu0 %v12435_v0  ;;  %v2989_v34 = vadd.f32 %v10701_v8, %v1717_v14  ;;  %v2980_v59 = vpop.f32.mrb[115].mxu0  ;;  %v1726_v14 = vld [vmem:[%s17330_s4 + $0x320] sm:$0xff] }
 0x37a   : > { %v2981_v44 = vadd.f32 %v2980_v59, %v1715_v57  ;;  %6457 = vmatpush1.bf16.msra.mxu1 %v3819_v1  ;;  %v11650_v59 = vld [vmem:[%s17331_s5 + $0x14] ss:$48 sps:$4 sm:$0xff]  }
 0x37b   : > { %v3821_v38 = vpack.c.bf16 %v2989_v34, %v2986_v26  ;;  %6458 = vmatprep.subr.bf16.mxu1 %v12435_v0  ;;  %v11642_v26 = vld [vmem:[%s17331_s5 + $0xb4c] ss:$48 sps:$4 sm:$0xff]  }
 0x37c   : > { %6150 = vmatpush1.bf16.msra.mxu0 %v13496_v21  ;;  %v3820_v39 = vpack.c.bf16 %v2981_v44, %v2978_v2  ;;  %v1727_v2 = vld [vmem:[%s17330_s4 + $0x328] sm:$0xff] }
 0x37d   : > { %6370 = vmatmul.mubr.bf16.gmra.mrb[48].mxu1 %v11626_v49  ;;  %6151 = vmatprep.subr.bf16.mxu0 %v12435_v0  ;;  %v11645_v34 = vld [vmem:[%s17331_s5 + $0xbac] ss:$48 sps:$4 sm:$0xff]  }
 0x37e   : > { %6377 = vmatprep.mubr.bf16.mxu1 %v11627_v62  ;;  %v10704_v43 = vpop.f32.mrb[116].mxu0  ;;  %6459 = vmatpush1.bf16.msra.mxu1 %v3820_v39  ;;  %v11651_v62 = vld [vmem:[%s17331_s5 + $0x74] ss:$48 sps:$4 sm:$0xff]  }
 0x37f   : > { %v3002_v21 = vadd.f32 %v10704_v43, %v1720_v11  ;;  %v2993_v42 = vpop.f32.mrb[117].mxu0  ;;  %6460 = vmatprep.subr.bf16.mxu1 %v12435_v0  ;;  %v1733_v11 = vld [vmem:[%s17330_s4 + $0x358] sm:$0xff] }
 0x380   : > { %6152 = vmatpush1.bf16.msra.mxu0 %v13492_v51  ;;  %v2994_v56 = vadd.f32 %v2993_v42, %v1718_v4  ;;  %v10705_v12 = vpop.f32.mrb[118].mxu0  ;;  %v11654_v42 = vld [vmem:[%s17331_s5 + $0xd4] ss:$48 sps:$4 sm:$0xff]  }
 0x381   : > { %6153 = vmatprep.subr.bf16.mxu0 %v12435_v0  ;;  %v3005_v23 = vadd.f32 %v10705_v12, %v1721_v15  ;;  %v2996_v48 = vpop.f32.mrb[119].mxu0  ;;  %v11653_v15 = vld [vmem:[%s17331_s5 + $0x70] ss:$48 sps:$4 sm:$0xff]  }
 0x382   : > { %v2997_v30 = vadd.f32 %v2996_v48, %v1719_v61  ;;  %6461 = vmatpush1.bf16.msra.mxu1 %v3821_v38 }
 0x383   : > { %v3823_v52 = vpack.c.bf16 %v3005_v23, %v3002_v21  ;;  %6462 = vmatprep.subr.bf16.mxu1 %v12435_v0  ;;  %v1730_v21 = vld [vmem:[%s17330_s4 + $0x340] sm:$0xff] }
 0x384   : > { %6154 = vmatpush1.bf16.msra.mxu0 %v13524_v41  ;;  %v3822_v51 = vpack.c.bf16 %v2997_v30, %v2994_v56  ;;  %v11657_v30 = vld [vmem:[%s17331_s5 + $0x134] ss:$48 sps:$4 sm:$0xff]  }
 0x385   : > { %6378 = vmatmul.mubr.bf16.gmra.mrb[52].mxu1 %v11629_v19  ;;  %6155 = vmatprep.subr.bf16.mxu0 %v12435_v0  ;;  %v1731_v19 = vld [vmem:[%s17330_s4 + $0x348] sm:$0xff] }
 0x386   : > { %6385 = vmatprep.mubr.bf16.mxu1 %v11630_v6  ;;  %6463 = vmatpush1.bf16.msra.mxu1 %v3822_v51  ;;  %v10708_v37 = vpop.f32.mrb[120].mxu0  ;;  %v11656_v6 = vld [vmem:[%s17331_s5 + $0xd0] ss:$48 sps:$4 sm:$0xff]   ;;  %v11660_v51 = vld [vmem:[%s17331_s5 + $0x194] ss:$48 sps:$4 sm:$0xff]  }
 0x387   : > { %6464 = vmatprep.subr.bf16.mxu1 %v12435_v0  ;;  %v13891_v41 = vadd.f32 %v10708_v37, %v1724_v32  ;;  %v3009_v40 = vpop.f32.mrb[121].mxu0  ;;  %v11662_v32 = vld [vmem:[%s17331_s5 + $0x190] ss:$48 sps:$4 sm:$0xff]  }
 0x388   : > { %6156 = vmatpush1.bf16.msra.mxu0 %v13520_v60  ;;  %v13897_v31 = vadd.f32 %v3009_v40, %v1722_v58  ;;  %v10709_v3 = vpop.f32.mrb[122].mxu0  ;;  %v11663_v58 = vld [vmem:[%s17331_s5 + $0x1f4] ss:$48 sps:$4 sm:$0xff]  }
 0x389   : > { %6157 = vmatprep.subr.bf16.mxu0 %v12435_v0  ;;  %v13903_v50 = vadd.f32 %v10709_v3, %v1725_v24  ;;  %v3012_v16 = vpop.f32.mrb[123].mxu0  ;;  %v1736_v37 = vld [vmem:[%s17330_s4 + $0x370] sm:$0xff] }
 0x38a   : > { %6465 = vmatpush1.bf16.msra.mxu1 %v3823_v52  ;;  %v13908_v35 = vadd.f32 %v3012_v16, %v1723_v54  ;;  %v11659_v52 = vld [vmem:[%s17331_s5 + $0x130] ss:$48 sps:$4 sm:$0xff]   ;;  %v1737_v54 = vld [vmem:[%s17330_s4 + $0x378] sm:$0xff]  ;;  %v11666_v16 = vld [vmem:[%s17331_s5 + $0x254] ss:$48 sps:$4 sm:$0xff]  }
 0x38b   : > { %v3825_v60 = vpack.c.bf16 %v13903_v50, %v13891_v41  ;;  %6723 = vmatprep.subr.bf16.mxu1 %v12435_v0  ;;  %v1734_v50 = vld [vmem:[%s17330_s4 + $0x360] sm:$0xff] }
 0x38c   : > { %6158 = vmatpush1.bf16.msra.mxu0 %v13552_v45  ;;  %v3824_v27 = vpack.c.bf16 %v13908_v35, %v13897_v31  ;;  %v11639_v45 = vld [vmem:[%s17331_s5 + $0xaec] ss:$48 sps:$4 sm:$0xff]  }
 0x38d   : > { %6386 = vmatmul.mubr.bf16.gmra.mrb[56].mxu1 %v11632_v5  ;;  %6159 = vmatprep.subr.bf16.mxu0 %v12435_v0  ;;  %v11665_v5 = vld [vmem:[%s17331_s5 + $0x1f0] ss:$48 sps:$4 sm:$0xff]  }
 0x38e   : > { %6393 = vmatprep.mubr.bf16.mxu1 %v11633_v47 }
 0x390   : > { %6160 = vmatpush1.bf16.msra.mxu0 %v13548_v55  ;;  %v11638_v55 = vld [vmem:[%s17331_s5 + $0xa88] ss:$48 sps:$4 sm:$0xff]  }
 0x391   : > { %6161 = vmatprep.subr.bf16.mxu0 %v12435_v0 }
 0x394   : > { %6162 = vmatpush1.bf16.msra.mxu0 %v13580_v63  ;;  %v1728_v63 = vld [vmem:[%s17330_s4 + $0x330] sm:$0xff] }
 0x395   : > { %6394 = vmatmul.mubr.bf16.gmra.mrb[60].mxu1 %v11635_v29  ;;  %6163 = vmatprep.subr.bf16.mxu0 %v12435_v0 }
 0x396   : > { %6401 = vmatprep.mubr.bf16.mxu1 %v11636_v36 }
 0x398   : > { %6164 = vmatpush1.bf16.msra.mxu0 %v13576_v33  ;;  %v10712_v33 = vpop.f32.mrb[124].mxu0 }
 0x399   : > { %6165 = vmatprep.subr.bf16.mxu0 %v12435_v0  ;;  %v13940_v1 = vadd.f32 %v10712_v33, %v1728_v63  ;;  %v3025_v25 = vpop.f32.mrb[125].mxu0  ;;  %v11671_v63 = vld [vmem:[%s17331_s5 + $0x2b0] ss:$48 sps:$4 sm:$0xff]   ;;  %v11672_v33 = vld [vmem:[%s17331_s5 + $0x314] ss:$48 sps:$4 sm:$0xff]  }
 0x39a   : > { %v10713_v10 = vpop.f32.mrb[126].mxu0 }
 0x39b   : > { %v3028_v57 = vpop.f32.mrb[127].mxu0 }
 0x39c   : > { %6166 = vmatpush1.bf16.msra.mxu0 %v13608_v17  ;;  %v3037_v17 = vadd.f32 %v10713_v10, %v1729_v9  ;;  %v3029_v8 = vadd.f32 %v3028_v57, %v1727_v2  ;;  %v10716_v44 = vpop.f32.mrb[128].mxu0  ;;  %v1740_v9 = vld [vmem:[%s17330_s4 + $0x390] sm:$0xff]  ;;  %v1738_v57 = vld [vmem:[%s17330_s4 + $0x380] sm:$0xff] }
 0x39d   : > { %6402 = vmatmul.mubr.bf16.gmra.mrb[64].mxu1 %v11638_v55  ;;  %6167 = vmatprep.subr.bf16.mxu0 %v12435_v0  ;;  %v3041_v39 = vpop.f32.mrb[129].mxu0  ;;  %v11668_v55 = vld [vmem:[%s17331_s5 + $0x250] ss:$48 sps:$4 sm:$0xff]   ;;  %v11678_v2 = vld [vmem:[%s17331_s5 + $0x3d4] ss:$48 sps:$4 sm:$0xff]  }
 0x39e   : > { %6409 = vmatprep.mubr.bf16.mxu1 %v11639_v45  ;;  %v3827_v13 = vpack.c.bf16 %v3037_v17, %v13940_v1  ;;  %v10717_v4 = vpop.f32.mrb[130].mxu0  ;;  %v3042_v56 = vadd.f32 %v3041_v39, %v1730_v21  ;;  %v11669_v45 = vld [vmem:[%s17331_s5 + $0x2b4] ss:$48 sps:$4 sm:$0xff]   ;;  %v11674_v1 = vld [vmem:[%s17331_s5 + $0x310] ss:$48 sps:$4 sm:$0xff]   ;;  %v1743_v21 = vld [vmem:[%s17330_s4 + $0x3a8] sm:$0xff] }
 0x39f   : > { %v3053_v43 = vadd.f32 %v10717_v4, %v1733_v11  ;;  %v3044_v12 = vpop.f32.mrb[131].mxu0  ;;  %v1742_v11 = vld [vmem:[%s17330_s4 + $0x3a0] sm:$0xff]  ;;  %v1745_v4 = vld [vmem:[%s17330_s4 + $0x3b8] sm:$0xff] }
 0x3a0   : > { %6168 = vmatpush1.bf16.msra.mxu0 %v13604_v22  ;;  %v3026_v22 = vadd.f32 %v3025_v25, %v1726_v14  ;;  %v3045_v23 = vadd.f32 %v3044_v12, %v1731_v19  ;;  %v10720_v24 = vpop.f32.mrb[132].mxu0  ;;  %v11675_v25 = vld [vmem:[%s17331_s5 + $0x374] ss:$48 sps:$4 sm:$0xff]   ;;  %v1741_v14 = vld [vmem:[%s17330_s4 + $0x398] sm:$0xff]  ;;  %v11686_v19 = vld [vmem:[%s17331_s5 + $0x490] ss:$48 sps:$4 sm:$0xff]  }
 0x3a1   : > { %6169 = vmatprep.subr.bf16.mxu0 %v12435_v0  ;;  %v3066_v41 = vadd.f32 %v10720_v24, %v1736_v37  ;;  %v3057_v40 = vpop.f32.mrb[133].mxu0 }
 0x3a2   : > { %v3826_v49 = vpack.c.bf16 %v3029_v8, %v3026_v22  ;;  %v3828_v48 = vpack.c.bf16 %v3045_v23, %v3042_v56  ;;  %v10721_v31 = vpop.f32.mrb[134].mxu0  ;;  %v3058_v35 = vadd.f32 %v3057_v40, %v1734_v50  ;;  %v11677_v22 = vld [vmem:[%s17331_s5 + $0x370] ss:$48 sps:$4 sm:$0xff]  }
 0x3a3   : > { %v3069_v3 = vadd.f32 %v10721_v31, %v1737_v54 }
 0x3a4   : > { %6170 = vmatpush1.bf16.msra.mxu0 %v13636_v20  ;;  %v11644_v20 = vld [vmem:[%s17331_s5 + $0xb48] ss:$48 sps:$4 sm:$0xff]  }
 0x3a5   : > { %6410 = vmatmul.mubr.bf16.gmra.mrb[68].mxu1 %v11641_v46  ;;  %6171 = vmatprep.subr.bf16.mxu0 %v12435_v0  ;;  %v3831_v47 = vpack.c.bf16 %v3069_v3, %v3066_v41  ;;  %v1747_v41 = vld [vmem:[%s17330_s4 + $0x3c8] sm:$0xff] }
 0x3a6   : > { %6417 = vmatprep.mubr.bf16.mxu1 %v11642_v26 }
 0x3a8   : > { %6172 = vmatpush1.bf16.msra.mxu0 %v13632_v18  ;;  %v11647_v18 = vld [vmem:[%s17331_s5 + $0xba8] ss:$48 sps:$4 sm:$0xff]  }
 0x3a9   : > { %6173 = vmatprep.subr.bf16.mxu0 %v12435_v0 }
 0x3ac   : > { %6174 = vmatpush1.bf16.msra.mxu0 %v13664_v28  ;;  %v11648_v28 = vld [vmem:[%s17331_s5 + $0x10] ss:$48 sps:$4 sm:$0xff]  }
 0x3ad   : > { %6418 = vmatmul.mubr.bf16.gmra.mrb[72].mxu1 %v11644_v20  ;;  %6175 = vmatprep.subr.bf16.mxu0 %v12435_v0 }
 0x3ae   : > { %6425 = vmatprep.mubr.bf16.mxu1 %v11645_v34  ;;  %v1739_v34 = vld [vmem:[%s17330_s4 + $0x388] sm:$0xff] }
 0x3b0   : > { %6176 = vmatpush1.bf16.msra.mxu0 %v13660_v7  ;;  %v1732_v7 = vld [vmem:[%s17330_s4 + $0x350] sm:$0xff] }
 0x3b1   : > { %v3050_v38 = vadd.f32 %v10716_v44, %v1732_v7  ;;  %v11683_v7 = vld [vmem:[%s17331_s5 + $0x430] ss:$48 sps:$4 sm:$0xff]   ;;  %v11684_v44 = vld [vmem:[%s17331_s5 + $0x494] ss:$48 sps:$4 sm:$0xff]  }
 0x3b3   : > { %v3829_v61 = vpack.c.bf16 %v3053_v43, %v3050_v38  ;;  %v1744_v38 = vld [vmem:[%s17330_s4 + $0x3b0] sm:$0xff] }
 0x3b5   : > { %6426 = vmatmul.mubr.bf16.gmra.mrb[76].mxu1 %v11647_v18 }
 0x3b6   : > { %6466 = vmatprep.mubr.bf16.mxu1 %v11650_v59 }
 0x3bd   : > { %6467 = vmatmul.mubr.bf16.vlgmr.msra.gmra.mrb[80].mxu1 %v11648_v28  ;;  %v11680_v28 = vld [vmem:[%s17331_s5 + $0x3d0] ss:$48 sps:$4 sm:$0xff]  }
 0x3be   : > { %6474 = vmatprep.mubr.bf16.mxu1 %v11651_v62  ;;  %6724 = vmatpush1.bf16.msra.mxu1 %v3824_v27  ;;  %v1735_v27 = vld [vmem:[%s17330_s4 + $0x368] sm:$0xff]  ;;  %v11681_v62 = vld [vmem:[%s17331_s5 + $0x434] ss:$48 sps:$4 sm:$0xff]  }
 0x3bf   : > { %6725 = vmatprep.subr.bf16.mxu1 %v12435_v0 }
 0x3c2   : > { %6726 = vmatpush1.bf16.msra.mxu1 %v3825_v60  ;;  %v3060_v60 = vpop.f32.mrb[135].mxu0 }
 0x3c3   : > { %6727 = vmatprep.subr.bf16.mxu1 %v12435_v0  ;;  %v3061_v29 = vadd.f32 %v3060_v60, %v1735_v27  ;;  %v10724_v10 = vpop.f32.mrb[136].mxu0  ;;  %v1752_v60 = vld [vmem:[%s17330_s4 + $0x3f0] sm:$0xff] }
 0x3c4   : > { %v3082_v17 = vadd.f32 %v10724_v10, %v1740_v9  ;;  %v3073_v46 = vpop.f32.mrb[137].mxu0  ;;  %v11692_v10 = vld [vmem:[%s17331_s5 + $0x550] ss:$48 sps:$4 sm:$0xff]  }
 0x3c5   : > { %6475 = vmatmul.mubr.bf16.gmra.mrb[84].mxu1 %v11653_v15  ;;  %v3830_v36 = vpack.c.bf16 %v3061_v29, %v3058_v35  ;;  %v10725_v26 = vpop.f32.mrb[138].mxu0  ;;  %v1750_v29 = vld [vmem:[%s17330_s4 + $0x3e0] sm:$0xff] }
 0x3c6   : > { %6482 = vmatprep.mubr.bf16.mxu1 %v11654_v42  ;;  %6728 = vmatpush1.bf16.msra.mxu1 %v3826_v49  ;;  %v3074_v49 = vadd.f32 %v3073_v46, %v1738_v57  ;;  %v3076_v20 = vpop.f32.mrb[139].mxu0  ;;  %v11693_v46 = vld [vmem:[%s17331_s5 + $0x5b4] ss:$48 sps:$4 sm:$0xff]   ;;  %v11698_v57 = vld [vmem:[%s17331_s5 + $0x610] ss:$48 sps:$4 sm:$0xff]  }
 0x3c7   : > { %6729 = vmatprep.subr.bf16.mxu1 %v12435_v0  ;;  %v3077_v18 = vadd.f32 %v3076_v20, %v1739_v34  ;;  %v10728_v39 = vpop.f32.mrb[140].mxu0  ;;  %v11701_v20 = vld [vmem:[%s17331_s5 + $0x670] ss:$48 sps:$4 sm:$0xff]   ;;  %v11702_v34 = vld [vmem:[%s17331_s5 + $0x6d4] ss:$48 sps:$4 sm:$0xff]  }
 0x3c8   : > { %v3098_v43 = vadd.f32 %v10728_v39, %v1744_v38  ;;  %v3089_v15 = vpop.f32.mrb[141].mxu0  ;;  %v11707_v38 = vld [vmem:[%s17331_s5 + $0x730] ss:$48 sps:$4 sm:$0xff]   ;;  %v11708_v39 = vld [vmem:[%s17331_s5 + $0x794] ss:$48 sps:$4 sm:$0xff]  }
 0x3c9   : > { %v3832_v59 = vpack.c.bf16 %v3077_v18, %v3074_v49  ;;  %v3090_v42 = vadd.f32 %v3089_v15, %v1742_v11  ;;  %v11749_v49 = vld [vmem:[%s17331_s5 + $0x60] ss:$48 sps:$4 sm:$0xff]   ;;  %v11753_v18 = vld [vmem:[%s17331_s5 + $0xc4] ss:$48 sps:$4 sm:$0xff]  }
 0x3ca   : > { %6730 = vmatpush1.bf16.msra.mxu1 %v3827_v13  ;;  %v3085_v13 = vadd.f32 %v10725_v26, %v1741_v14  ;;  %v11765_v11 = vld [vmem:[%s17331_s5 + $0x184] ss:$48 sps:$4 sm:$0xff]  }
 0x3cb   : > { %6731 = vmatprep.subr.bf16.mxu1 %v12435_v0  ;;  %v11711_v15 = vld [vmem:[%s17331_s5 + $0x7f4] ss:$48 sps:$4 sm:$0xff]  }
 0x3cc   : > { %v3833_v8 = vpack.c.bf16 %v3085_v13, %v3082_v17  ;;  %v11695_v13 = vld [vmem:[%s17331_s5 + $0x5b0] ss:$48 sps:$4 sm:$0xff]  }
 0x3cd   : > { %6483 = vmatmul.mubr.bf16.gmra.mrb[88].mxu1 %v11656_v6 }
 0x3ce   : > { %6490 = vmatprep.mubr.bf16.mxu1 %v11657_v30  ;;  %6732 = vmatpush1.bf16.msra.mxu1 %v3828_v48  ;;  %v11687_v48 = vld [vmem:[%s17331_s5 + $0x4f4] ss:$48 sps:$4 sm:$0xff]  }
 0x3cf   : > { %6733 = vmatprep.subr.bf16.mxu1 %v12435_v0 }
 0x3d2   : > { %6734 = vmatpush1.bf16.msra.mxu1 %v3829_v61  ;;  %v10729_v61 = vpop.f32.mrb[142].mxu0 }
 0x3d3   : > { %6735 = vmatprep.subr.bf16.mxu1 %v12435_v0  ;;  %v3101_v56 = vadd.f32 %v10729_v61, %v1745_v4  ;;  %v3092_v12 = vpop.f32.mrb[143].mxu0  ;;  %v11767_v4 = vld [vmem:[%s17331_s5 + $0x180] ss:$48 sps:$4 sm:$0xff]  }
 0x3d4   : > { %v3093_v23 = vadd.f32 %v3092_v12, %v1743_v21  ;;  %v11771_v21 = vld [vmem:[%s17331_s5 + $0x1e4] ss:$48 sps:$4 sm:$0xff]   ;;  %v11713_v61 = vld [vmem:[%s17331_s5 + $0x7f0] ss:$48 sps:$4 sm:$0xff]  }
 0x3d5   : > { %6491 = vmatmul.mubr.bf16.gmra.mrb[92].mxu1 %v11659_v52  ;;  %v3835_v6 = vpack.c.bf16 %v3101_v56, %v3098_v43  ;;  %v1748_v52 = vld [vmem:[%s17330_s4 + $0x3d0] sm:$0xff] }
 0x3d6   : > { %6498 = vmatprep.mubr.bf16.mxu1 %v11660_v51  ;;  %6736 = vmatpush1.bf16.msra.mxu1 %v3830_v36  ;;  %v3834_v30 = vpack.c.bf16 %v3093_v23, %v3090_v42  ;;  %v10732_v51 = vpop.f32.mrb[144].mxu0  ;;  %v1753_v36 = vld [vmem:[%s17330_s4 + $0x3f8] sm:$0xff]  ;;  %v11710_v43 = vld [vmem:[%s17331_s5 + $0x790] ss:$48 sps:$4 sm:$0xff]   ;;  %v11714_v56 = vld [vmem:[%s17331_s5 + $0x854] ss:$48 sps:$4 sm:$0xff]  }
 0x3d7   : > { %6737 = vmatprep.subr.bf16.mxu1 %v12435_v0  ;;  %v3114_v37 = vadd.f32 %v10732_v51, %v1748_v52  ;;  %v3105_v24 = vpop.f32.mrb[145].mxu0  ;;  %v11773_v42 = vld [vmem:[%s17331_s5 + $0x1e0] ss:$48 sps:$4 sm:$0xff]   ;;  %v11777_v12 = vld [vmem:[%s17331_s5 + $0x244] ss:$48 sps:$4 sm:$0xff]  }
 0x3d8   : > { %v10733_v54 = vpop.f32.mrb[146].mxu0  ;;  %v11716_v23 = vld [vmem:[%s17331_s5 + $0x850] ss:$48 sps:$4 sm:$0xff]   ;;  %v11720_v51 = vld [vmem:[%s17331_s5 + $0x914] ss:$48 sps:$4 sm:$0xff]  }
 0x3d9   : > { %v3108_v3 = vpop.f32.mrb[147].mxu0  ;;  %v11719_v52 = vld [vmem:[%s17331_s5 + $0x8b0] ss:$48 sps:$4 sm:$0xff]  }
 0x3da   : > { %6738 = vmatpush1.bf16.msra.mxu1 %v3831_v47  ;;  %v3109_v50 = vadd.f32 %v3108_v3, %v1747_v41  ;;  %v10736_v27 = vpop.f32.mrb[148].mxu0  ;;  %v11795_v41 = vld [vmem:[%s17331_s5 + $0x364] ss:$48 sps:$4 sm:$0xff]  }
 0x3db   : > { %6739 = vmatprep.subr.bf16.mxu1 %v12435_v0 }
 0x3dd   : > { %6499 = vmatmul.mubr.bf16.gmra.mrb[96].mxu1 %v11662_v32  ;;  %v1746_v32 = vld [vmem:[%s17330_s4 + $0x3c0] sm:$0xff] }
 0x3de   : > { %6506 = vmatprep.mubr.bf16.mxu1 %v11663_v58  ;;  %6740 = vmatpush1.bf16.msra.mxu1 %v3832_v59  ;;  %v1749_v58 = vld [vmem:[%s17330_s4 + $0x3d8] sm:$0xff]  ;;  %v3106_v40 = vadd.f32 %v3105_v24, %v1746_v32  ;;  %v11755_v59 = vld [vmem:[%s17331_s5 + $0xc0] ss:$48 sps:$4 sm:$0xff]   ;;  %v11789_v32 = vld [vmem:[%s17331_s5 + $0x304] ss:$48 sps:$4 sm:$0xff]  }
 0x3df   : > { %6741 = vmatprep.subr.bf16.mxu1 %v12435_v0  ;;  %v3117_v31 = vadd.f32 %v10733_v54, %v1749_v58  ;;  %v11791_v58 = vld [vmem:[%s17331_s5 + $0x300] ss:$48 sps:$4 sm:$0xff]   ;;  %v11723_v24 = vld [vmem:[%s17331_s5 + $0x974] ss:$48 sps:$4 sm:$0xff]  }
 0x3e0   : > { %v3836_v35 = vpack.c.bf16 %v3109_v50, %v3106_v40  ;;  %v11797_v40 = vld [vmem:[%s17331_s5 + $0x360] ss:$48 sps:$4 sm:$0xff]   ;;  %v1757_v50 = vld [vmem:[%s17330_s4 + $0x418] sm:$0xff] }
 0x3e1   : > { %v3837_v47 = vpack.c.bf16 %v3117_v31, %v3114_v37  ;;  %v11722_v37 = vld [vmem:[%s17331_s5 + $0x910] ss:$48 sps:$4 sm:$0xff]  }
 0x3e2   : > { %6742 = vmatpush1.bf16.msra.mxu1 %v3833_v8  ;;  %v11747_v8 = vld [vmem:[%s17331_s5 + $0x64] ss:$48 sps:$4 sm:$0xff]  }
 0x3e3   : > { %6743 = vmatprep.subr.bf16.mxu1 %v12435_v0  ;;  %5896 = vmatprep.mubr.bf16.mxu0 %v11747_v8  ;;  %v1756_v54 = vld [vmem:[%s17330_s4 + $0x410] sm:$0xff] }
 0x3e4   : > { %5897 = vmatmul.mubr.bf16.gmra.mrb[220].mxu0 %v11749_v49  ;;  %v11819_v8 = vld [vmem:[%s17331_s5 + $0x4e0] ss:$48 sps:$4 sm:$0xff]   ;;  %v11821_v49 = vld [vmem:[%s17331_s5 + $0x4e4] ss:$48 sps:$4 sm:$0xff]  }
 0x3e5   : > { %6507 = vmatmul.mubr.bf16.gmra.mrb[100].mxu1 %v11665_v5  ;;  %v11689_v5 = vld [vmem:[%s17331_s5 + $0x4f0] ss:$48 sps:$4 sm:$0xff]   ;;  %5904 = vmatprep.mubr.bf16.mxu0 %v11753_v18 }
 0x3e6   : > { %6514 = vmatprep.mubr.bf16.mxu1 %v11666_v16  ;;  %6744 = vmatpush1.bf16.msra.mxu1 %v3834_v30  ;;  %v11690_v16 = vld [vmem:[%s17331_s5 + $0x554] ss:$48 sps:$4 sm:$0xff]   ;;  %v11785_v30 = vld [vmem:[%s17331_s5 + $0x2a0] ss:$48 sps:$4 sm:$0xff]  }
 0x3e7   : > { %6745 = vmatprep.subr.bf16.mxu1 %v12435_v0 }
 0x3ea   : > { %6746 = vmatpush1.bf16.msra.mxu1 %v3835_v6  ;;  %v11783_v6 = vld [vmem:[%s17331_s5 + $0x2a4] ss:$48 sps:$4 sm:$0xff]  }
 0x3eb   : > { %6747 = vmatprep.subr.bf16.mxu1 %v12435_v0 }
 0x3ec   : > { %5905 = vmatmul.mubr.bf16.gmra.mrb[224].mxu0 %v11755_v59 }
 0x3ed   : > { %6515 = vmatmul.mubr.bf16.gmra.mrb[104].mxu1 %v11668_v55  ;;  %v3130_v55 = vadd.f32 %v10736_v27, %v1752_v60  ;;  %v1754_v60 = vld [vmem:[%s17330_s4 + $0x400] sm:$0xff] }
 0x3ee   : > { %6522 = vmatprep.mubr.bf16.mxu1 %v11669_v45  ;;  %6748 = vmatpush1.bf16.msra.mxu1 %v3836_v35  ;;  %v3121_v45 = vpop.f32.mrb[149].mxu0  ;;  %v11725_v35 = vld [vmem:[%s17331_s5 + $0x970] ss:$48 sps:$4 sm:$0xff]   ;;  %v11726_v27 = vld [vmem:[%s17331_s5 + $0x9d4] ss:$48 sps:$4 sm:$0xff]  }
 0x3ef   : > { %6749 = vmatprep.subr.bf16.mxu1 %v12435_v0 }
 0x3f2   : > { %6750 = vmatpush1.bf16.msra.mxu1 %v3837_v47 }
 0x3f3   : > { %6751 = vmatprep.subr.bf16.mxu1 %v12435_v0 }
 0x3f5   : > { %6523 = vmatmul.mubr.bf16.gmra.mrb[108].mxu1 %v11671_v63  ;;  %v1751_v63 = vld [vmem:[%s17330_s4 + $0x3e8] sm:$0xff] }
 0x3f6   : > { %6530 = vmatprep.mubr.bf16.mxu1 %v11672_v33  ;;  %v3122_v33 = vadd.f32 %v3121_v45, %v1750_v29  ;;  %v1755_v45 = vld [vmem:[%s17330_s4 + $0x408] sm:$0xff] }
 0x3fd   : > { %6531 = vmatmul.mubr.bf16.gmra.mrb[112].mxu1 %v11674_v1  ;;  %v10737_v1 = vpop.f32.mrb[150].mxu0 }
 0x3fe   : > { %6538 = vmatprep.mubr.bf16.mxu1 %v11675_v25  ;;  %v3133_v25 = vadd.f32 %v10737_v1, %v1753_v36  ;;  %v3124_v9 = vpop.f32.mrb[151].mxu0 }
 0x3ff   : > { %v3125_v17 = vadd.f32 %v3124_v9, %v1751_v63  ;;  %v10740_v31 = vpop.f32.mrb[152].mxu0  ;;  %v11801_v63 = vld [vmem:[%s17331_s5 + $0x3c0] ss:$48 sps:$4 sm:$0xff]  }
 0x400   : > { %v3839_v14 = vpack.c.bf16 %v3133_v25, %v3130_v55  ;;  %v14277_v3 = vadd.f32 %v10740_v31, %v1756_v54  ;;  %v11728_v9 = vld [vmem:[%s17331_s5 + $0x9d0] ss:$48 sps:$4 sm:$0xff]  }
 0x401   : > { %v3838_v26 = vpack.c.bf16 %v3125_v17, %v3122_v33  ;;  %v11803_v33 = vld [vmem:[%s17331_s5 + $0x3c4] ss:$48 sps:$4 sm:$0xff]   ;;  %v11807_v17 = vld [vmem:[%s17331_s5 + $0x420] ss:$48 sps:$4 sm:$0xff]  }
 0x403   : > { %6752 = vmatpush1.bf16.msra.mxu1 %v3838_v26  ;;  %v11732_v26 = vld [vmem:[%s17331_s5 + $0xa94] ss:$48 sps:$4 sm:$0xff]  }
 0x404   : > { %6753 = vmatprep.subr.bf16.mxu1 %v12435_v0 }
 0x405   : > { %6539 = vmatmul.mubr.bf16.gmra.mrb[116].mxu1 %v11677_v22  ;;  %v11696_v22 = vld [vmem:[%s17331_s5 + $0x614] ss:$48 sps:$4 sm:$0xff]  }
 0x406   : > { %6546 = vmatprep.mubr.bf16.mxu1 %v11678_v2  ;;  %v11699_v2 = vld [vmem:[%s17331_s5 + $0x674] ss:$48 sps:$4 sm:$0xff]  }
 0x407   : > { %6754 = vmatpush1.bf16.msra.mxu1 %v3839_v14  ;;  %v11731_v14 = vld [vmem:[%s17331_s5 + $0xa30] ss:$48 sps:$4 sm:$0xff]  }
 0x408   : > { %7012 = vmatprep.subr.bf16.mxu1 %v12435_v0 }
 0x40d   : > { %6547 = vmatmul.mubr.bf16.gmra.mrb[120].mxu1 %v11680_v28  ;;  %v11704_v28 = vld [vmem:[%s17331_s5 + $0x6d0] ss:$48 sps:$4 sm:$0xff]  }
 0x40e   : > { %6554 = vmatprep.mubr.bf16.mxu1 %v11681_v62  ;;  %v11705_v62 = vld [vmem:[%s17331_s5 + $0x734] ss:$48 sps:$4 sm:$0xff]  }
 0x415   : > { %6555 = vmatmul.mubr.bf16.gmra.mrb[124].mxu1 %v11683_v7  ;;  %v11759_v7 = vld [vmem:[%s17331_s5 + $0x124] ss:$48 sps:$4 sm:$0xff]  }
 0x416   : > { %6562 = vmatprep.mubr.bf16.mxu1 %v11684_v44  ;;  %v11761_v44 = vld [vmem:[%s17331_s5 + $0x120] ss:$48 sps:$4 sm:$0xff]   ;;  %5912 = vmatprep.mubr.bf16.mxu0 %v11759_v7 }
 0x417   : > { %5913 = vmatmul.mubr.bf16.gmra.mrb[228].mxu0 %v11761_v44  ;;  %v11737_v44 = vld [vmem:[%s17331_s5 + $0xaf0] ss:$48 sps:$4 sm:$0xff]  }
 0x418   : > { %5920 = vmatprep.mubr.bf16.mxu0 %v11765_v11 }
 0x41d   : > { %6563 = vmatmul.mubr.bf16.gmra.mrb[128].mxu1 %v11686_v19  ;;  %v11779_v19 = vld [vmem:[%s17331_s5 + $0x240] ss:$48 sps:$4 sm:$0xff]  }
 0x41e   : > { %6570 = vmatprep.mubr.bf16.mxu1 %v11687_v48  ;;  %v11717_v48 = vld [vmem:[%s17331_s5 + $0x8b4] ss:$48 sps:$4 sm:$0xff]  }
 0x41f   : > { %5921 = vmatmul.mubr.bf16.gmra.mrb[232].mxu0 %v11767_v4 }
 0x420   : > { %5928 = vmatprep.mubr.bf16.mxu0 %v11771_v21  ;;  %v11825_v21 = vld [vmem:[%s17331_s5 + $0x540] ss:$48 sps:$4 sm:$0xff]  }
 0x425   : > { %6571 = vmatmul.mubr.bf16.gmra.mrb[132].mxu1 %v11689_v5  ;;  %v3137_v5 = vpop.f32.mrb[153].mxu0 }
 0x426   : > { %6578 = vmatprep.mubr.bf16.mxu1 %v11690_v16  ;;  %v10741_v16 = vpop.f32.mrb[154].mxu0  ;;  %v14295_v36 = vadd.f32 %v3137_v5, %v1754_v60  ;;  %v1765_v5 = vld [vmem:[%s17330_s4 + $0x458] sm:$0xff]  ;;  %v1762_v60 = vld [vmem:[%s17330_s4 + $0x440] sm:$0xff] }
 0x427   : > { %5929 = vmatmul.mubr.bf16.gmra.mrb[236].mxu0 %v11773_v42  ;;  %v14282_v47 = vadd.f32 %v10741_v16, %v1757_v50  ;;  %v3140_v55 = vpop.f32.mrb[155].mxu0  ;;  %v11827_v42 = vld [vmem:[%s17331_s5 + $0x544] ss:$48 sps:$4 sm:$0xff]  }
 0x428   : > { %5936 = vmatprep.mubr.bf16.mxu0 %v11777_v12  ;;  %v14306_v1 = vadd.f32 %v3140_v55, %v1755_v45  ;;  %v11740_v12 = vld [vmem:[%s17331_s5 + $0xb50] ss:$48 sps:$4 sm:$0xff]  }
 0x429   : > { %v3841_v29 = vpack.c.bf16 %v14282_v47, %v14277_v3 }
 0x42a   : > { %v3840_v25 = vpack.c.bf16 %v14306_v1, %v14295_v36  ;;  %v11851_v1 = vld [vmem:[%s17331_s5 + $0x6c4] ss:$48 sps:$4 sm:$0xff]  }
 0x42d   : > { %6579 = vmatmul.mubr.bf16.gmra.mrb[136].mxu1 %v11692_v10  ;;  %v11729_v10 = vld [vmem:[%s17331_s5 + $0xa34] ss:$48 sps:$4 sm:$0xff]  }
 0x42e   : > { %6586 = vmatprep.mubr.bf16.mxu1 %v11693_v46  ;;  %v11809_v46 = vld [vmem:[%s17331_s5 + $0x424] ss:$48 sps:$4 sm:$0xff]  }
 0x42f   : > { %5937 = vmatmul.mubr.bf16.gmra.mrb[240].mxu0 %v11779_v19  ;;  %v11741_v19 = vld [vmem:[%s17331_s5 + $0xbb4] ss:$48 sps:$4 sm:$0xff]  }
 0x430   : > { %5944 = vmatprep.mubr.bf16.mxu0 %v11783_v6  ;;  %v11743_v6 = vld [vmem:[%s17331_s5 + $0xbb0] ss:$48 sps:$4 sm:$0xff]  }
 0x435   : > { %6587 = vmatmul.mubr.bf16.gmra.mrb[140].mxu1 %v11695_v13  ;;  %v11813_v13 = vld [vmem:[%s17331_s5 + $0x480] ss:$48 sps:$4 sm:$0xff]  }
 0x436   : > { %6594 = vmatprep.mubr.bf16.mxu1 %v11696_v22  ;;  %v11815_v22 = vld [vmem:[%s17331_s5 + $0x484] ss:$48 sps:$4 sm:$0xff]  }
 0x437   : > { %5945 = vmatmul.mubr.bf16.gmra.mrb[244].mxu0 %v11785_v30  ;;  %v11746_v30 = vld [vmem:[%s17331_s5 + $0x1c] ss:$48 sps:$4 sm:$0xff]  }
 0x438   : > { %5952 = vmatprep.mubr.bf16.mxu0 %v11789_v32  ;;  %v11744_v32 = vld [vmem:[%s17331_s5 + $0x18] ss:$48 sps:$4 sm:$0xff]  }
 0x43d   : > { %6595 = vmatmul.mubr.bf16.gmra.mrb[144].mxu1 %v11698_v57  ;;  %v11734_v57 = vld [vmem:[%s17331_s5 + $0xa90] ss:$48 sps:$4 sm:$0xff]  }
 0x43e   : > { %6602 = vmatprep.mubr.bf16.mxu1 %v11699_v2  ;;  %v11735_v2 = vld [vmem:[%s17331_s5 + $0xaf4] ss:$48 sps:$4 sm:$0xff]  }
 0x43f   : > { %5953 = vmatmul.mubr.bf16.gmra.mrb[248].mxu0 %v11791_v58  ;;  %v11750_v58 = vld [vmem:[%s17331_s5 + $0x7c] ss:$48 sps:$4 sm:$0xff]  }
 0x440   : > { %5960 = vmatprep.mubr.bf16.mxu0 %v11795_v41  ;;  %v1764_v41 = vld [vmem:[%s17330_s4 + $0x450] sm:$0xff] }
 0x445   : > { %6603 = vmatmul.mubr.bf16.gmra.mrb[148].mxu1 %v11701_v20  ;;  %v1760_v20 = vld [vmem:[%s17330_s4 + $0x430] sm:$0xff] }
 0x446   : > { %6610 = vmatprep.mubr.bf16.mxu1 %v11702_v34  ;;  %v10744_v34 = vpop.f32.mrb[156].mxu0 }
 0x447   : > { %5961 = vmatmul.mubr.bf16.gmra.mrb[252].mxu0 %v11797_v40  ;;  %v14349_v18 = vadd.f32 %v10744_v34, %v1760_v20  ;;  %v3153_v59 = vpop.f32.mrb[157].mxu0 }
 0x448   : > { %5968 = vmatprep.mubr.bf16.mxu0 %v11803_v33  ;;  %v11849_v33 = vld [vmem:[%s17331_s5 + $0x6c0] ss:$48 sps:$4 sm:$0xff]  }
 0x44d   : > { %6611 = vmatmul.mubr.bf16.gmra.mrb[24].mxu1 %v11704_v28  ;;  %v1761_v28 = vld [vmem:[%s17330_s4 + $0x438] sm:$0xff] }
 0x44e   : > { %6618 = vmatprep.mubr.bf16.mxu1 %v11705_v62  ;;  %v10745_v62 = vpop.f32.mrb[158].mxu0 }
 0x44f   : > { %5969 = vmatmul.mubr.bf16.gmra.mrb[0].mxu0 %v11801_v63  ;;  %v14354_v7 = vadd.f32 %v10745_v62, %v1761_v28  ;;  %v1763_v63 = vld [vmem:[%s17330_s4 + $0x448] sm:$0xff] }
 0x450   : > { %5976 = vmatprep.mubr.bf16.mxu0 %v11809_v46  ;;  %v11768_v46 = vld [vmem:[%s17331_s5 + $0x19c] ss:$48 sps:$4 sm:$0xff]   ;;  %v11776_v62 = vld [vmem:[%s17331_s5 + $0x1f8] ss:$48 sps:$4 sm:$0xff]  }
 0x451   : > { %v3843_v11 = vpack.c.bf16 %v14354_v7, %v14349_v18  ;;  %v1769_v18 = vld [vmem:[%s17330_s4 + $0x478] sm:$0xff]  ;;  %v1766_v7 = vld [vmem:[%s17330_s4 + $0x460] sm:$0xff] }
 0x455   : > { %6619 = vmatmul.mubr.bf16.gmra.mrb[28].mxu1 %v11707_v38  ;;  %v1758_v38 = vld [vmem:[%s17330_s4 + $0x420] sm:$0xff] }
 0x456   : > { %6626 = vmatprep.mubr.bf16.mxu1 %v11708_v39  ;;  %v11738_v39 = vld [vmem:[%s17331_s5 + $0xb54] ss:$48 sps:$4 sm:$0xff]   ;;  %v3154_v4 = vadd.f32 %v3153_v59, %v1758_v38 }
 0x457   : > { %5977 = vmatmul.mubr.bf16.gmra.mrb[4].mxu0 %v11807_v17  ;;  %v11764_v17 = vld [vmem:[%s17331_s5 + $0x138] ss:$48 sps:$4 sm:$0xff]  }
 0x458   : > { %5984 = vmatprep.mubr.bf16.mxu0 %v11815_v22  ;;  %v11774_v22 = vld [vmem:[%s17331_s5 + $0x1fc] ss:$48 sps:$4 sm:$0xff]  }
 0x45d   : > { %6627 = vmatmul.mubr.bf16.gmra.mrb[32].mxu1 %v11710_v43  ;;  %v3156_v43 = vpop.f32.mrb[159].mxu0 }
 0x45e   : > { %6634 = vmatprep.mubr.bf16.mxu1 %v11711_v15  ;;  %v1759_v15 = vld [vmem:[%s17330_s4 + $0x428] sm:$0xff]  ;;  %v10748_v40 = vpop.f32.mrb[160].mxu0 }
 0x45f   : > { %5985 = vmatmul.mubr.bf16.gmra.mrb[8].mxu0 %v11813_v13  ;;  %v3178_v54 = vadd.f32 %v10748_v40, %v1764_v41  ;;  %v3169_v31 = vpop.f32.mrb[161].mxu0  ;;  %v11770_v13 = vld [vmem:[%s17331_s5 + $0x198] ss:$48 sps:$4 sm:$0xff]  }
 0x460   : > { %5992 = vmatprep.mubr.bf16.mxu0 %v11821_v49  ;;  %v10749_v50 = vpop.f32.mrb[162].mxu0  ;;  %v3170_v55 = vadd.f32 %v3169_v31, %v1762_v60 }
 0x461   : > { %v3181_v16 = vadd.f32 %v10749_v50, %v1765_v5  ;;  %v3172_v45 = vpop.f32.mrb[163].mxu0  ;;  %v11800_v50 = vld [vmem:[%s17331_s5 + $0x378] ss:$48 sps:$4 sm:$0xff]  }
 0x462   : > { %v3173_v3 = vadd.f32 %v3172_v45, %v1763_v63  ;;  %v10752_v49 = vpop.f32.mrb[164].mxu0  ;;  %v11897_v45 = vld [vmem:[%s17331_s5 + $0x9c0] ss:$48 sps:$4 sm:$0xff]   ;;  %v11899_v63 = vld [vmem:[%s17331_s5 + $0x9c4] ss:$48 sps:$4 sm:$0xff]  }
 0x463   : > { %v3845_v36 = vpack.c.bf16 %v3181_v16, %v3178_v54  ;;  %v3185_v34 = vpop.f32.mrb[165].mxu0  ;;  %v1773_v54 = vld [vmem:[%s17330_s4 + $0x498] sm:$0xff]  ;;  %v1770_v16 = vld [vmem:[%s17330_s4 + $0x480] sm:$0xff] }
 0x464   : > { %v3844_v47 = vpack.c.bf16 %v3173_v3, %v3170_v55  ;;  %v10753_v59 = vpop.f32.mrb[166].mxu0  ;;  %v1771_v55 = vld [vmem:[%s17330_s4 + $0x488] sm:$0xff] }
 0x465   : > { %6635 = vmatmul.mubr.bf16.gmra.mrb[36].mxu1 %v11713_v61  ;;  %v3157_v61 = vadd.f32 %v3156_v43, %v1759_v15  ;;  %v3197_v28 = vadd.f32 %v10753_v59, %v1769_v18  ;;  %v11873_v43 = vld [vmem:[%s17331_s5 + $0x840] ss:$48 sps:$4 sm:$0xff]   ;;  %v11875_v15 = vld [vmem:[%s17331_s5 + $0x844] ss:$48 sps:$4 sm:$0xff]   ;;  %v11806_v3 = vld [vmem:[%s17331_s5 + $0x3d8] ss:$48 sps:$4 sm:$0xff]  }
 0x466   : > { %6642 = vmatprep.mubr.bf16.mxu1 %v11714_v56  ;;  %v11818_v59 = vld [vmem:[%s17331_s5 + $0x498] ss:$48 sps:$4 sm:$0xff]  }
 0x467   : > { %5993 = vmatmul.mubr.bf16.gmra.mrb[12].mxu0 %v11819_v8  ;;  %v3842_v56 = vpack.c.bf16 %v3157_v61, %v3154_v4  ;;  %v1768_v8 = vld [vmem:[%s17330_s4 + $0x470] sm:$0xff]  ;;  %v1767_v4 = vld [vmem:[%s17330_s4 + $0x468] sm:$0xff] }
 0x468   : > { %6000 = vmatprep.mubr.bf16.mxu0 %v11827_v42  ;;  %v3194_v20 = vadd.f32 %v10752_v49, %v1768_v8  ;;  %v11782_v61 = vld [vmem:[%s17331_s5 + $0x258] ss:$48 sps:$4 sm:$0xff]  }
 0x469   : > { %v1775_v8 = vld [vmem:[%s17330_s4 + $0x4a8] sm:$0xff] }
 0x46a   : > { %v3847_v38 = vpack.c.bf16 %v3197_v28, %v3194_v20 }
 0x46d   : > { %6643 = vmatmul.mubr.bf16.gmra.mrb[40].mxu1 %v11716_v23  ;;  %v11831_v23 = vld [vmem:[%s17331_s5 + $0x5a0] ss:$48 sps:$4 sm:$0xff]  }
 0x46e   : > { %6650 = vmatprep.mubr.bf16.mxu1 %v11717_v48  ;;  %v11833_v48 = vld [vmem:[%s17331_s5 + $0x5a4] ss:$48 sps:$4 sm:$0xff]  }
 0x46f   : > { %6001 = vmatmul.mubr.bf16.gmra.mrb[16].mxu0 %v11825_v21 }
 0x470   : > { %6008 = vmatprep.mubr.bf16.mxu0 %v11833_v48  ;;  %v11792_v48 = vld [vmem:[%s17331_s5 + $0x31c] ss:$48 sps:$4 sm:$0xff]  }
 0x475   : > { %6651 = vmatmul.mubr.bf16.gmra.mrb[44].mxu1 %v11719_v52  ;;  %v11837_v52 = vld [vmem:[%s17331_s5 + $0x600] ss:$48 sps:$4 sm:$0xff]  }
 0x476   : > { %6658 = vmatprep.mubr.bf16.mxu1 %v11720_v51  ;;  %v11839_v51 = vld [vmem:[%s17331_s5 + $0x604] ss:$48 sps:$4 sm:$0xff]  }
 0x477   : > { %6009 = vmatmul.mubr.bf16.gmra.mrb[20].mxu0 %v11831_v23  ;;  %v11788_v23 = vld [vmem:[%s17331_s5 + $0x2b8] ss:$48 sps:$4 sm:$0xff]  }
 0x478   : > { %6016 = vmatprep.mubr.bf16.mxu0 %v11839_v51  ;;  %v11798_v51 = vld [vmem:[%s17331_s5 + $0x37c] ss:$48 sps:$4 sm:$0xff]  }
 0x47d   : > { %6659 = vmatmul.mubr.bf16.gmra.mrb[48].mxu1 %v11722_v37  ;;  %v11843_v37 = vld [vmem:[%s17331_s5 + $0x660] ss:$48 sps:$4 sm:$0xff]  }
 0x47e   : > { %6666 = vmatprep.mubr.bf16.mxu1 %v11723_v24  ;;  %v11845_v24 = vld [vmem:[%s17331_s5 + $0x664] ss:$48 sps:$4 sm:$0xff]  }
 0x47f   : > { %6017 = vmatmul.mubr.bf16.gmra.mrb[24].mxu0 %v11837_v52  ;;  %v11794_v52 = vld [vmem:[%s17331_s5 + $0x318] ss:$48 sps:$4 sm:$0xff]  }
 0x480   : > { %6024 = vmatprep.mubr.bf16.mxu0 %v11845_v24 }
 0x485   : > { %6667 = vmatmul.mubr.bf16.gmra.mrb[52].mxu1 %v11725_v35  ;;  %v11752_v35 = vld [vmem:[%s17331_s5 + $0x78] ss:$48 sps:$4 sm:$0xff]  }
 0x486   : > { %6674 = vmatprep.mubr.bf16.mxu1 %v11726_v27  ;;  %v11756_v27 = vld [vmem:[%s17331_s5 + $0xdc] ss:$48 sps:$4 sm:$0xff]  }
 0x487   : > { %6025 = vmatmul.mubr.bf16.gmra.mrb[28].mxu0 %v11843_v37  ;;  %v1772_v37 = vld [vmem:[%s17330_s4 + $0x490] sm:$0xff] }
 0x488   : > { %6032 = vmatprep.mubr.bf16.mxu0 %v11851_v1 }
 0x48d   : > { %6675 = vmatmul.mubr.bf16.gmra.mrb[56].mxu1 %v11728_v9  ;;  %v11855_v9 = vld [vmem:[%s17331_s5 + $0x720] ss:$48 sps:$4 sm:$0xff]  }
 0x48e   : > { %6682 = vmatprep.mubr.bf16.mxu1 %v11729_v10  ;;  %v11857_v10 = vld [vmem:[%s17331_s5 + $0x724] ss:$48 sps:$4 sm:$0xff]  }
 0x48f   : > { %6033 = vmatmul.mubr.bf16.gmra.mrb[32].mxu0 %v11849_v33 }
 0x490   : > { %6040 = vmatprep.mubr.bf16.mxu0 %v11857_v10  ;;  %v11816_v10 = vld [vmem:[%s17331_s5 + $0x49c] ss:$48 sps:$4 sm:$0xff]  }
 0x495   : > { %6683 = vmatmul.mubr.bf16.gmra.mrb[60].mxu1 %v11731_v14  ;;  %v11861_v14 = vld [vmem:[%s17331_s5 + $0x780] ss:$48 sps:$4 sm:$0xff]  }
 0x496   : > { %6690 = vmatprep.mubr.bf16.mxu1 %v11732_v26  ;;  %v11863_v26 = vld [vmem:[%s17331_s5 + $0x784] ss:$48 sps:$4 sm:$0xff]  }
 0x497   : > { %6041 = vmatmul.mubr.bf16.gmra.mrb[36].mxu0 %v11855_v9  ;;  %v11812_v9 = vld [vmem:[%s17331_s5 + $0x438] ss:$48 sps:$4 sm:$0xff]  }
 0x498   : > { %6048 = vmatprep.mubr.bf16.mxu0 %v11863_v26  ;;  %v11911_v26 = vld [vmem:[%s17331_s5 + $0xa84] ss:$48 sps:$4 sm:$0xff]  }
 0x49d   : > { %6691 = vmatmul.mubr.bf16.gmra.mrb[64].mxu1 %v11734_v57  ;;  %v11867_v57 = vld [vmem:[%s17331_s5 + $0x7e0] ss:$48 sps:$4 sm:$0xff]  }
 0x49e   : > { %6698 = vmatprep.mubr.bf16.mxu1 %v11735_v2  ;;  %v11869_v2 = vld [vmem:[%s17331_s5 + $0x7e4] ss:$48 sps:$4 sm:$0xff]  }
 0x49f   : > { %6049 = vmatmul.mubr.bf16.gmra.mrb[40].mxu0 %v11861_v14  ;;  %v11909_v14 = vld [vmem:[%s17331_s5 + $0xa80] ss:$48 sps:$4 sm:$0xff]  }
 0x4a0   : > { %6056 = vmatprep.mubr.bf16.mxu0 %v11869_v2  ;;  %v1777_v2 = vld [vmem:[%s17330_s4 + $0x4b8] sm:$0xff] }
 0x4a5   : > { %6699 = vmatmul.mubr.bf16.gmra.mrb[68].mxu1 %v11737_v44  ;;  %v11780_v44 = vld [vmem:[%s17331_s5 + $0x25c] ss:$48 sps:$4 sm:$0xff]  }
 0x4a6   : > { %6706 = vmatprep.mubr.bf16.mxu1 %v11738_v39  ;;  %v3186_v39 = vadd.f32 %v3185_v34, %v1766_v7 }
 0x4a7   : > { %6057 = vmatmul.mubr.bf16.gmra.mrb[44].mxu0 %v11867_v57  ;;  %v1774_v57 = vld [vmem:[%s17330_s4 + $0x4a0] sm:$0xff] }
 0x4a8   : > { %6064 = vmatprep.mubr.bf16.mxu0 %v11875_v15 }
 0x4ad   : > { %6707 = vmatmul.mubr.bf16.gmra.mrb[72].mxu1 %v11740_v12  ;;  %v11879_v12 = vld [vmem:[%s17331_s5 + $0x8a0] ss:$48 sps:$4 sm:$0xff]  }
 0x4ae   : > { %6714 = vmatprep.mubr.bf16.mxu1 %v11741_v19  ;;  %v11881_v19 = vld [vmem:[%s17331_s5 + $0x8a4] ss:$48 sps:$4 sm:$0xff]  }
 0x4af   : > { %6065 = vmatmul.mubr.bf16.gmra.mrb[48].mxu0 %v11873_v43 }
 0x4b0   : > { %6072 = vmatprep.mubr.bf16.mxu0 %v11881_v19 }
 0x4b5   : > { %6715 = vmatmul.mubr.bf16.gmra.mrb[76].mxu1 %v11743_v6  ;;  %v11885_v6 = vld [vmem:[%s17331_s5 + $0x900] ss:$48 sps:$4 sm:$0xff]  }
 0x4b6   : > { %6755 = vmatprep.mubr.bf16.mxu1 %v11746_v30  ;;  %v11887_v30 = vld [vmem:[%s17331_s5 + $0x904] ss:$48 sps:$4 sm:$0xff]  }
 0x4b7   : > { %6073 = vmatmul.mubr.bf16.gmra.mrb[52].mxu0 %v11879_v12 }
 0x4b8   : > { %6080 = vmatprep.mubr.bf16.mxu0 %v11887_v30  ;;  %v11828_v30 = vld [vmem:[%s17331_s5 + $0x55c] ss:$48 sps:$4 sm:$0xff]  }
 0x4bd   : > { %6756 = vmatmul.mubr.bf16.vlgmr.msra.gmra.mrb[80].mxu1 %v11744_v32  ;;  %v11891_v32 = vld [vmem:[%s17331_s5 + $0x960] ss:$48 sps:$4 sm:$0xff]  }
 0x4be   : > { %6763 = vmatprep.mubr.bf16.mxu1 %v11750_v58  ;;  %7013 = vmatpush1.bf16.msra.mxu1 %v3840_v25  ;;  %v11762_v25 = vld [vmem:[%s17331_s5 + $0x13c] ss:$48 sps:$4 sm:$0xff]   ;;  %v11893_v58 = vld [vmem:[%s17331_s5 + $0x964] ss:$48 sps:$4 sm:$0xff]  }
 0x4bf   : > { %7014 = vmatprep.subr.bf16.mxu1 %v12435_v0  ;;  %6081 = vmatmul.mubr.bf16.gmra.mrb[56].mxu0 %v11885_v6 }
 0x4c0   : > { %6088 = vmatprep.mubr.bf16.mxu0 %v11893_v58 }
 0x4c2   : > { %7015 = vmatpush1.bf16.msra.mxu1 %v3841_v29  ;;  %v11758_v29 = vld [vmem:[%s17331_s5 + $0xd8] ss:$48 sps:$4 sm:$0xff]  }
 0x4c3   : > { %7016 = vmatprep.subr.bf16.mxu1 %v12435_v0 }
 0x4c5   : > { %6764 = vmatmul.mubr.bf16.gmra.mrb[84].mxu1 %v11752_v35  ;;  %v11804_v35 = vld [vmem:[%s17331_s5 + $0x3dc] ss:$48 sps:$4 sm:$0xff]  }
 0x4c6   : > { %6771 = vmatprep.mubr.bf16.mxu1 %v11756_v27  ;;  %7017 = vmatpush1.bf16.msra.mxu1 %v3842_v56  ;;  %v11786_v56 = vld [vmem:[%s17331_s5 + $0x2bc] ss:$48 sps:$4 sm:$0xff]  }
 0x4c7   : > { %7018 = vmatprep.subr.bf16.mxu1 %v12435_v0  ;;  %6089 = vmatmul.mubr.bf16.gmra.mrb[60].mxu0 %v11891_v32  ;;  %v1784_v32 = vld [vmem:[%s17330_s4 + $0x4f0] sm:$0xff] }
 0x4c8   : > { %6096 = vmatprep.mubr.bf16.mxu0 %v11899_v63 }
 0x4ca   : > { %7019 = vmatpush1.bf16.msra.mxu1 %v3843_v11  ;;  %v3188_v11 = vpop.f32.mrb[167].mxu0 }
 0x4cb   : > { %7020 = vmatprep.subr.bf16.mxu1 %v12435_v0  ;;  %v3189_v21 = vadd.f32 %v3188_v11, %v1767_v4  ;;  %v10756_v24 = vpop.f32.mrb[168].mxu0  ;;  %v11915_v11 = vld [vmem:[%s17331_s5 + $0xae0] ss:$48 sps:$4 sm:$0xff]   ;;  %v11917_v4 = vld [vmem:[%s17331_s5 + $0xae4] ss:$48 sps:$4 sm:$0xff]  }
 0x4cc   : > { %v3210_v41 = vadd.f32 %v10756_v24, %v1772_v37  ;;  %v3201_v40 = vpop.f32.mrb[169].mxu0  ;;  %v11921_v37 = vld [vmem:[%s17331_s5 + $0xb40] ss:$48 sps:$4 sm:$0xff]   ;;  %v11923_v24 = vld [vmem:[%s17331_s5 + $0xb44] ss:$48 sps:$4 sm:$0xff]  }
 0x4cd   : > { %6772 = vmatmul.mubr.bf16.gmra.mrb[88].mxu1 %v11758_v29  ;;  %v3846_v42 = vpack.c.bf16 %v3189_v21, %v3186_v39  ;;  %v10757_v31 = vpop.f32.mrb[170].mxu0  ;;  %v3202_v27 = vadd.f32 %v3201_v40, %v1770_v16  ;;  %v11903_v29 = vld [vmem:[%s17331_s5 + $0xa20] ss:$48 sps:$4 sm:$0xff]  }
 0x4ce   : > { %6779 = vmatprep.mubr.bf16.mxu1 %v11762_v25  ;;  %7021 = vmatpush1.bf16.msra.mxu1 %v3844_v47  ;;  %v3213_v5 = vadd.f32 %v10757_v31, %v1773_v54  ;;  %v11810_v47 = vld [vmem:[%s17331_s5 + $0x43c] ss:$48 sps:$4 sm:$0xff]   ;;  %v11905_v25 = vld [vmem:[%s17331_s5 + $0xa24] ss:$48 sps:$4 sm:$0xff]  }
 0x4cf   : > { %7022 = vmatprep.subr.bf16.mxu1 %v12435_v0  ;;  %6097 = vmatmul.mubr.bf16.gmra.mrb[64].mxu0 %v11897_v45  ;;  %v1778_v21 = vld [vmem:[%s17330_s4 + $0x4c0] sm:$0xff]  ;;  %v1785_v31 = vld [vmem:[%s17330_s4 + $0x4f8] sm:$0xff] }
 0x4d0   : > { %v3849_v60 = vpack.c.bf16 %v3213_v5, %v3210_v41  ;;  %6104 = vmatprep.mubr.bf16.mxu0 %v11905_v25  ;;  %v1782_v54 = vld [vmem:[%s17330_s4 + $0x4e0] sm:$0xff]  ;;  %v1783_v5 = vld [vmem:[%s17330_s4 + $0x4e8] sm:$0xff] }
 0x4d1   : > { %v11935_v25 = vld [vmem:[%s17331_s5 + $0xc] ss:$48 sps:$4 sm:$0xff]  }
 0x4d2   : > { %7023 = vmatpush1.bf16.msra.mxu1 %v3845_v36  ;;  %v3204_v36 = vpop.f32.mrb[171].mxu0 }
 0x4d3   : > { %7024 = vmatprep.subr.bf16.mxu1 %v12435_v0  ;;  %v3205_v33 = vadd.f32 %v3204_v36, %v1771_v55  ;;  %v11834_v55 = vld [vmem:[%s17331_s5 + $0x5bc] ss:$48 sps:$4 sm:$0xff]  }
 0x4d5   : > { %6780 = vmatmul.mubr.bf16.gmra.mrb[92].mxu1 %v11764_v17  ;;  %v3848_v1 = vpack.c.bf16 %v3205_v33, %v3202_v27  ;;  %v1776_v17 = vld [vmem:[%s17330_s4 + $0x4b0] sm:$0xff]  ;;  %v11830_v27 = vld [vmem:[%s17331_s5 + $0x558] ss:$48 sps:$4 sm:$0xff]  }
 0x4d6   : > { %6787 = vmatprep.mubr.bf16.mxu1 %v11768_v46  ;;  %7025 = vmatpush1.bf16.msra.mxu1 %v3846_v42  ;;  %v10760_v46 = vpop.f32.mrb[172].mxu0  ;;  %v1781_v42 = vld [vmem:[%s17330_s4 + $0x4d8] sm:$0xff]  ;;  %v11927_v33 = vld [vmem:[%s17331_s5 + $0xba0] ss:$48 sps:$4 sm:$0xff]  }
 0x4d7   : > { %7026 = vmatprep.subr.bf16.mxu1 %v12435_v0  ;;  %6105 = vmatmul.mubr.bf16.gmra.mrb[68].mxu0 %v11903_v29  ;;  %v11933_v29 = vld [vmem:[%s17331_s5 + $0x8] ss:$48 sps:$4 sm:$0xff]  }
 0x4d8   : > { %6112 = vmatprep.mubr.bf16.mxu0 %v11911_v26  ;;  %v11852_v26 = vld [vmem:[%s17331_s5 + $0x6dc] ss:$48 sps:$4 sm:$0xff]  }
 0x4da   : > { %7027 = vmatpush1.bf16.msra.mxu1 %v3847_v38  ;;  %v1780_v38 = vld [vmem:[%s17330_s4 + $0x4d0] sm:$0xff] }
 0x4db   : > { %7028 = vmatprep.subr.bf16.mxu1 %v12435_v0 }
 0x4dd   : > { %6788 = vmatmul.mubr.bf16.gmra.mrb[96].mxu1 %v11770_v13  ;;  %v3226_v13 = vadd.f32 %v10760_v46, %v1776_v17  ;;  %v11939_v17 = vld [vmem:[%s17331_s5 + $0x6c] ss:$48 sps:$4 sm:$0xff]   ;;  %v11941_v46 = vld [vmem:[%s17331_s5 + $0x68] ss:$48 sps:$4 sm:$0xff]  }
 0x4de   : > { %6795 = vmatprep.mubr.bf16.mxu1 %v11774_v22  ;;  %7029 = vmatpush1.bf16.msra.mxu1 %v3848_v1  ;;  %v3217_v22 = vpop.f32.mrb[173].mxu0  ;;  %v11929_v1 = vld [vmem:[%s17331_s5 + $0xba4] ss:$48 sps:$4 sm:$0xff]  }
 0x4df   : > { %7030 = vmatprep.subr.bf16.mxu1 %v12435_v0  ;;  %v3218_v49 = vadd.f32 %v3217_v22, %v1774_v57  ;;  %v10761_v20 = vpop.f32.mrb[174].mxu0  ;;  %6113 = vmatmul.mubr.bf16.gmra.mrb[72].mxu0 %v11909_v14  ;;  %v11848_v14 = vld [vmem:[%s17331_s5 + $0x678] ss:$48 sps:$4 sm:$0xff]  }
 0x4e0   : > { %v3229_v34 = vadd.f32 %v10761_v20, %v1777_v2  ;;  %v3220_v18 = vpop.f32.mrb[175].mxu0  ;;  %6120 = vmatprep.mubr.bf16.mxu0 %v11917_v4  ;;  %v11947_v22 = vld [vmem:[%s17331_s5 + $0xc8] ss:$48 sps:$4 sm:$0xff]   ;;  %v11858_v2 = vld [vmem:[%s17331_s5 + $0x73c] ss:$48 sps:$4 sm:$0xff]  }
 0x4e1   : > { %v3221_v28 = vadd.f32 %v3220_v18, %v1775_v8  ;;  %v10764_v39 = vpop.f32.mrb[176].mxu0  ;;  %v11854_v57 = vld [vmem:[%s17331_s5 + $0x6d8] ss:$48 sps:$4 sm:$0xff]   ;;  %v11951_v8 = vld [vmem:[%s17331_s5 + $0x12c] ss:$48 sps:$4 sm:$0xff]  }
 0x4e2   : > { %7031 = vmatpush1.bf16.msra.mxu1 %v3849_v60  ;;  %v3851_v7 = vpack.c.bf16 %v3229_v34, %v3226_v13  ;;  %v3242_v43 = vadd.f32 %v10764_v39, %v1780_v38  ;;  %v3233_v15 = vpop.f32.mrb[177].mxu0  ;;  %v11945_v13 = vld [vmem:[%s17331_s5 + $0xcc] ss:$48 sps:$4 sm:$0xff]   ;;  %v11860_v20 = vld [vmem:[%s17331_s5 + $0x738] ss:$48 sps:$4 sm:$0xff]  }
 0x4e3   : > { %7032 = vmatprep.subr.bf16.mxu1 %v12435_v0  ;;  %v10765_v12 = vpop.f32.mrb[178].mxu0  ;;  %v11864_v34 = vld [vmem:[%s17331_s5 + $0x79c] ss:$48 sps:$4 sm:$0xff]   ;;  %v11872_v38 = vld [vmem:[%s17331_s5 + $0x7f8] ss:$48 sps:$4 sm:$0xff]  }
 0x4e4   : > { %v3245_v19 = vadd.f32 %v10765_v12, %v1781_v42  ;;  %v11957_v18 = vld [vmem:[%s17331_s5 + $0x18c] ss:$48 sps:$4 sm:$0xff]   ;;  %v11971_v4 = vld [vmem:[%s17331_s5 + $0x248] ss:$48 sps:$4 sm:$0xff]  }
 0x4e5   : > { %6796 = vmatmul.mubr.bf16.gmra.mrb[100].mxu1 %v11776_v62  ;;  %v11822_v62 = vld [vmem:[%s17331_s5 + $0x4fc] ss:$48 sps:$4 sm:$0xff]   ;;  %v11977_v42 = vld [vmem:[%s17331_s5 + $0x2a8] ss:$48 sps:$4 sm:$0xff]  }
 0x4e6   : > { %6803 = vmatprep.mubr.bf16.mxu1 %v11780_v44  ;;  %v3850_v44 = vpack.c.bf16 %v3221_v28, %v3218_v49  ;;  %v11953_v49 = vld [vmem:[%s17331_s5 + $0x128] ss:$48 sps:$4 sm:$0xff]   ;;  %v11876_v39 = vld [vmem:[%s17331_s5 + $0x85c] ss:$48 sps:$4 sm:$0xff]  }
 0x4e7   : > { %6121 = vmatmul.mubr.bf16.gmra.mrb[76].mxu0 %v11915_v11  ;;  %v11866_v28 = vld [vmem:[%s17331_s5 + $0x798] ss:$48 sps:$4 sm:$0xff]   ;;  %v11969_v11 = vld [vmem:[%s17331_s5 + $0x24c] ss:$48 sps:$4 sm:$0xff]  }
 0x4e8   : > { %7033 = vmatpush1.bf16.msra.mxu1 %v3850_v44  ;;  %6128 = vmatprep.mubr.bf16.mxu0 %v11923_v24  ;;  %v11965_v44 = vld [vmem:[%s17331_s5 + $0x1e8] ss:$48 sps:$4 sm:$0xff]   ;;  %v11981_v12 = vld [vmem:[%s17331_s5 + $0x30c] ss:$48 sps:$4 sm:$0xff]  }
 0x4e9   : > { %7034 = vmatprep.subr.bf16.mxu1 %v12435_v0 }
 0x4ec   : > { %7035 = vmatpush1.bf16.msra.mxu1 %v3851_v7  ;;  %v11963_v7 = vld [vmem:[%s17331_s5 + $0x1ec] ss:$48 sps:$4 sm:$0xff]  }
 0x4ed   : > { %6804 = vmatmul.mubr.bf16.gmra.mrb[104].mxu1 %v11782_v61  ;;  %v1779_v61 = vld [vmem:[%s17330_s4 + $0x4c8] sm:$0xff]  ;;  %7036 = vmatprep.subr.bf16.mxu1 %v12435_v0 }
 0x4ee   : > { %6811 = vmatprep.mubr.bf16.mxu1 %v11786_v56  ;;  %v3234_v56 = vadd.f32 %v3233_v15, %v1778_v21  ;;  %v11882_v15 = vld [vmem:[%s17331_s5 + $0x8bc] ss:$48 sps:$4 sm:$0xff]  }
 0x4ef   : > { %6129 = vmatmul.mubr.bf16.gmra.mrb[80].mxu0 %v11921_v37  ;;  %v11975_v21 = vld [vmem:[%s17331_s5 + $0x2ac] ss:$48 sps:$4 sm:$0xff]  }
 0x4f0   : > { %6136 = vmatprep.mubr.bf16.mxu0 %v11929_v1  ;;  %v1789_v37 = vld [vmem:[%s17330_s4 + $0x518] sm:$0xff] }
 0x4f1   : > { %v12001_v1 = vld [vmem:[%s17331_s5 + $0x42c] ss:$48 sps:$4 sm:$0xff]  }
 0x4f5   : > { %6812 = vmatmul.mubr.bf16.gmra.mrb[108].mxu1 %v11788_v23  ;;  %v3236_v23 = vpop.f32.mrb[179].mxu0 }
 0x4f6   : > { %6819 = vmatprep.mubr.bf16.mxu1 %v11792_v48  ;;  %v11824_v48 = vld [vmem:[%s17331_s5 + $0x4f8] ss:$48 sps:$4 sm:$0xff]   ;;  %v3237_v6 = vadd.f32 %v3236_v23, %v1779_v61  ;;  %v10768_v58 = vpop.f32.mrb[180].mxu0 }
 0x4f7   : > { %v3258_v41 = vadd.f32 %v10768_v58, %v1784_v32  ;;  %v3249_v40 = vpop.f32.mrb[181].mxu0  ;;  %6137 = vmatmul.mubr.bf16.gmra.mrb[84].mxu0 %v11927_v33  ;;  %v11884_v61 = vld [vmem:[%s17331_s5 + $0x8b8] ss:$48 sps:$4 sm:$0xff]  }
 0x4f8   : > { %v10769_v16 = vpop.f32.mrb[182].mxu0  ;;  %6177 = vmatprep.mubr.bf16.mxu0 %v11935_v25  ;;  %v11890_v23 = vld [vmem:[%s17331_s5 + $0x918] ss:$48 sps:$4 sm:$0xff]   ;;  %v12007_v25 = vld [vmem:[%s17331_s5 + $0x48c] ss:$48 sps:$4 sm:$0xff]  }
 0x4f9   : > { %v3252_v60 = vpop.f32.mrb[183].mxu0  ;;  %v11999_v33 = vld [vmem:[%s17331_s5 + $0x428] ss:$48 sps:$4 sm:$0xff]  }
 0x4fa   : > { %v3253_v36 = vadd.f32 %v3252_v60, %v1783_v5  ;;  %v11993_v60 = vld [vmem:[%s17331_s5 + $0x3c8] ss:$48 sps:$4 sm:$0xff]  }
 0x4fd   : > { %6820 = vmatmul.mubr.bf16.gmra.mrb[112].mxu1 %v11794_v52  ;;  %v3853_v52 = vpack.c.bf16 %v3245_v19, %v3242_v43  ;;  %v11878_v43 = vld [vmem:[%s17331_s5 + $0x858] ss:$48 sps:$4 sm:$0xff]  }
 0x4fe   : > { %6827 = vmatprep.mubr.bf16.mxu1 %v11798_v51  ;;  %v3852_v51 = vpack.c.bf16 %v3237_v6, %v3234_v56  ;;  %v11888_v56 = vld [vmem:[%s17331_s5 + $0x91c] ss:$48 sps:$4 sm:$0xff]   ;;  %v11983_v19 = vld [vmem:[%s17331_s5 + $0x308] ss:$48 sps:$4 sm:$0xff]  }
 0x4ff   : > { %6178 = vmatmul.mubr.bf16.vlgmr.msra.gmra.mrb[216].mxu0 %v11933_v29  ;;  %v11987_v6 = vld [vmem:[%s17331_s5 + $0x36c] ss:$48 sps:$4 sm:$0xff]   ;;  %v12005_v29 = vld [vmem:[%s17331_s5 + $0x488] ss:$48 sps:$4 sm:$0xff]  }
 0x500   : > { %7037 = vmatpush1.bf16.msra.mxu1 %v3852_v51  ;;  %6185 = vmatprep.mubr.bf16.mxu0 %v11939_v17  ;;  %v10772_v51 = vpop.f32.mrb[184].mxu0  ;;  %v12011_v17 = vld [vmem:[%s17331_s5 + $0x4e8] ss:$48 sps:$4 sm:$0xff]  }
 0x501   : > { %7038 = vmatprep.subr.bf16.mxu1 %v12435_v0  ;;  %v3265_v58 = vpop.f32.mrb[185].mxu0 }
 0x502   : > { %v10773_v24 = vpop.f32.mrb[186].mxu0 }
 0x504   : > { %7039 = vmatpush1.bf16.msra.mxu1 %v3853_v52  ;;  %v1788_v52 = vld [vmem:[%s17330_s4 + $0x510] sm:$0xff] }
 0x505   : > { %6828 = vmatmul.mubr.bf16.gmra.mrb[116].mxu1 %v11800_v50  ;;  %v3250_v50 = vadd.f32 %v3249_v40, %v1782_v54  ;;  %7040 = vmatprep.subr.bf16.mxu1 %v12435_v0  ;;  %v14800_v32 = vadd.f32 %v10772_v51, %v1788_v52  ;;  %v11896_v40 = vld [vmem:[%s17331_s5 + $0x978] ss:$48 sps:$4 sm:$0xff]   ;;  %v1786_v54 = vld [vmem:[%s17330_s4 + $0x500] sm:$0xff] }
 0x506   : > { %6835 = vmatprep.mubr.bf16.mxu1 %v11804_v35  ;;  %v3261_v35 = vadd.f32 %v10769_v16, %v1785_v31  ;;  %v11900_v31 = vld [vmem:[%s17331_s5 + $0x9dc] ss:$48 sps:$4 sm:$0xff]   ;;  %v3268_v16 = vpop.f32.mrb[187].mxu0  ;;  %v11936_v51 = vld [vmem:[%s17331_s5 + $0x20] ss:$48 sps:$4 sm:$0xff]  }
 0x507   : > { %v3854_v63 = vpack.c.bf16 %v3253_v36, %v3250_v50  ;;  %6186 = vmatmul.mubr.bf16.gmra.mrb[220].mxu0 %v11941_v46  ;;  %v14818_v50 = vadd.f32 %v3265_v58, %v1786_v54  ;;  %v12013_v46 = vld [vmem:[%s17331_s5 + $0x4ec] ss:$48 sps:$4 sm:$0xff]   ;;  %v1794_v58 = vld [vmem:[%s17330_s4 + $0x540] sm:$0xff] }
 0x508   : > { %v3855_v45 = vpack.c.bf16 %v3261_v35, %v3258_v41  ;;  %6193 = vmatprep.mubr.bf16.mxu0 %v11945_v13  ;;  %v14805_v41 = vadd.f32 %v10773_v24, %v1789_v37  ;;  %v1787_v35 = vld [vmem:[%s17330_s4 + $0x508] sm:$0xff]  ;;  %v11942_v37 = vld [vmem:[%s17331_s5 + $0x84] ss:$48 sps:$4 sm:$0xff]  }
 0x509   : > { %7041 = vmatpush1.bf16.msra.mxu1 %v3854_v63  ;;  %v14829_v36 = vadd.f32 %v3268_v16, %v1787_v35  ;;  %v11906_v63 = vld [vmem:[%s17331_s5 + $0xa3c] ss:$48 sps:$4 sm:$0xff]   ;;  %v1800_v16 = vld [vmem:[%s17330_s4 + $0x570] sm:$0xff]  ;;  %v12035_v35 = vld [vmem:[%s17331_s5 + $0x668] ss:$48 sps:$4 sm:$0xff]  }
 0x50a   : > { %7042 = vmatprep.subr.bf16.mxu1 %v12435_v0  ;;  %v3857_v5 = vpack.c.bf16 %v14805_v41, %v14800_v32 }
 0x50d   : > { %6836 = vmatmul.mubr.bf16.gmra.mrb[120].mxu1 %v11806_v3  ;;  %v11836_v3 = vld [vmem:[%s17331_s5 + $0x5b8] ss:$48 sps:$4 sm:$0xff]  }
 0x50e   : > { %6843 = vmatprep.mubr.bf16.mxu1 %v11810_v47  ;;  %v11840_v47 = vld [vmem:[%s17331_s5 + $0x61c] ss:$48 sps:$4 sm:$0xff]   ;;  %7043 = vmatpush1.bf16.msra.mxu1 %v3855_v45  ;;  %v11902_v45 = vld [vmem:[%s17331_s5 + $0x9d8] ss:$48 sps:$4 sm:$0xff]  }
 0x50f   : > { %7301 = vmatprep.subr.bf16.mxu1 %v12435_v0  ;;  %6194 = vmatmul.mubr.bf16.gmra.mrb[224].mxu0 %v11947_v22 }
 0x510   : > { %6201 = vmatprep.mubr.bf16.mxu0 %v11951_v8 }
 0x515   : > { %6844 = vmatmul.mubr.bf16.gmra.mrb[124].mxu1 %v11812_v9  ;;  %v11842_v9 = vld [vmem:[%s17331_s5 + $0x618] ss:$48 sps:$4 sm:$0xff]  }
 0x516   : > { %6851 = vmatprep.mubr.bf16.mxu1 %v11816_v10  ;;  %v11846_v10 = vld [vmem:[%s17331_s5 + $0x67c] ss:$48 sps:$4 sm:$0xff]  }
 0x517   : > { %6202 = vmatmul.mubr.bf16.gmra.mrb[228].mxu0 %v11953_v49  ;;  %v11920_v49 = vld [vmem:[%s17331_s5 + $0xaf8] ss:$48 sps:$4 sm:$0xff]  }
 0x518   : > { %6209 = vmatprep.mubr.bf16.mxu0 %v11957_v18 }
 0x51d   : > { %6852 = vmatmul.mubr.bf16.gmra.mrb[128].mxu1 %v11818_v59  ;;  %v11959_v59 = vld [vmem:[%s17331_s5 + $0x188] ss:$48 sps:$4 sm:$0xff]  }
 0x51e   : > { %6859 = vmatprep.mubr.bf16.mxu1 %v11822_v62  ;;  %v11870_v62 = vld [vmem:[%s17331_s5 + $0x7fc] ss:$48 sps:$4 sm:$0xff]  }
 0x51f   : > { %6210 = vmatmul.mubr.bf16.gmra.mrb[232].mxu0 %v11959_v59 }
 0x520   : > { %6217 = vmatprep.mubr.bf16.mxu0 %v11963_v7  ;;  %v12017_v7 = vld [vmem:[%s17331_s5 + $0x548] ss:$48 sps:$4 sm:$0xff]  }
 0x525   : > { %6860 = vmatmul.mubr.bf16.gmra.mrb[132].mxu1 %v11824_v48  ;;  %v11894_v48 = vld [vmem:[%s17331_s5 + $0x97c] ss:$48 sps:$4 sm:$0xff]  }
 0x526   : > { %6867 = vmatprep.mubr.bf16.mxu1 %v11828_v30  ;;  %v11989_v30 = vld [vmem:[%s17331_s5 + $0x368] ss:$48 sps:$4 sm:$0xff]  }
 0x527   : > { %6218 = vmatmul.mubr.bf16.gmra.mrb[236].mxu0 %v11965_v44  ;;  %v12019_v44 = vld [vmem:[%s17331_s5 + $0x54c] ss:$48 sps:$4 sm:$0xff]  }
 0x528   : > { %6225 = vmatprep.mubr.bf16.mxu0 %v11969_v11  ;;  %v11926_v11 = vld [vmem:[%s17331_s5 + $0xb58] ss:$48 sps:$4 sm:$0xff]  }
 0x52d   : > { %6868 = vmatmul.mubr.bf16.gmra.mrb[136].mxu1 %v11830_v27  ;;  %v11995_v27 = vld [vmem:[%s17331_s5 + $0x3cc] ss:$48 sps:$4 sm:$0xff]  }
 0x52e   : > { %6875 = vmatprep.mubr.bf16.mxu1 %v11834_v55  ;;  %v3856_v55 = vpack.c.bf16 %v14829_v36, %v14818_v50  ;;  %v1799_v36 = vld [vmem:[%s17330_s4 + $0x568] sm:$0xff] }
 0x52f   : > { %6226 = vmatmul.mubr.bf16.gmra.mrb[240].mxu0 %v11971_v4  ;;  %v11930_v4 = vld [vmem:[%s17331_s5 + $0xbbc] ss:$48 sps:$4 sm:$0xff]  }
 0x530   : > { %6233 = vmatprep.mubr.bf16.mxu0 %v11975_v21  ;;  %v11932_v21 = vld [vmem:[%s17331_s5 + $0xbb8] ss:$48 sps:$4 sm:$0xff]  }
 0x535   : > { %6876 = vmatmul.mubr.bf16.gmra.mrb[140].mxu1 %v11836_v3  ;;  %v11908_v3 = vld [vmem:[%s17331_s5 + $0xa38] ss:$48 sps:$4 sm:$0xff]  }
 0x536   : > { %6883 = vmatprep.mubr.bf16.mxu1 %v11840_v47  ;;  %v11912_v47 = vld [vmem:[%s17331_s5 + $0xa9c] ss:$48 sps:$4 sm:$0xff]  }
 0x537   : > { %6234 = vmatmul.mubr.bf16.gmra.mrb[244].mxu0 %v11977_v42  ;;  %v11938_v42 = vld [vmem:[%s17331_s5 + $0x24] ss:$48 sps:$4 sm:$0xff]  }
 0x538   : > { %6241 = vmatprep.mubr.bf16.mxu0 %v11981_v12  ;;  %v1796_v12 = vld [vmem:[%s17330_s4 + $0x550] sm:$0xff] }
 0x53d   : > { %6884 = vmatmul.mubr.bf16.gmra.mrb[144].mxu1 %v11842_v9  ;;  %v11914_v9 = vld [vmem:[%s17331_s5 + $0xa98] ss:$48 sps:$4 sm:$0xff]  }
 0x53e   : > { %6891 = vmatprep.mubr.bf16.mxu1 %v11846_v10  ;;  %v11918_v10 = vld [vmem:[%s17331_s5 + $0xafc] ss:$48 sps:$4 sm:$0xff]  }
 0x53f   : > { %6242 = vmatmul.mubr.bf16.gmra.mrb[248].mxu0 %v11983_v19 }
 0x540   : > { %6249 = vmatprep.mubr.bf16.mxu0 %v11987_v6  ;;  %v1797_v6 = vld [vmem:[%s17330_s4 + $0x558] sm:$0xff] }
 0x545   : > { %6892 = vmatmul.mubr.bf16.gmra.mrb[148].mxu1 %v11848_v14  ;;  %v1792_v14 = vld [vmem:[%s17330_s4 + $0x530] sm:$0xff] }
 0x546   : > { %6899 = vmatprep.mubr.bf16.mxu1 %v11852_v26  ;;  %v10776_v26 = vpop.f32.mrb[188].mxu0 }
 0x547   : > { %6250 = vmatmul.mubr.bf16.gmra.mrb[252].mxu0 %v11989_v30  ;;  %v14872_v13 = vadd.f32 %v10776_v26, %v1792_v14  ;;  %v3281_v22 = vpop.f32.mrb[189].mxu0 }
 0x548   : > { %6257 = vmatprep.mubr.bf16.mxu0 %v11995_v27 }
 0x54d   : > { %6900 = vmatmul.mubr.bf16.gmra.mrb[24].mxu1 %v11854_v57  ;;  %v1793_v57 = vld [vmem:[%s17330_s4 + $0x538] sm:$0xff] }
 0x54e   : > { %6907 = vmatprep.mubr.bf16.mxu1 %v11858_v2  ;;  %v10777_v2 = vpop.f32.mrb[190].mxu0 }
 0x54f   : > { %6258 = vmatmul.mubr.bf16.gmra.mrb[0].mxu0 %v11993_v60  ;;  %v14877_v8 = vadd.f32 %v10777_v2, %v1793_v57 }
 0x550   : > { %6265 = vmatprep.mubr.bf16.mxu0 %v12001_v1 }
 0x551   : > { %v3859_v18 = vpack.c.bf16 %v14877_v8, %v14872_v13 }
 0x555   : > { %6908 = vmatmul.mubr.bf16.gmra.mrb[28].mxu1 %v11860_v20  ;;  %v1790_v20 = vld [vmem:[%s17330_s4 + $0x520] sm:$0xff] }
 0x556   : > { %6915 = vmatprep.mubr.bf16.mxu1 %v11864_v34  ;;  %v11924_v34 = vld [vmem:[%s17331_s5 + $0xb5c] ss:$48 sps:$4 sm:$0xff]   ;;  %v14890_v59 = vadd.f32 %v3281_v22, %v1790_v20 }
 0x557   : > { %6266 = vmatmul.mubr.bf16.gmra.mrb[4].mxu0 %v11999_v33  ;;  %v1801_v33 = vld [vmem:[%s17330_s4 + $0x578] sm:$0xff] }
 0x558   : > { %6273 = vmatprep.mubr.bf16.mxu0 %v12007_v25  ;;  %v11944_v25 = vld [vmem:[%s17331_s5 + $0x80] ss:$48 sps:$4 sm:$0xff]   ;;  %v1805_v22 = vld [vmem:[%s17330_s4 + $0x598] sm:$0xff] }
 0x55d   : > { %6916 = vmatmul.mubr.bf16.gmra.mrb[32].mxu1 %v11866_v28  ;;  %v3284_v28 = vpop.f32.mrb[191].mxu0 }
 0x55e   : > { %6923 = vmatprep.mubr.bf16.mxu1 %v11870_v62  ;;  %v1791_v62 = vld [vmem:[%s17330_s4 + $0x528] sm:$0xff]  ;;  %v10780_v19 = vpop.f32.mrb[192].mxu0 }
 0x55f   : > { %6274 = vmatmul.mubr.bf16.gmra.mrb[8].mxu0 %v12005_v29  ;;  %v1804_v29 = vld [vmem:[%s17330_s4 + $0x590] sm:$0xff] }
 0x560   : > { %6281 = vmatprep.mubr.bf16.mxu0 %v12013_v46  ;;  %v11948_v46 = vld [vmem:[%s17331_s5 + $0xe4] ss:$48 sps:$4 sm:$0xff]  }
 0x565   : > { %6924 = vmatmul.mubr.bf16.gmra.mrb[36].mxu1 %v11872_v38  ;;  %v14901_v38 = vadd.f32 %v3284_v28, %v1791_v62  ;;  %v1803_v28 = vld [vmem:[%s17330_s4 + $0x588] sm:$0xff]  ;;  %v1808_v62 = vld [vmem:[%s17330_s4 + $0x5b0] sm:$0xff] }
 0x566   : > { %6931 = vmatprep.mubr.bf16.mxu1 %v11876_v39 }
 0x567   : > { %6282 = vmatmul.mubr.bf16.gmra.mrb[12].mxu0 %v12011_v17  ;;  %v3858_v39 = vpack.c.bf16 %v14901_v38, %v14890_v59  ;;  %v1802_v17 = vld [vmem:[%s17330_s4 + $0x580] sm:$0xff]  ;;  %v1807_v59 = vld [vmem:[%s17330_s4 + $0x5a8] sm:$0xff] }
 0x568   : > { %6289 = vmatprep.mubr.bf16.mxu0 %v12019_v44 }
 0x56d   : > { %6932 = vmatmul.mubr.bf16.gmra.mrb[40].mxu1 %v11878_v43  ;;  %v12023_v43 = vld [vmem:[%s17331_s5 + $0x5a8] ss:$48 sps:$4 sm:$0xff]  }
 0x56e   : > { %6939 = vmatprep.mubr.bf16.mxu1 %v11882_v15  ;;  %v12025_v15 = vld [vmem:[%s17331_s5 + $0x5ac] ss:$48 sps:$4 sm:$0xff]  }
 0x56f   : > { %6290 = vmatmul.mubr.bf16.gmra.mrb[16].mxu0 %v12017_v7  ;;  %v1806_v7 = vld [vmem:[%s17330_s4 + $0x5a0] sm:$0xff] }
 0x570   : > { %6297 = vmatprep.mubr.bf16.mxu0 %v12025_v15 }
 0x575   : > { %6940 = vmatmul.mubr.bf16.gmra.mrb[44].mxu1 %v11884_v61  ;;  %v12029_v61 = vld [vmem:[%s17331_s5 + $0x608] ss:$48 sps:$4 sm:$0xff]  }
 0x576   : > { %6947 = vmatprep.mubr.bf16.mxu1 %v11888_v56  ;;  %v12031_v56 = vld [vmem:[%s17331_s5 + $0x60c] ss:$48 sps:$4 sm:$0xff]  }
 0x577   : > { %6298 = vmatmul.mubr.bf16.gmra.mrb[20].mxu0 %v12023_v43 }
 0x578   : > { %6305 = vmatprep.mubr.bf16.mxu0 %v12031_v56  ;;  %v11950_v56 = vld [vmem:[%s17331_s5 + $0xe0] ss:$48 sps:$4 sm:$0xff]  }
 0x57d   : > { %6948 = vmatmul.mubr.bf16.gmra.mrb[48].mxu1 %v11890_v23  ;;  %v14932_v23 = vadd.f32 %v10780_v19, %v1796_v12 }
 0x57e   : > { %6955 = vmatprep.mubr.bf16.mxu1 %v11894_v48  ;;  %v3297_v48 = vpop.f32.mrb[193].mxu0 }
 0x57f   : > { %v10781_v30 = vpop.f32.mrb[194].mxu0  ;;  %6306 = vmatmul.mubr.bf16.gmra.mrb[24].mxu0 %v12029_v61  ;;  %v1812_v61 = vld [vmem:[%s17330_s4 + $0x5d0] sm:$0xff] }
 0x580   : > { %v14937_v52 = vadd.f32 %v10781_v30, %v1797_v6  ;;  %v3300_v54 = vpop.f32.mrb[195].mxu0  ;;  %v11954_v6 = vld [vmem:[%s17331_s5 + $0x144] ss:$48 sps:$4 sm:$0xff]  }
 0x581   : > { %v10784_v27 = vpop.f32.mrb[196].mxu0 }
 0x582   : > { %v3861_v24 = vpack.c.bf16 %v14937_v52, %v14932_v23  ;;  %v14976_v1 = vadd.f32 %v10784_v27, %v1800_v16  ;;  %v3313_v50 = vpop.f32.mrb[197].mxu0  ;;  %v1811_v27 = vld [vmem:[%s17330_s4 + $0x5c8] sm:$0xff] }
 0x585   : > { %6956 = vmatmul.mubr.bf16.gmra.mrb[52].mxu1 %v11896_v40  ;;  %v14950_v40 = vadd.f32 %v3297_v48, %v1794_v58  ;;  %v1810_v48 = vld [vmem:[%s17330_s4 + $0x5c0] sm:$0xff]  ;;  %v1813_v58 = vld [vmem:[%s17330_s4 + $0x5d8] sm:$0xff] }
 0x586   : > { %6963 = vmatprep.mubr.bf16.mxu1 %v11900_v31  ;;  %v1795_v31 = vld [vmem:[%s17330_s4 + $0x548] sm:$0xff] }
 0x587   : > { %v14964_v60 = vadd.f32 %v3300_v54, %v1795_v31 }
 0x58d   : > { %6964 = vmatmul.mubr.bf16.gmra.mrb[56].mxu1 %v11902_v45  ;;  %v12037_v45 = vld [vmem:[%s17331_s5 + $0x66c] ss:$48 sps:$4 sm:$0xff]  }
 0x58e   : > { %6971 = vmatprep.mubr.bf16.mxu1 %v11906_v63  ;;  %v1798_v63 = vld [vmem:[%s17330_s4 + $0x560] sm:$0xff]  ;;  %6313 = vmatprep.mubr.bf16.mxu0 %v12037_v45  ;;  %v1816_v45 = vld [vmem:[%s17330_s4 + $0x5f0] sm:$0xff] }
 0x58f   : > { %6314 = vmatmul.mubr.bf16.gmra.mrb[28].mxu0 %v12035_v35 }
 0x595   : > { %6972 = vmatmul.mubr.bf16.gmra.mrb[60].mxu1 %v11908_v3  ;;  %v14983_v3 = vadd.f32 %v3313_v50, %v1798_v63  ;;  %v1814_v63 = vld [vmem:[%s17330_s4 + $0x5e0] sm:$0xff] }
 0x596   : > { %6979 = vmatprep.mubr.bf16.mxu1 %v11912_v47  ;;  %v10785_v47 = vpop.f32.mrb[198].mxu0 }
 0x59d   : > { %6980 = vmatmul.mubr.bf16.gmra.mrb[64].mxu1 %v11914_v9  ;;  %v14991_v9 = vadd.f32 %v10785_v47, %v1801_v33 }
 0x59e   : > { %6987 = vmatprep.mubr.bf16.mxu1 %v11918_v10  ;;  %v3316_v10 = vpop.f32.mrb[199].mxu0 }
 0x59f   : > { %v15002_v14 = vadd.f32 %v3316_v10, %v1799_v36  ;;  %v10788_v26 = vpop.f32.mrb[200].mxu0  ;;  %v3863_v57 = vpack.c.bf16 %v14991_v9, %v14976_v1  ;;  %v1817_v36 = vld [vmem:[%s17330_s4 + $0x5f8] sm:$0xff]  ;;  %v11968_v1 = vld [vmem:[%s17331_s5 + $0x200] ss:$48 sps:$4 sm:$0xff]  }
 0x5a0   : > { %v15010_v2 = vadd.f32 %v10788_v26, %v1804_v29 }
 0x5a1   : > { %v3862_v20 = vpack.c.bf16 %v15002_v14, %v14983_v3 }
 0x5a5   : > { %6988 = vmatmul.mubr.bf16.gmra.mrb[68].mxu1 %v11920_v49  ;;  %v3329_v49 = vpop.f32.mrb[201].mxu0 }
 0x5a6   : > { %6995 = vmatprep.mubr.bf16.mxu1 %v11924_v34  ;;  %v15014_v32 = vadd.f32 %v3329_v49, %v1802_v17  ;;  %v10789_v41 = vpop.f32.mrb[202].mxu0  ;;  %v11956_v17 = vld [vmem:[%s17331_s5 + $0x140] ss:$48 sps:$4 sm:$0xff]  }
 0x5a7   : > { %v3332_v34 = vpop.f32.mrb[203].mxu0 }
 0x5a8   : > { %v15030_v44 = vadd.f32 %v3332_v34, %v1803_v28 }
 0x5aa   : > { %v3864_v38 = vpack.c.bf16 %v15030_v44, %v15014_v32 }
 0x5ad   : > { %6996 = vmatmul.mubr.bf16.gmra.mrb[72].mxu1 %v11926_v11  ;;  %v10792_v11 = vpop.f32.mrb[204].mxu0 }
 0x5ae   : > { %7003 = vmatprep.mubr.bf16.mxu1 %v11930_v4  ;;  %v1809_v4 = vld [vmem:[%s17330_s4 + $0x5b8] sm:$0xff]  ;;  %v15038_v15 = vadd.f32 %v10792_v11, %v1808_v62 }
 0x5b5   : > { %7004 = vmatmul.mubr.bf16.gmra.mrb[76].mxu1 %v11932_v21  ;;  %v3345_v21 = vpop.f32.mrb[205].mxu0 }
 0x5b6   : > { %7044 = vmatprep.mubr.bf16.mxu1 %v11938_v42  ;;  %v10793_v42 = vpop.f32.mrb[206].mxu0 }
 0x5b7   : > { %v15053_v12 = vadd.f32 %v10793_v42, %v1809_v4  ;;  %v3348_v19 = vpop.f32.mrb[207].mxu0  ;;  %v11962_v4 = vld [vmem:[%s17331_s5 + $0x1a0] ss:$48 sps:$4 sm:$0xff]  }
 0x5b8   : > { %v15064_v30 = vadd.f32 %v3348_v19, %v1807_v59  ;;  %v11966_v59 = vld [vmem:[%s17331_s5 + $0x204] ss:$48 sps:$4 sm:$0xff]  }
 0x5bd   : > { %7045 = vmatmul.mubr.bf16.vlgmr.msra.gmra.mrb[80].mxu1 %v11936_v51  ;;  %v10796_v51 = vpop.f32.mrb[208].mxu0 }
 0x5be   : > { %7052 = vmatprep.mubr.bf16.mxu1 %v11942_v37  ;;  %7302 = vmatpush1.bf16.msra.mxu1 %v3856_v55  ;;  %v3860_v55 = vpack.c.bf16 %v14964_v60, %v14950_v40  ;;  %v3867_v37 = vpack.c.bf16 %v15053_v12, %v15038_v15  ;;  %v15072_v54 = vadd.f32 %v10796_v51, %v1812_v61  ;;  %v3361_v31 = vpop.f32.mrb[209].mxu0  ;;  %v1815_v40 = vld [vmem:[%s17330_s4 + $0x5e8] sm:$0xff]  ;;  %v11980_v15 = vld [vmem:[%s17331_s5 + $0x2c0] ss:$48 sps:$4 sm:$0xff]  }
 0x5bf   : > { %7303 = vmatprep.subr.bf16.mxu1 %v12435_v0  ;;  %v15076_v13 = vadd.f32 %v3361_v31, %v1810_v48  ;;  %v10797_v8 = vpop.f32.mrb[210].mxu0 }
 0x5c0   : > { %v3364_v35 = vpop.f32.mrb[211].mxu0 }
 0x5c1   : > { %v15092_v33 = vadd.f32 %v3364_v35, %v1811_v27  ;;  %v10800_v50 = vpop.f32.mrb[212].mxu0 }
 0x5c2   : > { %7304 = vmatpush1.bf16.msra.mxu1 %v3857_v5  ;;  %v15016_v5 = vadd.f32 %v10789_v41, %v1805_v22  ;;  %v15100_v29 = vadd.f32 %v10800_v50, %v1816_v45  ;;  %v11960_v22 = vld [vmem:[%s17331_s5 + $0x1a4] ss:$48 sps:$4 sm:$0xff]  }
 0x5c3   : > { %7305 = vmatprep.subr.bf16.mxu1 %v12435_v0  ;;  %v3868_v60 = vpack.c.bf16 %v15092_v33, %v15076_v13 }
 0x5c4   : > { %v3865_v43 = vpack.c.bf16 %v15016_v5, %v15010_v2  ;;  %v11974_v2 = vld [vmem:[%s17331_s5 + $0x260] ss:$48 sps:$4 sm:$0xff]  }
 0x5c5   : > { %7053 = vmatmul.mubr.bf16.gmra.mrb[84].mxu1 %v11944_v25  ;;  %v3377_v25 = vpop.f32.mrb[213].mxu0 }
 0x5c6   : > { %7060 = vmatprep.mubr.bf16.mxu1 %v11948_v46  ;;  %7306 = vmatpush1.bf16.msra.mxu1 %v3858_v39  ;;  %v15045_v39 = vadd.f32 %v3345_v21, %v1806_v7  ;;  %v10801_v10 = vpop.f32.mrb[214].mxu0 }
 0x5c7   : > { %7307 = vmatprep.subr.bf16.mxu1 %v12435_v0  ;;  %v15112_v46 = vadd.f32 %v10801_v10, %v1817_v36  ;;  %v3380_v26 = vpop.f32.mrb[215].mxu0 }
 0x5c8   : > { %v3866_v16 = vpack.c.bf16 %v15064_v30, %v15045_v39  ;;  %v15120_v49 = vadd.f32 %v3380_v26, %v1815_v40  ;;  %v15122_v41 = vpop.f32.mrb[32].mxu0 }
 0x5c9   : > { %v3871_v34 = vpack.c.bf16 %v15112_v46, %v15100_v29  ;;  %v6036_v28 = vpop.f32.mrb[33].mxu0  ;;  %v11996_v29 = vld [vmem:[%s17331_s5 + $0x3e4] ss:$48 sps:$4 sm:$0xff]  }
 0x5ca   : > { %7308 = vmatpush1.bf16.msra.mxu1 %v3859_v18  ;;  %v15078_v18 = vadd.f32 %v10797_v8, %v1813_v58  ;;  %v15129_v7 = vpop.f32.mrb[34].mxu0 }
 0x5cb   : > { %7309 = vmatprep.subr.bf16.mxu1 %v12435_v0  ;;  %v6039_v11 = vpop.f32.mrb[35].mxu0 }
 0x5cc   : > { %v3869_v47 = vpack.c.bf16 %v15078_v18, %v15072_v54  ;;  %v15131_v23 = vpop.f32.mrb[36].mxu0  ;;  %v11986_v54 = vld [vmem:[%s17331_s5 + $0x320] ss:$48 sps:$4 sm:$0xff]  }
 0x5cd   : > { %7061 = vmatmul.mubr.bf16.gmra.mrb[88].mxu1 %v11950_v56  ;;  %v6044_v52 = vpop.f32.mrb[37].mxu0 }
 0x5ce   : > { %7068 = vmatprep.mubr.bf16.mxu1 %v11954_v6  ;;  %7310 = vmatpush1.bf16.msra.mxu1 %v3860_v55  ;;  %v15107_v55 = vadd.f32 %v3377_v25, %v1814_v63 }
 0x5cf   : > { %7311 = vmatprep.subr.bf16.mxu1 %v12435_v0 }
 0x5d0   : > { %v3870_v62 = vpack.c.bf16 %v15120_v49, %v15107_v55 }
 0x5d2   : > { %7312 = vmatpush1.bf16.msra.mxu1 %v3861_v24  ;;  %v15137_v24 = vpop.f32.mrb[38].mxu0 }
 0x5d3   : > { %7313 = vmatprep.subr.bf16.mxu1 %v12435_v0  ;;  %v6047_v21 = vpop.f32.mrb[39].mxu0 }
 0x5d4   : > { %v15145_v42 = vpop.f32.mrb[40].mxu0  ;;  %v11998_v21 = vld [vmem:[%s17331_s5 + $0x3e0] ss:$48 sps:$4 sm:$0xff]  }
 0x5d5   : > { %7069 = vmatmul.mubr.bf16.gmra.mrb[92].mxu1 %v11956_v17  ;;  %v6052_v3 = vpop.f32.mrb[41].mxu0 }
 0x5d6   : > { %7076 = vmatprep.mubr.bf16.mxu1 %v11960_v22  ;;  %7314 = vmatpush1.bf16.msra.mxu1 %v3862_v20  ;;  %v15151_v14 = vpop.f32.mrb[42].mxu0  ;;  %v11992_v22 = vld [vmem:[%s17331_s5 + $0x380] ss:$48 sps:$4 sm:$0xff]   ;;  %v12002_v3 = vld [vmem:[%s17331_s5 + $0x444] ss:$48 sps:$4 sm:$0xff]  }
 0x5d7   : > { %7315 = vmatprep.subr.bf16.mxu1 %v12435_v0  ;;  %v6055_v20 = vpop.f32.mrb[43].mxu0 }
 0x5d8   : > { %v15153_v61 = vpop.f32.mrb[44].mxu0 }
 0x5d9   : > { %v6060_v56 = vpop.f32.mrb[45].mxu0 }
 0x5da   : > { %7316 = vmatpush1.bf16.msra.mxu1 %v3863_v57  ;;  %v15159_v19 = vpop.f32.mrb[46].mxu0  ;;  %v11972_v57 = vld [vmem:[%s17331_s5 + $0x264] ss:$48 sps:$4 sm:$0xff]  }
 0x5db   : > { %7317 = vmatprep.subr.bf16.mxu1 %v12435_v0  ;;  %v6063_v9 = vpop.f32.mrb[47].mxu0 }
 0x5dc   : > { %v15167_v48 = vpop.f32.mrb[48].mxu0 }
 0x5dd   : > { %7077 = vmatmul.mubr.bf16.gmra.mrb[96].mxu1 %v11962_v4  ;;  %v6068_v32 = vpop.f32.mrb[49].mxu0 }
 0x5de   : > { %7084 = vmatprep.mubr.bf16.mxu1 %v11966_v59  ;;  %7318 = vmatpush1.bf16.msra.mxu1 %v3864_v38  ;;  %v15173_v44 = vpop.f32.mrb[50].mxu0  ;;  %v12008_v32 = vld [vmem:[%s17331_s5 + $0x4a4] ss:$48 sps:$4 sm:$0xff]  }
 0x5df   : > { %7319 = vmatprep.subr.bf16.mxu1 %v12435_v0  ;;  %17364 = vst [vmem:[#allocation3_spill] sm:$0xff] %v15173_v44  ;;  %v6071_v38 = vpop.f32.mrb[51].mxu0 }
 0x5e0   : > { %v15175_v6 = vpop.f32.mrb[52].mxu0 }
 0x5e1   : > { %17365 = vst [vmem:[#allocation4_spill] sm:$0xff] %v15175_v6  ;;  %v6076_v51 = vpop.f32.mrb[53].mxu0 }
 0x5e2   : > { %7320 = vmatpush1.bf16.msra.mxu1 %v3865_v43  ;;  %v15181_v58 = vpop.f32.mrb[54].mxu0  ;;  %v11978_v43 = vld [vmem:[%s17331_s5 + $0x2c4] ss:$48 sps:$4 sm:$0xff]  }
 0x5e3   : > { %7321 = vmatprep.subr.bf16.mxu1 %v12435_v0  ;;  %17366 = vst [vmem:[#allocation5_spill] sm:$0xff] %v15181_v58  ;;  %v6079_v5 = vpop.f32.mrb[55].mxu0 }
 0x5e4   : > { %v15189_v31 = vpop.f32.mrb[56].mxu0 }
 0x5e5   : > { %7085 = vmatmul.mubr.bf16.gmra.mrb[100].mxu1 %v11968_v1  ;;  %17367 = vst [vmem:[#allocation6_spill] sm:$0xff] %v15189_v31  ;;  %v6084_v39 = vpop.f32.mrb[57].mxu0 }
 0x5e6   : > { %7092 = vmatprep.mubr.bf16.mxu1 %v11972_v57  ;;  %7322 = vmatpush1.bf16.msra.mxu1 %v3866_v16  ;;  %v15195_v30 = vpop.f32.mrb[58].mxu0  ;;  %v12004_v57 = vld [vmem:[%s17331_s5 + $0x440] ss:$48 sps:$4 sm:$0xff]   ;;  %v12014_v39 = vld [vmem:[%s17331_s5 + $0x504] ss:$48 sps:$4 sm:$0xff]  }
 0x5e7   : > { %7323 = vmatprep.subr.bf16.mxu1 %v12435_v0  ;;  %17368 = vst [vmem:[#allocation7_spill] sm:$0xff] %v15195_v30  ;;  %v6087_v16 = vpop.f32.mrb[59].mxu0  ;;  %v12169_v30 = vld [vmem:[%s17331_s5 + $0xaa8] ss:$48 sps:$4 sm:$0xff]  }
 0x5e8   : > { %v15197_v8 = vpop.f32.mrb[60].mxu0 }
 0x5e9   : > { %17369 = vst [vmem:[#allocation8_spill] sm:$0xff] %v15197_v8  ;;  %v6092_v35 = vpop.f32.mrb[61].mxu0 }
 0x5ea   : > { %7324 = vmatpush1.bf16.msra.mxu1 %v3867_v37  ;;  %v15203_v27 = vpop.f32.mrb[62].mxu0  ;;  %v11984_v37 = vld [vmem:[%s17331_s5 + $0x324] ss:$48 sps:$4 sm:$0xff]  }
 0x5eb   : > { %7325 = vmatprep.subr.bf16.mxu1 %v12435_v0  ;;  %17370 = vst [vmem:[#allocation9_spill] sm:$0xff] %v15203_v27  ;;  %v6095_v12 = vpop.f32.mrb[63].mxu0 }
 0x5ec   : > { %v15211_v45 = vpop.f32.mrb[64].mxu0 }
 0x5ed   : > { %7093 = vmatmul.mubr.bf16.gmra.mrb[104].mxu1 %v11974_v2  ;;  %17371 = vst [vmem:[#allocation10_spill] sm:$0xff] %v15211_v45  ;;  %v6100_v13 = vpop.f32.mrb[65].mxu0 }
 0x5ee   : > { %7100 = vmatprep.mubr.bf16.mxu1 %v11978_v43  ;;  %7326 = vmatpush1.bf16.msra.mxu1 %v3868_v60  ;;  %v15217_v63 = vpop.f32.mrb[66].mxu0  ;;  %v12010_v43 = vld [vmem:[%s17331_s5 + $0x4a0] ss:$48 sps:$4 sm:$0xff]   ;;  %v12020_v13 = vld [vmem:[%s17331_s5 + $0x564] ss:$48 sps:$4 sm:$0xff]  }
 0x5ef   : > { %7327 = vmatprep.subr.bf16.mxu1 %v12435_v0  ;;  %17372 = vst [vmem:[#allocation11_spill] sm:$0xff] %v15217_v63  ;;  %v6103_v33 = vpop.f32.mrb[67].mxu0 }
 0x5f0   : > { %v15219_v50 = vpop.f32.mrb[68].mxu0 }
 0x5f1   : > { %17373 = vst [vmem:[#allocation12_spill] sm:$0xff] %v15219_v50  ;;  %v6108_v36 = vpop.f32.mrb[69].mxu0  ;;  %v12166_v50 = vld [vmem:[%s17331_s5 + $0xa48] ss:$48 sps:$4 sm:$0xff]  }
 0x5f2   : > { %7328 = vmatpush1.bf16.msra.mxu1 %v3869_v47  ;;  %v15225_v25 = vpop.f32.mrb[70].mxu0  ;;  %v11990_v47 = vld [vmem:[%s17331_s5 + $0x384] ss:$48 sps:$4 sm:$0xff]  }
 0x5f3   : > { %7329 = vmatprep.subr.bf16.mxu1 %v12435_v0  ;;  %17374 = vst [vmem:[#allocation13_spill] sm:$0xff] %v15225_v25  ;;  %v6111_v18 = vpop.f32.mrb[71].mxu0 }
 0x5f4   : > { %v15233_v40 = vpop.f32.mrb[72].mxu0 }
 0x5f5   : > { %7101 = vmatmul.mubr.bf16.gmra.mrb[108].mxu1 %v11980_v15  ;;  %17375 = vst [vmem:[#allocation14_spill] sm:$0xff] %v15233_v40  ;;  %v6116_v60 = vpop.f32.mrb[73].mxu0 }
 0x5f6   : > { %7108 = vmatprep.mubr.bf16.mxu1 %v11984_v37  ;;  %7330 = vmatpush1.bf16.msra.mxu1 %v3870_v62  ;;  %v15238_v55 = vpop.f32.mrb[74].mxu0  ;;  %v12016_v37 = vld [vmem:[%s17331_s5 + $0x500] ss:$48 sps:$4 sm:$0xff]   ;;  %v12026_v60 = vld [vmem:[%s17331_s5 + $0x5c4] ss:$48 sps:$4 sm:$0xff]  }
 0x5f7   : > { %7331 = vmatprep.subr.bf16.mxu1 %v12435_v0  ;;  %17376 = vst [vmem:[#allocation15_spill] sm:$0xff] %v15238_v55  ;;  %v6119_v0 = vpop.f32.mrb[75].mxu0 }
 0x5f8   : > { %v15240_v10 = vpop.f32.mrb[76].mxu0 }
 0x5f9   : > { %17377 = vst [vmem:[#allocation16_spill] sm:$0xff] %v15240_v10  ;;  %v6124_v17 = vpop.f32.mrb[77].mxu0 }
 0x5fa   : > { %7332 = vmatpush1.bf16.msra.mxu1 %v3871_v34  ;;  %v15242_v26 = vpop.f32.mrb[78].mxu0 }
 0x5fb   : > { %17378 = vst [vmem:[#allocation17_spill] sm:$0xff] %v15242_v26  ;;  %v6127_v49 = vpop.f32.mrb[79].mxu0 }
 0x5fc   : > { %v15250_v46 = vpop.f32.mrb[80].mxu0 }
 0x5fd   : > { %7109 = vmatmul.mubr.bf16.gmra.mrb[112].mxu1 %v11986_v54  ;;  %17379 = vst [vmem:[#allocation18_spill] sm:$0xff] %v15250_v46  ;;  %v6132_v34 = vpop.f32.mrb[81].mxu0 }
 0x5fe   : > { %7116 = vmatprep.mubr.bf16.mxu1 %v11990_v47  ;;  %v15252_v28 = vpop.f32.mrb[82].mxu0  ;;  %v12022_v47 = vld [vmem:[%s17331_s5 + $0x560] ss:$48 sps:$4 sm:$0xff]   ;;  %v12032_v34 = vld [vmem:[%s17331_s5 + $0x624] ss:$48 sps:$4 sm:$0xff]  }
 0x5ff   : > { %17380 = vst [vmem:[#allocation19_spill] sm:$0xff] %v15252_v28  ;;  %v6135_v62 = vpop.f32.mrb[83].mxu0 }
 0x600   : > { %v15254_v11 = vpop.f32.mrb[84].mxu0 }
 0x601   : > { %17381 = vst [vmem:[#allocation20_spill] sm:$0xff] %v15254_v11  ;;  %v6140_v52 = vpop.f32.mrb[85].mxu0 }
 0x602   : > { %v15256_v4 = vpop.f32.mrb[86].mxu0 }
 0x603   : > { %17382 = vst [vmem:[#allocation21_spill] sm:$0xff] %v15256_v4  ;;  %v6143_v59 = vpop.f32.mrb[87].mxu0 }
 0x604   : > { %v15264_v20 = vpop.f32.mrb[216].mxu0 }
 0x605   : > { %7117 = vmatmul.mubr.bf16.gmra.mrb[116].mxu1 %v11992_v22  ;;  %v6181_v56 = vpop.f32.mrb[217].mxu0 }
 0x606   : > { %7124 = vmatprep.mubr.bf16.mxu1 %v11996_v29  ;;  %v15266_v1 = vpop.f32.mrb[218].mxu0  ;;  %v12028_v29 = vld [vmem:[%s17331_s5 + $0x5c0] ss:$48 sps:$4 sm:$0xff]   ;;  %v12038_v56 = vld [vmem:[%s17331_s5 + $0x684] ss:$48 sps:$4 sm:$0xff]  }
 0x607   : > { %v6184_v9 = vpop.f32.mrb[219].mxu0 }
 0x608   : > { %v15274_v38 = vpop.f32.mrb[220].mxu0 }
 0x609   : > { %v6189_v51 = vpop.f32.mrb[221].mxu0 }
 0x60a   : > { %v15276_v2 = vpop.f32.mrb[222].mxu0 }
 0x60b   : > { %v6192_v5 = vpop.f32.mrb[223].mxu0 }
 0x60c   : > { %v15284_v16 = vpop.f32.mrb[224].mxu0  ;;  %v12040_v5 = vld [vmem:[%s17331_s5 + $0x680] ss:$48 sps:$4 sm:$0xff]  }
 0x60d   : > { %7125 = vmatmul.mubr.bf16.gmra.mrb[120].mxu1 %v11998_v21  ;;  %v6197_v35 = vpop.f32.mrb[225].mxu0 }
 0x60e   : > { %7132 = vmatprep.mubr.bf16.mxu1 %v12002_v3  ;;  %v15286_v15 = vpop.f32.mrb[226].mxu0  ;;  %v12034_v3 = vld [vmem:[%s17331_s5 + $0x620] ss:$48 sps:$4 sm:$0xff]  }
 0x60f   : > { %v6200_v12 = vpop.f32.mrb[227].mxu0 }
 0x610   : > { %v15294_v33 = vpop.f32.mrb[228].mxu0 }
 0x611   : > { %v6205_v36 = vpop.f32.mrb[229].mxu0 }
 0x612   : > { %v15296_v54 = vpop.f32.mrb[230].mxu0  ;;  %v12044_v36 = vld [vmem:[%s17331_s5 + $0x744] ss:$48 sps:$4 sm:$0xff]  }
 0x613   : > { %v6208_v18 = vpop.f32.mrb[231].mxu0 }
 0x614   : > { %v15304_v0 = vpop.f32.mrb[232].mxu0 }
 0x615   : > { %7133 = vmatmul.mubr.bf16.gmra.mrb[124].mxu1 %v12004_v57  ;;  %v6213_v17 = vpop.f32.mrb[233].mxu0 }
 0x616   : > { %7140 = vmatprep.mubr.bf16.mxu1 %v12008_v32  ;;  %v15306_v22 = vpop.f32.mrb[234].mxu0 }
 0x617   : > { %v6216_v49 = vpop.f32.mrb[235].mxu0 }
 0x618   : > { %v15314_v62 = vpop.f32.mrb[236].mxu0  ;;  %v12046_v49 = vld [vmem:[%s17331_s5 + $0x740] ss:$48 sps:$4 sm:$0xff]  }
 0x619   : > { %v6221_v52 = vpop.f32.mrb[237].mxu0 }
 0x61a   : > { %v15316_v21 = vpop.f32.mrb[238].mxu0 }
 0x61b   : > { %v6224_v59 = vpop.f32.mrb[239].mxu0 }
 0x61c   : > { %v15324_v9 = vpop.f32.mrb[240].mxu0 }
 0x61d   : > { %7141 = vmatmul.mubr.bf16.gmra.mrb[128].mxu1 %v12010_v43  ;;  %v6229_v57 = vpop.f32.mrb[241].mxu0  ;;  %v12041_v43 = vld [vmem:[%s17331_s5 + $0x6e4] ss:$48 sps:$4 sm:$0xff]  }
 0x61e   : > { %7148 = vmatprep.mubr.bf16.mxu1 %v12014_v39  ;;  %v15326_v32 = vpop.f32.mrb[242].mxu0  ;;  %v12050_v57 = vld [vmem:[%s17331_s5 + $0x804] ss:$48 sps:$4 sm:$0xff]  }
 0x61f   : > { %v6232_v51 = vpop.f32.mrb[243].mxu0 }
 0x620   : > { %v15334_v39 = vpop.f32.mrb[244].mxu0 }
 0x621   : > { %v6237_v35 = vpop.f32.mrb[245].mxu0 }
 0x622   : > { %v15336_v12 = vpop.f32.mrb[246].mxu0 }
 0x625   : > { %7149 = vmatmul.mubr.bf16.gmra.mrb[132].mxu1 %v12016_v37  ;;  %v6240_v37 = vpop.f32.mrb[247].mxu0 }
 0x626   : > { %7156 = vmatprep.mubr.bf16.mxu1 %v12020_v13  ;;  %v12043_v13 = vld [vmem:[%s17331_s5 + $0x6e0] ss:$48 sps:$4 sm:$0xff]   ;;  %v15344_v18 = vpop.f32.mrb[248].mxu0 }
 0x627   : > { %v12052_v37 = vld [vmem:[%s17331_s5 + $0x800] ss:$48 sps:$4 sm:$0xff]  }
 0x62d   : > { %7157 = vmatmul.mubr.bf16.gmra.mrb[136].mxu1 %v12022_v47  ;;  %v6245_v47 = vpop.f32.mrb[249].mxu0 }
 0x62e   : > { %7164 = vmatprep.mubr.bf16.mxu1 %v12026_v60  ;;  %v15346_v60 = vpop.f32.mrb[250].mxu0 }
 0x62f   : > { %v6248_v17 = vpop.f32.mrb[251].mxu0 }
 0x635   : > { %7165 = vmatmul.mubr.bf16.gmra.mrb[140].mxu1 %v12028_v29  ;;  %v12047_v29 = vld [vmem:[%s17331_s5 + $0x7a4] ss:$48 sps:$4 sm:$0xff]  }
 0x636   : > { %7172 = vmatprep.mubr.bf16.mxu1 %v12032_v34  ;;  %v15354_v34 = vpop.f32.mrb[252].mxu0 }
 0x637   : > { %v6253_v52 = vpop.f32.mrb[253].mxu0 }
 0x638   : > { %v15356_v59 = vpop.f32.mrb[254].mxu0  ;;  %v12056_v52 = vld [vmem:[%s17331_s5 + $0x8c4] ss:$48 sps:$4 sm:$0xff]  }
 0x63d   : > { %7173 = vmatmul.mubr.bf16.gmra.mrb[144].mxu1 %v12034_v3  ;;  %v6256_v3 = vpop.f32.mrb[255].mxu0 }
 0x63e   : > { %7180 = vmatprep.mubr.bf16.mxu1 %v12038_v56  ;;  %v12049_v56 = vld [vmem:[%s17331_s5 + $0x7a0] ss:$48 sps:$4 sm:$0xff]   ;;  %v15364_v51 = vpop.f32.mrb[0].mxu0 }
 0x645   : > { %7181 = vmatmul.mubr.bf16.gmra.mrb[148].mxu1 %v12040_v5  ;;  %v6261_v5 = vpop.f32.mrb[1].mxu0 }
 0x646   : > { %7188 = vmatprep.mubr.bf16.mxu1 %v12041_v43  ;;  %v15366_v43 = vpop.f32.mrb[2].mxu0 }
 0x647   : > { %v6264_v35 = vpop.f32.mrb[3].mxu0 }
 0x648   : > { %v12058_v35 = vld [vmem:[%s17331_s5 + $0x8c0] ss:$48 sps:$4 sm:$0xff]  }
 0x64d   : > { %7189 = vmatmul.mubr.bf16.gmra.mrb[24].mxu1 %v12043_v13  ;;  %v12053_v13 = vld [vmem:[%s17331_s5 + $0x864] ss:$48 sps:$4 sm:$0xff]  }
 0x64e   : > { %7196 = vmatprep.mubr.bf16.mxu1 %v12044_v36  ;;  %v15374_v36 = vpop.f32.mrb[4].mxu0 }
 0x64f   : > { %v6269_v47 = vpop.f32.mrb[5].mxu0 }
 0x650   : > { %v15376_v17 = vpop.f32.mrb[6].mxu0 }
 0x655   : > { %7197 = vmatmul.mubr.bf16.gmra.mrb[28].mxu1 %v12046_v49  ;;  %v6272_v49 = vpop.f32.mrb[7].mxu0 }
 0x656   : > { %7204 = vmatprep.mubr.bf16.mxu1 %v12047_v29  ;;  %v12055_v29 = vld [vmem:[%s17331_s5 + $0x860] ss:$48 sps:$4 sm:$0xff]   ;;  %v15384_v3 = vpop.f32.mrb[8].mxu0 }
 0x65d   : > { %7205 = vmatmul.mubr.bf16.gmra.mrb[32].mxu1 %v12049_v56  ;;  %v6277_v56 = vpop.f32.mrb[9].mxu0 }
 0x65e   : > { %7212 = vmatprep.mubr.bf16.mxu1 %v12050_v57  ;;  %v15386_v57 = vpop.f32.mrb[10].mxu0  ;;  %v12062_v56 = vld [vmem:[%s17331_s5 + $0x984] ss:$48 sps:$4 sm:$0xff]  }
 0x65f   : > { %v6280_v5 = vpop.f32.mrb[11].mxu0 }
 0x665   : > { %7213 = vmatmul.mubr.bf16.gmra.mrb[36].mxu1 %v12052_v37  ;;  %v12059_v37 = vld [vmem:[%s17331_s5 + $0x924] ss:$48 sps:$4 sm:$0xff]  }
 0x666   : > { %7220 = vmatprep.mubr.bf16.mxu1 %v12053_v13  ;;  %v15394_v13 = vpop.f32.mrb[12].mxu0 }
 0x667   : > { %v6285_v47 = vpop.f32.mrb[13].mxu0 }
 0x668   : > { %v15396_v49 = vpop.f32.mrb[14].mxu0  ;;  %v12065_v47 = vld [vmem:[%s17331_s5 + $0x9e4] ss:$48 sps:$4 sm:$0xff]  }
 0x66d   : > { %7221 = vmatmul.mubr.bf16.gmra.mrb[40].mxu1 %v12055_v29  ;;  %v6288_v29 = vpop.f32.mrb[15].mxu0 }
 0x66e   : > { %7228 = vmatprep.mubr.bf16.mxu1 %v12056_v52  ;;  %v12061_v52 = vld [vmem:[%s17331_s5 + $0x920] ss:$48 sps:$4 sm:$0xff]   ;;  %v15404_v5 = vpop.f32.mrb[16].mxu0 }
 0x66f   : > { %v6293_v53 = vpop.f32.mrb[17].mxu0 }
 0x670   : > { %v15406_v4 = vpop.f32.mrb[18].mxu0 }
 0x675   : > { %7229 = vmatmul.mubr.bf16.gmra.mrb[44].mxu1 %v12058_v35  ;;  %v6296_v35 = vpop.f32.mrb[19].mxu0 }
 0x676   : > { %7236 = vmatprep.mubr.bf16.mxu1 %v12059_v37  ;;  %v12064_v37 = vld [vmem:[%s17331_s5 + $0x980] ss:$48 sps:$4 sm:$0xff]   ;;  %v15414_v29 = vpop.f32.mrb[20].mxu0 }
 0x677   : > { %v6301_v11 = vpop.f32.mrb[21].mxu0 }
 0x678   : > { %v15416_v28 = vpop.f32.mrb[22].mxu0 }
 0x679   : > { %v6304_v53 = vpop.f32.mrb[23].mxu0 }
 0x67a   : > { %v15424_v35 = vpop.f32.mrb[24].mxu0 }
 0x67b   : > { %v6309_v46 = vpop.f32.mrb[25].mxu0 }
 0x67c   : > { %v15426_v26 = vpop.f32.mrb[26].mxu0 }
 0x67d   : > { %7237 = vmatmul.mubr.bf16.gmra.mrb[48].mxu1 %v12061_v52  ;;  %v12067_v52 = vld [vmem:[%s17331_s5 + $0x9e0] ss:$48 sps:$4 sm:$0xff]   ;;  %v6312_v11 = vpop.f32.mrb[27].mxu0 }
 0x67e   : > { %7244 = vmatprep.mubr.bf16.mxu1 %v12062_v56  ;;  %v12068_v56 = vld [vmem:[%s17331_s5 + $0xa44] ss:$48 sps:$4 sm:$0xff]   ;;  %v15434_v53 = vpop.f32.mrb[28].mxu0  ;;  %v12076_v11 = vld [vmem:[%s17331_s5 + $0xb00] ss:$48 sps:$4 sm:$0xff]  }
 0x67f   : > { %v6317_v10 = vpop.f32.mrb[29].mxu0 }
 0x680   : > { %v15436_v55 = vpop.f32.mrb[30].mxu0  ;;  %v12077_v10 = vld [vmem:[%s17331_s5 + $0xb64] ss:$48 sps:$4 sm:$0xff]  }
 0x681   : > { %v6320_v46 = vpop.f32.mrb[31].mxu0 }
 0x682   : > { %v12082_v46 = vld [vmem:[%s17331_s5 + $0xbc0] ss:$48 sps:$4 sm:$0xff]  }
 0x685   : > { %7245 = vmatmul.mubr.bf16.gmra.mrb[52].mxu1 %v12064_v37  ;;  %v12070_v37 = vld [vmem:[%s17331_s5 + $0xa40] ss:$48 sps:$4 sm:$0xff]  }
 0x686   : > { %7252 = vmatprep.mubr.bf16.mxu1 %v12065_v47  ;;  %v12071_v47 = vld [vmem:[%s17331_s5 + $0xaa4] ss:$48 sps:$4 sm:$0xff]  }
 0x68d   : > { %7253 = vmatmul.mubr.bf16.gmra.mrb[56].mxu1 %v12067_v52  ;;  %v12073_v52 = vld [vmem:[%s17331_s5 + $0xaa0] ss:$48 sps:$4 sm:$0xff]  }
 0x68e   : > { %7260 = vmatprep.mubr.bf16.mxu1 %v12068_v56  ;;  %v12074_v56 = vld [vmem:[%s17331_s5 + $0xb04] ss:$48 sps:$4 sm:$0xff]  }
 0x695   : > { %7261 = vmatmul.mubr.bf16.gmra.mrb[60].mxu1 %v12070_v37  ;;  %v12079_v37 = vld [vmem:[%s17331_s5 + $0xb60] ss:$48 sps:$4 sm:$0xff]  }
 0x696   : > { %7268 = vmatprep.mubr.bf16.mxu1 %v12071_v47  ;;  %v12080_v47 = vld [vmem:[%s17331_s5 + $0xbc4] ss:$48 sps:$4 sm:$0xff]  }
 0x69d   : > { %7269 = vmatmul.mubr.bf16.gmra.mrb[64].mxu1 %v12073_v52  ;;  %v12085_v52 = vld [vmem:[%s17331_s5 + $0x2c] ss:$48 sps:$4 sm:$0xff]  }
 0x69e   : > { %7276 = vmatprep.mubr.bf16.mxu1 %v12074_v56  ;;  %v12083_v56 = vld [vmem:[%s17331_s5 + $0x28] ss:$48 sps:$4 sm:$0xff]  }
 0x6a5   : > { %7277 = vmatmul.mubr.bf16.gmra.mrb[68].mxu1 %v12076_v11  ;;  %v12086_v11 = vld [vmem:[%s17331_s5 + $0x8c] ss:$48 sps:$4 sm:$0xff]  }
 0x6a6   : > { %7284 = vmatprep.mubr.bf16.mxu1 %v12077_v10  ;;  %v12088_v10 = vld [vmem:[%s17331_s5 + $0x88] ss:$48 sps:$4 sm:$0xff]  }
 0x6ad   : > { %7285 = vmatmul.mubr.bf16.gmra.mrb[72].mxu1 %v12079_v37  ;;  %v12089_v37 = vld [vmem:[%s17331_s5 + $0xec] ss:$48 sps:$4 sm:$0xff]  }
 0x6ae   : > { %7292 = vmatprep.mubr.bf16.mxu1 %v12080_v47  ;;  %v12091_v47 = vld [vmem:[%s17331_s5 + $0xe8] ss:$48 sps:$4 sm:$0xff]  }
 0x6b5   : > { %7293 = vmatmul.mubr.bf16.gmra.mrb[76].mxu1 %v12082_v46  ;;  %v12092_v46 = vld [vmem:[%s17331_s5 + $0x14c] ss:$48 sps:$4 sm:$0xff]  }
 0x6b6   : > { %7333 = vmatprep.mubr.bf16.mxu1 %v12085_v52  ;;  %v12094_v52 = vld [vmem:[%s17331_s5 + $0x148] ss:$48 sps:$4 sm:$0xff]  }
 0x6bd   : > { %7334 = vmatmul.mubr.bf16.vlgmr.msra.gmra.mrb[80].mxu1 %v12083_v56  ;;  %v12095_v56 = vld [vmem:[%s17331_s5 + $0x1ac] ss:$48 sps:$4 sm:$0xff]  }
 0x6be   : > { %7341 = vmatprep.mubr.bf16.mxu1 %v12086_v11  ;;  %v12097_v11 = vld [vmem:[%s17331_s5 + $0x1a8] ss:$48 sps:$4 sm:$0xff]  }
 0x6c5   : > { %7342 = vmatmul.mubr.bf16.gmra.mrb[84].mxu1 %v12088_v10  ;;  %v12098_v10 = vld [vmem:[%s17331_s5 + $0x20c] ss:$48 sps:$4 sm:$0xff]  }
 0x6c6   : > { %7349 = vmatprep.mubr.bf16.mxu1 %v12089_v37  ;;  %v12100_v37 = vld [vmem:[%s17331_s5 + $0x208] ss:$48 sps:$4 sm:$0xff]  }
 0x6cd   : > { %7350 = vmatmul.mubr.bf16.gmra.mrb[88].mxu1 %v12091_v47  ;;  %v12101_v47 = vld [vmem:[%s17331_s5 + $0x26c] ss:$48 sps:$4 sm:$0xff]  }
 0x6ce   : > { %7357 = vmatprep.mubr.bf16.mxu1 %v12092_v46  ;;  %v12103_v46 = vld [vmem:[%s17331_s5 + $0x268] ss:$48 sps:$4 sm:$0xff]  }
 0x6d5   : > { %7358 = vmatmul.mubr.bf16.gmra.mrb[92].mxu1 %v12094_v52  ;;  %v12104_v52 = vld [vmem:[%s17331_s5 + $0x2cc] ss:$48 sps:$4 sm:$0xff]  }
 0x6d6   : > { %7365 = vmatprep.mubr.bf16.mxu1 %v12095_v56  ;;  %v12106_v56 = vld [vmem:[%s17331_s5 + $0x2c8] ss:$48 sps:$4 sm:$0xff]  }
 0x6dd   : > { %7366 = vmatmul.mubr.bf16.gmra.mrb[96].mxu1 %v12097_v11  ;;  %v12107_v11 = vld [vmem:[%s17331_s5 + $0x32c] ss:$48 sps:$4 sm:$0xff]  }
 0x6de   : > { %7373 = vmatprep.mubr.bf16.mxu1 %v12098_v10  ;;  %v12109_v10 = vld [vmem:[%s17331_s5 + $0x328] ss:$48 sps:$4 sm:$0xff]  }
 0x6e5   : > { %7374 = vmatmul.mubr.bf16.gmra.mrb[100].mxu1 %v12100_v37  ;;  %v12110_v37 = vld [vmem:[%s17331_s5 + $0x38c] ss:$48 sps:$4 sm:$0xff]  }
 0x6e6   : > { %7381 = vmatprep.mubr.bf16.mxu1 %v12101_v47  ;;  %v12112_v47 = vld [vmem:[%s17331_s5 + $0x388] ss:$48 sps:$4 sm:$0xff]  }
 0x6ed   : > { %7382 = vmatmul.mubr.bf16.gmra.mrb[104].mxu1 %v12103_v46  ;;  %v12113_v46 = vld [vmem:[%s17331_s5 + $0x3ec] ss:$48 sps:$4 sm:$0xff]  }
 0x6ee   : > { %7389 = vmatprep.mubr.bf16.mxu1 %v12104_v52  ;;  %v12115_v52 = vld [vmem:[%s17331_s5 + $0x3e8] ss:$48 sps:$4 sm:$0xff]  }
 0x6f5   : > { %7390 = vmatmul.mubr.bf16.gmra.mrb[108].mxu1 %v12106_v56  ;;  %v12116_v56 = vld [vmem:[%s17331_s5 + $0x44c] ss:$48 sps:$4 sm:$0xff]  }
 0x6f6   : > { %7397 = vmatprep.mubr.bf16.mxu1 %v12107_v11  ;;  %v12118_v11 = vld [vmem:[%s17331_s5 + $0x448] ss:$48 sps:$4 sm:$0xff]  }
 0x6fd   : > { %7398 = vmatmul.mubr.bf16.gmra.mrb[112].mxu1 %v12109_v10  ;;  %v12119_v10 = vld [vmem:[%s17331_s5 + $0x4ac] ss:$48 sps:$4 sm:$0xff]  }
 0x6fe   : > { %7405 = vmatprep.mubr.bf16.mxu1 %v12110_v37  ;;  %v12121_v37 = vld [vmem:[%s17331_s5 + $0x4a8] ss:$48 sps:$4 sm:$0xff]  }
 0x705   : > { %7406 = vmatmul.mubr.bf16.gmra.mrb[116].mxu1 %v12112_v47  ;;  %v12122_v47 = vld [vmem:[%s17331_s5 + $0x50c] ss:$48 sps:$4 sm:$0xff]  }
 0x706   : > { %7413 = vmatprep.mubr.bf16.mxu1 %v12113_v46  ;;  %v12124_v46 = vld [vmem:[%s17331_s5 + $0x508] ss:$48 sps:$4 sm:$0xff]  }
 0x70d   : > { %7414 = vmatmul.mubr.bf16.gmra.mrb[120].mxu1 %v12115_v52  ;;  %v12125_v52 = vld [vmem:[%s17331_s5 + $0x56c] ss:$48 sps:$4 sm:$0xff]  }
 0x70e   : > { %7421 = vmatprep.mubr.bf16.mxu1 %v12116_v56  ;;  %v12127_v56 = vld [vmem:[%s17331_s5 + $0x568] ss:$48 sps:$4 sm:$0xff]  }
 0x715   : > { %7422 = vmatmul.mubr.bf16.gmra.mrb[124].mxu1 %v12118_v11  ;;  %v12128_v11 = vld [vmem:[%s17331_s5 + $0x5cc] ss:$48 sps:$4 sm:$0xff]  }
 0x716   : > { %7429 = vmatprep.mubr.bf16.mxu1 %v12119_v10  ;;  %v12130_v10 = vld [vmem:[%s17331_s5 + $0x5c8] ss:$48 sps:$4 sm:$0xff]  }
 0x71d   : > { %7430 = vmatmul.mubr.bf16.gmra.mrb[128].mxu1 %v12121_v37  ;;  %v12131_v37 = vld [vmem:[%s17331_s5 + $0x62c] ss:$48 sps:$4 sm:$0xff]  }
 0x71e   : > { %7437 = vmatprep.mubr.bf16.mxu1 %v12122_v47  ;;  %v12133_v47 = vld [vmem:[%s17331_s5 + $0x628] ss:$48 sps:$4 sm:$0xff]  }
 0x725   : > { %7438 = vmatmul.mubr.bf16.gmra.mrb[132].mxu1 %v12124_v46  ;;  %v12134_v46 = vld [vmem:[%s17331_s5 + $0x68c] ss:$48 sps:$4 sm:$0xff]  }
 0x726   : > { %7445 = vmatprep.mubr.bf16.mxu1 %v12125_v52  ;;  %v12136_v52 = vld [vmem:[%s17331_s5 + $0x688] ss:$48 sps:$4 sm:$0xff]  }
 0x72d   : > { %7446 = vmatmul.mubr.bf16.gmra.mrb[136].mxu1 %v12127_v56  ;;  %v12137_v56 = vld [vmem:[%s17331_s5 + $0x6ec] ss:$48 sps:$4 sm:$0xff]  }
 0x72e   : > { %7453 = vmatprep.mubr.bf16.mxu1 %v12128_v11  ;;  %v12139_v11 = vld [vmem:[%s17331_s5 + $0x6e8] ss:$48 sps:$4 sm:$0xff]  }
 0x735   : > { %7454 = vmatmul.mubr.bf16.gmra.mrb[140].mxu1 %v12130_v10  ;;  %v12140_v10 = vld [vmem:[%s17331_s5 + $0x74c] ss:$48 sps:$4 sm:$0xff]  }
 0x736   : > { %7461 = vmatprep.mubr.bf16.mxu1 %v12131_v37  ;;  %v12142_v37 = vld [vmem:[%s17331_s5 + $0x748] ss:$48 sps:$4 sm:$0xff]  }
 0x73d   : > { %7462 = vmatmul.mubr.bf16.gmra.mrb[144].mxu1 %v12133_v47  ;;  %v12143_v47 = vld [vmem:[%s17331_s5 + $0x7ac] ss:$48 sps:$4 sm:$0xff]  }
 0x73e   : > { %7469 = vmatprep.mubr.bf16.mxu1 %v12134_v46  ;;  %v12145_v46 = vld [vmem:[%s17331_s5 + $0x7a8] ss:$48 sps:$4 sm:$0xff]  }
 0x745   : > { %7470 = vmatmul.mubr.bf16.gmra.mrb[148].mxu1 %v12136_v52  ;;  %v12146_v52 = vld [vmem:[%s17331_s5 + $0x80c] ss:$48 sps:$4 sm:$0xff]  }
 0x746   : > { %7477 = vmatprep.mubr.bf16.mxu1 %v12137_v56  ;;  %v12148_v56 = vld [vmem:[%s17331_s5 + $0x808] ss:$48 sps:$4 sm:$0xff]  }
 0x74d   : > { %7478 = vmatmul.mubr.bf16.gmra.mrb[24].mxu1 %v12139_v11  ;;  %v12149_v11 = vld [vmem:[%s17331_s5 + $0x86c] ss:$48 sps:$4 sm:$0xff]  }
 0x74e   : > { %7485 = vmatprep.mubr.bf16.mxu1 %v12140_v10  ;;  %v12151_v10 = vld [vmem:[%s17331_s5 + $0x868] ss:$48 sps:$4 sm:$0xff]  }
 0x755   : > { %7486 = vmatmul.mubr.bf16.gmra.mrb[28].mxu1 %v12142_v37  ;;  %v12152_v37 = vld [vmem:[%s17331_s5 + $0x8cc] ss:$48 sps:$4 sm:$0xff]  }
 0x756   : > { %7493 = vmatprep.mubr.bf16.mxu1 %v12143_v47  ;;  %v12154_v47 = vld [vmem:[%s17331_s5 + $0x8c8] ss:$48 sps:$4 sm:$0xff]  }
 0x75d   : > { %7494 = vmatmul.mubr.bf16.gmra.mrb[32].mxu1 %v12145_v46  ;;  %v12155_v46 = vld [vmem:[%s17331_s5 + $0x92c] ss:$48 sps:$4 sm:$0xff]  }
 0x75e   : > { %7501 = vmatprep.mubr.bf16.mxu1 %v12146_v52  ;;  %v12157_v52 = vld [vmem:[%s17331_s5 + $0x928] ss:$48 sps:$4 sm:$0xff]  }
 0x765   : > { %7502 = vmatmul.mubr.bf16.gmra.mrb[36].mxu1 %v12148_v56  ;;  %v12158_v56 = vld [vmem:[%s17331_s5 + $0x98c] ss:$48 sps:$4 sm:$0xff]  }
 0x766   : > { %7509 = vmatprep.mubr.bf16.mxu1 %v12149_v11  ;;  %v12160_v11 = vld [vmem:[%s17331_s5 + $0x988] ss:$48 sps:$4 sm:$0xff]  }
 0x76d   : > { %7510 = vmatmul.mubr.bf16.gmra.mrb[40].mxu1 %v12151_v10  ;;  %v12161_v10 = vld [vmem:[%s17331_s5 + $0x9ec] ss:$48 sps:$4 sm:$0xff]  }
 0x76e   : > { %7517 = vmatprep.mubr.bf16.mxu1 %v12152_v37  ;;  %v12163_v37 = vld [vmem:[%s17331_s5 + $0x9e8] ss:$48 sps:$4 sm:$0xff]  }
 0x775   : > { %7518 = vmatmul.mubr.bf16.gmra.mrb[44].mxu1 %v12154_v47  ;;  %v12164_v47 = vld [vmem:[%s17331_s5 + $0xa4c] ss:$48 sps:$4 sm:$0xff]  }
 0x776   : > { %7525 = vmatprep.mubr.bf16.mxu1 %v12155_v46  ;;  %v3872_v46 = vld [vmem:[%s17332_s6] sm:$0xff] }
 0x77d   : > { %7526 = vmatmul.mubr.bf16.gmra.mrb[48].mxu1 %v12157_v52  ;;  %v3873_v52 = vld [vmem:[%s17332_s6 + $0x8] sm:$0xff] }
 0x77e   : > { %7533 = vmatprep.mubr.bf16.mxu1 %v12158_v56  ;;  %v10834_v56 = vadd.f32 %v15264_v20, %v3872_v46  ;;  %v10836_v25 = vadd.f32 %v15266_v1, %v3873_v52  ;;  %v3874_v1 = vld [vmem:[%s17332_s6 + $0x10] sm:$0xff] }
 0x785   : > { %7534 = vmatmul.mubr.bf16.gmra.mrb[52].mxu1 %v12160_v11 }
 0x786   : > { %7541 = vmatprep.mubr.bf16.mxu1 %v12161_v10 }
 0x78d   : > { %7542 = vmatmul.mubr.bf16.gmra.mrb[56].mxu1 %v12163_v37  ;;  %v7654_v37 = vld [vmem:[%s17333_s7] sm:$0xff] }
 0x78e   : > { %7549 = vmatprep.mubr.bf16.mxu1 %v12164_v47  ;;  %v12167_v47 = vld [vmem:[%s17331_s5 + $0xaac] ss:$48 sps:$4 sm:$0xff]  }
 0x790   : > { %v7335_v11 = vpop.f32.mrb[80].mxu1 }
 0x791   : > { %v10835_v10 = vadd.f32 %v10834_v56, %v7335_v11  ;;  %v7337_v40 = vpop.f32.mrb[81].mxu1  ;;  %v7782_v11 = vld [vmem:[%s17334_s8] sm:$0xff] }
 0x792   : > { %v7338_v63 = vpop.f32.mrb[82].mxu1  ;;  %v7655_v40 = vld [vmem:[%s17333_s7 + $0x8] sm:$0xff] }
 0x793   : > { %v7590_v45 = vmax.f32 %v10835_v10, 0.0  ;;  %v10837_v20 = vadd.f32 %v10836_v25, %v7338_v63  ;;  %v7340_v46 = vpop.f32.mrb[83].mxu1  ;;  %v7783_v63 = vld [vmem:[%s17334_s8 + $0x8] sm:$0xff]  ;;  %v3875_v25 = vld [vmem:[%s17332_s6 + $0x18] sm:$0xff] }
 0x794   : > { %v10838_v46 = vadd.f32 %v15274_v38, %v3874_v1  ;;  %v10840_v8 = vadd.f32 %v15276_v2, %v3875_v25  ;;  %v12170_v38 = vld [vmem:[%s17331_s5 + $0xb0c] ss:$48 sps:$4 sm:$0xff]   ;;  %v12172_v2 = vld [vmem:[%s17331_s5 + $0xb08] ss:$48 sps:$4 sm:$0xff]  }
 0x795   : > { %v7718_v52 = vmul.f32 %v7654_v37, %v7590_v45  ;;  %v7591_v56 = vmax.f32 %v10837_v20, 0.0  ;;  %7550 = vmatmul.mubr.bf16.gmra.mrb[60].mxu1 %v12166_v50 }
 0x796   : > { %7557 = vmatprep.mubr.bf16.mxu1 %v12167_v47  ;;  %v7656_v47 = vld [vmem:[%s17333_s7 + $0x10] sm:$0xff] }
 0x797   : > { %v7719_v10 = vmul.f32 %v7655_v40, %v7591_v56  ;;  %v15657_v45 = vadd.f32 %v7782_v11, %v7718_v52  ;;  %v7657_v11 = vld [vmem:[%s17333_s7 + $0x18] sm:$0xff] }
 0x798   : > { %v7343_v27 = vpop.f32.mrb[84].mxu1 }
 0x799   : > { %v15659_v50 = vadd.f32 %v7783_v63, %v7719_v10  ;;  %v10839_v37 = vadd.f32 %v10838_v46, %v7343_v27  ;;  %v7345_v20 = vpop.f32.mrb[85].mxu1  ;;  %v12181_v27 = vld [vmem:[%s17335_s9 + $0x4] ss:$16 sps:$4 sm:$0xff]  }
 0x79a   : > { %v7346_v40 = vpop.f32.mrb[86].mxu1  ;;  %v3876_v63 = vld [vmem:[%s17332_s6 + $0x20] sm:$0xff]  ;;  %8390 = vmatprep.mubr.bf16.mxu0 %v12181_v27  ;;  %v7784_v46 = vld [vmem:[%s17334_s8 + $0x10] sm:$0xff] }
 0x79b   : > { %v7592_v1 = vmax.f32 %v10839_v37, 0.0  ;;  %v10841_v52 = vadd.f32 %v10840_v8, %v7346_v40  ;;  %v7348_v56 = vpop.f32.mrb[87].mxu1  ;;  %v7785_v8 = vld [vmem:[%s17334_s8 + $0x18] sm:$0xff]  ;;  %v3877_v37 = vld [vmem:[%s17332_s6 + $0x28] sm:$0xff]  ;;  %v10842_v40 = vadd.f32 %v15284_v16, %v3876_v63 }
 0x79c   : > { %v10844_v56 = vadd.f32 %v15286_v15, %v3877_v37  ;;  %v12173_v16 = vld [vmem:[%s17331_s5 + $0xb6c] ss:$48 sps:$4 sm:$0xff]   ;;  %v3878_v15 = vld [vmem:[%s17332_s6 + $0x30] sm:$0xff]  ;;  %v12175_v63 = vld [vmem:[%s17331_s5 + $0xb68] ss:$48 sps:$4 sm:$0xff]  }
 0x79d   : > { %v7720_v25 = vmul.f32 %v7656_v47, %v7592_v1  ;;  %v7593_v10 = vmax.f32 %v10841_v52, 0.0  ;;  %7558 = vmatmul.mubr.bf16.gmra.mrb[64].mxu1 %v12169_v30 }
 0x79e   : > { %7565 = vmatprep.mubr.bf16.mxu1 %v12170_v38  ;;  %v7658_v38 = vld [vmem:[%s17333_s7 + $0x20] sm:$0xff] }
 0x79f   : > { %v7721_v20 = vmul.f32 %v7657_v11, %v7593_v10  ;;  %v15692_v47 = vadd.f32 %v7784_v46, %v7720_v25 }
 0x7a0   : > { %v7351_v27 = vpop.f32.mrb[88].mxu1 }
 0x7a1   : > { %v15694_v30 = vadd.f32 %v7785_v8, %v7721_v20  ;;  %v10843_v1 = vadd.f32 %v10842_v40, %v7351_v27  ;;  %v7353_v52 = vpop.f32.mrb[89].mxu1  ;;  %v7659_v8 = vld [vmem:[%s17333_s7 + $0x28] sm:$0xff]  ;;  %v3879_v40 = vld [vmem:[%s17332_s6 + $0x38] sm:$0xff]  ;;  %v7786_v27 = vld [vmem:[%s17334_s8 + $0x20] sm:$0xff] }
 0x7a2   : > { %v7354_v11 = vpop.f32.mrb[90].mxu1  ;;  %v10846_v52 = vadd.f32 %v15294_v33, %v3878_v15  ;;  %v12176_v33 = vld [vmem:[%s17331_s5 + $0xbcc] ss:$48 sps:$4 sm:$0xff]  }
 0x7a3   : > { %v7594_v25 = vmax.f32 %v10843_v1, 0.0  ;;  %v10845_v10 = vadd.f32 %v10844_v56, %v7354_v11  ;;  %v7356_v46 = vpop.f32.mrb[91].mxu1  ;;  %v7787_v1 = vld [vmem:[%s17334_s8 + $0x28] sm:$0xff] }
 0x7a5   : > { %v7722_v37 = vmul.f32 %v7658_v38, %v7594_v25  ;;  %v7595_v20 = vmax.f32 %v10845_v10, 0.0  ;;  %7566 = vmatmul.mubr.bf16.gmra.mrb[68].mxu1 %v12172_v2  ;;  %v10848_v38 = vadd.f32 %v15296_v54, %v3879_v40  ;;  %v7661_v40 = vld [vmem:[%s17333_s7 + $0x38] sm:$0xff] }
 0x7a6   : > { %7573 = vmatprep.mubr.bf16.mxu1 %v12173_v16  ;;  %v7660_v16 = vld [vmem:[%s17333_s7 + $0x30] sm:$0xff] }
 0x7a7   : > { %v7723_v56 = vmul.f32 %v7659_v8, %v7595_v20  ;;  %v15725_v2 = vadd.f32 %v7786_v27, %v7722_v37  ;;  %v3880_v20 = vld [vmem:[%s17332_s6 + $0x40] sm:$0xff] }
 0x7a8   : > { %v7359_v11 = vpop.f32.mrb[92].mxu1 }
 0x7a9   : > { %v15727_v25 = vadd.f32 %v7787_v1, %v7723_v56  ;;  %v10847_v10 = vadd.f32 %v10846_v52, %v7359_v11  ;;  %v7361_v46 = vpop.f32.mrb[93].mxu1  ;;  %v3881_v52 = vld [vmem:[%s17332_s6 + $0x48] sm:$0xff]  ;;  %v7789_v56 = vld [vmem:[%s17334_s8 + $0x38] sm:$0xff]  ;;  %v10850_v11 = vadd.f32 %v15304_v0, %v3880_v20 }
 0x7aa   : > { %v7362_v31 = vpop.f32.mrb[94].mxu1  ;;  %v10852_v46 = vadd.f32 %v15306_v22, %v3881_v52 }
 0x7ab   : > { %v7596_v15 = vmax.f32 %v10847_v10, 0.0  ;;  %v10849_v8 = vadd.f32 %v10848_v38, %v7362_v31  ;;  %v7364_v37 = vpop.f32.mrb[95].mxu1  ;;  %v7788_v31 = vld [vmem:[%s17334_s8 + $0x30] sm:$0xff] }
 0x7ac   : > { %v12178_v37 = vld [vmem:[%s17331_s5 + $0xbc8] ss:$48 sps:$4 sm:$0xff]  }
 0x7ad   : > { %v7724_v27 = vmul.f32 %v7660_v16, %v7596_v15  ;;  %v7597_v1 = vmax.f32 %v10849_v8, 0.0  ;;  %7574 = vmatmul.mubr.bf16.gmra.mrb[72].mxu1 %v12175_v63 }
 0x7ae   : > { %7581 = vmatprep.mubr.bf16.mxu1 %v12176_v33  ;;  %v7662_v33 = vld [vmem:[%s17333_s7 + $0x40] sm:$0xff] }
 0x7af   : > { %v7725_v38 = vmul.f32 %v7661_v40, %v7597_v1  ;;  %v15757_v63 = vadd.f32 %v7788_v31, %v7724_v27  ;;  %v3882_v27 = vld [vmem:[%s17332_s6 + $0x50] sm:$0xff]  ;;  %v7663_v1 = vld [vmem:[%s17333_s7 + $0x48] sm:$0xff] }
 0x7b0   : > { %v7367_v10 = vpop.f32.mrb[96].mxu1 }
 0x7b1   : > { %v15759_v16 = vadd.f32 %v7789_v56, %v7725_v38  ;;  %v10851_v15 = vadd.f32 %v10850_v11, %v7367_v10  ;;  %v7369_v8 = vpop.f32.mrb[97].mxu1  ;;  %v3883_v56 = vld [vmem:[%s17332_s6 + $0x58] sm:$0xff]  ;;  %v7791_v11 = vld [vmem:[%s17334_s8 + $0x48] sm:$0xff]  ;;  %v10854_v38 = vadd.f32 %v15314_v62, %v3882_v27 }
 0x7b2   : > { %v7370_v54 = vpop.f32.mrb[98].mxu1 }
 0x7b3   : > { %v7598_v20 = vmax.f32 %v10851_v15, 0.0  ;;  %v10853_v22 = vadd.f32 %v10852_v46, %v7370_v54  ;;  %v7372_v40 = vpop.f32.mrb[99].mxu1  ;;  %v7790_v54 = vld [vmem:[%s17334_s8 + $0x40] sm:$0xff]  ;;  %v10856_v15 = vadd.f32 %v15316_v21, %v3883_v56  ;;  %v3885_v56 = vld [vmem:[%s17332_s6 + $0x68] sm:$0xff] }
 0x7b4   : > { %v3884_v21 = vld [vmem:[%s17332_s6 + $0x60] sm:$0xff] }
 0x7b5   : > { %v7726_v52 = vmul.f32 %v7662_v33, %v7598_v20  ;;  %v7599_v31 = vmax.f32 %v10853_v22, 0.0  ;;  %7582 = vmatmul.mubr.bf16.gmra.mrb[76].mxu1 %v12178_v37  ;;  %v7664_v22 = vld [vmem:[%s17333_s7 + $0x50] sm:$0xff] }
 0x7b7   : > { %v7727_v10 = vmul.f32 %v7663_v1, %v7599_v31  ;;  %v15786_v8 = vadd.f32 %v7790_v54, %v7726_v52  ;;  %v7665_v1 = vld [vmem:[%s17333_s7 + $0x58] sm:$0xff]  ;;  %v7792_v54 = vld [vmem:[%s17334_s8 + $0x50] sm:$0xff] }
 0x7b8   : > { %v7375_v46 = vpop.f32.mrb[100].mxu1 }
 0x7b9   : > { %v15788_v37 = vadd.f32 %v7791_v11, %v7727_v10  ;;  %v10855_v33 = vadd.f32 %v10854_v38, %v7375_v46  ;;  %v7377_v20 = vpop.f32.mrb[101].mxu1  ;;  %v7793_v11 = vld [vmem:[%s17334_s8 + $0x58] sm:$0xff]  ;;  %v10858_v38 = vadd.f32 %v15324_v9, %v3884_v21 }
 0x7ba   : > { %v7378_v40 = vpop.f32.mrb[102].mxu1 }
 0x7bb   : > { %v7600_v58 = vmax.f32 %v10855_v33, 0.0  ;;  %v10857_v62 = vadd.f32 %v10856_v15, %v7378_v40  ;;  %v7380_v27 = vpop.f32.mrb[103].mxu1  ;;  %v10860_v15 = vadd.f32 %v15326_v32, %v3885_v56  ;;  %v7666_v40 = vld [vmem:[%s17333_s7 + $0x60] sm:$0xff]  ;;  %v3886_v32 = vld [vmem:[%s17332_s6 + $0x70] sm:$0xff]  ;;  %v3887_v56 = vld [vmem:[%s17332_s6 + $0x78] sm:$0xff] }
 0x7bd   : > { %v7728_v52 = vmul.f32 %v7664_v22, %v7600_v58  ;;  %v7601_v31 = vmax.f32 %v10857_v62, 0.0 }
 0x7bf   : > { %v7729_v10 = vmul.f32 %v7665_v1, %v7601_v31  ;;  %v15812_v58 = vadd.f32 %v7792_v54, %v7728_v52  ;;  %v7667_v1 = vld [vmem:[%s17333_s7 + $0x68] sm:$0xff]  ;;  %v7794_v54 = vld [vmem:[%s17334_s8 + $0x60] sm:$0xff] }
 0x7c0   : > { %v7383_v46 = vpop.f32.mrb[104].mxu1 }
 0x7c1   : > { %v15814_v33 = vadd.f32 %v7793_v11, %v7729_v10  ;;  %v10859_v20 = vadd.f32 %v10858_v38, %v7383_v46  ;;  %v7385_v22 = vpop.f32.mrb[105].mxu1  ;;  %v7795_v11 = vld [vmem:[%s17334_s8 + $0x68] sm:$0xff]  ;;  %v10862_v38 = vadd.f32 %v15334_v39, %v3886_v32 }
 0x7c2   : > { %v7386_v62 = vpop.f32.mrb[106].mxu1 }
 0x7c3   : > { %v7602_v0 = vmax.f32 %v10859_v20, 0.0  ;;  %v10861_v9 = vadd.f32 %v10860_v15, %v7386_v62  ;;  %v7388_v21 = vpop.f32.mrb[107].mxu1  ;;  %v10864_v15 = vadd.f32 %v15336_v12, %v3887_v56  ;;  %v7668_v62 = vld [vmem:[%s17333_s7 + $0x70] sm:$0xff]  ;;  %v3888_v12 = vld [vmem:[%s17332_s6 + $0x80] sm:$0xff]  ;;  %v3889_v56 = vld [vmem:[%s17332_s6 + $0x88] sm:$0xff] }
 0x7c5   : > { %v7730_v52 = vmul.f32 %v7666_v40, %v7602_v0  ;;  %v7603_v31 = vmax.f32 %v10861_v9, 0.0 }
 0x7c7   : > { %v7731_v10 = vmul.f32 %v7667_v1, %v7603_v31  ;;  %v15838_v0 = vadd.f32 %v7794_v54, %v7730_v52  ;;  %v7669_v1 = vld [vmem:[%s17333_s7 + $0x78] sm:$0xff]  ;;  %v7796_v54 = vld [vmem:[%s17334_s8 + $0x70] sm:$0xff] }
 0x7c8   : > { %v7391_v46 = vpop.f32.mrb[108].mxu1 }
 0x7c9   : > { %v15840_v20 = vadd.f32 %v7795_v11, %v7731_v10  ;;  %v10863_v22 = vadd.f32 %v10862_v38, %v7391_v46  ;;  %v7393_v40 = vpop.f32.mrb[109].mxu1  ;;  %v7797_v11 = vld [vmem:[%s17334_s8 + $0x78] sm:$0xff]  ;;  %v10866_v38 = vadd.f32 %v15344_v18, %v3888_v12 }
 0x7ca   : > { %v7394_v9 = vpop.f32.mrb[110].mxu1 }
 0x7cb   : > { %v7604_v27 = vmax.f32 %v10863_v22, 0.0  ;;  %v10865_v39 = vadd.f32 %v10864_v15, %v7394_v9  ;;  %v7396_v32 = vpop.f32.mrb[111].mxu1  ;;  %v10868_v15 = vadd.f32 %v15346_v60, %v3889_v56  ;;  %v7670_v9 = vld [vmem:[%s17333_s7 + $0x80] sm:$0xff]  ;;  %v3890_v60 = vld [vmem:[%s17332_s6 + $0x90] sm:$0xff]  ;;  %v3891_v56 = vld [vmem:[%s17332_s6 + $0x98] sm:$0xff] }
 0x7cd   : > { %v7732_v52 = vmul.f32 %v7668_v62, %v7604_v27  ;;  %v7605_v31 = vmax.f32 %v10865_v39, 0.0 }
 0x7cf   : > { %v7733_v10 = vmul.f32 %v7669_v1, %v7605_v31  ;;  %v15864_v27 = vadd.f32 %v7796_v54, %v7732_v52  ;;  %v7671_v1 = vld [vmem:[%s17333_s7 + $0x88] sm:$0xff]  ;;  %v7798_v54 = vld [vmem:[%s17334_s8 + $0x80] sm:$0xff] }
 0x7d0   : > { %v7399_v46 = vpop.f32.mrb[112].mxu1 }
 0x7d1   : > { %v15866_v22 = vadd.f32 %v7797_v11, %v7733_v10  ;;  %v10867_v40 = vadd.f32 %v10866_v38, %v7399_v46  ;;  %v7401_v62 = vpop.f32.mrb[113].mxu1  ;;  %v7799_v11 = vld [vmem:[%s17334_s8 + $0x88] sm:$0xff]  ;;  %v10870_v38 = vadd.f32 %v15354_v34, %v3890_v60  ;;  %v3892_v34 = vld [vmem:[%s17332_s6 + $0xa0] sm:$0xff] }
 0x7d2   : > { %v7402_v39 = vpop.f32.mrb[114].mxu1 }
 0x7d3   : > { %v7606_v21 = vmax.f32 %v10867_v40, 0.0  ;;  %v10869_v18 = vadd.f32 %v10868_v15, %v7402_v39  ;;  %v7404_v12 = vpop.f32.mrb[115].mxu1  ;;  %v10872_v15 = vadd.f32 %v15356_v59, %v3891_v56  ;;  %v7672_v39 = vld [vmem:[%s17333_s7 + $0x90] sm:$0xff]  ;;  %v7673_v59 = vld [vmem:[%s17333_s7 + $0x98] sm:$0xff]  ;;  %v17383_v56 = vpack.c.bf16 %v15659_v50, %v15657_v45 }
 0x7d5   : > { %v7734_v52 = vmul.f32 %v7670_v9, %v7606_v21  ;;  %v7607_v31 = vmax.f32 %v10869_v18, 0.0 }
 0x7d7   : > { %v7735_v10 = vmul.f32 %v7671_v1, %v7607_v31  ;;  %v7862_v21 = vadd.f32 %v7798_v54, %v7734_v52  ;;  %v3893_v52 = vld [vmem:[%s17332_s6 + $0xa8] sm:$0xff]  ;;  %v7801_v31 = vld [vmem:[%s17334_s8 + $0x98] sm:$0xff]  ;;  %v10874_v54 = vadd.f32 %v15364_v51, %v3892_v34  ;;  %v3894_v51 = vld [vmem:[%s17332_s6 + $0xb0] sm:$0xff] }
 0x7d8   : > { %v7407_v46 = vpop.f32.mrb[116].mxu1  ;;  %v7802_v34 = vld [vmem:[%s17334_s8 + $0xa0] sm:$0xff] }
 0x7d9   : > { %v7863_v40 = vadd.f32 %v7799_v11, %v7735_v10  ;;  %v10871_v62 = vadd.f32 %v10870_v38, %v7407_v46  ;;  %v7409_v9 = vpop.f32.mrb[117].mxu1  ;;  %v10876_v11 = vadd.f32 %v15366_v43, %v3893_v52  ;;  %v7675_v43 = vld [vmem:[%s17333_s7 + $0xa8] sm:$0xff] }
 0x7da   : > { %v7410_v18 = vpop.f32.mrb[118].mxu1 }
 0x7db   : > { %v7608_v12 = vmax.f32 %v10871_v62, 0.0  ;;  %v10873_v32 = vadd.f32 %v10872_v15, %v7410_v18  ;;  %v7412_v6 = vpop.f32.mrb[119].mxu1  ;;  %v7982_v44 = vpack.c.bf16 %v7863_v40, %v7862_v21  ;;  %v7674_v21 = vld [vmem:[%s17333_s7 + $0xa0] sm:$0xff] }
 0x7dc   : > { %v7800_v6 = vld [vmem:[%s17334_s8 + $0x90] sm:$0xff] }
 0x7dd   : > { %v7736_v60 = vmul.f32 %v7672_v39, %v7608_v12  ;;  %v7609_v1 = vmax.f32 %v10873_v32, 0.0  ;;  %10246 = vmatprep.subr.bf16.mxu0 %v7982_v44  ;;  %v3895_v12 = vld [vmem:[%s17332_s6 + $0xb8] sm:$0xff] }
 0x7de   : > { %10247 = vmatpush3.bf16.msra.mxu0 %v17383_v56 }
 0x7df   : > { %v7737_v32 = vmul.f32 %v7673_v59, %v7609_v1  ;;  %v7864_v38 = vadd.f32 %v7800_v6, %v7736_v60  ;;  %v7803_v59 = vld [vmem:[%s17334_s8 + $0xa8] sm:$0xff]  ;;  %v17384_v60 = vpack.c.bf16 %v15694_v30, %v15692_v47  ;;  %v10878_v1 = vadd.f32 %v15374_v36, %v3894_v51  ;;  %v3896_v36 = vld [vmem:[%s17332_s6 + $0xc0] sm:$0xff] }
 0x7e0   : > { %v7415_v44 = vpop.f32.mrb[120].mxu1 }
 0x7e1   : > { %v7865_v10 = vadd.f32 %v7801_v31, %v7737_v32  ;;  %v10875_v46 = vadd.f32 %v10874_v54, %v7415_v44  ;;  %v7417_v15 = vpop.f32.mrb[121].mxu1  ;;  %v10880_v31 = vadd.f32 %v15376_v17, %v3895_v12  ;;  %v7677_v17 = vld [vmem:[%s17333_s7 + $0xb8] sm:$0xff] }
 0x7e2   : > { %v7418_v40 = vpop.f32.mrb[122].mxu1 }
 0x7e3   : > { %v7610_v62 = vmax.f32 %v10875_v46, 0.0  ;;  %v10877_v9 = vadd.f32 %v10876_v11, %v7418_v40  ;;  %v7420_v39 = vpop.f32.mrb[123].mxu1  ;;  %v7983_v45 = vpack.c.bf16 %v7865_v10, %v7864_v38  ;;  %v7676_v11 = vld [vmem:[%s17333_s7 + $0xb0] sm:$0xff]  ;;  %v3897_v40 = vld [vmem:[%s17332_s6 + $0xc8] sm:$0xff] }
 0x7e4   : > { %v17385_v39 = vpack.c.bf16 %v15727_v25, %v15725_v2 }
 0x7e5   : > { %v7738_v50 = vmul.f32 %v7674_v21, %v7610_v62  ;;  %v7611_v18 = vmax.f32 %v10877_v9, 0.0  ;;  %10248 = vmatprep.subr.bf16.mxu0 %v7983_v45  ;;  %v7804_v62 = vld [vmem:[%s17334_s8 + $0xb0] sm:$0xff]  ;;  %v7805_v9 = vld [vmem:[%s17334_s8 + $0xb8] sm:$0xff]  ;;  %v10882_v45 = vadd.f32 %v15384_v3, %v3896_v36 }
 0x7e6   : > { %10249 = vmatpush3.bf16.msra.mxu0 %v17384_v60  ;;  %v7678_v60 = vld [vmem:[%s17333_s7 + $0xc0] sm:$0xff]  ;;  %v3898_v3 = vld [vmem:[%s17332_s6 + $0xd0] sm:$0xff] }
 0x7e7   : > { %v7739_v52 = vmul.f32 %v7675_v43, %v7611_v18  ;;  %v7866_v56 = vadd.f32 %v7802_v34, %v7738_v50  ;;  %v10884_v50 = vadd.f32 %v15386_v57, %v3897_v40  ;;  %v7679_v57 = vld [vmem:[%s17333_s7 + $0xc8] sm:$0xff] }
 0x7e8   : > { %v7423_v6 = vpop.f32.mrb[124].mxu1 }
 0x7e9   : > { %v7867_v54 = vadd.f32 %v7803_v59, %v7739_v52  ;;  %v10879_v32 = vadd.f32 %v10878_v1, %v7423_v6  ;;  %v7425_v44 = vpop.f32.mrb[125].mxu1 }
 0x7ea   : > { %v7426_v38 = vpop.f32.mrb[126].mxu1  ;;  %v7807_v44 = vld [vmem:[%s17334_s8 + $0xc8] sm:$0xff] }
 0x7eb   : > { %v7612_v10 = vmax.f32 %v10879_v32, 0.0  ;;  %v10881_v46 = vadd.f32 %v10880_v31, %v7426_v38  ;;  %v7428_v15 = vpop.f32.mrb[127].mxu1  ;;  %v7984_v47 = vpack.c.bf16 %v7867_v54, %v7866_v56  ;;  %v3899_v54 = vld [vmem:[%s17332_s6 + $0xd8] sm:$0xff]  ;;  %v7806_v32 = vld [vmem:[%s17334_s8 + $0xc0] sm:$0xff]  ;;  %v10886_v38 = vadd.f32 %v15394_v13, %v3898_v3 }
 0x7ec   : > { %v10888_v15 = vadd.f32 %v15396_v49, %v3899_v54  ;;  %v3900_v13 = vld [vmem:[%s17332_s6 + $0xe0] sm:$0xff]  ;;  %v7681_v49 = vld [vmem:[%s17333_s7 + $0xd8] sm:$0xff] }
 0x7ed   : > { %v7740_v30 = vmul.f32 %v7676_v11, %v7612_v10  ;;  %v7613_v21 = vmax.f32 %v10881_v46, 0.0  ;;  %10250 = vmatprep.subr.bf16.mxu0 %v7984_v47  ;;  %v17386_v11 = vpack.c.bf16 %v15759_v16, %v15757_v63 }
 0x7ee   : > { %10251 = vmatpush3.bf16.msra.mxu0 %v17385_v39 }
 0x7ef   : > { %v7741_v51 = vmul.f32 %v7677_v17, %v7613_v21  ;;  %v7868_v18 = vadd.f32 %v7804_v62, %v7740_v30  ;;  %v7680_v21 = vld [vmem:[%s17333_s7 + $0xd0] sm:$0xff] }
 0x7f0   : > { %v7431_v43 = vpop.f32.mrb[128].mxu1 }
 0x7f1   : > { %v7869_v12 = vadd.f32 %v7805_v9, %v7741_v51  ;;  %v10883_v34 = vadd.f32 %v10882_v45, %v7431_v43  ;;  %v7433_v59 = vpop.f32.mrb[129].mxu1  ;;  %v3901_v51 = vld [vmem:[%s17332_s6 + $0xe8] sm:$0xff]  ;;  %v7808_v43 = vld [vmem:[%s17334_s8 + $0xd0] sm:$0xff] }
 0x7f2   : > { %v7434_v1 = vpop.f32.mrb[130].mxu1 }
 0x7f3   : > { %v7614_v52 = vmax.f32 %v10883_v34, 0.0  ;;  %v10885_v6 = vadd.f32 %v10884_v50, %v7434_v1  ;;  %v7436_v31 = vpop.f32.mrb[131].mxu1  ;;  %v7985_v2 = vpack.c.bf16 %v7869_v12, %v7868_v18  ;;  %v7809_v50 = vld [vmem:[%s17334_s8 + $0xd8] sm:$0xff]  ;;  %v17387_v18 = vpack.c.bf16 %v15788_v37, %v15786_v8 }
 0x7f4   : > { %v10890_v12 = vadd.f32 %v15404_v5, %v3900_v13  ;;  %v3902_v5 = vld [vmem:[%s17332_s6 + $0xf0] sm:$0xff] }
 0x7f5   : > { %v7742_v25 = vmul.f32 %v7678_v60, %v7614_v52  ;;  %v7615_v56 = vmax.f32 %v10885_v6, 0.0  ;;  %10252 = vmatprep.subr.bf16.mxu0 %v7985_v2  ;;  %v10892_v60 = vadd.f32 %v15406_v4, %v3901_v51  ;;  %v7682_v2 = vld [vmem:[%s17333_s7 + $0xe0] sm:$0xff]  ;;  %v7683_v4 = vld [vmem:[%s17333_s7 + $0xe8] sm:$0xff]  ;;  %v17389_v51 = vpack.c.bf16 %v15840_v20, %v15838_v0  ;;  %v3907_v20 = vld [vmem:[%s17332_s6 + $0x118] sm:$0xff] }
 0x7f6   : > { %10253 = vmatpush3.bf16.msra.mxu0 %v17386_v11  ;;  %v7811_v11 = vld [vmem:[%s17334_s8 + $0xe8] sm:$0xff] }
 0x7f7   : > { %v7743_v10 = vmul.f32 %v7679_v57, %v7615_v56  ;;  %v7870_v47 = vadd.f32 %v7806_v32, %v7742_v25  ;;  %v3903_v32 = vld [vmem:[%s17332_s6 + $0xf8] sm:$0xff] }
 0x7f8   : > { %v7439_v46 = vpop.f32.mrb[132].mxu1 }
 0x7f9   : > { %v7871_v36 = vadd.f32 %v7807_v44, %v7743_v10  ;;  %v10887_v17 = vadd.f32 %v10886_v38, %v7439_v46  ;;  %v7441_v30 = vpop.f32.mrb[133].mxu1  ;;  %v7810_v44 = vld [vmem:[%s17334_s8 + $0xe0] sm:$0xff]  ;;  %v17388_v38 = vpack.c.bf16 %v15814_v33, %v15812_v58  ;;  %v10894_v10 = vadd.f32 %v15414_v29, %v3902_v5  ;;  %v7815_v5 = vld [vmem:[%s17334_s8 + $0x108] sm:$0xff] }
 0x7fa   : > { %v7442_v40 = vpop.f32.mrb[134].mxu1  ;;  %v3904_v29 = vld [vmem:[%s17332_s6 + $0x100] sm:$0xff] }
 0x7fb   : > { %v7616_v62 = vmax.f32 %v10887_v17, 0.0  ;;  %v10889_v9 = vadd.f32 %v10888_v15, %v7442_v40  ;;  %v7444_v39 = vpop.f32.mrb[135].mxu1  ;;  %v7986_v63 = vpack.c.bf16 %v7871_v36, %v7870_v47  ;;  %v10896_v47 = vadd.f32 %v15416_v28, %v3903_v32  ;;  %v7684_v40 = vld [vmem:[%s17333_s7 + $0xf0] sm:$0xff]  ;;  %v7685_v28 = vld [vmem:[%s17333_s7 + $0xf8] sm:$0xff] }
 0x7fd   : > { %v7744_v16 = vmul.f32 %v7680_v21, %v7616_v62  ;;  %v7617_v45 = vmax.f32 %v10889_v9, 0.0  ;;  %10254 = vmatprep.subr.bf16.mxu0 %v7986_v63 }
 0x7fe   : > { %10255 = vmatpush3.bf16.msra.mxu0 %v17387_v18 }
 0x7ff   : > { %v7745_v34 = vmul.f32 %v7681_v49, %v7617_v45  ;;  %v7872_v1 = vadd.f32 %v7808_v43, %v7744_v16  ;;  %v3905_v49 = vld [vmem:[%s17332_s6 + $0x108] sm:$0xff]  ;;  %v7812_v16 = vld [vmem:[%s17334_s8 + $0xf0] sm:$0xff]  ;;  %v7813_v45 = vld [vmem:[%s17334_s8 + $0xf8] sm:$0xff]  ;;  %v10898_v43 = vadd.f32 %v15424_v35, %v3904_v29 }
 0x800   : > { %v7447_v59 = vpop.f32.mrb[136].mxu1  ;;  %v3906_v35 = vld [vmem:[%s17332_s6 + $0x110] sm:$0xff] }
 0x801   : > { %v7873_v52 = vadd.f32 %v7809_v50, %v7745_v34  ;;  %v10891_v6 = vadd.f32 %v10890_v12, %v7447_v59  ;;  %v7449_v31 = vpop.f32.mrb[137].mxu1  ;;  %v10900_v12 = vadd.f32 %v15426_v26, %v3905_v49  ;;  %v7687_v26 = vld [vmem:[%s17333_s7 + $0x108] sm:$0xff] }
 0x802   : > { %v7450_v3 = vpop.f32.mrb[138].mxu1 }
 0x803   : > { %v7618_v57 = vmax.f32 %v10891_v6, 0.0  ;;  %v10893_v25 = vadd.f32 %v10892_v60, %v7450_v3  ;;  %v7452_v56 = vpop.f32.mrb[139].mxu1  ;;  %v7987_v8 = vpack.c.bf16 %v7873_v52, %v7872_v1  ;;  %v7686_v52 = vld [vmem:[%s17333_s7 + $0x100] sm:$0xff] }
 0x804   : > { %v12179_v56 = vld [vmem:[%s17335_s9] ss:$16 sps:$4 sm:$0xff]  }
 0x805   : > { %v7746_v37 = vmul.f32 %v7682_v2, %v7618_v57  ;;  %v7619_v54 = vmax.f32 %v10893_v25, 0.0  ;;  %10256 = vmatprep.subr.bf16.mxu0 %v7987_v8  ;;  %v7814_v8 = vld [vmem:[%s17334_s8 + $0x100] sm:$0xff] }
 0x806   : > { %10257 = vmatpush3.bf16.msra.mxu0 %v17388_v38 }
 0x807   : > { %v7747_v46 = vmul.f32 %v7683_v4, %v7619_v54  ;;  %v7874_v36 = vadd.f32 %v7810_v44, %v7746_v37  ;;  %v17390_v4 = vpack.c.bf16 %v15866_v22, %v15864_v27  ;;  %v12184_v37 = vld [vmem:[%s17335_s9 + $0x24] ss:$16 sps:$4 sm:$0xff]   ;;  %v10902_v54 = vadd.f32 %v15434_v53, %v3906_v35 }
 0x808   : > { %v7455_v15 = vpop.f32.mrb[140].mxu1  ;;  %v7688_v27 = vld [vmem:[%s17333_s7 + $0x110] sm:$0xff] }
 0x809   : > { %v7875_v17 = vadd.f32 %v7811_v11, %v7747_v46  ;;  %v10895_v30 = vadd.f32 %v10894_v10, %v7455_v15  ;;  %v7457_v21 = vpop.f32.mrb[141].mxu1  ;;  %v10904_v11 = vadd.f32 %v15436_v55, %v3907_v20  ;;  %v7689_v55 = vld [vmem:[%s17333_s7 + $0x118] sm:$0xff] }
 0x80a   : > { %v7458_v62 = vpop.f32.mrb[142].mxu1 }
 0x80b   : > { %v7620_v9 = vmax.f32 %v10895_v30, 0.0  ;;  %v10897_v39 = vadd.f32 %v10896_v47, %v7458_v62  ;;  %v7460_v63 = vpop.f32.mrb[143].mxu1  ;;  %v7988_v58 = vpack.c.bf16 %v7875_v17, %v7874_v36  ;;  %v3908_v30 = vld [vmem:[%s17332_s6 + $0x120] sm:$0xff] }
 0x80c   : > { %v12182_v62 = vld [vmem:[%s17335_s9 + $0x20] ss:$16 sps:$4 sm:$0xff]   ;;  %v7817_v63 = vld [vmem:[%s17334_s8 + $0x118] sm:$0xff] }
 0x80d   : > { %v7748_v33 = vmul.f32 %v7684_v40, %v7620_v9  ;;  %v7621_v13 = vmax.f32 %v10897_v39, 0.0  ;;  %10258 = vmatprep.subr.bf16.mxu0 %v7988_v58  ;;  %v3909_v9 = vld [vmem:[%s17332_s6 + $0x128] sm:$0xff]  ;;  %v7816_v39 = vld [vmem:[%s17334_s8 + $0x110] sm:$0xff] }
 0x80e   : > { %10259 = vmatpush3.bf16.msra.mxu0 %v17389_v51  ;;  %v12187_v58 = vld [vmem:[%s17335_s9 + $0x44] ss:$16 sps:$4 sm:$0xff]   ;;  %v6038_v51 = vadd.f32 %v15129_v7, %v3909_v9 }
 0x80f   : > { %v7749_v50 = vmul.f32 %v7685_v28, %v7621_v13  ;;  %v7876_v34 = vadd.f32 %v7812_v16, %v7748_v33  ;;  %v6035_v28 = vadd.f32 %v15122_v41, %v3908_v30  ;;  %v3910_v7 = vld [vmem:[%s17332_s6 + $0x130] sm:$0xff] }
 0x810   : > { %v7463_v18 = vpop.f32.mrb[144].mxu1  ;;  %v6043_v35 = vadd.f32 %v15131_v23, %v3910_v7 }
 0x811   : > { %v7877_v59 = vadd.f32 %v7813_v45, %v7749_v50  ;;  %v10899_v60 = vadd.f32 %v10898_v43, %v7463_v18  ;;  %v7465_v1 = vpop.f32.mrb[145].mxu1  ;;  %v7690_v43 = vld [vmem:[%s17333_s7 + $0x120] sm:$0xff] }
 0x812   : > { %v7466_v6 = vpop.f32.mrb[146].mxu1 }
 0x813   : > { %v7622_v31 = vmax.f32 %v10899_v60, 0.0  ;;  %v10901_v2 = vadd.f32 %v10900_v12, %v7466_v6  ;;  %v7468_v3 = vpop.f32.mrb[147].mxu1  ;;  %v7989_v0 = vpack.c.bf16 %v7877_v59, %v7876_v34  ;;  %v7691_v59 = vld [vmem:[%s17333_s7 + $0x128] sm:$0xff]  ;;  %v3911_v6 = vld [vmem:[%s17332_s6 + $0x138] sm:$0xff] }
 0x814   : > { %v12190_v3 = vld [vmem:[%s17335_s9 + $0x64] ss:$16 sps:$4 sm:$0xff]  }
 0x815   : > { %v7750_v57 = vmul.f32 %v7686_v52, %v7622_v31  ;;  %v7623_v25 = vmax.f32 %v10901_v2, 0.0  ;;  %10260 = vmatprep.subr.bf16.mxu0 %v7989_v0  ;;  %v12185_v52 = vld [vmem:[%s17335_s9 + $0x40] ss:$16 sps:$4 sm:$0xff]   ;;  %v7819_v2 = vld [vmem:[%s17334_s8 + $0x128] sm:$0xff] }
 0x816   : > { %10261 = vmatpush3.bf16.msra.mxu0 %v17390_v4  ;;  %v7818_v31 = vld [vmem:[%s17334_s8 + $0x120] sm:$0xff] }
 0x817   : > { %v7751_v32 = vmul.f32 %v7687_v26, %v7623_v25  ;;  %v16080_v38 = vadd.f32 %v7814_v8, %v7750_v57  ;;  %v6046_v8 = vadd.f32 %v15137_v24, %v3911_v6  ;;  %v3912_v24 = vld [vmem:[%s17332_s6 + $0x140] sm:$0xff] }
 0x818   : > { %v7471_v44 = vpop.f32.mrb[148].mxu1 }
 0x819   : > { %v16082_v10 = vadd.f32 %v7815_v5, %v7751_v32  ;;  %v10903_v46 = vadd.f32 %v10902_v54, %v7471_v44  ;;  %v7473_v15 = vpop.f32.mrb[149].mxu1  ;;  %8391 = vmatmul.mubr.bf16.vlgmr.msra.gmra.mrb[88].mxu0 %v12179_v56  ;;  %v7692_v5 = vld [vmem:[%s17333_s7 + $0x130] sm:$0xff]  ;;  %v7693_v44 = vld [vmem:[%s17333_s7 + $0x138] sm:$0xff] }
 0x81a   : > { %v7474_v22 = vpop.f32.mrb[150].mxu1  ;;  %8398 = vmatprep.mubr.bf16.mxu0 %v12184_v37  ;;  %v12188_v15 = vld [vmem:[%s17335_s9 + $0x60] ss:$16 sps:$4 sm:$0xff]  }
 0x81b   : > { %v7990_v53 = vpack.c.bf16 %v16082_v10, %v16080_v38  ;;  %v7624_v47 = vmax.f32 %v10903_v46, 0.0  ;;  %v10905_v36 = vadd.f32 %v10904_v11, %v7474_v22  ;;  %v7476_v17 = vpop.f32.mrb[151].mxu1  ;;  %v7820_v22 = vld [vmem:[%s17334_s8 + $0x130] sm:$0xff]  ;;  %v7706_v38 = vld [vmem:[%s17333_s7 + $0x1a0] sm:$0xff] }
 0x81d   : > { %v7752_v21 = vmul.f32 %v7688_v27, %v7624_v47  ;;  %v7625_v40 = vmax.f32 %v10905_v36, 0.0  ;;  %v3913_v27 = vld [vmem:[%s17332_s6 + $0x148] sm:$0xff]  ;;  %v7821_v47 = vld [vmem:[%s17334_s8 + $0x138] sm:$0xff]  ;;  %v12193_v36 = vld [vmem:[%s17335_s9 + $0x84] ss:$16 sps:$4 sm:$0xff]  }
 0x81f   : > { %v7753_v29 = vmul.f32 %v7689_v55, %v7625_v40  ;;  %v16111_v13 = vadd.f32 %v7816_v39, %v7752_v21  ;;  %v6051_v55 = vadd.f32 %v15145_v42, %v3912_v24  ;;  %v6054_v39 = vadd.f32 %v15151_v14, %v3913_v27  ;;  %v3914_v14 = vld [vmem:[%s17332_s6 + $0x150] sm:$0xff] }
 0x820   : > { %v7479_v33 = vpop.f32.mrb[24].mxu1  ;;  %v6059_v7 = vadd.f32 %v15153_v61, %v3914_v14  ;;  %v7826_v14 = vld [vmem:[%s17334_s8 + $0x160] sm:$0xff] }
 0x821   : > { %v16113_v49 = vadd.f32 %v7817_v63, %v7753_v29  ;;  %v10907_v16 = vadd.f32 %v7479_v33, %v6035_v28  ;;  %v7481_v45 = vpop.f32.mrb[25].mxu1  ;;  %8399 = vmatmul.mubr.bf16.gmra.mrb[92].mxu0 %v12182_v62  ;;  %v7694_v63 = vld [vmem:[%s17333_s7 + $0x140] sm:$0xff] }
 0x822   : > { %v7482_v50 = vpop.f32.mrb[26].mxu1  ;;  %8406 = vmatprep.mubr.bf16.mxu0 %v12187_v58 }
 0x823   : > { %v7991_v18 = vpack.c.bf16 %v16113_v49, %v16111_v13  ;;  %v7626_v41 = vmax.f32 %v10907_v16, 0.0  ;;  %v10909_v12 = vadd.f32 %v7482_v50, %v6038_v51  ;;  %v7484_v34 = vpop.f32.mrb[27].mxu1  ;;  %v7695_v16 = vld [vmem:[%s17333_s7 + $0x148] sm:$0xff]  ;;  %v3915_v50 = vld [vmem:[%s17332_s6 + $0x158] sm:$0xff]  ;;  %v7708_v13 = vld [vmem:[%s17333_s7 + $0x1b0] sm:$0xff] }
 0x824   : > { %v12196_v34 = vld [vmem:[%s17335_s9 + $0xa4] ss:$16 sps:$4 sm:$0xff]  }
 0x825   : > { %v7754_v60 = vmul.f32 %v7690_v43, %v7626_v41  ;;  %v7627_v1 = vmax.f32 %v10909_v12, 0.0  ;;  %v12191_v43 = vld [vmem:[%s17335_s9 + $0x80] ss:$16 sps:$4 sm:$0xff]   ;;  %v7823_v12 = vld [vmem:[%s17334_s8 + $0x148] sm:$0xff] }
 0x826   : > { %v7822_v41 = vld [vmem:[%s17334_s8 + $0x140] sm:$0xff] }
 0x827   : > { %v7755_v0 = vmul.f32 %v7691_v59, %v7627_v1  ;;  %v16143_v20 = vadd.f32 %v7818_v31, %v7754_v60 }
 0x828   : > { %v7487_v26 = vpop.f32.mrb[28].mxu1 }
 0x829   : > { %v16145_v57 = vadd.f32 %v7819_v2, %v7755_v0  ;;  %v10911_v25 = vadd.f32 %v7487_v26, %v6043_v35  ;;  %v7489_v56 = vpop.f32.mrb[29].mxu1  ;;  %8407 = vmatmul.mubr.bf16.gmra.mrb[96].mxu0 %v12185_v52  ;;  %v6062_v2 = vadd.f32 %v15159_v19, %v3915_v50  ;;  %v3916_v19 = vld [vmem:[%s17332_s6 + $0x160] sm:$0xff]  ;;  %v17392_v50 = vld [vmem:[#allocation4_spill] sm:$0xff] }
 0x82a   : > { %v7490_v4 = vpop.f32.mrb[30].mxu1  ;;  %8414 = vmatprep.mubr.bf16.mxu0 %v12190_v3  ;;  %v7696_v3 = vld [vmem:[%s17333_s7 + $0x150] sm:$0xff]  ;;  %v7697_v56 = vld [vmem:[%s17333_s7 + $0x158] sm:$0xff] }
 0x82b   : > { %v7992_v37 = vpack.c.bf16 %v16145_v57, %v16143_v20  ;;  %v7628_v23 = vmax.f32 %v10911_v25, 0.0  ;;  %v10913_v54 = vadd.f32 %v7490_v4, %v6046_v8  ;;  %v7492_v32 = vpop.f32.mrb[31].mxu1  ;;  %v12194_v4 = vld [vmem:[%s17335_s9 + $0xa0] ss:$16 sps:$4 sm:$0xff]  }
 0x82c   : > { %v7825_v32 = vld [vmem:[%s17334_s8 + $0x158] sm:$0xff]  ;;  %v7710_v20 = vld [vmem:[%s17333_s7 + $0x1c0] sm:$0xff] }
 0x82d   : > { %v7756_v11 = vmul.f32 %v7692_v5, %v7628_v23  ;;  %v7629_v46 = vmax.f32 %v10913_v54, 0.0  ;;  %v3917_v23 = vld [vmem:[%s17332_s6 + $0x168] sm:$0xff]  ;;  %v7824_v54 = vld [vmem:[%s17334_s8 + $0x150] sm:$0xff] }
 0x82f   : > { %v7757_v17 = vmul.f32 %v7693_v44, %v7629_v46  ;;  %v16175_v21 = vadd.f32 %v7820_v22, %v7756_v11  ;;  %v12199_v44 = vld [vmem:[%s17335_s9 + $0xc4] ss:$16 sps:$4 sm:$0xff]   ;;  %v6067_v11 = vadd.f32 %v15167_v48, %v3916_v19 }
 0x830   : > { %v7495_v30 = vpop.f32.mrb[32].mxu1  ;;  %v3920_v19 = vld [vmem:[%s17332_s6 + $0x180] sm:$0xff] }
 0x831   : > { %v16177_v40 = vadd.f32 %v7821_v47, %v7757_v17  ;;  %v10915_v62 = vadd.f32 %v7495_v30, %v6051_v55  ;;  %v7497_v9 = vpop.f32.mrb[33].mxu1  ;;  %8415 = vmatmul.mubr.bf16.gmra.mrb[100].mxu0 %v12188_v15  ;;  %v7698_v55 = vld [vmem:[%s17333_s7 + $0x160] sm:$0xff] }
 0x832   : > { %v7498_v58 = vpop.f32.mrb[34].mxu1  ;;  %8422 = vmatprep.mubr.bf16.mxu0 %v12193_v36  ;;  %v17391_v36 = vld [vmem:[#allocation3_spill] sm:$0xff] }
 0x833   : > { %v7993_v29 = vpack.c.bf16 %v16177_v40, %v16175_v21  ;;  %v7630_v42 = vmax.f32 %v10915_v62, 0.0  ;;  %v10917_v28 = vadd.f32 %v7498_v58, %v6054_v39  ;;  %v7500_v33 = vpop.f32.mrb[35].mxu1  ;;  %v6070_v17 = vadd.f32 %v17391_v36, %v3917_v23  ;;  %v3918_v58 = vld [vmem:[%s17332_s6 + $0x170] sm:$0xff]  ;;  %v3921_v23 = vld [vmem:[%s17332_s6 + $0x188] sm:$0xff] }
 0x834   : > { %v12197_v33 = vld [vmem:[%s17335_s9 + $0xc0] ss:$16 sps:$4 sm:$0xff]  }
 0x835   : > { %v7758_v45 = vmul.f32 %v7694_v63, %v7630_v42  ;;  %v7631_v51 = vmax.f32 %v10917_v28, 0.0  ;;  %v7699_v63 = vld [vmem:[%s17333_s7 + $0x168] sm:$0xff]  ;;  %v7712_v21 = vld [vmem:[%s17333_s7 + $0x1d0] sm:$0xff] }
 0x837   : > { %v7759_v59 = vmul.f32 %v7695_v16, %v7631_v51  ;;  %v16207_v1 = vadd.f32 %v7822_v41, %v7758_v45  ;;  %v3919_v16 = vld [vmem:[%s17332_s6 + $0x178] sm:$0xff]  ;;  %v7827_v45 = vld [vmem:[%s17334_s8 + $0x168] sm:$0xff]  ;;  %v12202_v51 = vld [vmem:[%s17335_s9 + $0xe4] ss:$16 sps:$4 sm:$0xff]   ;;  %v6075_v41 = vadd.f32 %v17392_v50, %v3918_v58 }
 0x838   : > { %v7503_v60 = vpop.f32.mrb[36].mxu1  ;;  %v7830_v50 = vld [vmem:[%s17334_s8 + $0x180] sm:$0xff] }
 0x839   : > { %v16209_v52 = vadd.f32 %v7823_v12, %v7759_v59  ;;  %v10919_v6 = vadd.f32 %v7503_v60, %v6059_v7  ;;  %v7505_v31 = vpop.f32.mrb[37].mxu1  ;;  %8423 = vmatmul.mubr.bf16.gmra.mrb[104].mxu0 %v12191_v43 }
 0x83a   : > { %v7506_v0 = vpop.f32.mrb[38].mxu1  ;;  %8430 = vmatprep.mubr.bf16.mxu0 %v12196_v34 }
 0x83b   : > { %v7994_v35 = vpack.c.bf16 %v16209_v52, %v16207_v1  ;;  %v7632_v61 = vmax.f32 %v10919_v6, 0.0  ;;  %v10921_v26 = vadd.f32 %v7506_v0, %v6062_v2  ;;  %v7508_v25 = vpop.f32.mrb[39].mxu1  ;;  %v17393_v6 = vld [vmem:[#allocation5_spill] sm:$0xff]  ;;  %v7700_v2 = vld [vmem:[%s17333_s7 + $0x170] sm:$0xff]  ;;  %v7714_v1 = vld [vmem:[%s17333_s7 + $0x1e0] sm:$0xff] }
 0x83c   : > { %v6078_v31 = vadd.f32 %v17393_v6, %v3919_v16  ;;  %v3922_v16 = vld [vmem:[%s17332_s6 + $0x190] sm:$0xff] }
 0x83d   : > { %v7760_v8 = vmul.f32 %v7696_v3, %v7632_v61  ;;  %v7633_v5 = vmax.f32 %v10921_v26, 0.0 }
 0x83f   : > { %v7761_v24 = vmul.f32 %v7697_v56, %v7633_v5  ;;  %v16239_v15 = vadd.f32 %v7824_v54, %v7760_v8  ;;  %v7701_v56 = vld [vmem:[%s17333_s7 + $0x178] sm:$0xff]  ;;  %v7828_v54 = vld [vmem:[%s17334_s8 + $0x170] sm:$0xff] }
 0x840   : > { %v7511_v46 = vpop.f32.mrb[40].mxu1 }
 0x841   : > { %v16241_v27 = vadd.f32 %v7825_v32, %v7761_v24  ;;  %v10923_v22 = vadd.f32 %v7511_v46, %v6067_v11  ;;  %v7513_v47 = vpop.f32.mrb[41].mxu1  ;;  %8431 = vmatmul.mubr.bf16.gmra.mrb[108].mxu0 %v12194_v4  ;;  %v12200_v4 = vld [vmem:[%s17335_s9 + $0xe0] ss:$16 sps:$4 sm:$0xff]   ;;  %v7829_v32 = vld [vmem:[%s17334_s8 + $0x178] sm:$0xff] }
 0x842   : > { %v7514_v30 = vpop.f32.mrb[42].mxu1  ;;  %8438 = vmatprep.mubr.bf16.mxu0 %v12199_v44  ;;  %v12205_v44 = vld [vmem:[%s17335_s9 + $0x104] ss:$16 sps:$4 sm:$0xff]  }
 0x843   : > { %v7995_v62 = vpack.c.bf16 %v16241_v27, %v16239_v15  ;;  %v7634_v48 = vmax.f32 %v10923_v22, 0.0  ;;  %v10925_v9 = vadd.f32 %v7514_v30, %v6070_v17  ;;  %v7516_v39 = vpop.f32.mrb[43].mxu1  ;;  %v17394_v11 = vld [vmem:[#allocation6_spill] sm:$0xff]  ;;  %v17395_v30 = vld [vmem:[#allocation7_spill] sm:$0xff]  ;;  %v7716_v15 = vld [vmem:[%s17333_s7 + $0x1f0] sm:$0xff] }
 0x844   : > { %v6083_v46 = vadd.f32 %v17394_v11, %v3920_v19  ;;  %v7704_v19 = vld [vmem:[%s17333_s7 + $0x190] sm:$0xff] }
 0x845   : > { %v7762_v42 = vmul.f32 %v7698_v55, %v7634_v48  ;;  %v7635_v28 = vmax.f32 %v10925_v9, 0.0  ;;  %v6086_v48 = vadd.f32 %v17395_v30, %v3921_v23  ;;  %v7702_v9 = vld [vmem:[%s17333_s7 + $0x180] sm:$0xff] }
 0x846   : > { %v12211_v30 = vld [vmem:[%s17335_s9 + $0x144] ss:$16 sps:$4 sm:$0xff]  }
 0x847   : > { %v7763_v43 = vmul.f32 %v7699_v63, %v7635_v28  ;;  %v16271_v34 = vadd.f32 %v7826_v14, %v7762_v42 }
 0x848   : > { %v7519_v12 = vpop.f32.mrb[44].mxu1 }
 0x849   : > { %v16273_v59 = vadd.f32 %v7827_v45, %v7763_v43  ;;  %v10927_v7 = vadd.f32 %v7519_v12, %v6075_v41  ;;  %v7521_v60 = vpop.f32.mrb[45].mxu1  ;;  %8439 = vmatmul.mubr.bf16.gmra.mrb[112].mxu0 %v12197_v33  ;;  %v7703_v33 = vld [vmem:[%s17333_s7 + $0x188] sm:$0xff]  ;;  %v3923_v43 = vld [vmem:[%s17332_s6 + $0x198] sm:$0xff]  ;;  %v12208_v12 = vld [vmem:[%s17335_s9 + $0x124] ss:$16 sps:$4 sm:$0xff]  }
 0x84a   : > { %v7522_v3 = vpop.f32.mrb[46].mxu1  ;;  %8446 = vmatprep.mubr.bf16.mxu0 %v12202_v51  ;;  %v12203_v51 = vld [vmem:[%s17335_s9 + $0x100] ss:$16 sps:$4 sm:$0xff]   ;;  %v7831_v41 = vld [vmem:[%s17334_s8 + $0x188] sm:$0xff] }
 0x84b   : > { %v7996_v0 = vpack.c.bf16 %v16273_v59, %v16271_v34  ;;  %v7636_v61 = vmax.f32 %v10927_v7, 0.0  ;;  %v10929_v26 = vadd.f32 %v7522_v3, %v6078_v31  ;;  %v7524_v25 = vpop.f32.mrb[47].mxu1  ;;  %v17396_v60 = vld [vmem:[#allocation8_spill] sm:$0xff]  ;;  %v12232_v34 = vld [vmem:[%s17335_s9 + $0x2c] ss:$16 sps:$4 sm:$0xff]  }
 0x84c   : > { %v6091_v6 = vadd.f32 %v17396_v60, %v3922_v16  ;;  %v17397_v25 = vld [vmem:[#allocation9_spill] sm:$0xff] }
 0x84d   : > { %v7764_v8 = vmul.f32 %v7700_v2, %v7636_v61  ;;  %v7637_v5 = vmax.f32 %v10929_v26, 0.0  ;;  %v12230_v59 = vld [vmem:[%s17335_s9 + $0x28] ss:$16 sps:$4 sm:$0xff]  }
 0x84f   : > { %v7765_v24 = vmul.f32 %v7701_v56, %v7637_v5  ;;  %v16303_v47 = vadd.f32 %v7828_v54, %v7764_v8  ;;  %v6094_v56 = vadd.f32 %v17397_v25, %v3923_v43  ;;  %v17400_v25 = vld [vmem:[#allocation12_spill] sm:$0xff] }
 0x850   : > { %v7527_v22 = vpop.f32.mrb[48].mxu1 }
 0x851   : > { %v16305_v36 = vadd.f32 %v7829_v32, %v7765_v24  ;;  %v10931_v17 = vadd.f32 %v7527_v22, %v6083_v46  ;;  %v7529_v55 = vpop.f32.mrb[49].mxu1  ;;  %8447 = vmatmul.mubr.bf16.gmra.mrb[116].mxu0 %v12200_v4  ;;  %v7705_v32 = vld [vmem:[%s17333_s7 + $0x198] sm:$0xff]  ;;  %v12206_v46 = vld [vmem:[%s17335_s9 + $0x120] ss:$16 sps:$4 sm:$0xff]   ;;  %v3925_v22 = vld [vmem:[%s17332_s6 + $0x1a8] sm:$0xff] }
 0x852   : > { %v7530_v39 = vpop.f32.mrb[50].mxu1  ;;  %8454 = vmatprep.mubr.bf16.mxu0 %v12205_v44  ;;  %v3924_v44 = vld [vmem:[%s17332_s6 + $0x1a0] sm:$0xff]  ;;  %v7833_v55 = vld [vmem:[%s17334_s8 + $0x198] sm:$0xff] }
 0x853   : > { %v7997_v63 = vpack.c.bf16 %v16305_v36, %v16303_v47  ;;  %v7638_v58 = vmax.f32 %v10931_v17, 0.0  ;;  %v10933_v42 = vadd.f32 %v7530_v39, %v6086_v48  ;;  %v7532_v28 = vpop.f32.mrb[51].mxu1  ;;  %v7832_v17 = vld [vmem:[%s17334_s8 + $0x190] sm:$0xff]  ;;  %v12233_v47 = vld [vmem:[%s17335_s9 + $0x48] ss:$16 sps:$4 sm:$0xff]  }
 0x854   : > { %v12238_v36 = vld [vmem:[%s17335_s9 + $0x6c] ss:$16 sps:$4 sm:$0xff]  }
 0x855   : > { %v7766_v14 = vmul.f32 %v7702_v9, %v7638_v58  ;;  %v7639_v45 = vmax.f32 %v10933_v42, 0.0  ;;  %v17398_v9 = vld [vmem:[#allocation10_spill] sm:$0xff] }
 0x856   : > { %v6099_v39 = vadd.f32 %v17398_v9, %v3924_v44  ;;  %v7836_v9 = vld [vmem:[%s17334_s8 + $0x1b0] sm:$0xff] }
 0x857   : > { %v7767_v7 = vmul.f32 %v7703_v33, %v7639_v45  ;;  %v7894_v2 = vadd.f32 %v7830_v50, %v7766_v14  ;;  %v17399_v14 = vld [vmem:[#allocation11_spill] sm:$0xff] }
 0x858   : > { %v7535_v31 = vpop.f32.mrb[52].mxu1  ;;  %v6102_v45 = vadd.f32 %v17399_v14, %v3925_v22  ;;  %v3928_v22 = vld [vmem:[%s17332_s6 + $0x1c0] sm:$0xff] }
 0x859   : > { %v7895_v3 = vadd.f32 %v7831_v41, %v7767_v7  ;;  %v10935_v61 = vadd.f32 %v7535_v31, %v6091_v6  ;;  %v7537_v26 = vpop.f32.mrb[53].mxu1  ;;  %8455 = vmatmul.mubr.bf16.gmra.mrb[120].mxu0 %v12203_v51  ;;  %v7707_v41 = vld [vmem:[%s17333_s7 + $0x1a8] sm:$0xff]  ;;  %v12209_v6 = vld [vmem:[%s17335_s9 + $0x140] ss:$16 sps:$4 sm:$0xff]   ;;  %v3927_v31 = vld [vmem:[%s17332_s6 + $0x1b8] sm:$0xff] }
 0x85a   : > { %v7538_v8 = vpop.f32.mrb[54].mxu1  ;;  %8462 = vmatprep.mubr.bf16.mxu0 %v12208_v12  ;;  %v3926_v12 = vld [vmem:[%s17332_s6 + $0x1b0] sm:$0xff] }
 0x85b   : > { %v7640_v5 = vmax.f32 %v10935_v61, 0.0  ;;  %v10937_v4 = vadd.f32 %v7538_v8, %v6094_v56  ;;  %v7540_v23 = vpop.f32.mrb[55].mxu1  ;;  %v7998_v54 = vpack.c.bf16 %v7895_v3, %v7894_v2  ;;  %v7834_v2 = vld [vmem:[%s17334_s8 + $0x1a0] sm:$0xff]  ;;  %v7835_v3 = vld [vmem:[%s17334_s8 + $0x1a8] sm:$0xff]  ;;  %v6107_v56 = vadd.f32 %v17400_v25, %v3926_v12 }
 0x85c   : > { %v12214_v61 = vld [vmem:[%s17335_s9 + $0x164] ss:$16 sps:$4 sm:$0xff]   ;;  %v7711_v12 = vld [vmem:[%s17333_s7 + $0x1c8] sm:$0xff] }
 0x85d   : > { %v7768_v24 = vmul.f32 %v7704_v19, %v7640_v5  ;;  %v7641_v11 = vmax.f32 %v10937_v4, 0.0  ;;  %10358 = vmatprep.subr.bf16.mxu0 %v7998_v54  ;;  %v17401_v54 = vld [vmem:[#allocation13_spill] sm:$0xff] }
 0x85e   : > { %10359 = vmatpush3.bf16.msra.mxu0 %v7990_v53 }
 0x85f   : > { %v7769_v48 = vmul.f32 %v7705_v32, %v7641_v11  ;;  %v7896_v42 = vadd.f32 %v7832_v17, %v7768_v24  ;;  %v6110_v32 = vadd.f32 %v17401_v54, %v3927_v31  ;;  %v12215_v31 = vld [vmem:[%s17335_s9 + $0x180] ss:$16 sps:$4 sm:$0xff]  }
 0x860   : > { %v7543_v58 = vpop.f32.mrb[56].mxu1 }
 0x861   : > { %v7897_v28 = vadd.f32 %v7833_v55, %v7769_v48  ;;  %v10939_v33 = vadd.f32 %v7543_v58, %v6099_v39  ;;  %v7545_v16 = vpop.f32.mrb[57].mxu1  ;;  %8463 = vmatmul.mubr.bf16.gmra.mrb[124].mxu0 %v12206_v46  ;;  %v7709_v46 = vld [vmem:[%s17333_s7 + $0x1b8] sm:$0xff]  ;;  %v3929_v48 = vld [vmem:[%s17332_s6 + $0x1c8] sm:$0xff]  ;;  %v12217_v58 = vld [vmem:[%s17335_s9 + $0x184] ss:$16 sps:$4 sm:$0xff]  }
 0x862   : > { %v7546_v10 = vpop.f32.mrb[58].mxu1  ;;  %8470 = vmatprep.mubr.bf16.mxu0 %v12211_v30  ;;  %v12212_v30 = vld [vmem:[%s17335_s9 + $0x160] ss:$16 sps:$4 sm:$0xff]   ;;  %v7837_v39 = vld [vmem:[%s17334_s8 + $0x1b8] sm:$0xff] }
 0x863   : > { %v7642_v53 = vmax.f32 %v10939_v33, 0.0  ;;  %v10941_v51 = vadd.f32 %v7546_v10, %v6102_v45  ;;  %v7548_v43 = vpop.f32.mrb[59].mxu1  ;;  %v7999_v50 = vpack.c.bf16 %v7897_v28, %v7896_v42  ;;  %v17402_v28 = vld [vmem:[#allocation14_spill] sm:$0xff] }
 0x864   : > { %v6115_v33 = vadd.f32 %v17402_v28, %v3928_v22 }
 0x865   : > { %v7770_v7 = vmul.f32 %v7706_v38, %v7642_v53  ;;  %v7643_v60 = vmax.f32 %v10941_v51, 0.0  ;;  %10360 = vmatprep.subr.bf16.mxu0 %v7999_v50  ;;  %v17403_v53 = vld [vmem:[#allocation15_spill] sm:$0xff] }
 0x866   : > { %10361 = vmatpush3.bf16.msra.mxu0 %v7991_v18  ;;  %v6118_v51 = vadd.f32 %v17403_v53, %v3929_v48  ;;  %v7841_v48 = vld [vmem:[%s17334_s8 + $0x1d8] sm:$0xff] }
 0x867   : > { %v7771_v26 = vmul.f32 %v7707_v41, %v7643_v60  ;;  %v7898_v8 = vadd.f32 %v7834_v2, %v7770_v7  ;;  %v3930_v7 = vld [vmem:[%s17332_s6 + $0x1d0] sm:$0xff]  ;;  %v3931_v2 = vld [vmem:[%s17332_s6 + $0x1d8] sm:$0xff] }
 0x868   : > { %v7551_v19 = vpop.f32.mrb[60].mxu1 }
 0x869   : > { %v7899_v5 = vadd.f32 %v7835_v3, %v7771_v26  ;;  %v10943_v4 = vadd.f32 %v7551_v19, %v6107_v56  ;;  %v7553_v23 = vpop.f32.mrb[61].mxu1  ;;  %8471 = vmatmul.mubr.bf16.gmra.mrb[128].mxu0 %v12209_v6  ;;  %v7838_v3 = vld [vmem:[%s17334_s8 + $0x1c0] sm:$0xff]  ;;  %v17404_v56 = vld [vmem:[#allocation16_spill] sm:$0xff] }
 0x86a   : > { %v7554_v49 = vpop.f32.mrb[62].mxu1  ;;  %8478 = vmatprep.mubr.bf16.mxu0 %v12214_v61  ;;  %v7839_v61 = vld [vmem:[%s17334_s8 + $0x1c8] sm:$0xff]  ;;  %v12220_v26 = vld [vmem:[%s17335_s9 + $0x1a4] ss:$16 sps:$4 sm:$0xff]   ;;  %v6123_v19 = vadd.f32 %v17404_v56, %v3930_v7 }
 0x86b   : > { %v7644_v18 = vmax.f32 %v10943_v4, 0.0  ;;  %v10945_v44 = vadd.f32 %v7554_v49, %v6110_v32  ;;  %v7556_v24 = vpop.f32.mrb[63].mxu1  ;;  %v8000_v11 = vpack.c.bf16 %v7899_v5, %v7898_v8  ;;  %v17405_v32 = vld [vmem:[#allocation17_spill] sm:$0xff]  ;;  %v7842_v7 = vld [vmem:[%s17334_s8 + $0x1e0] sm:$0xff] }
 0x86c   : > { %v7713_v24 = vld [vmem:[%s17333_s7 + $0x1d8] sm:$0xff] }
 0x86d   : > { %v7772_v17 = vmul.f32 %v7708_v13, %v7644_v18  ;;  %v7645_v55 = vmax.f32 %v10945_v44, 0.0  ;;  %10362 = vmatprep.subr.bf16.mxu0 %v8000_v11  ;;  %v6126_v13 = vadd.f32 %v17405_v32, %v3931_v2  ;;  %v3932_v11 = vld [vmem:[%s17332_s6 + $0x1e0] sm:$0xff]  ;;  %v17408_v2 = vld [vmem:[#allocation20_spill] sm:$0xff]  ;;  %v7717_v32 = vld [vmem:[%s17333_s7 + $0x1f8] sm:$0xff] }
 0x86e   : > { %10363 = vmatpush3.bf16.msra.mxu0 %v7992_v37 }
 0x86f   : > { %v7773_v42 = vmul.f32 %v7709_v46, %v7645_v55  ;;  %v7900_v14 = vadd.f32 %v7836_v9, %v7772_v17  ;;  %v12218_v17 = vld [vmem:[%s17335_s9 + $0x1a0] ss:$16 sps:$4 sm:$0xff]   ;;  %v3933_v55 = vld [vmem:[%s17332_s6 + $0x1e8] sm:$0xff]  ;;  %v12223_v9 = vld [vmem:[%s17335_s9 + $0x1c4] ss:$16 sps:$4 sm:$0xff]  }
 0x870   : > { %v7559_v16 = vpop.f32.mrb[64].mxu1 }
 0x871   : > { %v7901_v45 = vadd.f32 %v7837_v39, %v7773_v42  ;;  %v10947_v38 = vadd.f32 %v7559_v16, %v6115_v33  ;;  %v7561_v10 = vpop.f32.mrb[65].mxu1  ;;  %8479 = vmatmul.mubr.bf16.gmra.mrb[132].mxu0 %v12212_v30  ;;  %v7840_v30 = vld [vmem:[%s17334_s8 + $0x1d0] sm:$0xff] }
 0x872   : > { %v7562_v57 = vpop.f32.mrb[66].mxu1  ;;  %8486 = vmatprep.mubr.bf16.mxu0 %v12217_v58  ;;  %v17406_v58 = vld [vmem:[#allocation18_spill] sm:$0xff] }
 0x873   : > { %v7646_v37 = vmax.f32 %v10947_v38, 0.0  ;;  %v10949_v43 = vadd.f32 %v7562_v57, %v6118_v51  ;;  %v7564_v50 = vpop.f32.mrb[67].mxu1  ;;  %v8001_v41 = vpack.c.bf16 %v7901_v45, %v7900_v14  ;;  %v6131_v42 = vadd.f32 %v17406_v58, %v3932_v11  ;;  %v17407_v38 = vld [vmem:[#allocation19_spill] sm:$0xff] }
 0x874   : > { %v6134_v10 = vadd.f32 %v17407_v38, %v3933_v55  ;;  %v7715_v57 = vld [vmem:[%s17333_s7 + $0x1e8] sm:$0xff] }
 0x875   : > { %v7774_v60 = vmul.f32 %v7710_v20, %v7646_v37  ;;  %v7647_v6 = vmax.f32 %v10949_v43, 0.0  ;;  %10364 = vmatprep.subr.bf16.mxu0 %v8001_v41  ;;  %v3934_v37 = vld [vmem:[%s17332_s6 + $0x1f0] sm:$0xff]  ;;  %v12239_v55 = vld [vmem:[%s17335_s9 + $0x88] ss:$16 sps:$4 sm:$0xff]   ;;  %v12250_v58 = vld [vmem:[%s17335_s9 + $0xec] ss:$16 sps:$4 sm:$0xff]  }
 0x876   : > { %10365 = vmatpush3.bf16.msra.mxu0 %v7993_v29  ;;  %v12221_v41 = vld [vmem:[%s17335_s9 + $0x1c0] ss:$16 sps:$4 sm:$0xff]   ;;  %v12257_v38 = vld [vmem:[%s17335_s9 + $0x148] ss:$16 sps:$4 sm:$0xff]  }
 0x877   : > { %v7775_v25 = vmul.f32 %v7711_v12, %v7647_v6  ;;  %v7902_v5 = vadd.f32 %v7838_v3, %v7774_v60  ;;  %v3935_v12 = vld [vmem:[%s17332_s6 + $0x1f8] sm:$0xff]  ;;  %v7843_v60 = vld [vmem:[%s17334_s8 + $0x1e8] sm:$0xff]  ;;  %v12226_v6 = vld [vmem:[%s17335_s9 + $0x1e4] ss:$16 sps:$4 sm:$0xff]   ;;  %v6139_v3 = vadd.f32 %v17408_v2, %v3934_v37 }
 0x878   : > { %v7567_v8 = vpop.f32.mrb[68].mxu1 }
 0x879   : > { %v7903_v4 = vadd.f32 %v7839_v61, %v7775_v25  ;;  %v10951_v23 = vadd.f32 %v7567_v8, %v6123_v19  ;;  %v7569_v54 = vpop.f32.mrb[69].mxu1  ;;  %8487 = vmatmul.mubr.bf16.gmra.mrb[136].mxu0 %v12215_v31  ;;  %v17409_v8 = vld [vmem:[#allocation21_spill] sm:$0xff] }
 0x87a   : > { %v7570_v40 = vpop.f32.mrb[70].mxu1  ;;  %8494 = vmatprep.mubr.bf16.mxu0 %v12220_v26 }
 0x87b   : > { %v7648_v29 = vmax.f32 %v10951_v23, 0.0  ;;  %v10953_v49 = vadd.f32 %v7570_v40, %v6126_v13  ;;  %v7572_v18 = vpop.f32.mrb[71].mxu1  ;;  %v8002_v44 = vpack.c.bf16 %v7903_v4, %v7902_v5  ;;  %v6142_v5 = vadd.f32 %v17409_v8, %v3935_v12  ;;  %v12224_v40 = vld [vmem:[%s17335_s9 + $0x1e0] ss:$16 sps:$4 sm:$0xff]   ;;  %v12268_v12 = vld [vmem:[%s17335_s9 + $0x1ac] ss:$16 sps:$4 sm:$0xff]  }
 0x87c   : > { %v12229_v18 = vld [vmem:[%s17335_s9 + $0xc] ss:$16 sps:$4 sm:$0xff]  }
 0x87d   : > { %v7776_v46 = vmul.f32 %v7712_v21, %v7648_v29  ;;  %v7649_v22 = vmax.f32 %v10953_v49, 0.0  ;;  %10366 = vmatprep.subr.bf16.mxu0 %v8002_v44  ;;  %v7844_v29 = vld [vmem:[%s17334_s8 + $0x1f0] sm:$0xff]  ;;  %v7845_v49 = vld [vmem:[%s17334_s8 + $0x1f8] sm:$0xff] }
 0x87e   : > { %10367 = vmatpush3.bf16.msra.mxu0 %v7994_v35 }
 0x87f   : > { %v7777_v39 = vmul.f32 %v7713_v24, %v7649_v22  ;;  %v7904_v33 = vadd.f32 %v7840_v30, %v7776_v46  ;;  %v12227_v22 = vld [vmem:[%s17335_s9 + $0x8] ss:$16 sps:$4 sm:$0xff]   ;;  %v12244_v30 = vld [vmem:[%s17335_s9 + $0xac] ss:$16 sps:$4 sm:$0xff]  }
 0x880   : > { %v7575_v28 = vpop.f32.mrb[72].mxu1 }
 0x881   : > { %v7905_v16 = vadd.f32 %v7841_v48, %v7777_v39  ;;  %v10955_v14 = vadd.f32 %v7575_v28, %v6131_v42  ;;  %v7577_v45 = vpop.f32.mrb[73].mxu1  ;;  %8495 = vmatmul.mubr.bf16.gmra.mrb[140].mxu0 %v12218_v17  ;;  %v12241_v17 = vld [vmem:[%s17335_s9 + $0x8c] ss:$16 sps:$4 sm:$0xff]   ;;  %v12242_v48 = vld [vmem:[%s17335_s9 + $0xa8] ss:$16 sps:$4 sm:$0xff]  }
 0x882   : > { %v7578_v52 = vpop.f32.mrb[74].mxu1  ;;  %8502 = vmatprep.mubr.bf16.mxu0 %v12223_v9  ;;  %v12247_v9 = vld [vmem:[%s17335_s9 + $0xcc] ss:$16 sps:$4 sm:$0xff]   ;;  %v12245_v39 = vld [vmem:[%s17335_s9 + $0xc8] ss:$16 sps:$4 sm:$0xff]  }
 0x883   : > { %v7650_v35 = vmax.f32 %v10955_v14, 0.0  ;;  %v10957_v53 = vadd.f32 %v7578_v52, %v6134_v10  ;;  %v7580_v51 = vpop.f32.mrb[75].mxu1  ;;  %v8003_v20 = vpack.c.bf16 %v7905_v16, %v7904_v33  ;;  %v12248_v42 = vld [vmem:[%s17335_s9 + $0xe8] ss:$16 sps:$4 sm:$0xff]   ;;  %v12253_v28 = vld [vmem:[%s17335_s9 + $0x10c] ss:$16 sps:$4 sm:$0xff]  }
 0x884   : > { %v12251_v33 = vld [vmem:[%s17335_s9 + $0x108] ss:$16 sps:$4 sm:$0xff]   ;;  %v12256_v16 = vld [vmem:[%s17335_s9 + $0x12c] ss:$16 sps:$4 sm:$0xff]  }
 0x885   : > { %v7778_v43 = vmul.f32 %v7714_v1, %v7650_v35  ;;  %v7651_v50 = vmax.f32 %v10957_v53, 0.0  ;;  %10368 = vmatprep.subr.bf16.mxu0 %v8003_v20  ;;  %v12254_v14 = vld [vmem:[%s17335_s9 + $0x128] ss:$16 sps:$4 sm:$0xff]   ;;  %v12259_v45 = vld [vmem:[%s17335_s9 + $0x14c] ss:$16 sps:$4 sm:$0xff]  }
 0x886   : > { %10369 = vmatpush3.bf16.msra.mxu0 %v7995_v62  ;;  %v12262_v10 = vld [vmem:[%s17335_s9 + $0x16c] ss:$16 sps:$4 sm:$0xff]   ;;  %v12260_v52 = vld [vmem:[%s17335_s9 + $0x168] ss:$16 sps:$4 sm:$0xff]  }
 0x887   : > { %v7779_v31 = vmul.f32 %v7715_v57, %v7651_v50  ;;  %v7906_v26 = vadd.f32 %v7842_v7, %v7778_v43  ;;  %v12265_v53 = vld [vmem:[%s17335_s9 + $0x18c] ss:$16 sps:$4 sm:$0xff]   ;;  %v12263_v50 = vld [vmem:[%s17335_s9 + $0x188] ss:$16 sps:$4 sm:$0xff]  }
 0x888   : > { %v7583_v61 = vpop.f32.mrb[76].mxu1 }
 0x889   : > { %v7907_v25 = vadd.f32 %v7843_v60, %v7779_v31  ;;  %v10959_v56 = vadd.f32 %v7583_v61, %v6139_v3  ;;  %v7585_v19 = vpop.f32.mrb[77].mxu1  ;;  %8503 = vmatmul.mubr.bf16.gmra.mrb[144].mxu0 %v12221_v41  ;;  %v12266_v3 = vld [vmem:[%s17335_s9 + $0x1a8] ss:$16 sps:$4 sm:$0xff]  }
 0x88a   : > { %v7586_v27 = vpop.f32.mrb[78].mxu1  ;;  %8510 = vmatprep.mubr.bf16.mxu0 %v12226_v6 }
 0x88b   : > { %v7652_v62 = vmax.f32 %v10959_v56, 0.0  ;;  %v10961_v4 = vadd.f32 %v7586_v27, %v6142_v5  ;;  %v7588_v23 = vpop.f32.mrb[79].mxu1  ;;  %v8004_v54 = vpack.c.bf16 %v7907_v25, %v7906_v26  ;;  %v12271_v26 = vld [vmem:[%s17335_s9 + $0x1cc] ss:$16 sps:$4 sm:$0xff]  }
 0x88d   : > { %v7780_v13 = vmul.f32 %v7716_v15, %v7652_v62  ;;  %v7653_v21 = vmax.f32 %v10961_v4, 0.0  ;;  %10370 = vmatprep.subr.bf16.mxu0 %v8004_v54  ;;  %v12269_v15 = vld [vmem:[%s17335_s9 + $0x1c8] ss:$16 sps:$4 sm:$0xff]   ;;  %v12274_v62 = vld [vmem:[%s17335_s9 + $0x1ec] ss:$16 sps:$4 sm:$0xff]  }
 0x88e   : > { %10371 = vmatpush3.bf16.msra.mxu0 %v7996_v0  ;;  %v12235_v0 = vld [vmem:[%s17335_s9 + $0x4c] ss:$16 sps:$4 sm:$0xff]  }
 0x88f   : > { %v7781_v44 = vmul.f32 %v7717_v32, %v7653_v21  ;;  %v7908_v24 = vadd.f32 %v7844_v29, %v7780_v13  ;;  %v12272_v21 = vld [vmem:[%s17335_s9 + $0x1e8] ss:$16 sps:$4 sm:$0xff]  }
 0x891   : > { %v7909_v11 = vadd.f32 %v7845_v49, %v7781_v44  ;;  %8511 = vmatmul.mubr.bf16.gmra.mrb[148].mxu0 %v12224_v40 }
 0x892   : > { %8551 = vmatprep.mubr.bf16.mxu0 %v12229_v18 }
 0x893   : > { %v8005_v46 = vpack.c.bf16 %v7909_v11, %v7908_v24 }
 0x895   : > { %10372 = vmatprep.subr.bf16.mxu0 %v8005_v46 }
 0x896   : > { %10373 = vmatpush3.bf16.msra.mxu0 %v7997_v63  ;;  %v12236_v63 = vld [vmem:[%s17335_s9 + $0x68] ss:$16 sps:$4 sm:$0xff]  }
 0x899   : > { %8552 = vmatmul.mubr.bf16.vlgmr.msra.gmra.mrb[152].mxu0 %v12227_v22 }
 0x89a   : > { %8559 = vmatprep.mubr.bf16.mxu0 %v12232_v34 }
 0x8a1   : > { %8560 = vmatmul.mubr.bf16.gmra.mrb[156].mxu0 %v12230_v59 }
 0x8a2   : > { %8567 = vmatprep.mubr.bf16.mxu0 %v12235_v0 }
 0x8a9   : > { %8568 = vmatmul.mubr.bf16.gmra.mrb[160].mxu0 %v12233_v47 }
 0x8aa   : > { %8575 = vmatprep.mubr.bf16.mxu0 %v12238_v36 }
 0x8b1   : > { %8576 = vmatmul.mubr.bf16.gmra.mrb[164].mxu0 %v12236_v63 }
 0x8b2   : > { %8583 = vmatprep.mubr.bf16.mxu0 %v12241_v17 }
 0x8b9   : > { %8584 = vmatmul.mubr.bf16.gmra.mrb[168].mxu0 %v12239_v55 }
 0x8ba   : > { %8591 = vmatprep.mubr.bf16.mxu0 %v12244_v30 }
 0x8c1   : > { %8592 = vmatmul.mubr.bf16.gmra.mrb[172].mxu0 %v12242_v48 }
 0x8c2   : > { %8599 = vmatprep.mubr.bf16.mxu0 %v12247_v9 }
 0x8c9   : > { %8600 = vmatmul.mubr.bf16.gmra.mrb[176].mxu0 %v12245_v39 }
 0x8ca   : > { %8607 = vmatprep.mubr.bf16.mxu0 %v12250_v58 }
 0x8d1   : > { %8608 = vmatmul.mubr.bf16.gmra.mrb[180].mxu0 %v12248_v42 }
 0x8d2   : > { %8615 = vmatprep.mubr.bf16.mxu0 %v12253_v28 }
 0x8d9   : > { %8616 = vmatmul.mubr.bf16.gmra.mrb[184].mxu0 %v12251_v33 }
 0x8da   : > { %8623 = vmatprep.mubr.bf16.mxu0 %v12256_v16 }
 0x8e1   : > { %8624 = vmatmul.mubr.bf16.gmra.mrb[188].mxu0 %v12254_v14 }
 0x8e2   : > { %8631 = vmatprep.mubr.bf16.mxu0 %v12259_v45 }
 0x8e9   : > { %8632 = vmatmul.mubr.bf16.gmra.mrb[192].mxu0 %v12257_v38 }
 0x8ea   : > { %8639 = vmatprep.mubr.bf16.mxu0 %v12262_v10 }
 0x8ec   : > { %v10262_v1 = vpop.f32.mrb[88].mxu0 }
 0x8ed   : > { %v10263_v35 = vpop.f32.mrb[89].mxu0 }
 0x8ee   : > { %v16606_v51 = vadd.f32 %v10263_v35, %v10262_v1  ;;  %v10265_v20 = vpop.f32.mrb[90].mxu0 }
 0x8ef   : > { %v10266_v57 = vpop.f32.mrb[91].mxu0 }
 0x8f0   : > { %v16608_v37 = vadd.f32 %v10266_v57, %v10265_v20 }
 0x8f1   : > { %8640 = vmatmul.mubr.bf16.gmra.mrb[196].mxu0 %v12260_v52 }
 0x8f2   : > { %8647 = vmatprep.mubr.bf16.mxu0 %v12265_v53 }
 0x8f4   : > { %v10268_v43 = vpop.f32.mrb[92].mxu0 }
 0x8f5   : > { %v10269_v41 = vpop.f32.mrb[93].mxu0 }
 0x8f6   : > { %v16616_v7 = vadd.f32 %v10269_v41, %v10268_v43  ;;  %v10271_v60 = vpop.f32.mrb[94].mxu0 }
 0x8f7   : > { %v10272_v6 = vpop.f32.mrb[95].mxu0 }
 0x8f8   : > { %v16618_v31 = vadd.f32 %v10272_v6, %v10271_v60 }
 0x8f9   : > { %8648 = vmatmul.mubr.bf16.gmra.mrb[200].mxu0 %v12263_v50 }
 0x8fa   : > { %8655 = vmatprep.mubr.bf16.mxu0 %v12268_v12 }
 0x8fc   : > { %v10274_v2 = vpop.f32.mrb[96].mxu0 }
 0x8fd   : > { %v10275_v61 = vpop.f32.mrb[97].mxu0 }
 0x8fe   : > { %v16626_v25 = vadd.f32 %v10275_v61, %v10274_v2  ;;  %v10277_v56 = vpop.f32.mrb[98].mxu0 }
 0x8ff   : > { %v10278_v19 = vpop.f32.mrb[99].mxu0 }
 0x900   : > { %v16628_v8 = vadd.f32 %v10278_v19, %v10277_v56 }
 0x901   : > { %8656 = vmatmul.mubr.bf16.gmra.mrb[204].mxu0 %v12266_v3 }
 0x902   : > { %8663 = vmatprep.mubr.bf16.mxu0 %v12271_v26 }
 0x904   : > { %v10280_v5 = vpop.f32.mrb[100].mxu0 }
 0x905   : > { %v10281_v27 = vpop.f32.mrb[101].mxu0 }
 0x906   : > { %v16636_v4 = vadd.f32 %v10281_v27, %v10280_v5  ;;  %v10283_v23 = vpop.f32.mrb[102].mxu0 }
 0x907   : > { %v10284_v54 = vpop.f32.mrb[103].mxu0 }
 0x908   : > { %v16638_v32 = vadd.f32 %v10284_v54, %v10283_v23 }
 0x909   : > { %8664 = vmatmul.mubr.bf16.gmra.mrb[208].mxu0 %v12269_v15 }
 0x90a   : > { %8671 = vmatprep.mubr.bf16.mxu0 %v12274_v62 }
 0x90c   : > { %v10286_v13 = vpop.f32.mrb[104].mxu0 }
 0x90d   : > { %v10287_v40 = vpop.f32.mrb[105].mxu0 }
 0x90e   : > { %v16643_v29 = vadd.f32 %v10287_v40, %v10286_v13  ;;  %v10289_v49 = vpop.f32.mrb[106].mxu0 }
 0x90f   : > { %v10290_v18 = vpop.f32.mrb[107].mxu0 }
 0x910   : > { %v16645_v44 = vadd.f32 %v10290_v18, %v10289_v49 }
 0x911   : > { %8672 = vmatmul.mubr.bf16.gmra.mrb[212].mxu0 %v12272_v21 }
 0x914   : > { %v10292_v24 = vpop.f32.mrb[108].mxu0 }
 0x915   : > { %v10293_v11 = vpop.f32.mrb[109].mxu0 }
 0x916   : > { %v16647_v46 = vadd.f32 %v10293_v11, %v10292_v24  ;;  %v10295_v22 = vpop.f32.mrb[110].mxu0 }
 0x917   : > { %v10296_v34 = vpop.f32.mrb[111].mxu0 }
 0x918   : > { %v16649_v59 = vadd.f32 %v10296_v34, %v10295_v22 }
 0x91c   : > { %v10298_v0 = vpop.f32.mrb[112].mxu0 }
 0x91d   : > { %v10299_v47 = vpop.f32.mrb[113].mxu0 }
 0x91e   : > { %v16651_v36 = vadd.f32 %v10299_v47, %v10298_v0  ;;  %v10301_v63 = vpop.f32.mrb[114].mxu0 }
 0x91f   : > { %v10302_v17 = vpop.f32.mrb[115].mxu0 }
 0x920   : > { %v16653_v55 = vadd.f32 %v10302_v17, %v10301_v63 }
 0x924   : > { %v10304_v30 = vpop.f32.mrb[116].mxu0 }
 0x925   : > { %v10305_v48 = vpop.f32.mrb[117].mxu0 }
 0x926   : > { %v16655_v9 = vadd.f32 %v10305_v48, %v10304_v30  ;;  %v10307_v39 = vpop.f32.mrb[118].mxu0 }
 0x927   : > { %v10308_v58 = vpop.f32.mrb[119].mxu0 }
 0x928   : > { %v16657_v42 = vadd.f32 %v10308_v58, %v10307_v39 }
 0x92c   : > { %v10310_v28 = vpop.f32.mrb[120].mxu0 }
 0x92d   : > { %v10311_v33 = vpop.f32.mrb[121].mxu0 }
 0x92e   : > { %v16659_v16 = vadd.f32 %v10311_v33, %v10310_v28  ;;  %v10313_v14 = vpop.f32.mrb[122].mxu0  ;;  %v8006_v28 = vld [vmem:[%s17336_s10] sm:$0xff] }
 0x92f   : > { %v10314_v45 = vpop.f32.mrb[123].mxu0 }
 0x930   : > { %v16661_v38 = vadd.f32 %v10314_v45, %v10313_v14  ;;  %v8007_v14 = vld [vmem:[%s17336_s10 + $0x8] sm:$0xff] }
 0x934   : > { %v10316_v10 = vpop.f32.mrb[124].mxu0 }
 0x935   : > { %v10317_v1 = vpop.f32.mrb[125].mxu0 }
 0x936   : > { %v16663_v52 = vadd.f32 %v10317_v1, %v10316_v10  ;;  %v10319_v35 = vpop.f32.mrb[126].mxu0  ;;  %v8393_v10 = vadd.f32 %v16606_v51, %v8006_v28  ;;  %v8713_v51 = vld [vmem:[%s17337_s11 + $0x8] sm:$0xff]  ;;  %v8714_v28 = vld [vmem:[%s17337_s11 + $0x10] sm:$0xff] }
 0x937   : > { %v10320_v53 = vpop.f32.mrb[127].mxu0 }
 0x938   : > { %v16665_v20 = vadd.f32 %v10320_v53, %v10319_v35 }
 0x93c   : > { %v10322_v57 = vpop.f32.mrb[128].mxu0 }
 0x93d   : > { %v10323_v43 = vpop.f32.mrb[129].mxu0 }
 0x93e   : > { %v16667_v50 = vadd.f32 %v10323_v43, %v10322_v57  ;;  %v10325_v41 = vpop.f32.mrb[130].mxu0  ;;  %v8396_v57 = vadd.f32 %v16608_v37, %v8007_v14  ;;  %v8009_v37 = vld [vmem:[%s17336_s10 + $0x18] sm:$0xff] }
 0x93f   : > { %v10326_v12 = vpop.f32.mrb[131].mxu0 }
 0x940   : > { %v16669_v60 = vadd.f32 %v10326_v12, %v10325_v41  ;;  %v8712_v12 = vld [vmem:[%s17337_s11] sm:$0xff] }
 0x944   : > { %v10328_v6 = vpop.f32.mrb[132].mxu0 }
 0x945   : > { %v10329_v2 = vpop.f32.mrb[133].mxu0 }
 0x946   : > { %v16671_v3 = vadd.f32 %v10329_v2, %v10328_v6  ;;  %v10331_v61 = vpop.f32.mrb[134].mxu0 }
 0x947   : > { %v10332_v26 = vpop.f32.mrb[135].mxu0 }
 0x948   : > { %v16673_v56 = vadd.f32 %v10332_v26, %v10331_v61  ;;  %v8008_v61 = vld [vmem:[%s17336_s10 + $0x10] sm:$0xff] }
 0x94c   : > { %v10334_v19 = vpop.f32.mrb[136].mxu0 }
 0x94d   : > { %v10335_v5 = vpop.f32.mrb[137].mxu0 }
 0x94e   : > { %v16675_v15 = vadd.f32 %v10335_v5, %v10334_v19  ;;  %v10337_v27 = vpop.f32.mrb[138].mxu0 }
 0x94f   : > { %v10338_v62 = vpop.f32.mrb[139].mxu0 }
 0x950   : > { %v16677_v23 = vadd.f32 %v10338_v62, %v10337_v27  ;;  %v8776_v27 = vld [vmem:[%s17338_s12] sm:$0xff]  ;;  %v8777_v62 = vld [vmem:[%s17338_s12 + $0x8] sm:$0xff] }
 0x954   : > { %v10340_v54 = vpop.f32.mrb[140].mxu0 }
 0x955   : > { %v10341_v13 = vpop.f32.mrb[141].mxu0 }
 0x956   : > { %v16679_v21 = vadd.f32 %v10341_v13, %v10340_v54  ;;  %v10343_v40 = vpop.f32.mrb[142].mxu0  ;;  %v12277_v13 = vld [vmem:[%s17339_s13 + $0x4] ss:$8 sps:$4 sm:$0xff]  }
 0x957   : > { %v10344_v49 = vpop.f32.mrb[143].mxu0  ;;  %9112 = vmatprep.mubr.bf16.mxu0 %v12277_v13 }
 0x958   : > { %v16681_v18 = vadd.f32 %v10344_v49, %v10343_v40  ;;  %v8401_v40 = vadd.f32 %v16616_v7, %v8008_v61 }
 0x95c   : > { %v10346_v24 = vpop.f32.mrb[144].mxu0 }
 0x95d   : > { %v10347_v11 = vpop.f32.mrb[145].mxu0 }
 0x95e   : > { %v16683_v22 = vadd.f32 %v10347_v11, %v10346_v24  ;;  %v10349_v34 = vpop.f32.mrb[146].mxu0 }
 0x95f   : > { %v10350_v0 = vpop.f32.mrb[147].mxu0 }
 0x960   : > { %v16685_v47 = vadd.f32 %v10350_v0, %v10349_v34  ;;  %v8404_v34 = vadd.f32 %v16618_v31, %v8009_v37  ;;  %v8010_v31 = vld [vmem:[%s17336_s10 + $0x20] sm:$0xff] }
 0x964   : > { %v10352_v63 = vpop.f32.mrb[148].mxu0 }
 0x965   : > { %v10353_v17 = vpop.f32.mrb[149].mxu0 }
 0x966   : > { %v16687_v30 = vadd.f32 %v10353_v17, %v10352_v63  ;;  %v10355_v48 = vpop.f32.mrb[150].mxu0 }
 0x967   : > { %v10356_v39 = vpop.f32.mrb[151].mxu0 }
 0x968   : > { %v16689_v58 = vadd.f32 %v10356_v39, %v10355_v48 }
 0x96c   : > { %v10374_v33 = vpop.f32.mrb[152].mxu0 }
 0x96d   : > { %v10375_v45 = vpop.f32.mrb[153].mxu0 }
 0x96e   : > { %v10376_v1 = vadd.f32 %v10375_v45, %v10374_v33  ;;  %v10377_v35 = vpop.f32.mrb[154].mxu0  ;;  %v8715_v45 = vld [vmem:[%s17337_s11 + $0x18] sm:$0xff] }
 0x96f   : > { %v10378_v53 = vpop.f32.mrb[155].mxu0 }
 0x970   : > { %v8554_v43 = vadd.f32 %v10376_v1, %v8393_v10  ;;  %v10379_v41 = vadd.f32 %v10378_v53, %v10377_v35  ;;  %v8011_v10 = vld [vmem:[%s17336_s10 + $0x28] sm:$0xff] }
 0x972   : > { %v8680_v6 = vmax.f32 %v8554_v43, 0.0  ;;  %v8557_v2 = vadd.f32 %v10379_v41, %v8396_v57  ;;  %v8778_v57 = vld [vmem:[%s17338_s12 + $0x10] sm:$0xff]  ;;  %v8779_v43 = vld [vmem:[%s17338_s12 + $0x18] sm:$0xff] }
 0x974   : > { %v8744_v26 = vmul.f32 %v8712_v12, %v8680_v6  ;;  %v8681_v19 = vmax.f32 %v8557_v2, 0.0  ;;  %v10380_v5 = vpop.f32.mrb[156].mxu0  ;;  %v8409_v12 = vadd.f32 %v16626_v25, %v8010_v31 }
 0x975   : > { %v10381_v54 = vpop.f32.mrb[157].mxu0 }
 0x976   : > { %v8745_v49 = vmul.f32 %v8713_v51, %v8681_v19  ;;  %v10382_v24 = vadd.f32 %v10381_v54, %v10380_v5  ;;  %v10383_v11 = vpop.f32.mrb[158].mxu0  ;;  %v16722_v63 = vadd.f32 %v8776_v27, %v8744_v26  ;;  %v8412_v51 = vadd.f32 %v16628_v8, %v8011_v10  ;;  %v8012_v8 = vld [vmem:[%s17336_s10 + $0x30] sm:$0xff] }
 0x977   : > { %v10384_v0 = vpop.f32.mrb[159].mxu0 }
 0x978   : > { %v16724_v17 = vadd.f32 %v8777_v62, %v8745_v49  ;;  %v8562_v48 = vadd.f32 %v10382_v24, %v8401_v40  ;;  %v10385_v39 = vadd.f32 %v10384_v0, %v10383_v11  ;;  %v8716_v62 = vld [vmem:[%s17337_s11 + $0x20] sm:$0xff]  ;;  %v8717_v40 = vld [vmem:[%s17337_s11 + $0x28] sm:$0xff]  ;;  %v8013_v49 = vld [vmem:[%s17336_s10 + $0x38] sm:$0xff] }
 0x979   : > { %v8780_v0 = vld [vmem:[%s17338_s12 + $0x20] sm:$0xff] }
 0x97a   : > { %v8682_v33 = vmax.f32 %v8562_v48, 0.0  ;;  %v8565_v14 = vadd.f32 %v10385_v39, %v8404_v34  ;;  %v8872_v7 = vpack.c.bf16 %v16724_v17, %v16722_v63  ;;  %v8781_v48 = vld [vmem:[%s17338_s12 + $0x28] sm:$0xff] }
 0x97c   : > { %v8746_v1 = vmul.f32 %v8714_v28, %v8682_v33  ;;  %v8683_v35 = vmax.f32 %v8565_v14, 0.0  ;;  %v10386_v53 = vpop.f32.mrb[160].mxu0  ;;  %v8417_v28 = vadd.f32 %v16636_v4, %v8012_v8 }
 0x97d   : > { %v10387_v41 = vpop.f32.mrb[161].mxu0 }
 0x97e   : > { %v8747_v6 = vmul.f32 %v8715_v45, %v8683_v35  ;;  %v10388_v2 = vadd.f32 %v10387_v41, %v10386_v53  ;;  %v10389_v61 = vpop.f32.mrb[162].mxu0  ;;  %v16748_v26 = vadd.f32 %v8778_v57, %v8746_v1  ;;  %v8420_v45 = vadd.f32 %v16638_v32, %v8013_v49  ;;  %v8014_v32 = vld [vmem:[%s17336_s10 + $0x40] sm:$0xff] }
 0x97f   : > { %v10390_v37 = vpop.f32.mrb[163].mxu0 }
 0x980   : > { %v16750_v19 = vadd.f32 %v8779_v43, %v8747_v6  ;;  %v8570_v5 = vadd.f32 %v10388_v2, %v8409_v12  ;;  %v10391_v27 = vadd.f32 %v10390_v37, %v10389_v61  ;;  %v8718_v43 = vld [vmem:[%s17337_s11 + $0x30] sm:$0xff]  ;;  %v8719_v6 = vld [vmem:[%s17337_s11 + $0x38] sm:$0xff]  ;;  %v8015_v2 = vld [vmem:[%s17336_s10 + $0x48] sm:$0xff] }
 0x981   : > { %v8428_v49 = vadd.f32 %v16645_v44, %v8015_v2  ;;  %v8016_v44 = vld [vmem:[%s17336_s10 + $0x50] sm:$0xff] }
 0x982   : > { %v8684_v54 = vmax.f32 %v8570_v5, 0.0  ;;  %v8573_v13 = vadd.f32 %v10391_v27, %v8412_v51  ;;  %v8873_v25 = vpack.c.bf16 %v16750_v19, %v16748_v26  ;;  %v8782_v5 = vld [vmem:[%s17338_s12 + $0x30] sm:$0xff]  ;;  %v8783_v27 = vld [vmem:[%s17338_s12 + $0x38] sm:$0xff] }
 0x984   : > { %v8748_v24 = vmul.f32 %v8716_v62, %v8684_v54  ;;  %v8685_v11 = vmax.f32 %v8573_v13, 0.0  ;;  %v10392_v34 = vpop.f32.mrb[164].mxu0  ;;  %v8425_v54 = vadd.f32 %v16643_v29, %v8014_v32 }
 0x985   : > { %v10393_v39 = vpop.f32.mrb[165].mxu0 }
 0x986   : > { %v8749_v33 = vmul.f32 %v8717_v40, %v8685_v11  ;;  %v10394_v14 = vadd.f32 %v10393_v39, %v10392_v34  ;;  %v10395_v31 = vpop.f32.mrb[166].mxu0  ;;  %v16774_v1 = vadd.f32 %v8780_v0, %v8748_v24  ;;  %v8720_v39 = vld [vmem:[%s17337_s11 + $0x40] sm:$0xff] }
 0x987   : > { %v10396_v10 = vpop.f32.mrb[167].mxu0 }
 0x988   : > { %v16776_v35 = vadd.f32 %v8781_v48, %v8749_v33  ;;  %v8578_v53 = vadd.f32 %v10394_v14, %v8417_v28  ;;  %v10397_v57 = vadd.f32 %v10396_v10, %v10395_v31  ;;  %v8721_v14 = vld [vmem:[%s17337_s11 + $0x48] sm:$0xff]  ;;  %v8017_v31 = vld [vmem:[%s17336_s10 + $0x58] sm:$0xff] }
 0x98a   : > { %v8686_v41 = vmax.f32 %v8578_v53, 0.0  ;;  %v8581_v12 = vadd.f32 %v10397_v57, %v8420_v45  ;;  %v8874_v4 = vpack.c.bf16 %v16776_v35, %v16774_v1  ;;  %v8784_v57 = vld [vmem:[%s17338_s12 + $0x40] sm:$0xff] }
 0x98c   : > { %v8750_v61 = vmul.f32 %v8718_v43, %v8686_v41  ;;  %v8687_v51 = vmax.f32 %v8581_v12, 0.0  ;;  %v10398_v37 = vpop.f32.mrb[168].mxu0  ;;  %v8785_v43 = vld [vmem:[%s17338_s12 + $0x48] sm:$0xff]  ;;  %v8433_v12 = vadd.f32 %v16647_v46, %v8016_v44 }
 0x98d   : > { %v10399_v62 = vpop.f32.mrb[169].mxu0 }
 0x98e   : > { %v8751_v13 = vmul.f32 %v8719_v6, %v8687_v51  ;;  %v10400_v8 = vadd.f32 %v10399_v62, %v10398_v37  ;;  %v10401_v40 = vpop.f32.mrb[170].mxu0  ;;  %v16800_v11 = vadd.f32 %v8782_v5, %v8750_v61  ;;  %v8436_v61 = vadd.f32 %v16649_v59, %v8017_v31  ;;  %v8018_v59 = vld [vmem:[%s17336_s10 + $0x60] sm:$0xff] }
 0x98f   : > { %v10402_v24 = vpop.f32.mrb[171].mxu0  ;;  %v8441_v44 = vadd.f32 %v16651_v36, %v8018_v59 }
 0x990   : > { %v16802_v34 = vadd.f32 %v8783_v27, %v8751_v13  ;;  %v8586_v0 = vadd.f32 %v10400_v8, %v8425_v54  ;;  %v10403_v48 = vadd.f32 %v10402_v24, %v10401_v40  ;;  %v8722_v54 = vld [vmem:[%s17337_s11 + $0x50] sm:$0xff]  ;;  %v8723_v40 = vld [vmem:[%s17337_s11 + $0x58] sm:$0xff] }
 0x992   : > { %v8688_v28 = vmax.f32 %v8586_v0, 0.0  ;;  %v8589_v33 = vadd.f32 %v10403_v48, %v8428_v49  ;;  %v8875_v29 = vpack.c.bf16 %v16802_v34, %v16800_v11  ;;  %v8019_v49 = vld [vmem:[%s17336_s10 + $0x68] sm:$0xff] }
 0x994   : > { %v8752_v45 = vmul.f32 %v8720_v39, %v8688_v28  ;;  %v8689_v10 = vmax.f32 %v8589_v33, 0.0  ;;  %v10404_v53 = vpop.f32.mrb[172].mxu0  ;;  %v8786_v39 = vld [vmem:[%s17338_s12 + $0x50] sm:$0xff]  ;;  %v8787_v28 = vld [vmem:[%s17338_s12 + $0x58] sm:$0xff] }
 0x995   : > { %v10405_v41 = vpop.f32.mrb[173].mxu0 }
 0x996   : > { %v8753_v32 = vmul.f32 %v8721_v14, %v8689_v10  ;;  %v10406_v6 = vadd.f32 %v10405_v41, %v10404_v53  ;;  %v10407_v2 = vpop.f32.mrb[174].mxu0  ;;  %v16826_v37 = vadd.f32 %v8784_v57, %v8752_v45  ;;  %v8444_v10 = vadd.f32 %v16653_v55, %v8019_v49  ;;  %v8020_v55 = vld [vmem:[%s17336_s10 + $0x70] sm:$0xff] }
 0x997   : > { %v10408_v51 = vpop.f32.mrb[175].mxu0 }
 0x998   : > { %v16828_v5 = vadd.f32 %v8785_v43, %v8753_v32  ;;  %v8594_v27 = vadd.f32 %v10406_v6, %v8433_v12  ;;  %v10409_v62 = vadd.f32 %v10408_v51, %v10407_v2  ;;  %v8724_v32 = vld [vmem:[%s17337_s11 + $0x60] sm:$0xff]  ;;  %v8021_v51 = vld [vmem:[%s17336_s10 + $0x78] sm:$0xff] }
 0x99a   : > { %v8690_v13 = vmax.f32 %v8594_v27, 0.0  ;;  %v8597_v8 = vadd.f32 %v10409_v62, %v8436_v61  ;;  %v8876_v46 = vpack.c.bf16 %v16828_v5, %v16826_v37  ;;  %v8725_v61 = vld [vmem:[%s17337_s11 + $0x68] sm:$0xff] }
 0x99c   : > { %v8754_v24 = vmul.f32 %v8722_v54, %v8690_v13  ;;  %v8691_v0 = vmax.f32 %v8597_v8, 0.0  ;;  %v10410_v48 = vpop.f32.mrb[176].mxu0  ;;  %v8788_v13 = vld [vmem:[%s17338_s12 + $0x60] sm:$0xff]  ;;  %v8789_v8 = vld [vmem:[%s17338_s12 + $0x68] sm:$0xff] }
 0x99d   : > { %v10411_v33 = vpop.f32.mrb[177].mxu0 }
 0x99e   : > { %v8755_v14 = vmul.f32 %v8723_v40, %v8691_v0  ;;  %v10412_v31 = vadd.f32 %v10411_v33, %v10410_v48  ;;  %v10413_v45 = vpop.f32.mrb[178].mxu0  ;;  %v16852_v57 = vadd.f32 %v8786_v39, %v8754_v24  ;;  %v8449_v40 = vadd.f32 %v16655_v9, %v8020_v55  ;;  %v8791_v55 = vld [vmem:[%s17338_s12 + $0x78] sm:$0xff] }
 0x99f   : > { %v10414_v53 = vpop.f32.mrb[179].mxu0  ;;  %v8452_v48 = vadd.f32 %v16657_v42, %v8021_v51  ;;  %v8022_v42 = vld [vmem:[%s17336_s10 + $0x80] sm:$0xff] }
 0x9a0   : > { %v16854_v43 = vadd.f32 %v8787_v28, %v8755_v14  ;;  %v8602_v41 = vadd.f32 %v10412_v31, %v8441_v44  ;;  %v10415_v12 = vadd.f32 %v10414_v53, %v10413_v45  ;;  %v8726_v31 = vld [vmem:[%s17337_s11 + $0x70] sm:$0xff]  ;;  %v8727_v53 = vld [vmem:[%s17337_s11 + $0x78] sm:$0xff]  ;;  %v8457_v51 = vadd.f32 %v16659_v16, %v8022_v42 }
 0x9a2   : > { %v8692_v6 = vmax.f32 %v8602_v41, 0.0  ;;  %v8605_v2 = vadd.f32 %v10415_v12, %v8444_v10  ;;  %v8877_v36 = vpack.c.bf16 %v16854_v43, %v16852_v57  ;;  %v8023_v41 = vld [vmem:[%s17336_s10 + $0x88] sm:$0xff] }
 0x9a4   : > { %v8756_v27 = vmul.f32 %v8724_v32, %v8692_v6  ;;  %v8693_v62 = vmax.f32 %v8605_v2, 0.0  ;;  %v10416_v54 = vpop.f32.mrb[180].mxu0  ;;  %v8790_v2 = vld [vmem:[%s17338_s12 + $0x70] sm:$0xff] }
 0x9a5   : > { %v10417_v59 = vpop.f32.mrb[181].mxu0 }
 0x9a6   : > { %v8757_v49 = vmul.f32 %v8725_v61, %v8693_v62  ;;  %v10418_v24 = vadd.f32 %v10417_v59, %v10416_v54  ;;  %v10419_v0 = vpop.f32.mrb[182].mxu0  ;;  %v16878_v28 = vadd.f32 %v8788_v13, %v8756_v27  ;;  %v8460_v13 = vadd.f32 %v16661_v38, %v8023_v41  ;;  %v8024_v38 = vld [vmem:[%s17336_s10 + $0x90] sm:$0xff]  ;;  %v8793_v41 = vld [vmem:[%s17338_s12 + $0x88] sm:$0xff] }
 0x9a7   : > { %v10420_v39 = vpop.f32.mrb[183].mxu0 }
 0x9a8   : > { %v16880_v33 = vadd.f32 %v8789_v8, %v8757_v49  ;;  %v8610_v44 = vadd.f32 %v10418_v24, %v8449_v40  ;;  %v10421_v14 = vadd.f32 %v10420_v39, %v10419_v0  ;;  %v8728_v0 = vld [vmem:[%s17337_s11 + $0x80] sm:$0xff] }
 0x9aa   : > { %v8694_v45 = vmax.f32 %v8610_v44, 0.0  ;;  %v8613_v10 = vadd.f32 %v10421_v14, %v8452_v48  ;;  %v8878_v9 = vpack.c.bf16 %v16880_v33, %v16878_v28  ;;  %v8729_v44 = vld [vmem:[%s17337_s11 + $0x88] sm:$0xff]  ;;  %v8025_v14 = vld [vmem:[%s17336_s10 + $0x98] sm:$0xff] }
 0x9ab   : > { %v12280_v28 = vld [vmem:[%s17339_s13 + $0x14] ss:$8 sps:$4 sm:$0xff]   ;;  %v12278_v33 = vld [vmem:[%s17339_s13 + $0x10] ss:$8 sps:$4 sm:$0xff]  }
 0x9ac   : > { %v8758_v12 = vmul.f32 %v8726_v31, %v8694_v45  ;;  %v8695_v32 = vmax.f32 %v8613_v10, 0.0  ;;  %v10422_v6 = vpop.f32.mrb[184].mxu0 }
 0x9ad   : > { %v10423_v61 = vpop.f32.mrb[185].mxu0 }
 0x9ae   : > { %v8759_v27 = vmul.f32 %v8727_v53, %v8695_v32  ;;  %v10424_v62 = vadd.f32 %v10423_v61, %v10422_v6  ;;  %v10425_v54 = vpop.f32.mrb[186].mxu0  ;;  %v16904_v59 = vadd.f32 %v8790_v2, %v8758_v12  ;;  %v8792_v53 = vld [vmem:[%s17338_s12 + $0x80] sm:$0xff]  ;;  %v8465_v12 = vadd.f32 %v16663_v52, %v8024_v38 }
 0x9af   : > { %v10426_v8 = vpop.f32.mrb[187].mxu0  ;;  %v8026_v52 = vld [vmem:[%s17336_s10 + $0xa0] sm:$0xff] }
 0x9b0   : > { %v16906_v40 = vadd.f32 %v8791_v55, %v8759_v27  ;;  %v8618_v49 = vadd.f32 %v10424_v62, %v8457_v51  ;;  %v10427_v24 = vadd.f32 %v10426_v8, %v10425_v54  ;;  %v8468_v55 = vadd.f32 %v16665_v20, %v8025_v14  ;;  %v8731_v20 = vld [vmem:[%s17337_s11 + $0x98] sm:$0xff]  ;;  %v8794_v14 = vld [vmem:[%s17338_s12 + $0x90] sm:$0xff] }
 0x9b2   : > { %v8696_v48 = vmax.f32 %v8618_v49, 0.0  ;;  %v8621_v39 = vadd.f32 %v10427_v24, %v8460_v13  ;;  %v8879_v16 = vpack.c.bf16 %v16906_v40, %v16904_v59  ;;  %v8730_v13 = vld [vmem:[%s17337_s11 + $0x90] sm:$0xff]  ;;  %v12281_v59 = vld [vmem:[%s17339_s13 + $0x20] ss:$8 sps:$4 sm:$0xff]  }
 0x9b3   : > { %v12286_v40 = vld [vmem:[%s17339_s13 + $0x34] ss:$8 sps:$4 sm:$0xff]  }
 0x9b4   : > { %v8760_v31 = vmul.f32 %v8728_v0, %v8696_v48  ;;  %v8697_v45 = vmax.f32 %v8621_v39, 0.0  ;;  %v10428_v10 = vpop.f32.mrb[188].mxu0  ;;  %v8027_v0 = vld [vmem:[%s17336_s10 + $0xa8] sm:$0xff] }
 0x9b5   : > { %v10429_v42 = vpop.f32.mrb[189].mxu0 }
 0x9b6   : > { %v8761_v32 = vmul.f32 %v8729_v44, %v8697_v45  ;;  %v10430_v6 = vadd.f32 %v10429_v42, %v10428_v10  ;;  %v10431_v2 = vpop.f32.mrb[190].mxu0  ;;  %v8824_v62 = vadd.f32 %v8792_v53, %v8760_v31  ;;  %v8795_v31 = vld [vmem:[%s17338_s12 + $0x98] sm:$0xff]  ;;  %v8473_v45 = vadd.f32 %v16667_v50, %v8026_v52  ;;  %v8028_v50 = vld [vmem:[%s17336_s10 + $0xb0] sm:$0xff] }
 0x9b7   : > { %v10432_v61 = vpop.f32.mrb[191].mxu0 }
 0x9b8   : > { %v8626_v51 = vadd.f32 %v10430_v6, %v8465_v12  ;;  %v10433_v27 = vadd.f32 %v10432_v61, %v10431_v2  ;;  %v8825_v54 = vadd.f32 %v8793_v41, %v8761_v32  ;;  %v8476_v41 = vadd.f32 %v16669_v60, %v8027_v0  ;;  %v8733_v60 = vld [vmem:[%s17337_s11 + $0xa8] sm:$0xff] }
 0x9ba   : > { %v8698_v8 = vmax.f32 %v8626_v51, 0.0  ;;  %v8629_v49 = vadd.f32 %v10433_v27, %v8468_v55  ;;  %v8880_v24 = vpack.c.bf16 %v8825_v54, %v8824_v62  ;;  %v8029_v51 = vld [vmem:[%s17336_s10 + $0xb8] sm:$0xff] }
 0x9bc   : > { %v8762_v48 = vmul.f32 %v8730_v13, %v8698_v8  ;;  %v8699_v39 = vmax.f32 %v8629_v49, 0.0  ;;  %v10434_v38 = vpop.f32.mrb[192].mxu0  ;;  %10470 = vmatprep.subr.bf16.mxu0 %v8880_v24  ;;  %v8796_v8 = vld [vmem:[%s17338_s12 + $0xa0] sm:$0xff]  ;;  %v8797_v49 = vld [vmem:[%s17338_s12 + $0xa8] sm:$0xff]  ;;  %v8481_v24 = vadd.f32 %v16671_v3, %v8028_v50 }
 0x9bd   : > { %v10435_v44 = vpop.f32.mrb[193].mxu0  ;;  %10471 = vmatpush3.bf16.msra.mxu0 %v8872_v7  ;;  %v8732_v7 = vld [vmem:[%s17337_s11 + $0xa0] sm:$0xff] }
 0x9be   : > { %v8763_v10 = vmul.f32 %v8731_v20, %v8699_v39  ;;  %v10436_v42 = vadd.f32 %v10435_v44, %v10434_v38  ;;  %v10437_v53 = vpop.f32.mrb[194].mxu0  ;;  %v8826_v63 = vadd.f32 %v8794_v14, %v8762_v48  ;;  %v8484_v48 = vadd.f32 %v16673_v56, %v8029_v51  ;;  %v8030_v3 = vld [vmem:[%s17336_s10 + $0xc0] sm:$0xff]  ;;  %v8735_v56 = vld [vmem:[%s17337_s11 + $0xb8] sm:$0xff] }
 0x9bf   : > { %v10438_v12 = vpop.f32.mrb[195].mxu0 }
 0x9c0   : > { %v8634_v32 = vadd.f32 %v10436_v42, %v8473_v45  ;;  %v10439_v6 = vadd.f32 %v10438_v12, %v10437_v53  ;;  %v8827_v17 = vadd.f32 %v8795_v31, %v8763_v10  ;;  %v8031_v10 = vld [vmem:[%s17336_s10 + $0xc8] sm:$0xff] }
 0x9c2   : > { %v8700_v2 = vmax.f32 %v8634_v32, 0.0  ;;  %v8637_v55 = vadd.f32 %v10439_v6, %v8476_v41  ;;  %v8881_v61 = vpack.c.bf16 %v8827_v17, %v8826_v63  ;;  %v8798_v32 = vld [vmem:[%s17338_s12 + $0xb0] sm:$0xff]  ;;  %v8799_v6 = vld [vmem:[%s17338_s12 + $0xb8] sm:$0xff]  ;;  %v8489_v63 = vadd.f32 %v16675_v15, %v8030_v3  ;;  %v8035_v3 = vld [vmem:[%s17336_s10 + $0xe8] sm:$0xff] }
 0x9c3   : > { %v8032_v15 = vld [vmem:[%s17336_s10 + $0xd0] sm:$0xff] }
 0x9c4   : > { %v8764_v27 = vmul.f32 %v8732_v7, %v8700_v2  ;;  %v8701_v62 = vmax.f32 %v8637_v55, 0.0  ;;  %v10440_v54 = vpop.f32.mrb[196].mxu0  ;;  %10472 = vmatprep.subr.bf16.mxu0 %v8881_v61  ;;  %v8492_v55 = vadd.f32 %v16677_v23, %v8031_v10  ;;  %v8737_v23 = vld [vmem:[%s17337_s11 + $0xc8] sm:$0xff] }
 0x9c5   : > { %v10441_v13 = vpop.f32.mrb[197].mxu0  ;;  %10473 = vmatpush3.bf16.msra.mxu0 %v8873_v25  ;;  %v8734_v25 = vld [vmem:[%s17337_s11 + $0xb0] sm:$0xff] }
 0x9c6   : > { %v8765_v52 = vmul.f32 %v8733_v60, %v8701_v62  ;;  %v10442_v20 = vadd.f32 %v10441_v13, %v10440_v54  ;;  %v10443_v0 = vpop.f32.mrb[198].mxu0  ;;  %v8828_v26 = vadd.f32 %v8796_v8, %v8764_v27  ;;  %v8033_v54 = vld [vmem:[%s17336_s10 + $0xd8] sm:$0xff] }
 0x9c7   : > { %v10444_v39 = vpop.f32.mrb[199].mxu0 }
 0x9c8   : > { %v8642_v38 = vadd.f32 %v10442_v20, %v8481_v24  ;;  %v10445_v44 = vadd.f32 %v10444_v39, %v10443_v0  ;;  %v8829_v19 = vadd.f32 %v8797_v49, %v8765_v52  ;;  %v8800_v52 = vld [vmem:[%s17338_s12 + $0xc0] sm:$0xff]  ;;  %v8801_v20 = vld [vmem:[%s17338_s12 + $0xc8] sm:$0xff]  ;;  %v8497_v0 = vadd.f32 %v16679_v21, %v8032_v15 }
 0x9c9   : > { %v8034_v21 = vld [vmem:[%s17336_s10 + $0xe0] sm:$0xff] }
 0x9ca   : > { %v8702_v14 = vmax.f32 %v8642_v38, 0.0  ;;  %v8645_v31 = vadd.f32 %v10445_v44, %v8484_v48  ;;  %v8882_v45 = vpack.c.bf16 %v8829_v19, %v8828_v26  ;;  %v8500_v44 = vadd.f32 %v16681_v18, %v8033_v54  ;;  %v8739_v18 = vld [vmem:[%s17337_s11 + $0xd8] sm:$0xff]  ;;  %v8804_v15 = vld [vmem:[%s17338_s12 + $0xe0] sm:$0xff] }
 0x9cc   : > { %v8766_v42 = vmul.f32 %v8734_v25, %v8702_v14  ;;  %v8703_v53 = vmax.f32 %v8645_v31, 0.0  ;;  %v10446_v41 = vpop.f32.mrb[200].mxu0  ;;  %10474 = vmatprep.subr.bf16.mxu0 %v8882_v45 }
 0x9cd   : > { %v10447_v12 = vpop.f32.mrb[201].mxu0  ;;  %10475 = vmatpush3.bf16.msra.mxu0 %v8874_v4  ;;  %v8736_v4 = vld [vmem:[%s17337_s11 + $0xc0] sm:$0xff] }
 0x9ce   : > { %v8767_v17 = vmul.f32 %v8735_v56, %v8703_v53  ;;  %v10448_v7 = vadd.f32 %v10447_v12, %v10446_v41  ;;  %v10449_v2 = vpop.f32.mrb[202].mxu0  ;;  %v8830_v1 = vadd.f32 %v8798_v32, %v8766_v42  ;;  %v8802_v41 = vld [vmem:[%s17338_s12 + $0xd0] sm:$0xff]  ;;  %v8803_v12 = vld [vmem:[%s17338_s12 + $0xd8] sm:$0xff]  ;;  %v8505_v32 = vadd.f32 %v16683_v22, %v8034_v21 }
 0x9cf   : > { %v10450_v61 = vpop.f32.mrb[203].mxu0  ;;  %v8036_v22 = vld [vmem:[%s17336_s10 + $0xf0] sm:$0xff] }
 0x9d0   : > { %v8650_v50 = vadd.f32 %v10448_v7, %v8489_v63  ;;  %v10451_v60 = vadd.f32 %v10450_v61, %v10449_v2  ;;  %v8831_v35 = vadd.f32 %v8799_v6, %v8767_v17  ;;  %v8508_v7 = vadd.f32 %v16685_v47, %v8035_v3  ;;  %v8741_v47 = vld [vmem:[%s17337_s11 + $0xe8] sm:$0xff]  ;;  %v12292_v21 = vld [vmem:[%s17339_s13 + $0x54] ss:$8 sps:$4 sm:$0xff]  }
 0x9d1   : > { %v8513_v54 = vadd.f32 %v16687_v30, %v8036_v22  ;;  %v8743_v30 = vld [vmem:[%s17337_s11 + $0xf8] sm:$0xff]  ;;  %v12295_v3 = vld [vmem:[%s17339_s13 + $0x64] ss:$8 sps:$4 sm:$0xff]  }
 0x9d2   : > { %v8704_v51 = vmax.f32 %v8650_v50, 0.0  ;;  %v8653_v27 = vadd.f32 %v10451_v60, %v8492_v55  ;;  %v8883_v62 = vpack.c.bf16 %v8831_v35, %v8830_v1  ;;  %v8037_v35 = vld [vmem:[%s17336_s10 + $0xf8] sm:$0xff]  ;;  %v8888_v22 = vld [vmem:[%s17340_s14] sm:$0xff] }
 0x9d4   : > { %v8768_v13 = vmul.f32 %v8736_v4, %v8704_v51  ;;  %v8705_v8 = vmax.f32 %v8653_v27, 0.0  ;;  %v10452_v49 = vpop.f32.mrb[204].mxu0  ;;  %10476 = vmatprep.subr.bf16.mxu0 %v8883_v62 }
 0x9d5   : > { %v10453_v24 = vpop.f32.mrb[205].mxu0  ;;  %10477 = vmatpush3.bf16.msra.mxu0 %v8875_v29  ;;  %v8738_v29 = vld [vmem:[%s17337_s11 + $0xd0] sm:$0xff] }
 0x9d6   : > { %v8769_v48 = vmul.f32 %v8737_v23, %v8705_v8  ;;  %v10454_v39 = vadd.f32 %v10453_v24, %v10452_v49  ;;  %v10455_v38 = vpop.f32.mrb[206].mxu0  ;;  %v8832_v11 = vadd.f32 %v8800_v52, %v8768_v13  ;;  %v8805_v23 = vld [vmem:[%s17338_s12 + $0xe8] sm:$0xff]  ;;  %v8516_v24 = vadd.f32 %v16689_v58, %v8037_v35  ;;  %v8806_v58 = vld [vmem:[%s17338_s12 + $0xf0] sm:$0xff] }
 0x9d7   : > { %v10456_v26 = vpop.f32.mrb[207].mxu0 }
 0x9d8   : > { %v8658_v19 = vadd.f32 %v10454_v39, %v8497_v0  ;;  %v10457_v25 = vadd.f32 %v10456_v26, %v10455_v38  ;;  %v8833_v34 = vadd.f32 %v8801_v20, %v8769_v48 }
 0x9da   : > { %v8706_v14 = vmax.f32 %v8658_v19, 0.0  ;;  %v8661_v31 = vadd.f32 %v10457_v25, %v8500_v44  ;;  %v8884_v45 = vpack.c.bf16 %v8833_v34, %v8832_v11  ;;  %v8807_v19 = vld [vmem:[%s17338_s12 + $0xf8] sm:$0xff] }
 0x9dc   : > { %v8770_v56 = vmul.f32 %v8738_v29, %v8706_v14  ;;  %v8707_v10 = vmax.f32 %v8661_v31, 0.0  ;;  %v10458_v42 = vpop.f32.mrb[208].mxu0  ;;  %10478 = vmatprep.subr.bf16.mxu0 %v8884_v45  ;;  %v12275_v14 = vld [vmem:[%s17339_s13] ss:$8 sps:$4 sm:$0xff]   ;;  %v12289_v31 = vld [vmem:[%s17339_s13 + $0x44] ss:$8 sps:$4 sm:$0xff]  }
 0x9dd   : > { %v10459_v53 = vpop.f32.mrb[209].mxu0  ;;  %10479 = vmatpush3.bf16.msra.mxu0 %v8876_v46  ;;  %v8740_v46 = vld [vmem:[%s17337_s11 + $0xe0] sm:$0xff] }
 0x9de   : > { %v8771_v6 = vmul.f32 %v8739_v18, %v8707_v10  ;;  %v10460_v63 = vadd.f32 %v10459_v53, %v10458_v42  ;;  %v10461_v17 = vpop.f32.mrb[210].mxu0  ;;  %v8834_v37 = vadd.f32 %v8802_v41, %v8770_v56  ;;  %v12287_v45 = vld [vmem:[%s17339_s13 + $0x40] ss:$8 sps:$4 sm:$0xff]   ;;  %v12290_v18 = vld [vmem:[%s17339_s13 + $0x50] ss:$8 sps:$4 sm:$0xff]  }
 0x9df   : > { %v10462_v2 = vpop.f32.mrb[211].mxu0  ;;  %v12293_v56 = vld [vmem:[%s17339_s13 + $0x60] ss:$8 sps:$4 sm:$0xff]   ;;  %v12298_v10 = vld [vmem:[%s17339_s13 + $0x74] ss:$8 sps:$4 sm:$0xff]  }
 0x9e0   : > { %v8666_v55 = vadd.f32 %v10460_v63, %v8505_v32  ;;  %v10463_v61 = vadd.f32 %v10462_v2, %v10461_v17  ;;  %v8835_v5 = vadd.f32 %v8803_v12, %v8771_v6  ;;  %v12296_v42 = vld [vmem:[%s17339_s13 + $0x70] ss:$8 sps:$4 sm:$0xff]   ;;  %v12301_v53 = vld [vmem:[%s17339_s13 + $0x84] ss:$8 sps:$4 sm:$0xff]   ;;  %v12299_v41 = vld [vmem:[%s17339_s13 + $0x80] ss:$8 sps:$4 sm:$0xff]  }
 0x9e1   : > { %v12304_v12 = vld [vmem:[%s17339_s13 + $0x94] ss:$8 sps:$4 sm:$0xff]   ;;  %v12302_v32 = vld [vmem:[%s17339_s13 + $0x90] ss:$8 sps:$4 sm:$0xff]   ;;  %v12307_v6 = vld [vmem:[%s17339_s13 + $0xa4] ss:$8 sps:$4 sm:$0xff]  }
 0x9e2   : > { %v8708_v50 = vmax.f32 %v8666_v55, 0.0  ;;  %v8669_v60 = vadd.f32 %v10463_v61, %v8508_v7  ;;  %v8885_v1 = vpack.c.bf16 %v8835_v5, %v8834_v37  ;;  %v12305_v63 = vld [vmem:[%s17339_s13 + $0xa0] ss:$8 sps:$4 sm:$0xff]   ;;  %v12310_v17 = vld [vmem:[%s17339_s13 + $0xb4] ss:$8 sps:$4 sm:$0xff]  }
 0x9e3   : > { %v12308_v7 = vld [vmem:[%s17339_s13 + $0xb0] ss:$8 sps:$4 sm:$0xff]   ;;  %v12313_v2 = vld [vmem:[%s17339_s13 + $0xc4] ss:$8 sps:$4 sm:$0xff]   ;;  %v12311_v55 = vld [vmem:[%s17339_s13 + $0xc0] ss:$8 sps:$4 sm:$0xff]  }
 0x9e4   : > { %v8772_v4 = vmul.f32 %v8740_v46, %v8708_v50  ;;  %v8709_v51 = vmax.f32 %v8669_v60, 0.0  ;;  %v10464_v27 = vpop.f32.mrb[212].mxu0  ;;  %10480 = vmatprep.subr.bf16.mxu0 %v8885_v1  ;;  %v12316_v61 = vld [vmem:[%s17339_s13 + $0xd4] ss:$8 sps:$4 sm:$0xff]   ;;  %v12314_v37 = vld [vmem:[%s17339_s13 + $0xd0] ss:$8 sps:$4 sm:$0xff]  }
 0x9e5   : > { %v10465_v62 = vpop.f32.mrb[213].mxu0  ;;  %10481 = vmatpush3.bf16.msra.mxu0 %v8877_v36  ;;  %v8742_v36 = vld [vmem:[%s17337_s11 + $0xf0] sm:$0xff]  ;;  %v12319_v5 = vld [vmem:[%s17339_s13 + $0xe4] ss:$8 sps:$4 sm:$0xff]   ;;  %v12317_v46 = vld [vmem:[%s17339_s13 + $0xe0] ss:$8 sps:$4 sm:$0xff]  }
 0x9e6   : > { %v8773_v13 = vmul.f32 %v8741_v47, %v8709_v51  ;;  %v10466_v8 = vadd.f32 %v10465_v62, %v10464_v27  ;;  %v10467_v49 = vpop.f32.mrb[214].mxu0  ;;  %v8836_v57 = vadd.f32 %v8804_v15, %v8772_v4  ;;  %v12322_v50 = vld [vmem:[%s17339_s13 + $0xf4] ss:$8 sps:$4 sm:$0xff]   ;;  %v12320_v60 = vld [vmem:[%s17339_s13 + $0xf0] ss:$8 sps:$4 sm:$0xff]   ;;  %v8889_v51 = vld [vmem:[%s17340_s14 + $0x8] sm:$0xff] }
 0x9e7   : > { %v10468_v52 = vpop.f32.mrb[215].mxu0 }
 0x9e8   : > { %v8674_v20 = vadd.f32 %v10466_v8, %v8513_v54  ;;  %v10469_v0 = vadd.f32 %v10468_v52, %v10467_v49  ;;  %v8837_v43 = vadd.f32 %v8805_v23, %v8773_v13  ;;  %v17188_v23 = vld [vmem:[%s17341_s15] sm:$0xff]  ;;  %v8890_v52 = vld [vmem:[%s17340_s14 + $0x10] sm:$0xff] }
 0x9e9   : > { %v10143_v13 = vcombine.high %v17188_v23, %v17188_v23 }
 0x9ea   : > { %v8710_v48 = vmax.f32 %v8674_v20, 0.0  ;;  %v8677_v39 = vadd.f32 %v10469_v0, %v8516_v24  ;;  %v8886_v38 = vpack.c.bf16 %v8837_v43, %v8836_v57 }
 0x9ec   : > { %v8774_v44 = vmul.f32 %v8742_v36, %v8710_v48  ;;  %v8711_v26 = vmax.f32 %v8677_v39, 0.0  ;;  %10482 = vmatprep.subr.bf16.mxu0 %v8886_v38  ;;  %v8891_v36 = vld [vmem:[%s17340_s14 + $0x18] sm:$0xff] }
 0x9ed   : > { %10483 = vmatpush3.bf16.msra.mxu0 %v8878_v9  ;;  %v12283_v9 = vld [vmem:[%s17339_s13 + $0x24] ss:$8 sps:$4 sm:$0xff]  }
 0x9ee   : > { %v8775_v25 = vmul.f32 %v8743_v30, %v8711_v26  ;;  %v8838_v11 = vadd.f32 %v8806_v58, %v8774_v44 }
 0x9f0   : > { %v8839_v34 = vadd.f32 %v8807_v19, %v8775_v25  ;;  %v8892_v19 = vld [vmem:[%s17340_s14 + $0x20] sm:$0xff] }
 0x9f2   : > { %v8887_v29 = vpack.c.bf16 %v8839_v34, %v8838_v11 }
 0x9f4   : > { %10484 = vmatprep.subr.bf16.mxu0 %v8887_v29 }
 0x9f5   : > { %10485 = vmatpush3.bf16.msra.mxu0 %v8879_v16  ;;  %v12284_v16 = vld [vmem:[%s17339_s13 + $0x30] ss:$8 sps:$4 sm:$0xff]  }
 0x9f8   : > { %9113 = vmatmul.mubr.bf16.vlgmr.msra.gmra.mrb[32].mxu0 %v12275_v14  ;;  %v8893_v14 = vld [vmem:[%s17340_s14 + $0x28] sm:$0xff] }
 0x9f9   : > { %9120 = vmatprep.mubr.bf16.mxu0 %v12280_v28 }
 0xa00   : > { %9121 = vmatmul.mubr.bf16.gmra.mrb[36].mxu0 %v12278_v33 }
 0xa01   : > { %9128 = vmatprep.mubr.bf16.mxu0 %v12283_v9 }
 0xa08   : > { %9129 = vmatmul.mubr.bf16.gmra.mrb[40].mxu0 %v12281_v59 }
 0xa09   : > { %9136 = vmatprep.mubr.bf16.mxu0 %v12286_v40 }
 0xa10   : > { %9137 = vmatmul.mubr.bf16.gmra.mrb[44].mxu0 %v12284_v16 }
 0xa11   : > { %9144 = vmatprep.mubr.bf16.mxu0 %v12289_v31 }
 0xa18   : > { %9145 = vmatmul.mubr.bf16.gmra.mrb[48].mxu0 %v12287_v45  ;;  %v8894_v45 = vld [vmem:[%s17340_s14 + $0x30] sm:$0xff] }
 0xa19   : > { %9152 = vmatprep.mubr.bf16.mxu0 %v12292_v21 }
 0xa20   : > { %9153 = vmatmul.mubr.bf16.gmra.mrb[52].mxu0 %v12290_v18 }
 0xa21   : > { %9160 = vmatprep.mubr.bf16.mxu0 %v12295_v3 }
 0xa28   : > { %9161 = vmatmul.mubr.bf16.gmra.mrb[56].mxu0 %v12293_v56 }
 0xa29   : > { %9168 = vmatprep.mubr.bf16.mxu0 %v12298_v10  ;;  %v8895_v10 = vld [vmem:[%s17340_s14 + $0x38] sm:$0xff] }
 0xa30   : > { %9169 = vmatmul.mubr.bf16.gmra.mrb[60].mxu0 %v12296_v42 }
 0xa31   : > { %9176 = vmatprep.mubr.bf16.mxu0 %v12301_v53 }
 0xa38   : > { %9177 = vmatmul.mubr.bf16.gmra.mrb[64].mxu0 %v12299_v41 }
 0xa39   : > { %9184 = vmatprep.mubr.bf16.mxu0 %v12304_v12 }
 0xa40   : > { %9185 = vmatmul.mubr.bf16.gmra.mrb[68].mxu0 %v12302_v32 }
 0xa41   : > { %9192 = vmatprep.mubr.bf16.mxu0 %v12307_v6 }
 0xa48   : > { %9193 = vmatmul.mubr.bf16.gmra.mrb[72].mxu0 %v12305_v63 }
 0xa49   : > { %9200 = vmatprep.mubr.bf16.mxu0 %v12310_v17  ;;  %v8896_v17 = vld [vmem:[%s17340_s14 + $0x40] sm:$0xff] }
 0xa50   : > { %9201 = vmatmul.mubr.bf16.gmra.mrb[76].mxu0 %v12308_v7 }
 0xa51   : > { %9208 = vmatprep.mubr.bf16.mxu0 %v12313_v2 }
 0xa58   : > { %9209 = vmatmul.mubr.bf16.gmra.mrb[80].mxu0 %v12311_v55 }
 0xa59   : > { %9216 = vmatprep.mubr.bf16.mxu0 %v12316_v61 }
 0xa60   : > { %9217 = vmatmul.mubr.bf16.gmra.mrb[84].mxu0 %v12314_v37  ;;  %v8897_v37 = vld [vmem:[%s17340_s14 + $0x48] sm:$0xff] }
 0xa61   : > { %9224 = vmatprep.mubr.bf16.mxu0 %v12319_v5 }
 0xa68   : > { %9225 = vmatmul.mubr.bf16.gmra.mrb[216].mxu0 %v12317_v46 }
 0xa69   : > { %9232 = vmatprep.mubr.bf16.mxu0 %v12322_v50 }
 0xa70   : > { %9233 = vmatmul.mubr.bf16.gmra.mrb[220].mxu0 %v12320_v60 }
 0xa71   : > { %9330 = vmatprep.mubr.bf16.mxu0 %v10143_v13 }
 0xacb   : > { %v10486_v1 = vpop.f32.mrb[32].mxu0 }
 0xacc   : > { %v10487_v47 = vpop.f32.mrb[33].mxu0 }
 0xacd   : > { %v10488_v35 = vadd.f32 %v10487_v47, %v10486_v1  ;;  %v10489_v4 = vpop.f32.mrb[34].mxu0 }
 0xace   : > { %v10490_v27 = vpop.f32.mrb[35].mxu0 }
 0xacf   : > { %v9115_v62 = vadd.f32 %v10488_v35, %v8888_v22  ;;  %v10491_v15 = vadd.f32 %v10490_v27, %v10489_v4  ;;  %v8898_v35 = vld [vmem:[%s17340_s14 + $0x50] sm:$0xff] }
 0xad1   : > { %v9118_v54 = vadd.f32 %v10491_v15, %v8889_v51  ;;  %v9241_v8 = vmax.f32 %v9115_v62, 0.0  ;;  %v8899_v15 = vld [vmem:[%s17340_s14 + $0x58] sm:$0xff] }
 0xad3   : > { %v9242_v49 = vmax.f32 %v9118_v54, 0.0  ;;  %v10492_v24 = vpop.f32.mrb[36].mxu0 }
 0xad4   : > { %v10493_v20 = vpop.f32.mrb[37].mxu0 }
 0xad5   : > { %v17195_v0 = vpack.c.bf16 %v9242_v49, %v9241_v8  ;;  %v10494_v57 = vadd.f32 %v10493_v20, %v10492_v24  ;;  %v10495_v43 = vpop.f32.mrb[38].mxu0 }
 0xad6   : > { %v10496_v48 = vpop.f32.mrb[39].mxu0 }
 0xad7   : > { %v9123_v39 = vadd.f32 %v10494_v57, %v8890_v52  ;;  %v10497_v38 = vadd.f32 %v10496_v48, %v10495_v43  ;;  %v8900_v57 = vld [vmem:[%s17340_s14 + $0x60] sm:$0xff] }
 0xad9   : > { %v9126_v30 = vadd.f32 %v10497_v38, %v8891_v36  ;;  %v9243_v44 = vmax.f32 %v9123_v39, 0.0  ;;  %v8901_v38 = vld [vmem:[%s17340_s14 + $0x68] sm:$0xff] }
 0xadb   : > { %v9244_v26 = vmax.f32 %v9126_v30, 0.0  ;;  %v10498_v58 = vpop.f32.mrb[40].mxu0 }
 0xadc   : > { %v10499_v25 = vpop.f32.mrb[41].mxu0 }
 0xadd   : > { %v17203_v11 = vpack.c.bf16 %v9244_v26, %v9243_v44  ;;  %v10500_v34 = vadd.f32 %v10499_v25, %v10498_v58  ;;  %v10501_v29 = vpop.f32.mrb[42].mxu0 }
 0xade   : > { %v10502_v28 = vpop.f32.mrb[43].mxu0 }
 0xadf   : > { %v9131_v33 = vadd.f32 %v10500_v34, %v8892_v19  ;;  %v10503_v9 = vadd.f32 %v10502_v28, %v10501_v29  ;;  %v8902_v29 = vld [vmem:[%s17340_s14 + $0x70] sm:$0xff] }
 0xae1   : > { %v9134_v59 = vadd.f32 %v10503_v9, %v8893_v14  ;;  %v9245_v40 = vmax.f32 %v9131_v33, 0.0 }
 0xae3   : > { %v9246_v16 = vmax.f32 %v9134_v59, 0.0  ;;  %v10504_v31 = vpop.f32.mrb[44].mxu0  ;;  %v8903_v59 = vld [vmem:[%s17340_s14 + $0x78] sm:$0xff] }
 0xae4   : > { %v10505_v21 = vpop.f32.mrb[45].mxu0 }
 0xae5   : > { %v17211_v18 = vpack.c.bf16 %v9246_v16, %v9245_v40  ;;  %v10506_v3 = vadd.f32 %v10505_v21, %v10504_v31  ;;  %v10507_v56 = vpop.f32.mrb[46].mxu0 }
 0xae6   : > { %v10508_v42 = vpop.f32.mrb[47].mxu0 }
 0xae7   : > { %v9139_v53 = vadd.f32 %v10506_v3, %v8894_v45  ;;  %v10509_v41 = vadd.f32 %v10508_v42, %v10507_v56 }
 0xae9   : > { %v9142_v12 = vadd.f32 %v10509_v41, %v8895_v10  ;;  %v9247_v32 = vmax.f32 %v9139_v53, 0.0  ;;  %v8904_v10 = vld [vmem:[%s17340_s14 + $0x80] sm:$0xff] }
 0xaeb   : > { %v9248_v6 = vmax.f32 %v9142_v12, 0.0  ;;  %v10510_v63 = vpop.f32.mrb[48].mxu0 }
 0xaec   : > { %v10511_v7 = vpop.f32.mrb[49].mxu0 }
 0xaed   : > { %v17219_v2 = vpack.c.bf16 %v9248_v6, %v9247_v32  ;;  %v10512_v55 = vadd.f32 %v10511_v7, %v10510_v63  ;;  %v10513_v61 = vpop.f32.mrb[50].mxu0  ;;  %v8905_v32 = vld [vmem:[%s17340_s14 + $0x88] sm:$0xff] }
 0xaee   : > { %v10514_v5 = vpop.f32.mrb[51].mxu0 }
 0xaef   : > { %v9147_v46 = vadd.f32 %v10512_v55, %v8896_v17  ;;  %v10515_v50 = vadd.f32 %v10514_v5, %v10513_v61  ;;  %v8906_v5 = vld [vmem:[%s17340_s14 + $0x90] sm:$0xff] }
 0xaf1   : > { %v9150_v60 = vadd.f32 %v10515_v50, %v8897_v37  ;;  %v9249_v1 = vmax.f32 %v9147_v46, 0.0 }
 0xaf3   : > { %v9250_v22 = vmax.f32 %v9150_v60, 0.0  ;;  %v10516_v47 = vpop.f32.mrb[52].mxu0 }
 0xaf4   : > { %v10517_v4 = vpop.f32.mrb[53].mxu0 }
 0xaf5   : > { %v17227_v51 = vpack.c.bf16 %v9250_v22, %v9249_v1  ;;  %v10518_v27 = vadd.f32 %v10517_v4, %v10516_v47  ;;  %v10519_v62 = vpop.f32.mrb[54].mxu0  ;;  %v8907_v22 = vld [vmem:[%s17340_s14 + $0x98] sm:$0xff] }
 0xaf6   : > { %v10520_v54 = vpop.f32.mrb[55].mxu0 }
 0xaf7   : > { %v9155_v13 = vadd.f32 %v10518_v27, %v8898_v35  ;;  %v10521_v8 = vadd.f32 %v10520_v54, %v10519_v62 }
 0xaf9   : > { %v9158_v49 = vadd.f32 %v10521_v8, %v8899_v15  ;;  %v9251_v24 = vmax.f32 %v9155_v13, 0.0  ;;  %v8908_v13 = vld [vmem:[%s17340_s14 + $0xa0] sm:$0xff] }
 0xafb   : > { %v9252_v52 = vmax.f32 %v9158_v49, 0.0  ;;  %v10522_v20 = vpop.f32.mrb[56].mxu0 }
 0xafc   : > { %v10523_v43 = vpop.f32.mrb[57].mxu0 }
 0xafd   : > { %v17235_v36 = vpack.c.bf16 %v9252_v52, %v9251_v24  ;;  %v10524_v48 = vadd.f32 %v10523_v43, %v10522_v20  ;;  %v10525_v39 = vpop.f32.mrb[58].mxu0  ;;  %v8909_v20 = vld [vmem:[%s17340_s14 + $0xa8] sm:$0xff] }
 0xafe   : > { %v10526_v30 = vpop.f32.mrb[59].mxu0 }
 0xaff   : > { %v9163_v44 = vadd.f32 %v10524_v48, %v8900_v57  ;;  %v10527_v26 = vadd.f32 %v10526_v30, %v10525_v39 }
 0xb01   : > { %v9166_v58 = vadd.f32 %v10527_v26, %v8901_v38  ;;  %v9253_v19 = vmax.f32 %v9163_v44, 0.0  ;;  %v8910_v44 = vld [vmem:[%s17340_s14 + $0xb0] sm:$0xff] }
 0xb03   : > { %v9254_v25 = vmax.f32 %v9166_v58, 0.0  ;;  %v10528_v34 = vpop.f32.mrb[60].mxu0 }
 0xb04   : > { %v10529_v14 = vpop.f32.mrb[61].mxu0 }
 0xb05   : > { %v17243_v28 = vpack.c.bf16 %v9254_v25, %v9253_v19  ;;  %v10530_v33 = vadd.f32 %v10529_v14, %v10528_v34  ;;  %v10531_v9 = vpop.f32.mrb[62].mxu0  ;;  %v8911_v34 = vld [vmem:[%s17340_s14 + $0xb8] sm:$0xff] }
 0xb06   : > { %v10532_v40 = vpop.f32.mrb[63].mxu0 }
 0xb07   : > { %v9171_v16 = vadd.f32 %v10530_v33, %v8902_v29  ;;  %v10533_v31 = vadd.f32 %v10532_v40, %v10531_v9 }
 0xb09   : > { %v9174_v45 = vadd.f32 %v10533_v31, %v8903_v59  ;;  %v9255_v21 = vmax.f32 %v9171_v16, 0.0  ;;  %v8912_v16 = vld [vmem:[%s17340_s14 + $0xc0] sm:$0xff] }
 0xb0b   : > { %v9256_v3 = vmax.f32 %v9174_v45, 0.0  ;;  %v10534_v56 = vpop.f32.mrb[64].mxu0 }
 0xb0c   : > { %v10535_v42 = vpop.f32.mrb[65].mxu0 }
 0xb0d   : > { %v17251_v53 = vpack.c.bf16 %v9256_v3, %v9255_v21  ;;  %v10536_v41 = vadd.f32 %v10535_v42, %v10534_v56  ;;  %v10537_v12 = vpop.f32.mrb[66].mxu0  ;;  %v8913_v56 = vld [vmem:[%s17340_s14 + $0xc8] sm:$0xff] }
 0xb0e   : > { %v10538_v6 = vpop.f32.mrb[67].mxu0 }
 0xb0f   : > { %v9179_v63 = vadd.f32 %v10536_v41, %v8904_v10  ;;  %v10539_v17 = vadd.f32 %v10538_v6, %v10537_v12 }
 0xb11   : > { %v9182_v7 = vadd.f32 %v10539_v17, %v8905_v32  ;;  %v9257_v55 = vmax.f32 %v9179_v63, 0.0  ;;  %v8914_v63 = vld [vmem:[%s17340_s14 + $0xd0] sm:$0xff] }
 0xb13   : > { %v9258_v61 = vmax.f32 %v9182_v7, 0.0  ;;  %v10540_v37 = vpop.f32.mrb[68].mxu0 }
 0xb14   : > { %v10541_v46 = vpop.f32.mrb[69].mxu0 }
 0xb15   : > { %v10542_v50 = vadd.f32 %v10541_v46, %v10540_v37  ;;  %v10543_v60 = vpop.f32.mrb[70].mxu0  ;;  %v9282_v1 = vpack.c.bf16 %v9258_v61, %v9257_v55  ;;  %v8915_v37 = vld [vmem:[%s17340_s14 + $0xd8] sm:$0xff] }
 0xb16   : > { %v10544_v47 = vpop.f32.mrb[71].mxu0 }
 0xb17   : > { %v9187_v35 = vadd.f32 %v10542_v50, %v8906_v5  ;;  %v10545_v4 = vadd.f32 %v10544_v47, %v10543_v60  ;;  %10582 = vmatprep.subr.bf16.mxu0 %v9282_v1  ;;  %v8916_v47 = vld [vmem:[%s17340_s14 + $0xe0] sm:$0xff] }
 0xb18   : > { %10583 = vmatpush3.bf16.msra.mxu0 %v17195_v0 }
 0xb19   : > { %v9190_v27 = vadd.f32 %v10545_v4, %v8907_v22  ;;  %v9259_v62 = vmax.f32 %v9187_v35, 0.0 }
 0xb1b   : > { %v9260_v15 = vmax.f32 %v9190_v27, 0.0  ;;  %v10546_v54 = vpop.f32.mrb[72].mxu0 }
 0xb1c   : > { %v10547_v8 = vpop.f32.mrb[73].mxu0 }
 0xb1d   : > { %v10548_v49 = vadd.f32 %v10547_v8, %v10546_v54  ;;  %v10549_v24 = vpop.f32.mrb[74].mxu0  ;;  %v9283_v52 = vpack.c.bf16 %v9260_v15, %v9259_v62  ;;  %v8917_v15 = vld [vmem:[%s17340_s14 + $0xe8] sm:$0xff] }
 0xb1e   : > { %v10550_v57 = vpop.f32.mrb[75].mxu0 }
 0xb1f   : > { %v9195_v43 = vadd.f32 %v10548_v49, %v8908_v13  ;;  %v10551_v48 = vadd.f32 %v10550_v57, %v10549_v24  ;;  %10584 = vmatprep.subr.bf16.mxu0 %v9283_v52 }
 0xb20   : > { %10585 = vmatpush3.bf16.msra.mxu0 %v17203_v11 }
 0xb21   : > { %v9198_v0 = vadd.f32 %v10551_v48, %v8909_v20  ;;  %v9261_v39 = vmax.f32 %v9195_v43, 0.0  ;;  %v8918_v20 = vld [vmem:[%s17340_s14 + $0xf0] sm:$0xff] }
 0xb23   : > { %v9262_v38 = vmax.f32 %v9198_v0, 0.0  ;;  %v10552_v30 = vpop.f32.mrb[76].mxu0 }
 0xb24   : > { %v10553_v26 = vpop.f32.mrb[77].mxu0 }
 0xb25   : > { %v10554_v58 = vadd.f32 %v10553_v26, %v10552_v30  ;;  %v10555_v19 = vpop.f32.mrb[78].mxu0  ;;  %v9284_v25 = vpack.c.bf16 %v9262_v38, %v9261_v39  ;;  %v8919_v39 = vld [vmem:[%s17340_s14 + $0xf8] sm:$0xff] }
 0xb26   : > { %v10556_v29 = vpop.f32.mrb[79].mxu0 }
 0xb27   : > { %v9203_v14 = vadd.f32 %v10554_v58, %v8910_v44  ;;  %v10557_v33 = vadd.f32 %v10556_v29, %v10555_v19  ;;  %10586 = vmatprep.subr.bf16.mxu0 %v9284_v25  ;;  %v10142_v25 = vcombine.low %v17188_v23, %v17188_v23  ;;  %v9290_v29 = vld [vmem:[%s17342_s16] sm:$0xff] }
 0xb28   : > { %10587 = vmatpush3.bf16.msra.mxu0 %v17211_v18 }
 0xb29   : > { %v9206_v11 = vadd.f32 %v10557_v33, %v8911_v34  ;;  %v9263_v9 = vmax.f32 %v9203_v14, 0.0 }
 0xb2b   : > { %v9264_v59 = vmax.f32 %v9206_v11, 0.0  ;;  %v10558_v40 = vpop.f32.mrb[80].mxu0 }
 0xb2c   : > { %v10559_v31 = vpop.f32.mrb[81].mxu0 }
 0xb2d   : > { %v10560_v45 = vadd.f32 %v10559_v31, %v10558_v40  ;;  %v10561_v21 = vpop.f32.mrb[82].mxu0  ;;  %v9285_v3 = vpack.c.bf16 %v9264_v59, %v9263_v9 }
 0xb2e   : > { %v10562_v10 = vpop.f32.mrb[83].mxu0 }
 0xb2f   : > { %v9211_v42 = vadd.f32 %v10560_v45, %v8912_v16  ;;  %v10563_v41 = vadd.f32 %v10562_v10, %v10561_v21  ;;  %10588 = vmatprep.subr.bf16.mxu0 %v9285_v3  ;;  %v17410_v10 = vlaneseq }
 0xb30   : > { %10589 = vmatpush3.bf16.msra.mxu0 %v17219_v2 }
 0xb31   : > { %v9214_v18 = vadd.f32 %v10563_v41, %v8913_v56  ;;  %v9265_v12 = vmax.f32 %v9211_v42, 0.0  ;;  %v9339_v42 = vshrl.u32 %v17410_v10, 7 }
 0xb33   : > { %v9266_v32 = vmax.f32 %v9214_v18, 0.0  ;;  %v10564_v6 = vpop.f32.mrb[84].mxu0  ;;  %vm9360_vm15 = vcmp.eq.s32.totalorder %v9339_v42, 2  ;;  %vm9359_vm0 = vcmp.eq.s32.totalorder %v9339_v42, 1 }
 0xb34   : > { %v10565_v17 = vpop.f32.mrb[85].mxu0 }
 0xb35   : > { %v10566_v7 = vadd.f32 %v10565_v17, %v10564_v6  ;;  %v10567_v55 = vpop.f32.mrb[86].mxu0  ;;  %v9286_v61 = vpack.c.bf16 %v9266_v32, %v9265_v12 }
 0xb36   : > { %v10568_v5 = vpop.f32.mrb[87].mxu0 }
 0xb37   : > { %v9219_v46 = vadd.f32 %v10566_v7, %v8914_v63  ;;  %v10569_v50 = vadd.f32 %v10568_v5, %v10567_v55  ;;  %10590 = vmatprep.subr.bf16.mxu0 %v9286_v61 }
 0xb38   : > { %10591 = vmatpush3.bf16.msra.mxu0 %v17227_v51 }
 0xb39   : > { %v9222_v2 = vadd.f32 %v10569_v50, %v8915_v37  ;;  %v9267_v60 = vmax.f32 %v9219_v46, 0.0 }
 0xb3b   : > { %v9268_v1 = vmax.f32 %v9222_v2, 0.0  ;;  %v10570_v22 = vpop.f32.mrb[216].mxu0 }
 0xb3c   : > { %v10571_v35 = vpop.f32.mrb[217].mxu0 }
 0xb3d   : > { %v10572_v4 = vadd.f32 %v10571_v35, %v10570_v22  ;;  %v10573_v27 = vpop.f32.mrb[218].mxu0  ;;  %v9287_v62 = vpack.c.bf16 %v9268_v1, %v9267_v60 }
 0xb3e   : > { %v10574_v54 = vpop.f32.mrb[219].mxu0 }
 0xb3f   : > { %v9227_v13 = vadd.f32 %v10572_v4, %v8916_v47  ;;  %v10575_v8 = vadd.f32 %v10574_v54, %v10573_v27  ;;  %10592 = vmatprep.subr.bf16.mxu0 %v9287_v62 }
 0xb40   : > { %10593 = vmatpush3.bf16.msra.mxu0 %v17235_v36 }
 0xb41   : > { %v9230_v51 = vadd.f32 %v10575_v8, %v8917_v15  ;;  %v9269_v49 = vmax.f32 %v9227_v13, 0.0 }
 0xb43   : > { %v9270_v24 = vmax.f32 %v9230_v51, 0.0  ;;  %v10576_v52 = vpop.f32.mrb[220].mxu0 }
 0xb44   : > { %v10577_v57 = vpop.f32.mrb[221].mxu0 }
 0xb45   : > { %v10578_v43 = vadd.f32 %v10577_v57, %v10576_v52  ;;  %v10579_v48 = vpop.f32.mrb[222].mxu0  ;;  %v9288_v0 = vpack.c.bf16 %v9270_v24, %v9269_v49 }
 0xb46   : > { %v10580_v38 = vpop.f32.mrb[223].mxu0 }
 0xb47   : > { %v9235_v30 = vadd.f32 %v10578_v43, %v8918_v20  ;;  %v10581_v44 = vadd.f32 %v10580_v38, %v10579_v48  ;;  %10594 = vmatprep.subr.bf16.mxu0 %v9288_v0 }
 0xb48   : > { %10595 = vmatpush3.bf16.msra.mxu0 %v17243_v28 }
 0xb49   : > { %v9238_v36 = vadd.f32 %v10581_v44, %v8919_v39  ;;  %v9271_v26 = vmax.f32 %v9235_v30, 0.0 }
 0xb4b   : > { %v9272_v58 = vmax.f32 %v9238_v36, 0.0 }
 0xb4d   : > { %v9289_v19 = vpack.c.bf16 %v9272_v58, %v9271_v26 }
 0xb4f   : > { %10596 = vmatprep.subr.bf16.mxu0 %v9289_v19 }
 0xb50   : > { %10597 = vmatpush3.bf16.msra.mxu0 %v17251_v53 }
 0xb53   : > { %9331 = vmatmul.mubr.bf16.vlgmr.msra.gmra.mrb[224].mxu0 %v10142_v25 }
 0xc26   : > { %v10598_v34 = vpop.f32.mrb[224].mxu0 }
 0xc27   : > { %v10599_v14 = vpop.f32.mrb[225].mxu0 }
 0xc28   : > { %v10600_v33 = vadd.f32 %v10599_v14, %v10598_v34  ;;  %v10601_v11 = vpop.f32.mrb[226].mxu0 }
 0xc29   : > { %v10602_v28 = vpop.f32.mrb[227].mxu0 }
 0xc2a   : > { %v9333_v9 = vadd.f32 %v10600_v33, %v9290_v29 }
 0xc2c   : > { %v9345_v59 = vand.u32 2147483647, %v9333_v9  ;;  %v9340_v31 = vmul.f32 0.5, %v9333_v9  ;;  %v9344_v6 = vmax.f32 %v9333_v9, 0.0 }
 0xc2e   : > { %v9346_v40 = vsub.f32 0.0, %v9345_v59 }
 0xc30   : > { %v9347_v16 = vmul.f32 1.442695, %v9346_v40 }
 0xc32   : > { %12405 = vpow2.f32 %v9347_v16 }
 0xc33   : > { %12407 = vtanh.f32 %v9340_v31 }
 0xc3c   : > { %v12406_v23 = vpop.eup %12405 }
 0xc3d   : > { %v9349_v53 = vadd.f32 1.0, %v12406_v23  ;;  %v9352_v45 = vmul.f32 -0.5, %v12406_v23  ;;  %v12408_v3 = vpop.eup %12407  ;;  %v9355_v56 = vand.u32 2147483647, %v12406_v23 }
 0xc3e   : > { %v9342_v18 = vmul.f32 0.5, %v12408_v3 }
 0xc3f   : > { %12409 = vlog2.f32 %v9349_v53  ;;  %v9353_v21 = vadd.f32 1.0, %v9352_v45  ;;  %vm9356_vm14 = vcmp.lt.f32.partialorder %v9355_v56, 0.0004427343 }
 0xc40   : > { %v9343_v7 = vadd.f32 0.5, %v9342_v18 }
 0xc41   : > { %v9354_v32 = vmul.f32 %v12406_v23, %v9353_v21 }
 0xc49   : > { %v12410_v41 = vpop.eup %12409 }
 0xc4a   : > { %v9351_v12 = vmul.f32 0.6931472, %v12410_v41 }
 0xc4c   : > { %v9357_v63 = vsel %vm9356_vm14, %v9354_v32, %v9351_v12 }
 0xc4d   : > { %v9358_v17 = vadd.f32 %v9357_v63, %v9344_v6 }
 0xc4f   : > { %v9361_v55 = vsel %vm9360_vm15, %v9358_v17, %v9333_v9 }
 0xc50   : > { %v9362_v61 = vsel %vm9359_vm0, %v9343_v7, %v9361_v55 }
 0xc51   : > { %9363 = vst.msk [vmem:[%s574_s30] sm:$0xff] %vm580_vm3, %v9362_v61 }
 0xc52 PF: > { %s27_s26 = sadd.s32 1, %s12433_s26   ;;  %s17411_s24 = smov %s12429_s25 }
 0xc53   : > { %p24_p5 = scmp.ge.s32.totalorder %s27_s26, 4   ;;  %s17412_s25 = smov %s17414_s27 }
 0xc55   :  { %26 = sbr.rel (!%p24_p5) target bundleno = 3 (0x3), region = 126 }

</bundles_post_ra>
